<compile_context>
chip_gen: v7x
topology: tpu7x:2x2x1
jax: 0.10.0
libtpu: 0.0.40
codegen_flags: <defaults>
</compile_context>

<pallas_src>
import jax
import jax.numpy as jnp
from jax.experimental import pallas as pl
from jax.experimental.pallas import tpu as pltpu

POOL_K = 5
POOL_S = 3
IN_HW = 14                                   # AvgPool2d(5,3) + view(-1, 128*4*4) implies 14x14 input
OUT_HW = (IN_HW - POOL_K) // POOL_S + 1      # 4
P = OUT_HW * OUT_HW                          # 16 pooled positions
CONV_OUT = 128
HIDDEN = 1024
POOL_INV = 1.0 / (POOL_K * POOL_K)


def inception_aux_kernel(x_ref, wc_ref, bc_ref, w1_ref, b1_ref, w2_ref, b2_ref,
                         o_ref, f_ref):
    # x:  (bn, 14, 14, C) bf16 NHWC          wc: (C, 128) bf16 (1/25 pre-folded)
    # bc: (1, 128) f32                        w1: (2048, 1024) bf16, rows in (p*128+co) order
    # b1: (1, 1024) f32                       w2: (1024, Kpad) bf16, zero-padded cols
    # b2: (1, Kpad) f32 (-1e30 in pad cols)   o:  (bn, Kpad) f32
    # f_ref: (bn, 2048) bf16 VMEM scratch holding the flattened conv activations.
    wc = wc_ref[...]
    bc = bc_ref[...]
    for oh in range(OUT_HW):
        # Row-slab sum: add the 5 H rows of this output row once (f32 accumulation).
        rows = x_ref[:, oh * POOL_S:oh * POOL_S + POOL_K, :, :]          # (bn, 5, 14, C) bf16
        row_sum = jnp.sum(rows.astype(jnp.float32), axis=1)              # (bn, 14, C) f32
        for ow in range(OUT_HW):
            p = oh * OUT_HW + ow
            pooled = jnp.sum(row_sum[:, ow * POOL_S:ow * POOL_S + POOL_K, :], axis=1)  # (bn, C)
            conv = jnp.dot(pooled.astype(jnp.bfloat16), wc,
                           preferred_element_type=jnp.float32) + bc
            conv = jnp.maximum(conv, 0.0)                                 # (bn, 128)
            f_ref[:, p * CONV_OUT:(p + 1) * CONV_OUT] = conv.astype(jnp.bfloat16)
    # Single K=2048 FC1 matmul (instead of 16 fragmented K=128 dots).
    h = jnp.dot(f_ref[...], w1_ref[...], preferred_element_type=jnp.float32) + b1_ref[...]
    h = jnp.maximum(h, 0.0)
    # TODO(synk): nn.Dropout(p=0.7) is identity in eval mode; training-mode RNG masking not implemented.
    logits = jnp.dot(h.astype(jnp.bfloat16), w2_ref[...],
                     preferred_element_type=jnp.float32) + b2_ref[...]
    m = jnp.max(logits, axis=1, keepdims=True)
    e = jnp.exp(logits - m)
    s = jnp.sum(e, axis=1, keepdims=True)
    o_ref[...] = (e * pl.reciprocal(s, approx=True)).astype(o_ref.dtype)


def prepare_params(params):
    """One-time parameter plumbing, hoisted out of the per-call forward."""
    w_conv, b_conv, w1, b1, w2, b2 = params
    out_chan = w2.shape[1]
    k_pad = ((out_chan + 127) // 128) * 128
    # Fold the 1/25 avg-pool scale into the conv weight (kernel pools with a plain sum).
    wc = (w_conv * POOL_INV).astype(jnp.bfloat16)                         # (C, 128)
    # Permute FC1 rows from PyTorch flatten order (co*16 + p) to kernel order (p*128 + co).
    w1_b = (w1.reshape(CONV_OUT, P, HIDDEN).transpose(1, 0, 2)
            .reshape(CONV_OUT * P, HIDDEN)).astype(jnp.bfloat16)
    # Pad out_chan to a lane-dense multiple of 128: zero weight cols, -1e30 bias -> exp()==0.
    w2_pad = jnp.zeros((HIDDEN, k_pad), jnp.float32).at[:, :out_chan].set(w2).astype(jnp.bfloat16)
    b2_pad = jnp.full((1, k_pad), -1e30, jnp.float32).at[:, :out_chan].set(b2)
    return (wc, b_conv.astype(jnp.float32), w1_b, b1.astype(jnp.float32),
            w2_pad, b2_pad, out_chan)


def _select_tiling(N, C, weight_bytes):
    """Generation-specific batch tile & VMEM limit (bn~128/96MiB on v5e/v6e,
    bn~64/48MiB + grid>=2 on v7x), clamped so the double-buffered bf16 x block fits."""
    bn_cap, vmem_limit = 128, 96 * 1024 * 1024
    try:
        if pltpu.get_tpu_info().vmem_capacity_bytes <= 64 * 1024 * 1024:
            bn_cap, vmem_limit = 64, 48 * 1024 * 1024       # v7x: 64 MiB VMEM per TC
    except Exception:
        pass                                                # interpret / unknown backend
    x_row_bytes = IN_HW * IN_HW * C * 2                     # bf16 bytes per batch row of x
    budget = vmem_limit - weight_bytes - (4 << 20)          # headroom: out, scratch, biases
    fit = max(8, (budget // (2 * x_row_bytes)) & ~7) if budget > 2 * x_row_bytes else 8
    bn = min(bn_cap, fit, N)
    if bn_cap == 64 and N > 8:                              # keep >=2 grid steps for 2 TCs
        bn = min(bn, ((N + 1) // 2 + 7) // 8 * 8)
    return max(1, bn), vmem_limit


def inception_aux_forward(x_nhwc, prepared):
    """x_nhwc: (N, 14, 14, C) bf16.  NCHW->NHWC + bf16 cast is done once, upstream."""
    wc, bc, w1_b, b1, w2_pad, b2_pad, out_chan = prepared
    N, H, W, C = x_nhwc.shape
    k_pad = w2_pad.shape[1]
    weight_bytes = sum(int(a.size) * a.dtype.itemsize
                       for a in (wc, bc, w1_b, b1, w2_pad, b2_pad))
    bn, vmem_limit = _select_tiling(N, C, weight_bytes)
    grid = (pl.cdiv(N, bn),)

    out_pad = pl.pallas_call(
        inception_aux_kernel,
        out_shape=jax.ShapeDtypeStruct((N, k_pad), jnp.float32),
        grid=grid,
        in_specs=[
            pl.BlockSpec((bn, H, W, C), lambda i: (i, 0, 0, 0)),
            pl.BlockSpec((C, CONV_OUT), lambda i: (0, 0)),
            pl.BlockSpec((1, CONV_OUT), lambda i: (0, 0)),
            pl.BlockSpec((CONV_OUT * P, HIDDEN), lambda i: (0, 0)),
            pl.BlockSpec((1, HIDDEN), lambda i: (0, 0)),
            pl.BlockSpec((HIDDEN, k_pad), lambda i: (0, 0)),
            pl.BlockSpec((1, k_pad), lambda i: (0, 0)),
        ],
        out_specs=pl.BlockSpec((bn, k_pad), lambda i: (i, 0)),
        scratch_shapes=[pltpu.VMEM((bn, CONV_OUT * P), jnp.bfloat16)],
        compiler_params=pltpu.CompilerParams(
            dimension_semantics=("parallel",),
            vmem_limit_bytes=vmem_limit),
    )(x_nhwc, wc, bc, w1_b, b1, w2_pad, b2_pad)

    return out_pad[:, :out_chan]


def reference_forward(x, params):
    """Pure-JAX reference (NCHW, PyTorch semantics) mirroring the kernel's bf16
    quantization points; all dots are f32 so it also runs on the CPU executor."""
    w_conv, b_conv, w1, b1, w2, b2 = params
    N = x.shape[0]
    xq = x.astype(jnp.bfloat16).astype(jnp.float32)
    wc_q = (w_conv * POOL_INV).astype(jnp.bfloat16).astype(jnp.float32)
    w1_q = w1.astype(jnp.bfloat16).astype(jnp.float32)
    w2_q = w2.astype(jnp.bfloat16).astype(jnp.float32)
    pooled = jnp.stack(
        [jnp.sum(xq[:, :, oh * POOL_S:oh * POOL_S + POOL_K,
                       ow * POOL_S:ow * POOL_S + POOL_K], axis=(2, 3))
         for oh in range(OUT_HW) for ow in range(OUT_HW)],
        axis=-1)                                                          # (N, C, 16) window sums
    pooled_q = pooled.astype(jnp.bfloat16).astype(jnp.float32)
    conv = jnp.einsum('ncp,cd->ndp', pooled_q, wc_q) + b_conv[0][None, :, None]
    conv = jnp.maximum(conv, 0.0)                                         # (N, 128, 16)
    f = conv.reshape(N, CONV_OUT * P)                                     # PyTorch NCHW flatten
    f_q = f.astype(jnp.bfloat16).astype(jnp.float32)
    h = jnp.maximum(jnp.dot(f_q, w1_q) + b1, 0.0)
    h_q = h.astype(jnp.bfloat16).astype(jnp.float32)
    logits = jnp.dot(h_q, w2_q) + b2
    return jax.nn.softmax(logits, axis=1)


if __name__ == "__main__":
    in_chan, out_chan = 16, 10
    N = 2

    key = jax.random.PRNGKey(0)
    ks = jax.random.split(key, 7)
    w_conv = jax.random.normal(ks[0], (in_chan, CONV_OUT), jnp.float32) * 0.05
    b_conv = jax.random.normal(ks[1], (1, CONV_OUT), jnp.float32) * 0.05
    w1 = jax.random.normal(ks[2], (CONV_OUT * P, HIDDEN), jnp.float32) * 0.02
    b1 = jax.random.normal(ks[3], (1, HIDDEN), jnp.float32) * 0.02
    w2 = jax.random.normal(ks[4], (HIDDEN, out_chan), jnp.float32) * 0.02
    b2 = jax.random.normal(ks[5], (1, out_chan), jnp.float32) * 0.02
    params = (w_conv, b_conv, w1, b1, w2, b2)

    # AvgPool2d(k=5, s=3) followed by view(-1, 128*4*4) requires a 14x14 spatial input.
    x_nchw = jax.random.normal(ks[6], (N, in_chan, IN_HW, IN_HW), jnp.float32)

    prepared = prepare_params(params)                                     # one-time weight plumbing
    x_nhwc = jnp.transpose(x_nchw, (0, 2, 3, 1)).astype(jnp.bfloat16)     # one-time layout/dtype

    out = jax.block_until_ready(inception_aux_forward(x_nhwc, prepared))
    ref = jax.block_until_ready(reference_forward(x_nchw, params))

    assert out.shape == (N, out_chan)
    assert jnp.allclose(jnp.sum(out, axis=1), 1.0, atol=2e-3)
    assert jnp.allclose(out, ref, rtol=3e-3, atol=1e-4)
    print("KERNEL_OK")
</pallas_src>

<mosaic_0001>
module attributes {stable_mosaic.version = 11 : i64} {
  func.func @inception_aux_kernel(%arg0: i32, %arg1: memref<2x14x14x16xbf16, #tpu.memory_space<vmem>>, %arg2: memref<16x128xbf16, #tpu.memory_space<vmem>>, %arg3: memref<1x128xf32, #tpu.memory_space<vmem>>, %arg4: memref<2048x1024xbf16, #tpu.memory_space<vmem>>, %arg5: memref<1x1024xf32, #tpu.memory_space<vmem>>, %arg6: memref<1024x128xbf16, #tpu.memory_space<vmem>>, %arg7: memref<1x128xf32, #tpu.memory_space<vmem>>, %arg8: memref<2x128xf32, #tpu.memory_space<vmem>>, %arg9: memref<2x2048xbf16, #tpu.memory_space<vmem>>) attributes {dimension_semantics = [#tpu.dimension_semantics<parallel>], iteration_bounds = array<i64: 1>, scalar_prefetch = 0 : i64, scratch_operands = 1 : i64, tpu.core_type = #tpu.core_type<tc>, window_params = [{transform_indices = @transform_0, window_bounds = array<i64: 2, 14, 14, 16>}, {pipeline_mode = #tpu.pipeline_mode<synchronous>, transform_indices = @transform_1, window_bounds = array<i64: 16, 128>}, {pipeline_mode = #tpu.pipeline_mode<synchronous>, transform_indices = @transform_2, window_bounds = array<i64: 1, 128>}, {pipeline_mode = #tpu.pipeline_mode<synchronous>, transform_indices = @transform_3, window_bounds = array<i64: 2048, 1024>}, {pipeline_mode = #tpu.pipeline_mode<synchronous>, transform_indices = @transform_4, window_bounds = array<i64: 1, 1024>}, {pipeline_mode = #tpu.pipeline_mode<synchronous>, transform_indices = @transform_5, window_bounds = array<i64: 1024, 128>}, {pipeline_mode = #tpu.pipeline_mode<synchronous>, transform_indices = @transform_6, window_bounds = array<i64: 1, 128>}, {transform_indices = @transform_7, window_bounds = array<i64: 2, 128>}]} {
    %c0 = arith.constant 0 : index
    %c0_0 = arith.constant 0 : index
    %0 = vector.load %arg2[%c0, %c0_0] : memref<16x128xbf16, #tpu.memory_space<vmem>>, vector<16x128xbf16>
    %c0_1 = arith.constant 0 : index
    %c0_2 = arith.constant 0 : index
    %1 = vector.load %arg3[%c0_1, %c0_2] : memref<1x128xf32, #tpu.memory_space<vmem>>, vector<1x128xf32>
    %c0_3 = arith.constant 0 : index
    %c0_4 = arith.constant 0 : index
    %c0_5 = arith.constant 0 : index
    %c0_6 = arith.constant 0 : index
    %2 = vector.load %arg1[%c0_3, %c0_4, %c0_5, %c0_6] : memref<2x14x14x16xbf16, #tpu.memory_space<vmem>>, vector<2x5x14x16xbf16>
    %3 = arith.extf %2 : vector<2x5x14x16xbf16> to vector<2x5x14x16xf32>
    %cst = arith.constant dense<0.000000e+00> : vector<2x14x16xf32>
    %4 = vector.multi_reduction <add>, %3, %cst [1] : vector<2x5x14x16xf32> to vector<2x14x16xf32>
    %5 = vector.extract_strided_slice %4 {offsets = [0, 0, 0], sizes = [2, 5, 16], strides = [1, 1, 1]} : vector<2x14x16xf32> to vector<2x5x16xf32>
    %cst_7 = arith.constant dense<0.000000e+00> : vector<2x16xf32>
    %6 = vector.multi_reduction <add>, %5, %cst_7 [1] : vector<2x5x16xf32> to vector<2x16xf32>
    %7 = arith.truncf %6 : vector<2x16xf32> to vector<2x16xbf16>
    %cst_8 = arith.constant dense<0.000000e+00> : vector<2x128xf32>
    %8 = tpu.matmul %7, %0, %cst_8 {dimension_numbers = #tpu.dot_dimension_numbers<[1], [0], [0], [1], [0, 0, 1, 1], [], []>} : vector<2x16xbf16>, vector<16x128xbf16>, vector<2x128xf32> -> vector<2x128xf32>
    %9 = vector.broadcast %1 : vector<1x128xf32> to vector<2x128xf32>
    %10 = arith.addf %8, %9 : vector<2x128xf32>
    %cst_9 = arith.constant 0.000000e+00 : f32
    %11 = vector.broadcast %cst_9 : f32 to vector<2x128xf32>
    %12 = arith.maximumf %10, %11 : vector<2x128xf32>
    %13 = arith.truncf %12 : vector<2x128xf32> to vector<2x128xbf16>
    %c0_10 = arith.constant 0 : index
    %c0_11 = arith.constant 0 : index
    %14 = vector.load %arg9[%c0_10, %c0_11] : memref<2x2048xbf16, #tpu.memory_space<vmem>>, vector<2x128xbf16>
    tpu.vector_store %arg9[%c0_10, %c0_11], %13 {strides = array<i32>} : memref<2x2048xbf16, #tpu.memory_space<vmem>>, vector<2x128xbf16>,
    %15 = vector.extract_strided_slice %4 {offsets = [0, 3, 0], sizes = [2, 5, 16], strides = [1, 1, 1]} : vector<2x14x16xf32> to vector<2x5x16xf32>
    %cst_12 = arith.constant dense<0.000000e+00> : vector<2x16xf32>
    %16 = vector.multi_reduction <add>, %15, %cst_12 [1] : vector<2x5x16xf32> to vector<2x16xf32>
    %17 = arith.truncf %16 : vector<2x16xf32> to vector<2x16xbf16>
    %cst_13 = arith.constant dense<0.000000e+00> : vector<2x128xf32>
    %18 = tpu.matmul %17, %0, %cst_13 {dimension_numbers = #tpu.dot_dimension_numbers<[1], [0], [0], [1], [0, 0, 1, 1], [], []>} : vector<2x16xbf16>, vector<16x128xbf16>, vector<2x128xf32> -> vector<2x128xf32>
    %19 = vector.broadcast %1 : vector<1x128xf32> to vector<2x128xf32>
    %20 = arith.addf %18, %19 : vector<2x128xf32>
    %cst_14 = arith.constant 0.000000e+00 : f32
    %21 = vector.broadcast %cst_14 : f32 to vector<2x128xf32>
    %22 = arith.maximumf %20, %21 : vector<2x128xf32>
    %23 = arith.truncf %22 : vector<2x128xf32> to vector<2x128xbf16>
    %c0_15 = arith.constant 0 : index
    %c128 = arith.constant 128 : index
    %24 = vector.load %arg9[%c0_15, %c128] : memref<2x2048xbf16, #tpu.memory_space<vmem>>, vector<2x128xbf16>
    tpu.vector_store %arg9[%c0_15, %c128], %23 {strides = array<i32>} : memref<2x2048xbf16, #tpu.memory_space<vmem>>, vector<2x128xbf16>,
    %25 = vector.extract_strided_slice %4 {offsets = [0, 6, 0], sizes = [2, 5, 16], strides = [1, 1, 1]} : vector<2x14x16xf32> to vector<2x5x16xf32>
    %cst_16 = arith.constant dense<0.000000e+00> : vector<2x16xf32>
    %26 = vector.multi_reduction <add>, %25, %cst_16 [1] : vector<2x5x16xf32> to vector<2x16xf32>
    %27 = arith.truncf %26 : vector<2x16xf32> to vector<2x16xbf16>
    %cst_17 = arith.constant dense<0.000000e+00> : vector<2x128xf32>
    %28 = tpu.matmul %27, %0, %cst_17 {dimension_numbers = #tpu.dot_dimension_numbers<[1], [0], [0], [1], [0, 0, 1, 1], [], []>} : vector<2x16xbf16>, vector<16x128xbf16>, vector<2x128xf32> -> vector<2x128xf32>
    %29 = vector.broadcast %1 : vector<1x128xf32> to vector<2x128xf32>
    %30 = arith.addf %28, %29 : vector<2x128xf32>
    %cst_18 = arith.constant 0.000000e+00 : f32
    %31 = vector.broadcast %cst_18 : f32 to vector<2x128xf32>
    %32 = arith.maximumf %30, %31 : vector<2x128xf32>
    %33 = arith.truncf %32 : vector<2x128xf32> to vector<2x128xbf16>
    %c0_19 = arith.constant 0 : index
    %c256 = arith.constant 256 : index
    %34 = vector.load %arg9[%c0_19, %c256] : memref<2x2048xbf16, #tpu.memory_space<vmem>>, vector<2x128xbf16>
    tpu.vector_store %arg9[%c0_19, %c256], %33 {strides = array<i32>} : memref<2x2048xbf16, #tpu.memory_space<vmem>>, vector<2x128xbf16>,
    %35 = vector.extract_strided_slice %4 {offsets = [0, 9, 0], sizes = [2, 5, 16], strides = [1, 1, 1]} : vector<2x14x16xf32> to vector<2x5x16xf32>
    %cst_20 = arith.constant dense<0.000000e+00> : vector<2x16xf32>
    %36 = vector.multi_reduction <add>, %35, %cst_20 [1] : vector<2x5x16xf32> to vector<2x16xf32>
    %37 = arith.truncf %36 : vector<2x16xf32> to vector<2x16xbf16>
    %cst_21 = arith.constant dense<0.000000e+00> : vector<2x128xf32>
    %38 = tpu.matmul %37, %0, %cst_21 {dimension_numbers = #tpu.dot_dimension_numbers<[1], [0], [0], [1], [0, 0, 1, 1], [], []>} : vector<2x16xbf16>, vector<16x128xbf16>, vector<2x128xf32> -> vector<2x128xf32>
    %39 = vector.broadcast %1 : vector<1x128xf32> to vector<2x128xf32>
    %40 = arith.addf %38, %39 : vector<2x128xf32>
    %cst_22 = arith.constant 0.000000e+00 : f32
    %41 = vector.broadcast %cst_22 : f32 to vector<2x128xf32>
    %42 = arith.maximumf %40, %41 : vector<2x128xf32>
    %43 = arith.truncf %42 : vector<2x128xf32> to vector<2x128xbf16>
    %c0_23 = arith.constant 0 : index
    %c384 = arith.constant 384 : index
    %44 = vector.load %arg9[%c0_23, %c384] : memref<2x2048xbf16, #tpu.memory_space<vmem>>, vector<2x128xbf16>
    tpu.vector_store %arg9[%c0_23, %c384], %43 {strides = array<i32>} : memref<2x2048xbf16, #tpu.memory_space<vmem>>, vector<2x128xbf16>,
    %c0_24 = arith.constant 0 : index
    %c3 = arith.constant 3 : index
    %c0_25 = arith.constant 0 : index
    %c0_26 = arith.constant 0 : index
    %45 = vector.load %arg1[%c0_24, %c3, %c0_25, %c0_26] : memref<2x14x14x16xbf16, #tpu.memory_space<vmem>>, vector<2x5x14x16xbf16>
    %46 = arith.extf %45 : vector<2x5x14x16xbf16> to vector<2x5x14x16xf32>
    %cst_27 = arith.constant dense<0.000000e+00> : vector<2x14x16xf32>
    %47 = vector.multi_reduction <add>, %46, %cst_27 [1] : vector<2x5x14x16xf32> to vector<2x14x16xf32>
    %48 = vector.extract_strided_slice %47 {offsets = [0, 0, 0], sizes = [2, 5, 16], strides = [1, 1, 1]} : vector<2x14x16xf32> to vector<2x5x16xf32>
    %cst_28 = arith.constant dense<0.000000e+00> : vector<2x16xf32>
    %49 = vector.multi_reduction <add>, %48, %cst_28 [1] : vector<2x5x16xf32> to vector<2x16xf32>
    %50 = arith.truncf %49 : vector<2x16xf32> to vector<2x16xbf16>
    %cst_29 = arith.constant dense<0.000000e+00> : vector<2x128xf32>
    %51 = tpu.matmul %50, %0, %cst_29 {dimension_numbers = #tpu.dot_dimension_numbers<[1], [0], [0], [1], [0, 0, 1, 1], [], []>} : vector<2x16xbf16>, vector<16x128xbf16>, vector<2x128xf32> -> vector<2x128xf32>
    %52 = vector.broadcast %1 : vector<1x128xf32> to vector<2x128xf32>
    %53 = arith.addf %51, %52 : vector<2x128xf32>
    %cst_30 = arith.constant 0.000000e+00 : f32
    %54 = vector.broadcast %cst_30 : f32 to vector<2x128xf32>
    %55 = arith.maximumf %53, %54 : vector<2x128xf32>
    %56 = arith.truncf %55 : vector<2x128xf32> to vector<2x128xbf16>
    %c0_31 = arith.constant 0 : index
    %c512 = arith.constant 512 : index
    %57 = vector.load %arg9[%c0_31, %c512] : memref<2x2048xbf16, #tpu.memory_space<vmem>>, vector<2x128xbf16>
    tpu.vector_store %arg9[%c0_31, %c512], %56 {strides = array<i32>} : memref<2x2048xbf16, #tpu.memory_space<vmem>>, vector<2x128xbf16>,
    %58 = vector.extract_strided_slice %47 {offsets = [0, 3, 0], sizes = [2, 5, 16], strides = [1, 1, 1]} : vector<2x14x16xf32> to vector<2x5x16xf32>
    %cst_32 = arith.constant dense<0.000000e+00> : vector<2x16xf32>
    %59 = vector.multi_reduction <add>, %58, %cst_32 [1] : vector<2x5x16xf32> to vector<2x16xf32>
    %60 = arith.truncf %59 : vector<2x16xf32> to vector<2x16xbf16>
    %cst_33 = arith.constant dense<0.000000e+00> : vector<2x128xf32>
    %61 = tpu.matmul %60, %0, %cst_33 {dimension_numbers = #tpu.dot_dimension_numbers<[1], [0], [0], [1], [0, 0, 1, 1], [], []>} : vector<2x16xbf16>, vector<16x128xbf16>, vector<2x128xf32> -> vector<2x128xf32>
    %62 = vector.broadcast %1 : vector<1x128xf32> to vector<2x128xf32>
    %63 = arith.addf %61, %62 : vector<2x128xf32>
    %cst_34 = arith.constant 0.000000e+00 : f32
    %64 = vector.broadcast %cst_34 : f32 to vector<2x128xf32>
    %65 = arith.maximumf %63, %64 : vector<2x128xf32>
    %66 = arith.truncf %65 : vector<2x128xf32> to vector<2x128xbf16>
    %c0_35 = arith.constant 0 : index
    %c640 = arith.constant 640 : index
    %67 = vector.load %arg9[%c0_35, %c640] : memref<2x2048xbf16, #tpu.memory_space<vmem>>, vector<2x128xbf16>
    tpu.vector_store %arg9[%c0_35, %c640], %66 {strides = array<i32>} : memref<2x2048xbf16, #tpu.memory_space<vmem>>, vector<2x128xbf16>,
    %68 = vector.extract_strided_slice %47 {offsets = [0, 6, 0], sizes = [2, 5, 16], strides = [1, 1, 1]} : vector<2x14x16xf32> to vector<2x5x16xf32>
    %cst_36 = arith.constant dense<0.000000e+00> : vector<2x16xf32>
    %69 = vector.multi_reduction <add>, %68, %cst_36 [1] : vector<2x5x16xf32> to vector<2x16xf32>
    %70 = arith.truncf %69 : vector<2x16xf32> to vector<2x16xbf16>
    %cst_37 = arith.constant dense<0.000000e+00> : vector<2x128xf32>
    %71 = tpu.matmul %70, %0, %cst_37 {dimension_numbers = #tpu.dot_dimension_numbers<[1], [0], [0], [1], [0, 0, 1, 1], [], []>} : vector<2x16xbf16>, vector<16x128xbf16>, vector<2x128xf32> -> vector<2x128xf32>
    %72 = vector.broadcast %1 : vector<1x128xf32> to vector<2x128xf32>
    %73 = arith.addf %71, %72 : vector<2x128xf32>
    %cst_38 = arith.constant 0.000000e+00 : f32
    %74 = vector.broadcast %cst_38 : f32 to vector<2x128xf32>
    %75 = arith.maximumf %73, %74 : vector<2x128xf32>
    %76 = arith.truncf %75 : vector<2x128xf32> to vector<2x128xbf16>
    %c0_39 = arith.constant 0 : index
    %c768 = arith.constant 768 : index
    %77 = vector.load %arg9[%c0_39, %c768] : memref<2x2048xbf16, #tpu.memory_space<vmem>>, vector<2x128xbf16>
    tpu.vector_store %arg9[%c0_39, %c768], %76 {strides = array<i32>} : memref<2x2048xbf16, #tpu.memory_space<vmem>>, vector<2x128xbf16>,
    %78 = vector.extract_strided_slice %47 {offsets = [0, 9, 0], sizes = [2, 5, 16], strides = [1, 1, 1]} : vector<2x14x16xf32> to vector<2x5x16xf32>
    %cst_40 = arith.constant dense<0.000000e+00> : vector<2x16xf32>
    %79 = vector.multi_reduction <add>, %78, %cst_40 [1] : vector<2x5x16xf32> to vector<2x16xf32>
    %80 = arith.truncf %79 : vector<2x16xf32> to vector<2x16xbf16>
    %cst_41 = arith.constant dense<0.000000e+00> : vector<2x128xf32>
    %81 = tpu.matmul %80, %0, %cst_41 {dimension_numbers = #tpu.dot_dimension_numbers<[1], [0], [0], [1], [0, 0, 1, 1], [], []>} : vector<2x16xbf16>, vector<16x128xbf16>, vector<2x128xf32> -> vector<2x128xf32>
    %82 = vector.broadcast %1 : vector<1x128xf32> to vector<2x128xf32>
    %83 = arith.addf %81, %82 : vector<2x128xf32>
    %cst_42 = arith.constant 0.000000e+00 : f32
    %84 = vector.broadcast %cst_42 : f32 to vector<2x128xf32>
    %85 = arith.maximumf %83, %84 : vector<2x128xf32>
    %86 = arith.truncf %85 : vector<2x128xf32> to vector<2x128xbf16>
    %c0_43 = arith.constant 0 : index
    %c896 = arith.constant 896 : index
    %87 = vector.load %arg9[%c0_43, %c896] : memref<2x2048xbf16, #tpu.memory_space<vmem>>, vector<2x128xbf16>
    tpu.vector_store %arg9[%c0_43, %c896], %86 {strides = array<i32>} : memref<2x2048xbf16, #tpu.memory_space<vmem>>, vector<2x128xbf16>,
    %c0_44 = arith.constant 0 : index
    %c6 = arith.constant 6 : index
    %c0_45 = arith.constant 0 : index
    %c0_46 = arith.constant 0 : index
    %88 = vector.load %arg1[%c0_44, %c6, %c0_45, %c0_46] : memref<2x14x14x16xbf16, #tpu.memory_space<vmem>>, vector<2x5x14x16xbf16>
    %89 = arith.extf %88 : vector<2x5x14x16xbf16> to vector<2x5x14x16xf32>
    %cst_47 = arith.constant dense<0.000000e+00> : vector<2x14x16xf32>
    %90 = vector.multi_reduction <add>, %89, %cst_47 [1] : vector<2x5x14x16xf32> to vector<2x14x16xf32>
    %91 = vector.extract_strided_slice %90 {offsets = [0, 0, 0], sizes = [2, 5, 16], strides = [1, 1, 1]} : vector<2x14x16xf32> to vector<2x5x16xf32>
    %cst_48 = arith.constant dense<0.000000e+00> : vector<2x16xf32>
    %92 = vector.multi_reduction <add>, %91, %cst_48 [1] : vector<2x5x16xf32> to vector<2x16xf32>
    %93 = arith.truncf %92 : vector<2x16xf32> to vector<2x16xbf16>
    %cst_49 = arith.constant dense<0.000000e+00> : vector<2x128xf32>
    %94 = tpu.matmul %93, %0, %cst_49 {dimension_numbers = #tpu.dot_dimension_numbers<[1], [0], [0], [1], [0, 0, 1, 1], [], []>} : vector<2x16xbf16>, vector<16x128xbf16>, vector<2x128xf32> -> vector<2x128xf32>
    %95 = vector.broadcast %1 : vector<1x128xf32> to vector<2x128xf32>
    %96 = arith.addf %94, %95 : vector<2x128xf32>
    %cst_50 = arith.constant 0.000000e+00 : f32
    %97 = vector.broadcast %cst_50 : f32 to vector<2x128xf32>
    %98 = arith.maximumf %96, %97 : vector<2x128xf32>
    %99 = arith.truncf %98 : vector<2x128xf32> to vector<2x128xbf16>
    %c0_51 = arith.constant 0 : index
    %c1024 = arith.constant 1024 : index
    %100 = vector.load %arg9[%c0_51, %c1024] : memref<2x2048xbf16, #tpu.memory_space<vmem>>, vector<2x128xbf16>
    tpu.vector_store %arg9[%c0_51, %c1024], %99 {strides = array<i32>} : memref<2x2048xbf16, #tpu.memory_space<vmem>>, vector<2x128xbf16>,
    %101 = vector.extract_strided_slice %90 {offsets = [0, 3, 0], sizes = [2, 5, 16], strides = [1, 1, 1]} : vector<2x14x16xf32> to vector<2x5x16xf32>
    %cst_52 = arith.constant dense<0.000000e+00> : vector<2x16xf32>
    %102 = vector.multi_reduction <add>, %101, %cst_52 [1] : vector<2x5x16xf32> to vector<2x16xf32>
    %103 = arith.truncf %102 : vector<2x16xf32> to vector<2x16xbf16>
    %cst_53 = arith.constant dense<0.000000e+00> : vector<2x128xf32>
    %104 = tpu.matmul %103, %0, %cst_53 {dimension_numbers = #tpu.dot_dimension_numbers<[1], [0], [0], [1], [0, 0, 1, 1], [], []>} : vector<2x16xbf16>, vector<16x128xbf16>, vector<2x128xf32> -> vector<2x128xf32>
    %105 = vector.broadcast %1 : vector<1x128xf32> to vector<2x128xf32>
    %106 = arith.addf %104, %105 : vector<2x128xf32>
    %cst_54 = arith.constant 0.000000e+00 : f32
    %107 = vector.broadcast %cst_54 : f32 to vector<2x128xf32>
    %108 = arith.maximumf %106, %107 : vector<2x128xf32>
    %109 = arith.truncf %108 : vector<2x128xf32> to vector<2x128xbf16>
    %c0_55 = arith.constant 0 : index
    %c1152 = arith.constant 1152 : index
    %110 = vector.load %arg9[%c0_55, %c1152] : memref<2x2048xbf16, #tpu.memory_space<vmem>>, vector<2x128xbf16>
    tpu.vector_store %arg9[%c0_55, %c1152], %109 {strides = array<i32>} : memref<2x2048xbf16, #tpu.memory_space<vmem>>, vector<2x128xbf16>,
    %111 = vector.extract_strided_slice %90 {offsets = [0, 6, 0], sizes = [2, 5, 16], strides = [1, 1, 1]} : vector<2x14x16xf32> to vector<2x5x16xf32>
    %cst_56 = arith.constant dense<0.000000e+00> : vector<2x16xf32>
    %112 = vector.multi_reduction <add>, %111, %cst_56 [1] : vector<2x5x16xf32> to vector<2x16xf32>
    %113 = arith.truncf %112 : vector<2x16xf32> to vector<2x16xbf16>
    %cst_57 = arith.constant dense<0.000000e+00> : vector<2x128xf32>
    %114 = tpu.matmul %113, %0, %cst_57 {dimension_numbers = #tpu.dot_dimension_numbers<[1], [0], [0], [1], [0, 0, 1, 1], [], []>} : vector<2x16xbf16>, vector<16x128xbf16>, vector<2x128xf32> -> vector<2x128xf32>
    %115 = vector.broadcast %1 : vector<1x128xf32> to vector<2x128xf32>
    %116 = arith.addf %114, %115 : vector<2x128xf32>
    %cst_58 = arith.constant 0.000000e+00 : f32
    %117 = vector.broadcast %cst_58 : f32 to vector<2x128xf32>
    %118 = arith.maximumf %116, %117 : vector<2x128xf32>
    %119 = arith.truncf %118 : vector<2x128xf32> to vector<2x128xbf16>
    %c0_59 = arith.constant 0 : index
    %c1280 = arith.constant 1280 : index
    %120 = vector.load %arg9[%c0_59, %c1280] : memref<2x2048xbf16, #tpu.memory_space<vmem>>, vector<2x128xbf16>
    tpu.vector_store %arg9[%c0_59, %c1280], %119 {strides = array<i32>} : memref<2x2048xbf16, #tpu.memory_space<vmem>>, vector<2x128xbf16>,
    %121 = vector.extract_strided_slice %90 {offsets = [0, 9, 0], sizes = [2, 5, 16], strides = [1, 1, 1]} : vector<2x14x16xf32> to vector<2x5x16xf32>
    %cst_60 = arith.constant dense<0.000000e+00> : vector<2x16xf32>
    %122 = vector.multi_reduction <add>, %121, %cst_60 [1] : vector<2x5x16xf32> to vector<2x16xf32>
    %123 = arith.truncf %122 : vector<2x16xf32> to vector<2x16xbf16>
    %cst_61 = arith.constant dense<0.000000e+00> : vector<2x128xf32>
    %124 = tpu.matmul %123, %0, %cst_61 {dimension_numbers = #tpu.dot_dimension_numbers<[1], [0], [0], [1], [0, 0, 1, 1], [], []>} : vector<2x16xbf16>, vector<16x128xbf16>, vector<2x128xf32> -> vector<2x128xf32>
    %125 = vector.broadcast %1 : vector<1x128xf32> to vector<2x128xf32>
    %126 = arith.addf %124, %125 : vector<2x128xf32>
    %cst_62 = arith.constant 0.000000e+00 : f32
    %127 = vector.broadcast %cst_62 : f32 to vector<2x128xf32>
    %128 = arith.maximumf %126, %127 : vector<2x128xf32>
    %129 = arith.truncf %128 : vector<2x128xf32> to vector<2x128xbf16>
    %c0_63 = arith.constant 0 : index
    %c1408 = arith.constant 1408 : index
    %130 = vector.load %arg9[%c0_63, %c1408] : memref<2x2048xbf16, #tpu.memory_space<vmem>>, vector<2x128xbf16>
    tpu.vector_store %arg9[%c0_63, %c1408], %129 {strides = array<i32>} : memref<2x2048xbf16, #tpu.memory_space<vmem>>, vector<2x128xbf16>,
    %c0_64 = arith.constant 0 : index
    %c9 = arith.constant 9 : index
    %c0_65 = arith.constant 0 : index
    %c0_66 = arith.constant 0 : index
    %131 = vector.load %arg1[%c0_64, %c9, %c0_65, %c0_66] : memref<2x14x14x16xbf16, #tpu.memory_space<vmem>>, vector<2x5x14x16xbf16>
    %132 = arith.extf %131 : vector<2x5x14x16xbf16> to vector<2x5x14x16xf32>
    %cst_67 = arith.constant dense<0.000000e+00> : vector<2x14x16xf32>
    %133 = vector.multi_reduction <add>, %132, %cst_67 [1] : vector<2x5x14x16xf32> to vector<2x14x16xf32>
    %134 = vector.extract_strided_slice %133 {offsets = [0, 0, 0], sizes = [2, 5, 16], strides = [1, 1, 1]} : vector<2x14x16xf32> to vector<2x5x16xf32>
    %cst_68 = arith.constant dense<0.000000e+00> : vector<2x16xf32>
    %135 = vector.multi_reduction <add>, %134, %cst_68 [1] : vector<2x5x16xf32> to vector<2x16xf32>
    %136 = arith.truncf %135 : vector<2x16xf32> to vector<2x16xbf16>
    %cst_69 = arith.constant dense<0.000000e+00> : vector<2x128xf32>
    %137 = tpu.matmul %136, %0, %cst_69 {dimension_numbers = #tpu.dot_dimension_numbers<[1], [0], [0], [1], [0, 0, 1, 1], [], []>} : vector<2x16xbf16>, vector<16x128xbf16>, vector<2x128xf32> -> vector<2x128xf32>
    %138 = vector.broadcast %1 : vector<1x128xf32> to vector<2x128xf32>
    %139 = arith.addf %137, %138 : vector<2x128xf32>
    %cst_70 = arith.constant 0.000000e+00 : f32
    %140 = vector.broadcast %cst_70 : f32 to vector<2x128xf32>
    %141 = arith.maximumf %139, %140 : vector<2x128xf32>
    %142 = arith.truncf %141 : vector<2x128xf32> to vector<2x128xbf16>
    %c0_71 = arith.constant 0 : index
    %c1536 = arith.constant 1536 : index
    %143 = vector.load %arg9[%c0_71, %c1536] : memref<2x2048xbf16, #tpu.memory_space<vmem>>, vector<2x128xbf16>
    tpu.vector_store %arg9[%c0_71, %c1536], %142 {strides = array<i32>} : memref<2x2048xbf16, #tpu.memory_space<vmem>>, vector<2x128xbf16>,
    %144 = vector.extract_strided_slice %133 {offsets = [0, 3, 0], sizes = [2, 5, 16], strides = [1, 1, 1]} : vector<2x14x16xf32> to vector<2x5x16xf32>
    %cst_72 = arith.constant dense<0.000000e+00> : vector<2x16xf32>
    %145 = vector.multi_reduction <add>, %144, %cst_72 [1] : vector<2x5x16xf32> to vector<2x16xf32>
    %146 = arith.truncf %145 : vector<2x16xf32> to vector<2x16xbf16>
    %cst_73 = arith.constant dense<0.000000e+00> : vector<2x128xf32>
    %147 = tpu.matmul %146, %0, %cst_73 {dimension_numbers = #tpu.dot_dimension_numbers<[1], [0], [0], [1], [0, 0, 1, 1], [], []>} : vector<2x16xbf16>, vector<16x128xbf16>, vector<2x128xf32> -> vector<2x128xf32>
    %148 = vector.broadcast %1 : vector<1x128xf32> to vector<2x128xf32>
    %149 = arith.addf %147, %148 : vector<2x128xf32>
    %cst_74 = arith.constant 0.000000e+00 : f32
    %150 = vector.broadcast %cst_74 : f32 to vector<2x128xf32>
    %151 = arith.maximumf %149, %150 : vector<2x128xf32>
    %152 = arith.truncf %151 : vector<2x128xf32> to vector<2x128xbf16>
    %c0_75 = arith.constant 0 : index
    %c1664 = arith.constant 1664 : index
    %153 = vector.load %arg9[%c0_75, %c1664] : memref<2x2048xbf16, #tpu.memory_space<vmem>>, vector<2x128xbf16>
    tpu.vector_store %arg9[%c0_75, %c1664], %152 {strides = array<i32>} : memref<2x2048xbf16, #tpu.memory_space<vmem>>, vector<2x128xbf16>,
    %154 = vector.extract_strided_slice %133 {offsets = [0, 6, 0], sizes = [2, 5, 16], strides = [1, 1, 1]} : vector<2x14x16xf32> to vector<2x5x16xf32>
    %cst_76 = arith.constant dense<0.000000e+00> : vector<2x16xf32>
    %155 = vector.multi_reduction <add>, %154, %cst_76 [1] : vector<2x5x16xf32> to vector<2x16xf32>
    %156 = arith.truncf %155 : vector<2x16xf32> to vector<2x16xbf16>
    %cst_77 = arith.constant dense<0.000000e+00> : vector<2x128xf32>
    %157 = tpu.matmul %156, %0, %cst_77 {dimension_numbers = #tpu.dot_dimension_numbers<[1], [0], [0], [1], [0, 0, 1, 1], [], []>} : vector<2x16xbf16>, vector<16x128xbf16>, vector<2x128xf32> -> vector<2x128xf32>
    %158 = vector.broadcast %1 : vector<1x128xf32> to vector<2x128xf32>
    %159 = arith.addf %157, %158 : vector<2x128xf32>
    %cst_78 = arith.constant 0.000000e+00 : f32
    %160 = vector.broadcast %cst_78 : f32 to vector<2x128xf32>
    %161 = arith.maximumf %159, %160 : vector<2x128xf32>
    %162 = arith.truncf %161 : vector<2x128xf32> to vector<2x128xbf16>
    %c0_79 = arith.constant 0 : index
    %c1792 = arith.constant 1792 : index
    %163 = vector.load %arg9[%c0_79, %c1792] : memref<2x2048xbf16, #tpu.memory_space<vmem>>, vector<2x128xbf16>
    tpu.vector_store %arg9[%c0_79, %c1792], %162 {strides = array<i32>} : memref<2x2048xbf16, #tpu.memory_space<vmem>>, vector<2x128xbf16>,
    %164 = vector.extract_strided_slice %133 {offsets = [0, 9, 0], sizes = [2, 5, 16], strides = [1, 1, 1]} : vector<2x14x16xf32> to vector<2x5x16xf32>
    %cst_80 = arith.constant dense<0.000000e+00> : vector<2x16xf32>
    %165 = vector.multi_reduction <add>, %164, %cst_80 [1] : vector<2x5x16xf32> to vector<2x16xf32>
    %166 = arith.truncf %165 : vector<2x16xf32> to vector<2x16xbf16>
    %cst_81 = arith.constant dense<0.000000e+00> : vector<2x128xf32>
    %167 = tpu.matmul %166, %0, %cst_81 {dimension_numbers = #tpu.dot_dimension_numbers<[1], [0], [0], [1], [0, 0, 1, 1], [], []>} : vector<2x16xbf16>, vector<16x128xbf16>, vector<2x128xf32> -> vector<2x128xf32>
    %168 = vector.broadcast %1 : vector<1x128xf32> to vector<2x128xf32>
    %169 = arith.addf %167, %168 : vector<2x128xf32>
    %cst_82 = arith.constant 0.000000e+00 : f32
    %170 = vector.broadcast %cst_82 : f32 to vector<2x128xf32>
    %171 = arith.maximumf %169, %170 : vector<2x128xf32>
    %172 = arith.truncf %171 : vector<2x128xf32> to vector<2x128xbf16>
    %c0_83 = arith.constant 0 : index
    %c1920 = arith.constant 1920 : index
    %173 = vector.load %arg9[%c0_83, %c1920] : memref<2x2048xbf16, #tpu.memory_space<vmem>>, vector<2x128xbf16>
    tpu.vector_store %arg9[%c0_83, %c1920], %172 {strides = array<i32>} : memref<2x2048xbf16, #tpu.memory_space<vmem>>, vector<2x128xbf16>,
    %c0_84 = arith.constant 0 : index
    %c0_85 = arith.constant 0 : index
    %174 = vector.load %arg9[%c0_84, %c0_85] : memref<2x2048xbf16, #tpu.memory_space<vmem>>, vector<2x2048xbf16>
    %c0_86 = arith.constant 0 : index
    %c0_87 = arith.constant 0 : index
    %175 = vector.load %arg4[%c0_86, %c0_87] : memref<2048x1024xbf16, #tpu.memory_space<vmem>>, vector<2048x1024xbf16>
    %cst_88 = arith.constant dense<0.000000e+00> : vector<2x1024xf32>
    %176 = tpu.matmul %174, %175, %cst_88 {dimension_numbers = #tpu.dot_dimension_numbers<[1], [0], [0], [1], [0, 0, 1, 1], [], []>} : vector<2x2048xbf16>, vector<2048x1024xbf16>, vector<2x1024xf32> -> vector<2x1024xf32>
    %c0_89 = arith.constant 0 : index
    %c0_90 = arith.constant 0 : index
    %177 = vector.load %arg5[%c0_89, %c0_90] : memref<1x1024xf32, #tpu.memory_space<vmem>>, vector<1x1024xf32>
    %178 = vector.broadcast %177 : vector<1x1024xf32> to vector<2x1024xf32>
    %179 = arith.addf %176, %178 : vector<2x1024xf32>
    %cst_91 = arith.constant 0.000000e+00 : f32
    %180 = vector.broadcast %cst_91 : f32 to vector<2x1024xf32>
    %181 = arith.maximumf %179, %180 : vector<2x1024xf32>
    %182 = arith.truncf %181 : vector<2x1024xf32> to vector<2x1024xbf16>
    %c0_92 = arith.constant 0 : index
    %c0_93 = arith.constant 0 : index
    %183 = vector.load %arg6[%c0_92, %c0_93] : memref<1024x128xbf16, #tpu.memory_space<vmem>>, vector<1024x128xbf16>
    %cst_94 = arith.constant dense<0.000000e+00> : vector<2x128xf32>
    %184 = tpu.matmul %182, %183, %cst_94 {dimension_numbers = #tpu.dot_dimension_numbers<[1], [0], [0], [1], [0, 0, 1, 1], [], []>} : vector<2x1024xbf16>, vector<1024x128xbf16>, vector<2x128xf32> -> vector<2x128xf32>
    %c0_95 = arith.constant 0 : index
    %c0_96 = arith.constant 0 : index
    %185 = vector.load %arg7[%c0_95, %c0_96] : memref<1x128xf32, #tpu.memory_space<vmem>>, vector<1x128xf32>
    %186 = vector.broadcast %185 : vector<1x128xf32> to vector<2x128xf32>
    %187 = arith.addf %184, %186 : vector<2x128xf32>
    %cst_97 = arith.constant dense<0xFF800000> : vector<2xf32>
    %188 = vector.multi_reduction <maximumf>, %187, %cst_97 [1] : vector<2x128xf32> to vector<2xf32>
    %189 = vector.shape_cast %188 : vector<2xf32> to vector<2x1xf32>
    %190 = vector.broadcast %189 : vector<2x1xf32> to vector<2x128xf32>
    %191 = arith.subf %187, %190 : vector<2x128xf32>
    %192 = math.exp %191 : vector<2x128xf32>
    %cst_98 = arith.constant dense<0.000000e+00> : vector<2xf32>
    %193 = vector.multi_reduction <add>, %192, %cst_98 [1] : vector<2x128xf32> to vector<2xf32>
    %194 = vector.shape_cast %193 : vector<2xf32> to vector<2x1xf32>
    %195 = tpu.reciprocal %194 {approx = true} : vector<2x1xf32> -> vector<2x1xf32>
    %196 = vector.broadcast %195 : vector<2x1xf32> to vector<2x128xf32>
    %197 = arith.mulf %192, %196 : vector<2x128xf32>
    %c0_99 = arith.constant 0 : index
    %c0_100 = arith.constant 0 : index
    %198 = vector.load %arg8[%c0_99, %c0_100] : memref<2x128xf32, #tpu.memory_space<vmem>>, vector<2x128xf32>
    tpu.vector_store %arg8[%c0_99, %c0_100], %197 {strides = array<i32>} : memref<2x128xf32, #tpu.memory_space<vmem>>, vector<2x128xf32>,
    return
  }
  func.func @transform_0(%arg0: i32) -> (i32, i32, i32, i32) {
    %c0_i32 = arith.constant 0 : i32
    %c0_i32_0 = arith.constant 0 : i32
    %c0_i32_1 = arith.constant 0 : i32
    %c0_i32_2 = arith.constant 0 : i32
    return %arg0, %c0_i32, %c0_i32_0, %c0_i32_1 : i32, i32, i32, i32
  }
  func.func @transform_1(%arg0: i32) -> (i32, i32) {
    %c0_i32 = arith.constant 0 : i32
    %c0_i32_0 = arith.constant 0 : i32
    %c0_i32_1 = arith.constant 0 : i32
    return %c0_i32, %c0_i32_0 : i32, i32
  }
  func.func @transform_2(%arg0: i32) -> (i32, i32) {
    %c0_i32 = arith.constant 0 : i32
    %c0_i32_0 = arith.constant 0 : i32
    %c0_i32_1 = arith.constant 0 : i32
    return %c0_i32, %c0_i32_0 : i32, i32
  }
  func.func @transform_3(%arg0: i32) -> (i32, i32) {
    %c0_i32 = arith.constant 0 : i32
    %c0_i32_0 = arith.constant 0 : i32
    %c0_i32_1 = arith.constant 0 : i32
    return %c0_i32, %c0_i32_0 : i32, i32
  }
  func.func @transform_4(%arg0: i32) -> (i32, i32) {
    %c0_i32 = arith.constant 0 : i32
    %c0_i32_0 = arith.constant 0 : i32
    %c0_i32_1 = arith.constant 0 : i32
    return %c0_i32, %c0_i32_0 : i32, i32
  }
  func.func @transform_5(%arg0: i32) -> (i32, i32) {
    %c0_i32 = arith.constant 0 : i32
    %c0_i32_0 = arith.constant 0 : i32
    %c0_i32_1 = arith.constant 0 : i32
    return %c0_i32, %c0_i32_0 : i32, i32
  }
  func.func @transform_6(%arg0: i32) -> (i32, i32) {
    %c0_i32 = arith.constant 0 : i32
    %c0_i32_0 = arith.constant 0 : i32
    %c0_i32_1 = arith.constant 0 : i32
    return %c0_i32, %c0_i32_0 : i32, i32
  }
  func.func @transform_7(%arg0: i32) -> (i32, i32) {
    %c0_i32 = arith.constant 0 : i32
    %c0_i32_0 = arith.constant 0 : i32
    return %arg0, %c0_i32 : i32, i32
  }
}

</mosaic_0001>

<bundles_post_ra>
// kernel: tpu_custom_call.1
= control target key start
LH: loop header
LB: loop body
LE: loop exit
PB: predicated region body
PF: predicated region fallthrough
CT: control target
= control target key end

     0   :  { %12 = vsyncpa [#allocation4], 0  ;;  %s12390_s0 = inlined_call_operand.hbm [shape: bf16[2,14,14,16], index: 0, kind: input, shape index: {}]   ;;  %s12391_s1 = inlined_call_operand.hbm [shape: bf16[16,128], index: 1, kind: input, shape index: {}]   ;;  %s12392_s2 = inlined_call_operand.hbm [shape: f32[1,128], index: 2, kind: input, shape index: {}]   ;;  %s12393_s3 = inlined_call_operand.hbm [shape: bf16[2048,1024], index: 3, kind: input, shape index: {}]   ;;  %s12394_s4 = inlined_call_operand.hbm [shape: f32[1,1024], index: 4, kind: input, shape index: {}]   ;;  %s12395_s5 = inlined_call_operand.hbm [shape: bf16[1024,128], index: 5, kind: input, shape index: {}]   ;;  %s12396_s6 = inlined_call_operand.hbm [shape: f32[1,128], index: 6, kind: input, shape index: {}]   ;;  %s12397_s7 = inlined_call_operand.hbm [shape: f32[2,128], index: 7, kind: output, shape index: {}]  }
   0x1   :  { %13 = vsyncpa [#allocation7], 0 }
   0x2   :  { %14 = vsyncpa [#allocation10], 0 }
   0x3   :  { %15 = vsyncpa [#allocation13], 0 }
   0x4   :  { %16 = vsyncpa [#allocation5], 0  ;;  %s11669_s24 = smov [#allocation6]   ;;  %s11670_s26 = smov [#allocation9]  }
   0x5   :  { %s34_s25 = sshll.u32 %s11669_s24, 4  ;;  %s56_s27 = sshll.u32 %s11670_s26, 4  ;;  %s35_s25 = int_to_ptr.vmem [resolvable:$true] %s34_s25  ;;  %s11724_s27 = int_to_ptr.vmem [resolvable:$true] %s56_s27 }
   0x6   :  { %s11483_s30 = scalar_lea.hbm %s12391_s1, 128 }
   0x7   :  { %p11484_p0 = scmp.ne.s32.totalorder %s12391_s1, %s11483_s30  ;;  %p11487_p1 = scmp.lt.u32.totalorder %s11483_s30, %s12391_s1 }
   0x9   :  { %p11489_p2 = pnand %p11487_p1, %p11484_p0 }
   0xb   :  { %11492 = shalt.err (!%p11489_p2)
}
   0xc   :  { %s11493_s12 = scalar_lea.vmem %s35_s25, 128  ;;  %p11498_p4 = scmp.lt.s32.totalorder %s35_s25, %s35_s25 }
   0xd   :  { %p11494_p3 = scmp.ne.s32.totalorder %s35_s25, %s11493_s12  ;;  %p11499_p5 = scmp.lt.s32.totalorder %s11493_s12, %s11493_s12 }
   0xf   :  { %p11500_p6 = por %p11499_p5, %p11498_p4 }
  0x11   :  { %p11501_p7 = pnand %p11500_p6, %p11494_p3 }
  0x13   :  { %11504 = shalt.err (!%p11501_p7)
}
  0x14   :  { %s11671_s13 = smov 64   ;;  %s11672_s14 = smov 4  }
  0x15   :  { %40 = dma.hbm_to_vmem [thread:$0]  %s12391_s1, 128, %s35_s25, [#allocation7], %s11671_s13, %s11671_s13, %s11672_s14  }
  0x16   :  { %s11505_s19 = scalar_lea.hbm %s12393_s3, 131072 }
  0x17   :  { %p11506_p8 = scmp.ne.s32.totalorder %s12393_s3, %s11505_s19  ;;  %p11509_p9 = scmp.lt.u32.totalorder %s11505_s19, %s12393_s3 }
  0x19   :  { %p11511_p10 = pnand %p11509_p9, %p11506_p8 }
  0x1b   :  { %11514 = shalt.err (!%p11511_p10)
}
  0x1c   :  { %s11515_s24 = scalar_lea.vmem %s11724_s27, 131072  ;;  %p11520_p12 = scmp.lt.s32.totalorder %s11724_s27, %s11724_s27 }
  0x1d   :  { %p11516_p11 = scmp.ne.s32.totalorder %s11724_s27, %s11515_s24  ;;  %p11521_p13 = scmp.lt.s32.totalorder %s11515_s24, %s11515_s24 }
  0x1f   :  { %p11522_p0 = por %p11521_p13, %p11520_p12 }
  0x21   :  { %p11523_p1 = pnand %p11522_p0, %p11516_p11 }
  0x23   :  { %11526 = shalt.err (!%p11523_p1)
}
  0x24   :  { %s11673_s1 = smov 512   ;;  %s11674_s25 = smov 32  }
  0x25   :  { %62 = dma.hbm_to_vmem [thread:$0]  %s12393_s3, 131072, %s11724_s27, [#allocation10], %s11673_s1, %s11673_s1, %s11674_s25  }
  0x26   :  { %s11675_s29 = smov [#allocation12]   ;;  %s11676_s8 = smov [#allocation3]  }
  0x27   :  { %s78_s30 = sshll.u32 %s11675_s29, 4  ;;  %s22_s9 = sshll.u32 %s11676_s8, 4  ;;  %s79_s30 = int_to_ptr.vmem [resolvable:$true] %s78_s30  ;;  %s11758_s9 = int_to_ptr.vmem [resolvable:$true] %s22_s9 }
  0x28   :  { %s11527_s12 = scalar_lea.hbm %s12395_s5, 8192 }
  0x29   :  { %p11528_p2 = scmp.ne.s32.totalorder %s12395_s5, %s11527_s12  ;;  %p11531_p3 = scmp.lt.u32.totalorder %s11527_s12, %s12395_s5 }
  0x2b   :  { %p11533_p4 = pnand %p11531_p3, %p11528_p2 }
  0x2d   :  { %11536 = shalt.err (!%p11533_p4)
}
  0x2e   :  { %s11537_s3 = scalar_lea.vmem %s79_s30, 8192  ;;  %p11542_p6 = scmp.lt.s32.totalorder %s79_s30, %s79_s30 }
  0x2f   :  { %p11538_p5 = scmp.ne.s32.totalorder %s79_s30, %s11537_s3  ;;  %p11543_p7 = scmp.lt.s32.totalorder %s11537_s3, %s11537_s3 }
  0x31   :  { %p11544_p8 = por %p11543_p7, %p11542_p6 }
  0x33   :  { %p11545_p9 = pnand %p11544_p8, %p11538_p5 }
  0x35   :  { %11548 = shalt.err (!%p11545_p9)
}
  0x36   :  { %84 = dma.hbm_to_vmem [thread:$0]  %s12395_s5, 8192, %s79_s30, [#allocation13], %s11671_s13, %s11671_s13, %s11672_s14  }
  0x37   :  { %s11549_s22 = scalar_lea.hbm %s12390_s0, 3584 }
  0x38   :  { %p11550_p10 = scmp.ne.s32.totalorder %s12390_s0, %s11549_s22  ;;  %p11553_p11 = scmp.lt.u32.totalorder %s11549_s22, %s12390_s0 }
  0x3a   :  { %p11555_p12 = pnand %p11553_p11, %p11550_p10 }
  0x3c   :  { %11558 = shalt.err (!%p11555_p12)
}
  0x3d   :  { %s11559_s26 = scalar_lea.vmem %s11758_s9, 3584  ;;  %p11564_p0 = scmp.lt.s32.totalorder %s11758_s9, %s11758_s9 }
  0x3e   :  { %p11560_p13 = scmp.ne.s32.totalorder %s11758_s9, %s11559_s26  ;;  %p11565_p1 = scmp.lt.s32.totalorder %s11559_s26, %s11559_s26 }
  0x40   :  { %p11566_p2 = por %p11565_p1, %p11564_p0 }
  0x42   :  { %p11567_p3 = pnand %p11566_p2, %p11560_p13 }
  0x44   :  { %11570 = shalt.err (!%p11567_p3)
}
  0x45   :  { %28 = dma.hbm_to_vmem [thread:$0]  %s12390_s0, 3584, %s11758_s9, [#allocation4], %s11671_s13, %s11671_s13, %s11672_s14  }
  0x46   :  { %s11677_s29 = smov [#allocation8]   ;;  %s11678_s8 = smov [#allocation11]  }
  0x47   :  { %s47_s30 = sshll.u32 %s11677_s29, 4  ;;  %s69_s10 = sshll.u32 %s11678_s8, 4  ;;  %s48_s30 = int_to_ptr.vmem [resolvable:$true] %s47_s30  ;;  %s70_s10 = int_to_ptr.vmem [resolvable:$true] %s69_s10 }
  0x48   :  { %s11571_s15 = scalar_lea.hbm %s12392_s2, 16 }
  0x49   :  { %p11572_p4 = scmp.ne.s32.totalorder %s12392_s2, %s11571_s15  ;;  %p11575_p5 = scmp.lt.u32.totalorder %s11571_s15, %s12392_s2 }
  0x4b   :  { %p11577_p6 = pnand %p11575_p5, %p11572_p4 }
  0x4d   :  { %11580 = shalt.err (!%p11577_p6)
}
  0x4e   :  { %s11581_s0 = scalar_lea.vmem %s48_s30, 16  ;;  %s11585_s13 = scalar_lea.vmem %s48_s30, 32 }
  0x4f   :  { %p11582_p7 = scmp.ne.s32.totalorder %s48_s30, %s11581_s0  ;;  %p11586_p8 = scmp.lt.s32.totalorder %s48_s30, %s48_s30 }
  0x50   :  { %p11587_p9 = scmp.lt.s32.totalorder %s11585_s13, %s11581_s0 }
  0x52   :  { %p11588_p10 = por %p11587_p9, %p11586_p8 }
  0x54   :  { %p11589_p11 = pnand %p11588_p10, %p11582_p7 }
  0x56   :  { %11592 = shalt.err (!%p11589_p11)
}
  0x57   :  { %50 = dma.hbm_to_vmem [thread:$0]  %s12392_s2, 16, %s48_s30, [#allocation7]  }
  0x58   :  { %s11593_s20 = scalar_lea.hbm %s12394_s4, 128 }
  0x59   :  { %p11594_p12 = scmp.ne.s32.totalorder %s12394_s4, %s11593_s20  ;;  %p11597_p13 = scmp.lt.u32.totalorder %s11593_s20, %s12394_s4 }
  0x5b   :  { %p11599_p0 = pnand %p11597_p13, %p11594_p12 }
  0x5d   :  { %11602 = shalt.err (!%p11599_p0)
}
  0x5e   :  { %s11603_s1 = scalar_lea.vmem %s70_s10, 128  ;;  %p11608_p2 = scmp.lt.s32.totalorder %s70_s10, %s70_s10 }
  0x5f   :  { %p11604_p1 = scmp.ne.s32.totalorder %s70_s10, %s11603_s1  ;;  %p11609_p3 = scmp.lt.s32.totalorder %s11603_s1, %s11603_s1 }
  0x61   :  { %p11610_p4 = por %p11609_p3, %p11608_p2 }
  0x63   :  { %p11611_p5 = pnand %p11610_p4, %p11604_p1 }
  0x65   :  { %11614 = shalt.err (!%p11611_p5)
}
  0x66   :  { %72 = dma.hbm_to_vmem [thread:$0]  %s12394_s4, 128, %s70_s10, [#allocation10]  }
  0x67   :  { %s11679_s26 = smov [#allocation14]   ;;  %s11615_s30 = scalar_lea.hbm %s12396_s6, 16 }
  0x68   :  { %s91_s5 = sshll.u32 %s11679_s26, 4  ;;  %p11616_p6 = scmp.ne.s32.totalorder %s12396_s6, %s11615_s30  ;;  %s92_s5 = int_to_ptr.vmem [resolvable:$true] %s91_s5 }
  0x69   :  { %p11619_p7 = scmp.lt.u32.totalorder %s11615_s30, %s12396_s6 }
  0x6b   :  { %p11621_p8 = pnand %p11619_p7, %p11616_p6 }
  0x6d   :  { %11624 = shalt.err (!%p11621_p8)
}
  0x6e   :  { %s11625_s16 = scalar_lea.vmem %s92_s5, 16  ;;  %s11629_s4 = scalar_lea.vmem %s92_s5, 32 }
  0x6f   :  { %p11626_p9 = scmp.ne.s32.totalorder %s92_s5, %s11625_s16  ;;  %p11630_p10 = scmp.lt.s32.totalorder %s92_s5, %s92_s5 }
  0x70   :  { %p11631_p11 = scmp.lt.s32.totalorder %s11629_s4, %s11625_s16 }
  0x72   :  { %p11632_p12 = por %p11631_p11, %p11630_p10 }
  0x74   :  { %p11633_p13 = pnand %p11632_p12, %p11626_p9 }
  0x76   :  { %11636 = shalt.err (!%p11633_p13)
}
  0x77   :  { %94 = dma.hbm_to_vmem [thread:$0]  %s12396_s6, 16, %s92_s5, [#allocation13]  }
  0x78   :  { %11659 = dma.done.wait [#allocation4], 3584  }
  0x79   :  { %11660 = vsyncadd [#allocation4], 4294963712 }
  0x7a   :  { %11661 = dma.done.wait [#allocation7], 144  }
  0x7b   :  { %11662 = vsyncadd [#allocation7], 4294967152 }
  0x7c   :  { %11663 = dma.done.wait [#allocation10], 131200  }
  0x7d   :  { %11664 = vsyncadd [#allocation10], 4294836096 }
  0x7e   :  { %11665 = dma.done.wait [#allocation13], 8208  }
  0x7f   :  { %11666 = vsyncadd [#allocation13], 4294959088  ;;  %v11680_v0 = vmov 0.0   ;;  %vm11681_vm0 = vmmov 0   ;;  %vm160_vm1 = vcmask 130048   ;;  %v11837_v1 = vld [vmem:[#allocation6] sm:$0xff]  }
  0x80   :  { %11180 = vmatprep.subr.bf16.mxu0 %v11680_v0  ;;  %11186 = vmatprep.subr.bf16.mxu1 %v11680_v0  ;;  %vm170_vm2 = vcmask 128000   ;;  %v120_v2 = vld [vmem:[#allocation3] ss:$8 sps:$4 sm:$0xff]   ;;  %v124_v3 = vld [vmem:[#allocation3 + $0x10] ss:$8 sps:$4 sm:$0xff]   ;;  %vm198_vm3 = vcmask 126976  }
  0x81   :  { %11182 = vmatprep.mubr.msk.bf16.mxu0 %vm11681_vm0, %v11680_v0  ;;  %11188 = vmatprep.mubr.msk.bf16.mxu1 %vm11681_vm0, %v11680_v0  ;;  %v128_v4 = vld [vmem:[#allocation3 + $0x20] ss:$80 sps:$4 sm:$0xff]   ;;  %v140_v7 = vunpack.c.l.bf16 %v120_v2  ;;  %v142_v8 = vunpack.c.h.bf16 %v120_v2  ;;  %v144_v9 = vunpack.c.l.bf16 %v124_v3  ;;  %v146_v10 = vunpack.c.h.bf16 %v124_v3  ;;  %v121_v11 = vld [vmem:[#allocation3 + $0x4] sm:$0x7]  ;;  %v123_v16 = vld [vmem:[#allocation3 + $0xc] sm:$0x7] }
  0x82   :  { %11181 = vmatpush3.bf16.msra.mxu0 %v11837_v1  ;;  %11187 = vmatpush3.bf16.msra.mxu1 %v11837_v1  ;;  %v132_v5 = vld [vmem:[#allocation3 + $0x78] ss:$8 sps:$4 sm:$0xff]   ;;  %v136_v6 = vld [vmem:[#allocation3 + $0x88] ss:$8 sps:$4 sm:$0xff]   ;;  %v148_v12 = vunpack.c.l.bf16 %v128_v4  ;;  %v150_v13 = vunpack.c.h.bf16 %v128_v4  ;;  %v125_v17 = vld [vmem:[#allocation3 + $0x14] sm:$0x7]  ;;  %v141_v40 = vunpack.c.l.bf16 %v121_v11  ;;  %v143_v41 = vunpack.c.l.bf16 %v123_v16 }
  0x83   :  { %v152_v14 = vunpack.c.l.bf16 %v132_v5  ;;  %v154_v15 = vunpack.c.h.bf16 %v132_v5  ;;  %11192 = vmatprep.subr.bf16.mxu0 %v11680_v0  ;;  %11198 = vmatprep.subr.bf16.mxu1 %v11680_v0  ;;  %v127_v18 = vld [vmem:[#allocation3 + $0x1c] sm:$0x7]  ;;  %v156_v19 = vunpack.c.l.bf16 %v136_v6  ;;  %v158_v20 = vunpack.c.h.bf16 %v136_v6  ;;  %v129_v23 = vld [vmem:[#allocation3 + $0x24] sm:$0x7]  ;;  %v131_v24 = vld [vmem:[#allocation3 + $0x74] sm:$0x7] }
  0x84   :  { %v161_v21 = vsel %vm160_vm1, %v140_v7, 0.0  ;;  %v162_v22 = vsel %vm160_vm1, %v142_v8, 0.0  ;;  %v164_v26 = vsel %vm160_vm1, %v144_v9, 0.0  ;;  %v166_v27 = vsel %vm160_vm1, %v146_v10, 0.0  ;;  %v133_v29 = vld [vmem:[#allocation3 + $0x7c] sm:$0x7] }
  0x85   :  { %v163_v25 = vadd.f32 %v162_v22, %v161_v21  ;;  %v168_v28 = vsel %vm160_vm1, %v148_v12, 0.0  ;;  %v180_v30 = vsel %vm160_vm1, %v150_v13, 0.0  ;;  %v181_v31 = vsel %vm160_vm1, %v152_v14, 0.0  ;;  %v135_v34 = vld [vmem:[#allocation3 + $0x84] sm:$0x7]  ;;  %s11683_s6 = smov [#allocation15]  }
  0x86   :  { %v183_v32 = vsel %vm160_vm1, %v154_v15, 0.0  ;;  %v185_v33 = vsel %vm160_vm1, %v156_v19, 0.0  ;;  %v182_v36 = vadd.f32 %v181_v31, %v180_v30  ;;  %v187_v37 = vsel %vm160_vm1, %v158_v20, 0.0  ;;  %v137_v38 = vld [vmem:[#allocation3 + $0x8c] sm:$0x7]  ;;  %s9941_s18 = sshll.u32 %s11683_s6, 4  ;;  %s9942_s18 = int_to_ptr.vmem [resolvable:$true] %s9941_s18 }
  0x87   :  { %v165_v35 = vadd.f32 %v164_v26, %v163_v25  ;;  %v139_v39 = vld [vmem:[#allocation3 + $0x94] sm:$0x7]  ;;  %v145_v42 = vunpack.c.l.bf16 %v125_v17  ;;  %v147_v43 = vunpack.c.l.bf16 %v127_v18  ;;  %v149_v44 = vunpack.c.l.bf16 %v129_v23  ;;  %v11864_v15 = vld [vmem:[#allocation3 + $0x18] ss:$8 sps:$4 sm:$0xff]   ;;  %s11637_s3 = scalar_lea.vmem %s9942_s18, 32  ;;  %p11642_p1 = scmp.lt.s32.totalorder %s9942_s18, %s9942_s18 }
  0x88   :  { %v184_v46 = vadd.f32 %v183_v32, %v182_v36  ;;  %v151_v47 = vunpack.c.l.bf16 %v131_v24  ;;  %v153_v48 = vunpack.c.l.bf16 %v133_v29  ;;  %v155_v49 = vunpack.c.l.bf16 %v135_v34  ;;  %v11869_v24 = vld [vmem:[#allocation3 + $0x28] ss:$8 sps:$4 sm:$0xff]   ;;  %p11638_p0 = scmp.ne.s32.totalorder %s9942_s18, %s11637_s3  ;;  %p11643_p2 = scmp.lt.s32.totalorder %s11637_s3, %s11637_s3 }
  0x89   :  { %v167_v45 = vadd.f32 %v166_v27, %v165_v35  ;;  %v157_v50 = vunpack.c.l.bf16 %v137_v38  ;;  %v159_v51 = vunpack.c.l.bf16 %v139_v39  ;;  %v171_v52 = vsel %vm170_vm2, %v141_v40, 0.0 }
  0x8a   :  { %v186_v54 = vadd.f32 %v185_v33, %v184_v46  ;;  %v172_v55 = vsel %vm170_vm2, %v143_v41, 0.0  ;;  %v174_v56 = vsel %vm170_vm2, %v145_v42, 0.0  ;;  %v176_v58 = vsel %vm170_vm2, %v147_v43, 0.0  ;;  %p11644_p3 = por %p11643_p2, %p11642_p1 }
  0x8b   :  { %v169_v53 = vadd.f32 %v168_v28, %v167_v45  ;;  %v173_v57 = vadd.f32 %v172_v55, %v171_v52  ;;  %v178_v59 = vsel %vm170_vm2, %v149_v44, 0.0  ;;  %v189_v60 = vsel %vm170_vm2, %v151_v47, 0.0 }
  0x8c   :  { %vm356_vm4 = vcmask 1041408   ;;  %v188_v61 = vadd.f32 %v187_v37, %v186_v54  ;;  %v190_v5 = vsel %vm170_vm2, %v153_v48, 0.0  ;;  %v192_v6 = vsel %vm170_vm2, %v155_v49, 0.0  ;;  %p11645_p4 = pnand %p11644_p3, %p11638_p0 }
  0x8d   :  { %v199_v62 = vsel %vm198_vm3, %v169_v53, 0.0  ;;  %v357_v63 = vrot.slane %v169_v53, 6  ;;  %v282_v2 = vrot.slane %v169_v53, 3  ;;  %v175_v4 = vadd.f32 %v174_v56, %v173_v57 }
  0x8e   :  { %v200_v3 = vrot.slane %v199_v62, 4  ;;  %v206_v7 = vsel %vm198_vm3, %v188_v61, 0.0  ;;  %v360_v8 = vrot.slane %v188_v61, 6  ;;  %v283_v9 = vrot.slane %v188_v61, 3 }
  0x8f   :  { %v286_v10 = vsel %vm198_vm3, %v282_v2, 0.0  ;;  %v207_v12 = vrot.slane %v206_v7, 4  ;;  %v177_v14 = vadd.f32 %v176_v58, %v175_v4  ;;  %v191_v17 = vadd.f32 %v190_v5, %v189_v60 }
  0x90   :  { %v201_v11 = vadd.f32 %v200_v3, %v199_v62  ;;  %v287_v13 = vrot.slane %v286_v10, 4  ;;  %v293_v16 = vsel %vm198_vm3, %v283_v9, 0.0  ;;  %v194_v18 = vsel %vm170_vm2, %v157_v50, 0.0 }
  0x91   :  { %v196_v19 = vsel %vm170_vm2, %v159_v51, 0.0  ;;  %v208_v21 = vadd.f32 %v207_v12, %v206_v7  ;;  %v294_v23 = vrot.slane %v293_v16, 4  ;;  %v179_v25 = vadd.f32 %v178_v59, %v177_v14  ;;  %v514_v7 = vld [vmem:[#allocation3 + $0x38] ss:$80 sps:$4 sm:$0xff]  }
  0x92   :  { %v202_v20 = vrot.slane %v201_v11, 2  ;;  %v288_v22 = vadd.f32 %v287_v13, %v286_v10  ;;  %v193_v26 = vadd.f32 %v192_v6, %v191_v17  ;;  %v526_v27 = vunpack.c.l.bf16 %v11864_v15 }
  0x93   :  { %v528_v28 = vunpack.c.h.bf16 %v11864_v15  ;;  %v209_v30 = vrot.slane %v208_v21, 2  ;;  %v295_v32 = vadd.f32 %v294_v23, %v293_v16  ;;  %vm225_vm5 = vcmask 1041409   ;;  %v518_v16 = vld [vmem:[#allocation3 + $0x90] ss:$8 sps:$4 sm:$0xff]  }
  0x94   :  { %v203_v29 = vadd.f32 %v202_v20, %v201_v11  ;;  %v289_v31 = vrot.slane %v288_v22, 2  ;;  %v195_v33 = vadd.f32 %v194_v18, %v193_v26  ;;  %v358_v34 = vrot.slane %v179_v25, 6 }
  0x95   :  { %v433_v35 = vrot.slane %v179_v25, 1  ;;  %v530_v36 = vunpack.c.l.bf16 %v11869_v24  ;;  %v210_v38 = vadd.f32 %v209_v30, %v208_v21  ;;  %v296_v40 = vrot.slane %v295_v32, 2 }
  0x96   :  { %v204_v37 = vrot.slane %v203_v29, 1  ;;  %v290_v39 = vadd.f32 %v289_v31, %v288_v22  ;;  %v197_v41 = vadd.f32 %v196_v19, %v195_v33  ;;  %v359_v42 = vsel %vm356_vm4, %v357_v63, %v358_v34 }
  0x97   :  { %v437_v43 = vsel %vm198_vm3, %v433_v35, 0.0  ;;  %v532_v44 = vunpack.c.h.bf16 %v11869_v24  ;;  %v211_v46 = vrot.slane %v210_v38, 1  ;;  %v297_v48 = vadd.f32 %v296_v40, %v295_v32 }
  0x98   :  { %v205_v45 = vadd.f32 %v204_v37, %v203_v29  ;;  %v291_v47 = vrot.slane %v290_v39, 1  ;;  %v361_v49 = vrot.slane %v197_v41, 6  ;;  %v365_v50 = vsel %vm198_vm3, %v359_v42, 0.0  ;;  %v522_v29 = vld [vmem:[#allocation3 + $0xa0] ss:$8 sps:$4 sm:$0xff]  }
  0x99   :  { %v434_v51 = vrot.slane %v197_v41, 1  ;;  %v438_v52 = vrot.slane %v437_v43, 4  ;;  %v212_v53 = vadd.f32 %v211_v46, %v210_v38  ;;  %v298_v56 = vrot.slane %v297_v48, 1 }
  0x9a   :  { %v213_v54 = vpack.c.bf16 %v205_v45, %v205_v45  ;;  %v292_v55 = vadd.f32 %v291_v47, %v290_v39  ;;  %v362_v57 = vsel %vm356_vm4, %v360_v8, %v361_v49  ;;  %v366_v58 = vrot.slane %v365_v50, 4 }
  0x9b   :  { %v439_v59 = vadd.f32 %v438_v52, %v437_v43  ;;  %v444_v60 = vsel %vm198_vm3, %v434_v51, 0.0  ;;  %v214_v61 = vpack.c.bf16 %v212_v53, %v212_v53  ;;  %v299_v63 = vadd.f32 %v298_v56, %v297_v48  ;;  %v507_v51 = vld [vmem:[#allocation3 + $0x1c] sm:$0x7]  ;;  %v509_v52 = vld [vmem:[#allocation3 + $0x24] sm:$0x7] }
  0x9c   :  { %v223_v62 = vunpack.c.l.b16 %v213_v54  ;;  %v300_v2 = vpack.c.bf16 %v292_v55, %v292_v55  ;;  %v367_v3 = vadd.f32 %v366_v58, %v365_v50  ;;  %v372_v4 = vsel %vm198_vm3, %v362_v57, 0.0  ;;  %v511_v55 = vld [vmem:[#allocation3 + $0x2c] sm:$0x7]  ;;  %v11906_v56 = vld [vmem:[#allocation3 + $0x34] sm:$0x7] }
  0x9d   :  { %v440_v5 = vrot.slane %v439_v59, 2  ;;  %v445_v6 = vrot.slane %v444_v60, 4  ;;  %v224_v9 = vunpack.c.l.b16 %v214_v61  ;;  %v301_v10 = vpack.c.bf16 %v299_v63, %v299_v63  ;;  %v517_v63 = vld [vmem:[#allocation3 + $0x8c] sm:$0x7] }
  0x9e   :  { %v304_v11 = vunpack.c.l.b16 %v300_v2  ;;  %v373_v12 = vrot.slane %v372_v4, 4  ;;  %v368_v13 = vrot.slane %v367_v3, 2  ;;  %v534_v17 = vunpack.c.l.bf16 %v514_v7 }
  0x9f   :  { %v441_v8 = vadd.f32 %v440_v5, %v439_v59  ;;  %v446_v14 = vadd.f32 %v445_v6, %v444_v60  ;;  %v226_v18 = vsel %vm225_vm5, %v224_v9, %v223_v62  ;;  %v305_v19 = vunpack.c.l.b16 %v301_v10  ;;  %v515_v59 = vld [vmem:[#allocation3 + $0x3c] sm:$0x7] }
  0xa0   :  { %v374_v20 = vadd.f32 %v373_v12, %v372_v4  ;;  %v536_v21 = vunpack.c.h.bf16 %v514_v7  ;;  %v227_v22 = vpack.c.b16 %v226_v18, %v226_v18  ;;  %v369_v23 = vadd.f32 %v368_v13, %v367_v3  ;;  %v519_v13 = vld [vmem:[#allocation3 + $0x94] sm:$0x7]  ;;  %v521_v18 = vld [vmem:[#allocation3 + $0x9c] sm:$0x7] }
  0xa1   :  { %v442_v25 = vrot.slane %v441_v8, 1  ;;  %v447_v26 = vrot.slane %v446_v14, 2  ;;  %v306_v30 = vsel %vm225_vm5, %v305_v19, %v304_v11  ;;  %v538_v32 = vunpack.c.l.bf16 %v518_v16  ;;  %v523_v19 = vld [vmem:[#allocation3 + $0xa4] sm:$0x7] }
  0xa2   :  { %v375_v31 = vrot.slane %v374_v20, 2  ;;  %v540_v33 = vunpack.c.h.bf16 %v518_v16  ;;  %11183 = vmatmul.mubr.msk.bf16.vlgmr.msra.gmra.mrb[0].mxu0 %vm160_vm1, %v227_v22  ;;  %v307_v34 = vpack.c.b16 %v306_v30, %v306_v30  ;;  %v370_v35 = vrot.slane %v369_v23, 1 }
  0xa3   :  { %v443_v37 = vadd.f32 %v442_v25, %v441_v8  ;;  %v448_v38 = vadd.f32 %v447_v26, %v446_v14  ;;  %11193 = vmatpush3.bf16.msra.mxu0 %v11837_v1  ;;  %11194 = vmatprep.mubr.msk.bf16.mxu0 %vm11681_vm0, %v11680_v0  ;;  %v542_v40 = vunpack.c.l.bf16 %v522_v29  ;;  %v544_v41 = vunpack.c.h.bf16 %v522_v29 }
  0xa4   :  { %v376_v39 = vadd.f32 %v375_v31, %v374_v20  ;;  %v546_v42 = vsel %vm160_vm1, %v526_v27, 0.0  ;;  %11189 = vmatmul.mubr.msk.bf16.vlgmr.msra.gmra.mrb[0].mxu1 %vm160_vm1, %v307_v34  ;;  %v371_v43 = vadd.f32 %v370_v35, %v369_v23  ;;  %11204 = vmatprep.subr.bf16.mxu0 %v11680_v0  ;;  %v547_v47 = vsel %vm160_vm1, %v528_v28, 0.0  ;;  %v525_v20 = vld [vmem:[#allocation3 + $0xac] sm:$0x7] }
  0xa5   :  { %v449_v45 = vrot.slane %v448_v38, 1  ;;  %v451_v46 = vpack.c.bf16 %v443_v37, %v443_v37  ;;  %11199 = vmatpush3.bf16.msra.mxu1 %v11837_v1  ;;  %11200 = vmatprep.mubr.msk.bf16.mxu1 %vm11681_vm0, %v11680_v0  ;;  %v548_v49 = vadd.f32 %v547_v47, %v546_v42  ;;  %v549_v27 = vsel %vm160_vm1, %v530_v36, 0.0 }
  0xa6   :  { %v377_v48 = vrot.slane %v376_v39, 1  ;;  %v551_v50 = vsel %vm160_vm1, %v532_v44, 0.0  ;;  %v379_v15 = vpack.c.bf16 %v371_v43, %v371_v43  ;;  %11210 = vmatprep.subr.bf16.mxu1 %v11680_v0  ;;  %v553_v54 = vsel %vm160_vm1, %v534_v17, 0.0 }
  0xa7   :  { %v450_v28 = vadd.f32 %v449_v45, %v448_v38  ;;  %v455_v53 = vunpack.c.l.b16 %v451_v46  ;;  %v550_v58 = vadd.f32 %v549_v27, %v548_v49  ;;  %v564_v36 = vsel %vm160_vm1, %v536_v21, 0.0 }
  0xa8   :  { %v378_v57 = vadd.f32 %v377_v48, %v376_v39  ;;  %v565_v24 = vsel %vm160_vm1, %v538_v32, 0.0  ;;  %v383_v44 = vunpack.c.l.b16 %v379_v15  ;;  %v567_v62 = vsel %vm160_vm1, %v540_v33, 0.0 }
  0xa9   :  { %v452_v60 = vpack.c.bf16 %v450_v28, %v450_v28  ;;  %v566_v61 = vadd.f32 %v565_v24, %v564_v36  ;;  %v552_v3 = vadd.f32 %v551_v50, %v550_v58  ;;  %v569_v4 = vsel %vm160_vm1, %v542_v40, 0.0 }
  0xaa   :  { %v380_v2 = vpack.c.bf16 %v378_v57, %v378_v57  ;;  %v571_v5 = vsel %vm160_vm1, %v544_v41, 0.0  ;;  %v527_v9 = vunpack.c.l.bf16 %v507_v51  ;;  %v529_v10 = vunpack.c.l.bf16 %v509_v52 }
  0xab   :  { %v456_v6 = vunpack.c.l.b16 %v452_v60  ;;  %v568_v7 = vadd.f32 %v567_v62, %v566_v61  ;;  %v11913_v12 = vadd.f32 %v553_v54, %v552_v3  ;;  %v531_v8 = vunpack.c.l.bf16 %v511_v55  ;;  %v11946_v62 = vld [vmem:[#allocation3 + $0x30] ss:$8 sps:$4 sm:$0xff]  }
  0xac   :  { %v384_v11 = vunpack.c.l.b16 %v380_v2  ;;  %v533_v14 = vunpack.c.l.bf16 %v11906_v56  ;;  %v535_v21 = vunpack.c.l.bf16 %v515_v59  ;;  %v537_v22 = vunpack.c.l.bf16 %v517_v63 }
  0xad   :  { %v457_v16 = vsel %vm225_vm5, %v456_v6, %v455_v53  ;;  %v570_v17 = vadd.f32 %v569_v4, %v568_v7  ;;  %v582_v26 = vsel %vm198_vm3, %v11913_v12, 0.0  ;;  %v652_v29 = vrot.slane %v11913_v12, 3 }
  0xae   :  { %v385_v23 = vsel %vm225_vm5, %v384_v11, %v383_v44  ;;  %v458_v25 = vpack.c.b16 %v457_v16, %v457_v16  ;;  %v583_v32 = vrot.slane %v582_v26, 4  ;;  %v539_v33 = vunpack.c.l.bf16 %v519_v13 }
  0xaf   :  { %v386_v30 = vpack.c.b16 %v385_v23, %v385_v23  ;;  %v11921_v31 = vadd.f32 %v571_v5, %v570_v17  ;;  %v656_v34 = vsel %vm198_vm3, %v652_v29, 0.0  ;;  %v541_v35 = vunpack.c.l.bf16 %v521_v18 }
  0xb0   :  { %11201 = vmatmul.mubr.msk.bf16.vlgmr.msra.gmra.mrb[4].mxu1 %vm160_vm1, %v458_v25  ;;  %v543_v37 = vunpack.c.l.bf16 %v523_v19  ;;  %v545_v38 = vunpack.c.l.bf16 %v525_v20  ;;  %v584_v39 = vadd.f32 %v583_v32, %v582_v26  ;;  %v657_v42 = vrot.slane %v656_v34, 4 }
  0xb1   :  { %11195 = vmatmul.mubr.msk.bf16.vlgmr.msra.gmra.mrb[4].mxu0 %vm160_vm1, %v386_v30  ;;  %11211 = vmatpush3.bf16.msra.mxu1 %v11837_v1  ;;  %v589_v40 = vsel %vm198_vm3, %v11921_v31, 0.0  ;;  %v653_v41 = vrot.slane %v11921_v31, 3  ;;  %v555_v45 = vsel %vm170_vm2, %v527_v9, 0.0  ;;  %v556_v46 = vsel %vm170_vm2, %v529_v10, 0.0 }
  0xb2   :  { %11205 = vmatpush3.bf16.msra.mxu0 %v11837_v1  ;;  %11206 = vmatprep.mubr.msk.bf16.mxu0 %vm11681_vm0, %v11680_v0  ;;  %v590_v43 = vrot.slane %v589_v40, 4  ;;  %v558_v47 = vsel %vm170_vm2, %v531_v8, 0.0  ;;  %v585_v48 = vrot.slane %v584_v39, 2  ;;  %v658_v49 = vadd.f32 %v657_v42, %v656_v34 }
  0xb3   :  { %11212 = vmatprep.mubr.msk.bf16.mxu1 %vm11681_vm0, %v11680_v0  ;;  %11216 = vmatprep.subr.bf16.mxu0 %v11680_v0  ;;  %v663_v27 = vsel %vm198_vm3, %v653_v41, 0.0  ;;  %v557_v50 = vadd.f32 %v556_v46, %v555_v45  ;;  %v560_v15 = vsel %vm170_vm2, %v533_v14, 0.0  ;;  %v562_v28 = vsel %vm170_vm2, %v535_v21, 0.0 }
  0xb4   :  { %v591_v51 = vadd.f32 %v590_v43, %v589_v40  ;;  %11222 = vmatprep.subr.bf16.mxu1 %v11680_v0  ;;  %v664_v52 = vrot.slane %v663_v27, 4  ;;  %v586_v53 = vadd.f32 %v585_v48, %v584_v39  ;;  %v659_v54 = vrot.slane %v658_v49, 2  ;;  %v887_v48 = vld [vmem:[#allocation3 + $0xa8] ss:$8 sps:$4 sm:$0xff]  }
  0xb5   :  { %v559_v55 = vadd.f32 %v558_v47, %v557_v50  ;;  %v573_v56 = vsel %vm170_vm2, %v537_v22, 0.0  ;;  %v574_v36 = vsel %vm170_vm2, %v539_v33, 0.0  ;;  %v576_v24 = vsel %vm170_vm2, %v541_v35, 0.0  ;;  %v11952_v22 = vld [vmem:[#allocation3 + $0x40] ss:$8 sps:$4 sm:$0xff]  }
  0xb6   :  { %v592_v57 = vrot.slane %v591_v51, 2  ;;  %v665_v58 = vadd.f32 %v664_v52, %v663_v27  ;;  %v587_v59 = vrot.slane %v586_v53, 1  ;;  %v660_v44 = vadd.f32 %v659_v54, %v658_v49  ;;  %v883_v47 = vld [vmem:[#allocation3 + $0x50] ss:$80 sps:$4 sm:$0xff]  }
  0xb7   :  { %v561_v60 = vadd.f32 %v560_v15, %v559_v55  ;;  %v575_v61 = vadd.f32 %v574_v36, %v573_v56  ;;  %v578_v3 = vsel %vm170_vm2, %v543_v37, 0.0  ;;  %v580_v4 = vsel %vm170_vm2, %v545_v38, 0.0  ;;  %v11964_v15 = vld [vmem:[#allocation3 + $0xb8] ss:$8 sps:$4 sm:$0xff]  }
  0xb8   :  { %v593_v63 = vadd.f32 %v592_v57, %v591_v51  ;;  %v666_v2 = vrot.slane %v665_v58, 2  ;;  %v588_v5 = vadd.f32 %v587_v59, %v586_v53  ;;  %v661_v6 = vrot.slane %v660_v44, 1 }
  0xb9   :  { %v563_v7 = vadd.f32 %v562_v28, %v561_v60  ;;  %v577_v9 = vadd.f32 %v576_v24, %v575_v61  ;;  %v726_v13 = vrot.slane %v11913_v12, 6  ;;  %v729_v8 = vrot.slane %v11921_v31, 6 }
  0xba   :  { %v594_v10 = vrot.slane %v593_v63, 1  ;;  %v667_v11 = vadd.f32 %v666_v2, %v665_v58  ;;  %v596_v14 = vpack.c.bf16 %v588_v5, %v588_v5  ;;  %v662_v16 = vadd.f32 %v661_v6, %v660_v44 }
  0xbb   :  { %v579_v17 = vadd.f32 %v578_v3, %v577_v9  ;;  %v727_v18 = vrot.slane %v563_v7, 6  ;;  %v802_v21 = vrot.slane %v563_v7, 1  ;;  %v895_v23 = vunpack.c.l.bf16 %v11946_v62 }
  0xbc   :  { %v595_v19 = vadd.f32 %v594_v10, %v593_v63  ;;  %v668_v20 = vrot.slane %v667_v11, 1  ;;  %v600_v25 = vunpack.c.l.b16 %v596_v14  ;;  %v670_v26 = vpack.c.bf16 %v662_v16, %v662_v16 }
  0xbd   :  { %v581_v29 = vadd.f32 %v580_v4, %v579_v17  ;;  %v728_v30 = vsel %vm356_vm4, %v726_v13, %v727_v18  ;;  %v806_v33 = vsel %vm198_vm3, %v802_v21, 0.0  ;;  %v897_v42 = vunpack.c.h.bf16 %v11946_v62 }
  0xbe   :  { %v597_v32 = vpack.c.bf16 %v595_v19, %v595_v19  ;;  %v669_v12 = vadd.f32 %v668_v20, %v667_v11  ;;  %v734_v31 = vsel %vm198_vm3, %v728_v30, 0.0  ;;  %v674_v34 = vunpack.c.l.b16 %v670_v26  ;;  %v876_v20 = vld [vmem:[#allocation3 + $0x34] sm:$0x7]  ;;  %v878_v26 = vld [vmem:[#allocation3 + $0x3c] sm:$0x7] }
  0xbf   :  { %v730_v35 = vrot.slane %v581_v29, 6  ;;  %v735_v37 = vrot.slane %v734_v31, 4  ;;  %v803_v38 = vrot.slane %v581_v29, 1  ;;  %v807_v41 = vrot.slane %v806_v33, 4  ;;  %v880_v29 = vld [vmem:[#allocation3 + $0x44] sm:$0x7] }
  0xc0   :  { %v601_v39 = vunpack.c.l.b16 %v597_v32  ;;  %v671_v40 = vpack.c.bf16 %v669_v12, %v669_v12  ;;  %v899_v49 = vunpack.c.l.bf16 %v11952_v22  ;;  %v901_v58 = vunpack.c.h.bf16 %v11952_v22  ;;  %v11985_v30 = vld [vmem:[#allocation3 + $0x4c] sm:$0x7] }
  0xc1   :  { %v731_v43 = vsel %vm356_vm4, %v729_v8, %v730_v35  ;;  %v736_v45 = vadd.f32 %v735_v37, %v734_v31  ;;  %v813_v46 = vsel %vm198_vm3, %v803_v38, 0.0  ;;  %v808_v52 = vadd.f32 %v807_v41, %v806_v33 }
  0xc2   :  { %v602_v27 = vsel %vm225_vm5, %v601_v39, %v600_v25  ;;  %v675_v50 = vunpack.c.l.b16 %v671_v40  ;;  %v741_v51 = vsel %vm198_vm3, %v731_v43, 0.0  ;;  %v814_v55 = vrot.slane %v813_v46, 4  ;;  %v11990_v39 = vld [vmem:[#allocation3 + $0x54] sm:$0x7]  ;;  %v11992_v40 = vld [vmem:[#allocation3 + $0xa4] sm:$0x7] }
  0xc3   :  { %v603_v28 = vpack.c.b16 %v602_v27, %v602_v27  ;;  %v737_v53 = vrot.slane %v736_v45, 2  ;;  %v742_v54 = vrot.slane %v741_v51, 4  ;;  %v809_v57 = vrot.slane %v808_v52, 2 }
  0xc4   :  { %v676_v56 = vsel %vm225_vm5, %v675_v50, %v674_v34  ;;  %v903_v36 = vunpack.c.l.bf16 %v883_v47  ;;  %v815_v60 = vadd.f32 %v814_v55, %v813_v46  ;;  %v905_v62 = vunpack.c.h.bf16 %v883_v47  ;;  %v888_v46 = vld [vmem:[#allocation3 + $0xac] sm:$0x7] }
  0xc5   :  { %11207 = vmatmul.mubr.msk.bf16.vlgmr.msra.gmra.mrb[8].mxu0 %vm160_vm1, %v603_v28  ;;  %v677_v24 = vpack.c.b16 %v676_v56, %v676_v56  ;;  %v738_v59 = vadd.f32 %v737_v53, %v736_v45  ;;  %v743_v44 = vadd.f32 %v742_v54, %v741_v51  ;;  %v810_v61 = vadd.f32 %v809_v57, %v808_v52  ;;  %v890_v51 = vld [vmem:[#allocation3 + $0xb4] sm:$0x7]  ;;  %v892_v52 = vld [vmem:[#allocation3 + $0xbc] sm:$0x7] }
  0xc6   :  { %11217 = vmatpush3.bf16.msra.mxu0 %v11837_v1  ;;  %11218 = vmatprep.mubr.msk.bf16.mxu0 %vm11681_vm0, %v11680_v0  ;;  %v907_v63 = vunpack.c.l.bf16 %v887_v48  ;;  %v909_v2 = vunpack.c.h.bf16 %v887_v48  ;;  %v816_v5 = vrot.slane %v815_v60, 2  ;;  %v911_v6 = vunpack.c.l.bf16 %v11964_v15 }
  0xc7   :  { %11213 = vmatmul.mubr.msk.bf16.vlgmr.msra.gmra.mrb[8].mxu1 %vm160_vm1, %v677_v24  ;;  %v739_v3 = vrot.slane %v738_v59, 1  ;;  %v744_v4 = vrot.slane %v743_v44, 2  ;;  %11228 = vmatprep.subr.bf16.mxu0 %v11680_v0  ;;  %v811_v7 = vrot.slane %v810_v61, 1  ;;  %v913_v9 = vunpack.c.h.bf16 %v11964_v15  ;;  %v11998_v15 = vld [vmem:[#allocation3 + $0xc4] sm:$0x7] }
  0xc8   :  { %11223 = vmatpush3.bf16.msra.mxu1 %v11837_v1  ;;  %11224 = vmatprep.mubr.msk.bf16.mxu1 %vm11681_vm0, %v11680_v0  ;;  %v915_v10 = vsel %vm160_vm1, %v895_v23, 0.0  ;;  %v916_v11 = vsel %vm160_vm1, %v897_v42, 0.0  ;;  %v817_v14 = vadd.f32 %v816_v5, %v815_v60  ;;  %v918_v18 = vsel %vm160_vm1, %v899_v49, 0.0 }
  0xc9   :  { %v740_v13 = vadd.f32 %v739_v3, %v738_v59  ;;  %v745_v8 = vadd.f32 %v744_v4, %v743_v44  ;;  %11234 = vmatprep.subr.bf16.mxu1 %v11680_v0  ;;  %v917_v16 = vadd.f32 %v916_v11, %v915_v10  ;;  %v812_v17 = vadd.f32 %v811_v7, %v810_v61 }
  0xca   :  { %v920_v1 = vsel %vm160_vm1, %v901_v58, 0.0  ;;  %v922_v19 = vsel %vm160_vm1, %v903_v36, 0.0  ;;  %v818_v25 = vrot.slane %v817_v14, 1  ;;  %v933_v12 = vsel %vm160_vm1, %v905_v62, 0.0 }
  0xcb   :  { %v746_v21 = vrot.slane %v745_v8, 1  ;;  %v748_v22 = vpack.c.bf16 %v740_v13, %v740_v13  ;;  %v919_v23 = vadd.f32 %v918_v18, %v917_v16  ;;  %v820_v32 = vpack.c.bf16 %v812_v17, %v812_v17  ;;  %v12018_v16 = vld [vmem:[#allocation6] sm:$0xff]  }
  0xcc   :  { %v934_v31 = vsel %vm160_vm1, %v907_v63, 0.0  ;;  %v936_v33 = vsel %vm160_vm1, %v909_v2, 0.0  ;;  %v819_v37 = vadd.f32 %v818_v25, %v817_v14  ;;  %v938_v43 = vsel %vm160_vm1, %v911_v6, 0.0 }
  0xcd   :  { %v747_v34 = vadd.f32 %v746_v21, %v745_v8  ;;  %v752_v35 = vunpack.c.l.b16 %v748_v22  ;;  %v921_v38 = vadd.f32 %v920_v1, %v919_v23  ;;  %v824_v41 = vunpack.c.l.b16 %v820_v32 }
  0xce   :  { %v935_v42 = vadd.f32 %v934_v31, %v933_v12  ;;  %v940_v45 = vsel %vm160_vm1, %v913_v9, 0.0  ;;  %v821_v48 = vpack.c.bf16 %v819_v37, %v819_v37  ;;  %v896_v27 = vunpack.c.l.bf16 %v876_v20 }
  0xcf   :  { %v749_v47 = vpack.c.bf16 %v747_v34, %v747_v34  ;;  %v11996_v49 = vadd.f32 %v922_v19, %v921_v38  ;;  %v898_v28 = vunpack.c.l.bf16 %v878_v26  ;;  %v900_v53 = vunpack.c.l.bf16 %v880_v29 }
  0xd0   :  { %v937_v50 = vadd.f32 %v936_v33, %v935_v42  ;;  %v902_v54 = vunpack.c.l.bf16 %v11985_v30  ;;  %v825_v56 = vunpack.c.l.b16 %v821_v48  ;;  %v904_v59 = vunpack.c.l.bf16 %v11990_v39  ;;  %v12037_v48 = vld [vmem:[#allocation3 + $0x48] ss:$8 sps:$4 sm:$0xff]  }
  0xd1   :  { %v753_v55 = vunpack.c.l.b16 %v749_v47  ;;  %v951_v57 = vsel %vm198_vm3, %v11996_v49, 0.0  ;;  %v1021_v58 = vrot.slane %v11996_v49, 3  ;;  %v906_v44 = vunpack.c.l.bf16 %v11992_v40 }
  0xd2   :  { %v939_v36 = vadd.f32 %v938_v43, %v937_v50  ;;  %v952_v24 = vrot.slane %v951_v57, 4  ;;  %v826_v61 = vsel %vm225_vm5, %v825_v56, %v824_v41  ;;  %v908_v63 = vunpack.c.l.bf16 %v888_v46 }
  0xd3   :  { %v754_v60 = vsel %vm225_vm5, %v753_v55, %v752_v35  ;;  %v1025_v62 = vsel %vm198_vm3, %v1021_v58, 0.0  ;;  %v827_v3 = vpack.c.b16 %v826_v61, %v826_v61  ;;  %v910_v7 = vunpack.c.l.bf16 %v890_v51  ;;  %v12041_v55 = vld [vmem:[#allocation3 + $0x58] ss:$8 sps:$4 sm:$0xff]  }
  0xd4   :  { %v755_v2 = vpack.c.b16 %v754_v60, %v754_v60  ;;  %v12009_v4 = vadd.f32 %v940_v45, %v939_v36  ;;  %v953_v5 = vadd.f32 %v952_v24, %v951_v57  ;;  %v1026_v6 = vrot.slane %v1025_v62, 4 }
  0xd5   :  { %v912_v9 = vunpack.c.l.bf16 %v892_v52  ;;  %v914_v10 = vunpack.c.l.bf16 %v11998_v15  ;;  %11225 = vmatmul.mubr.msk.bf16.vlgmr.msra.gmra.mrb[12].mxu1 %vm160_vm1, %v827_v3  ;;  %v924_v14 = vsel %vm170_vm2, %v896_v27, 0.0  ;;  %v925_v1 = vsel %vm170_vm2, %v898_v28, 0.0 }
  0xd6   :  { %11219 = vmatmul.mubr.msk.bf16.vlgmr.msra.gmra.mrb[12].mxu0 %vm160_vm1, %v755_v2  ;;  %v954_v11 = vrot.slane %v953_v5, 2  ;;  %v958_v13 = vsel %vm198_vm3, %v12009_v4, 0.0  ;;  %v1022_v8 = vrot.slane %v12009_v4, 3  ;;  %11235 = vmatpush3.bf16.msra.mxu1 %v12018_v16  ;;  %v1027_v18 = vadd.f32 %v1026_v6, %v1025_v62 }
  0xd7   :  { %11229 = vmatpush3.bf16.msra.mxu0 %v12018_v16  ;;  %v959_v17 = vrot.slane %v958_v13, 4  ;;  %v927_v19 = vsel %vm170_vm2, %v900_v53, 0.0  ;;  %11230 = vmatprep.mubr.msk.bf16.mxu0 %vm11681_vm0, %v11680_v0  ;;  %v926_v22 = vadd.f32 %v925_v1, %v924_v14  ;;  %v929_v25 = vsel %vm170_vm2, %v902_v54, 0.0 }
  0xd8   :  { %11236 = vmatprep.mubr.msk.bf16.mxu1 %vm11681_vm0, %v11680_v0  ;;  %v955_v20 = vadd.f32 %v954_v11, %v953_v5  ;;  %v1032_v21 = vsel %vm198_vm3, %v1022_v8, 0.0  ;;  %v1028_v26 = vrot.slane %v1027_v18, 2  ;;  %11240 = vmatprep.subr.bf16.mxu0 %v11680_v0  ;;  %v931_v30 = vsel %vm170_vm2, %v904_v59, 0.0 }
  0xd9   :  { %v960_v23 = vadd.f32 %v959_v17, %v958_v13  ;;  %v1033_v29 = vrot.slane %v1032_v21, 4  ;;  %11246 = vmatprep.subr.bf16.mxu1 %v11680_v0  ;;  %v928_v12 = vadd.f32 %v927_v19, %v926_v22  ;;  %v942_v31 = vsel %vm170_vm2, %v906_v44, 0.0 }
  0xda   :  { %v956_v32 = vrot.slane %v955_v20, 1  ;;  %v943_v33 = vsel %vm170_vm2, %v908_v63, 0.0  ;;  %v1029_v35 = vadd.f32 %v1028_v26, %v1027_v18  ;;  %v945_v41 = vsel %vm170_vm2, %v910_v7, 0.0  ;;  %v1256_v18 = vld [vmem:[#allocation3 + $0xc0] ss:$8 sps:$4 sm:$0xff]  }
  0xdb   :  { %v961_v34 = vrot.slane %v960_v23, 2  ;;  %v1034_v37 = vadd.f32 %v1033_v29, %v1032_v21  ;;  %v944_v38 = vadd.f32 %v943_v33, %v942_v31  ;;  %v930_v40 = vadd.f32 %v929_v25, %v928_v12  ;;  %v12053_v21 = vld [vmem:[#allocation3 + $0xd0] ss:$8 sps:$4 sm:$0xff]  }
  0xdc   :  { %v957_v39 = vadd.f32 %v956_v32, %v955_v20  ;;  %v947_v42 = vsel %vm170_vm2, %v912_v9, 0.0  ;;  %v1030_v45 = vrot.slane %v1029_v35, 1  ;;  %v949_v51 = vsel %vm170_vm2, %v914_v10, 0.0  ;;  %v1252_v10 = vld [vmem:[#allocation3 + $0x68] ss:$80 sps:$4 sm:$0xff]  }
  0xdd   :  { %v962_v43 = vadd.f32 %v961_v34, %v960_v23  ;;  %v1035_v46 = vrot.slane %v1034_v37, 2  ;;  %v946_v47 = vadd.f32 %v945_v41, %v944_v38  ;;  %v932_v50 = vadd.f32 %v931_v30, %v930_v40 }
  0xde   :  { %v965_v27 = vpack.c.bf16 %v957_v39, %v957_v39  ;;  %v1095_v52 = vrot.slane %v11996_v49, 6  ;;  %v1031_v28 = vadd.f32 %v1030_v45, %v1029_v35  ;;  %v1098_v58 = vrot.slane %v12009_v4, 6 }
  0xdf   :  { %v963_v15 = vrot.slane %v962_v43, 1  ;;  %v1036_v53 = vadd.f32 %v1035_v46, %v1034_v37  ;;  %v948_v54 = vadd.f32 %v947_v42, %v946_v47  ;;  %v1096_v57 = vrot.slane %v932_v50, 6 }
  0xe0   :  { %v969_v56 = vunpack.c.l.b16 %v965_v27  ;;  %v1171_v36 = vrot.slane %v932_v50, 1  ;;  %v1039_v44 = vpack.c.bf16 %v1031_v28, %v1031_v28  ;;  %v1264_v49 = vunpack.c.l.bf16 %v12037_v48 }
  0xe1   :  { %v964_v24 = vadd.f32 %v963_v15, %v962_v43  ;;  %v1037_v59 = vrot.slane %v1036_v53, 1  ;;  %v950_v60 = vadd.f32 %v949_v51, %v948_v54  ;;  %v1097_v61 = vsel %vm356_vm4, %v1095_v52, %v1096_v57 }
  0xe2   :  { %v1175_v62 = vsel %vm198_vm3, %v1171_v36, 0.0  ;;  %v1266_v63 = vunpack.c.h.bf16 %v12037_v48  ;;  %v1043_v5 = vunpack.c.l.b16 %v1039_v44  ;;  %v1103_v7 = vsel %vm198_vm3, %v1097_v61, 0.0 }
  0xe3   :  { %v966_v2 = vpack.c.bf16 %v964_v24, %v964_v24  ;;  %v1038_v3 = vadd.f32 %v1037_v59, %v1036_v53  ;;  %v1099_v6 = vrot.slane %v950_v60, 6  ;;  %v1172_v4 = vrot.slane %v950_v60, 1 }
  0xe4   :  { %v1176_v9 = vrot.slane %v1175_v62, 4  ;;  %v1268_v11 = vunpack.c.l.bf16 %v12041_v55  ;;  %v1104_v17 = vrot.slane %v1103_v7, 4  ;;  %v1270_v22 = vunpack.c.h.bf16 %v12041_v55 }
  0xe5   :  { %v970_v13 = vunpack.c.l.b16 %v966_v2  ;;  %v1040_v8 = vpack.c.bf16 %v1038_v3, %v1038_v3  ;;  %v1100_v14 = vsel %vm356_vm4, %v1098_v58, %v1099_v6  ;;  %v1182_v20 = vsel %vm198_vm3, %v1172_v4, 0.0  ;;  %v1245_v3 = vld [vmem:[#allocation3 + $0x4c] sm:$0x7] }
  0xe6   :  { %v1110_v1 = vsel %vm198_vm3, %v1100_v14, 0.0  ;;  %v1177_v19 = vadd.f32 %v1176_v9, %v1175_v62  ;;  %v1105_v26 = vadd.f32 %v1104_v17, %v1103_v7  ;;  %v1183_v12 = vrot.slane %v1182_v20, 4 }
  0xe7   :  { %v971_v25 = vsel %vm225_vm5, %v970_v13, %v969_v56  ;;  %v1044_v23 = vunpack.c.l.b16 %v1040_v8  ;;  %v1111_v29 = vrot.slane %v1110_v1, 4  ;;  %v1272_v31 = vunpack.c.l.bf16 %v1252_v10 }
  0xe8   :  { %v972_v30 = vpack.c.b16 %v971_v25, %v971_v25  ;;  %v1178_v32 = vrot.slane %v1177_v19, 2  ;;  %v1106_v34 = vrot.slane %v1105_v26, 2  ;;  %v1274_v37 = vunpack.c.h.bf16 %v1252_v10  ;;  %v1249_v10 = vld [vmem:[#allocation3 + $0x5c] sm:$0x7] }
  0xe9   :  { %v1045_v33 = vsel %vm225_vm5, %v1044_v23, %v1043_v5  ;;  %v1112_v35 = vadd.f32 %v1111_v29, %v1110_v1  ;;  %v1184_v40 = vadd.f32 %v1183_v12, %v1182_v20  ;;  %v1276_v41 = vunpack.c.l.bf16 %v1256_v18  ;;  %v1247_v5 = vld [vmem:[#allocation3 + $0x54] sm:$0x7]  ;;  %v1255_v20 = vld [vmem:[#allocation3 + $0xbc] sm:$0x7] }
  0xea   :  { %11231 = vmatmul.mubr.msk.bf16.vlgmr.msra.gmra.mrb[16].mxu0 %vm160_vm1, %v972_v30  ;;  %v1046_v38 = vpack.c.b16 %v1045_v33, %v1045_v33  ;;  %v1179_v39 = vadd.f32 %v1178_v32, %v1177_v19  ;;  %v1107_v42 = vadd.f32 %v1106_v34, %v1105_v26  ;;  %v1278_v45 = vunpack.c.h.bf16 %v1256_v18  ;;  %v1253_v18 = vld [vmem:[#allocation3 + $0x6c] sm:$0x7]  ;;  %v1257_v26 = vld [vmem:[#allocation3 + $0xc4] sm:$0x7] }
  0xeb   :  { %11241 = vmatpush3.bf16.msra.mxu0 %v12018_v16  ;;  %11242 = vmatprep.mubr.msk.bf16.mxu0 %vm11681_vm0, %v11680_v0  ;;  %v1113_v43 = vrot.slane %v1112_v35, 2  ;;  %v1280_v46 = vunpack.c.l.bf16 %v12053_v21  ;;  %v1185_v48 = vrot.slane %v1184_v40, 2  ;;  %v1282_v27 = vunpack.c.h.bf16 %v12053_v21 }
  0xec   :  { %11237 = vmatmul.mubr.msk.bf16.vlgmr.msra.gmra.mrb[16].mxu1 %vm160_vm1, %v1046_v38  ;;  %v1180_v47 = vrot.slane %v1179_v39, 1  ;;  %11252 = vmatprep.subr.bf16.mxu0 %v11680_v0  ;;  %v1284_v50 = vsel %vm160_vm1, %v1264_v49, 0.0  ;;  %v1108_v51 = vrot.slane %v1107_v42, 1  ;;  %v1285_v15 = vsel %vm160_vm1, %v1266_v63, 0.0  ;;  %v1259_v38 = vld [vmem:[#allocation3 + $0xcc] sm:$0x7] }
  0xed   :  { %11247 = vmatpush3.bf16.msra.mxu1 %v12018_v16  ;;  %11248 = vmatprep.mubr.msk.bf16.mxu1 %vm11681_vm0, %v11680_v0  ;;  %v1114_v52 = vadd.f32 %v1113_v43, %v1112_v35  ;;  %v1287_v28 = vsel %vm160_vm1, %v1268_v11, 0.0  ;;  %v1186_v54 = vadd.f32 %v1185_v48, %v1184_v40  ;;  %v1286_v55 = vadd.f32 %v1285_v15, %v1284_v50  ;;  %v1251_v11 = vld [vmem:[#allocation3 + $0x64] sm:$0x7] }
  0xee   :  { %v1181_v53 = vadd.f32 %v1180_v47, %v1179_v39  ;;  %11258 = vmatprep.subr.bf16.mxu1 %v11680_v0  ;;  %v1289_v56 = vsel %vm160_vm1, %v1270_v22, 0.0  ;;  %v1109_v57 = vadd.f32 %v1108_v51, %v1107_v42  ;;  %v1291_v36 = vsel %vm160_vm1, %v1272_v31, 0.0  ;;  %v1261_v39 = vld [vmem:[#allocation3 + $0xd4] sm:$0x7] }
  0xef   :  { %v1115_v58 = vrot.slane %v1114_v52, 1  ;;  %v1302_v24 = vsel %vm160_vm1, %v1274_v37, 0.0  ;;  %v1187_v59 = vrot.slane %v1186_v54, 1  ;;  %v1288_v60 = vadd.f32 %v1287_v28, %v1286_v55 }
  0xf0   :  { %v1189_v44 = vpack.c.bf16 %v1181_v53, %v1181_v53  ;;  %v1303_v61 = vsel %vm160_vm1, %v1276_v41, 0.0  ;;  %v1117_v49 = vpack.c.bf16 %v1109_v57, %v1109_v57  ;;  %v1305_v2 = vsel %vm160_vm1, %v1278_v45, 0.0  ;;  %v1263_v45 = vld [vmem:[#allocation3 + $0xdc] sm:$0x7] }
  0xf1   :  { %v1116_v62 = vadd.f32 %v1115_v58, %v1114_v52  ;;  %v1304_v63 = vadd.f32 %v1303_v61, %v1302_v24  ;;  %v1188_v6 = vadd.f32 %v1187_v59, %v1186_v54  ;;  %v1290_v4 = vadd.f32 %v1289_v56, %v1288_v60 }
  0xf2   :  { %v1193_v7 = vunpack.c.l.b16 %v1189_v44  ;;  %v1307_v9 = vsel %vm160_vm1, %v1280_v46, 0.0  ;;  %v1121_v8 = vunpack.c.l.b16 %v1117_v49  ;;  %v1309_v17 = vsel %vm160_vm1, %v1282_v27, 0.0 }
  0xf3   :  { %v1118_v13 = vpack.c.bf16 %v1116_v62, %v1116_v62  ;;  %v1306_v14 = vadd.f32 %v1305_v2, %v1304_v63  ;;  %v1190_v1 = vpack.c.bf16 %v1188_v6, %v1188_v6  ;;  %v12080_v19 = vadd.f32 %v1291_v36, %v1290_v4 }
  0xf4   :  { %v1265_v21 = vunpack.c.l.bf16 %v1245_v3  ;;  %v1267_v22 = vunpack.c.l.bf16 %v1247_v5  ;;  %v1269_v29 = vunpack.c.l.bf16 %v1249_v10  ;;  %v1271_v30 = vunpack.c.l.bf16 %v1251_v11 }
  0xf5   :  { %v1122_v25 = vunpack.c.l.b16 %v1118_v13  ;;  %v1308_v23 = vadd.f32 %v1307_v9, %v1306_v14  ;;  %v1194_v32 = vunpack.c.l.b16 %v1190_v1  ;;  %v1320_v12 = vsel %vm198_vm3, %v12080_v19, 0.0 }
  0xf6   :  { %v1390_v31 = vrot.slane %v12080_v19, 3  ;;  %v1273_v33 = vunpack.c.l.bf16 %v1253_v18  ;;  %v1321_v37 = vrot.slane %v1320_v12, 4  ;;  %v1275_v40 = vunpack.c.l.bf16 %v1255_v20 }
  0xf7   :  { %v1123_v34 = vsel %vm225_vm5, %v1122_v25, %v1121_v8  ;;  %v12086_v35 = vadd.f32 %v1309_v17, %v1308_v23  ;;  %v1195_v42 = vsel %vm225_vm5, %v1194_v32, %v1193_v7  ;;  %v1277_v46 = vunpack.c.l.bf16 %v1257_v26 }
  0xf8   :  { %v1124_v41 = vpack.c.b16 %v1123_v34, %v1123_v34  ;;  %v1394_v43 = vsel %vm198_vm3, %v1390_v31, 0.0  ;;  %v1196_v47 = vpack.c.b16 %v1195_v42, %v1195_v42  ;;  %v1322_v48 = vadd.f32 %v1321_v37, %v1320_v12  ;;  %v12116_v42 = vld [vmem:[#allocation9] sm:$0xff] }
  0xf9   :  { %v1327_v27 = vsel %vm198_vm3, %v12086_v35, 0.0  ;;  %v1391_v50 = vrot.slane %v12086_v35, 3  ;;  %v1395_v52 = vrot.slane %v1394_v43, 4  ;;  %v1279_v15 = vunpack.c.l.bf16 %v1259_v38 }
  0xfa   :  { %11243 = vmatmul.mubr.msk.bf16.vlgmr.msra.gmra.mrb[20].mxu0 %vm160_vm1, %v1124_v41  ;;  %v1328_v51 = vrot.slane %v1327_v27, 4  ;;  %v1281_v28 = vunpack.c.l.bf16 %v1261_v39  ;;  %11249 = vmatmul.mubr.msk.bf16.vlgmr.msra.gmra.mrb[20].mxu1 %vm160_vm1, %v1196_v47  ;;  %v1323_v53 = vrot.slane %v1322_v48, 2  ;;  %v1283_v55 = vunpack.c.l.bf16 %v1263_v45 }
  0xfb   :  { %11253 = vmatpush3.bf16.msra.mxu0 %v12018_v16  ;;  %v1401_v54 = vsel %vm198_vm3, %v1391_v50, 0.0  ;;  %v1293_v56 = vsel %vm170_vm2, %v1265_v21, 0.0  ;;  %11259 = vmatpush3.bf16.msra.mxu1 %v12018_v16  ;;  %v1396_v58 = vadd.f32 %v1395_v52, %v1394_v43  ;;  %v1294_v24 = vsel %vm170_vm2, %v1267_v22, 0.0  ;;  %v12118_v43 = vld [vmem:[#allocation9 + $0x20] sm:$0xff] }
  0xfc   :  { %11254 = vmatprep.mubr.msk.bf16.mxu0 %vm11681_vm0, %v11680_v0  ;;  %v1329_v57 = vadd.f32 %v1328_v51, %v1327_v27  ;;  %v1402_v36 = vrot.slane %v1401_v54, 4  ;;  %11260 = vmatprep.mubr.msk.bf16.mxu1 %vm11681_vm0, %v11680_v0  ;;  %v1324_v59 = vadd.f32 %v1323_v53, %v1322_v48  ;;  %v1295_v44 = vadd.f32 %v1294_v24, %v1293_v56  ;;  %v12129_v56 = vld [vmem:[#allocation9 + $0x28] sm:$0xff] }
  0xfd   :  { %11264 = vmatprep.subr.bf16.mxu0 %v11680_v0  ;;  %v1296_v60 = vsel %vm170_vm2, %v1269_v29, 0.0  ;;  %v1298_v61 = vsel %vm170_vm2, %v1271_v30, 0.0  ;;  %v1397_v49 = vrot.slane %v1396_v58, 2  ;;  %11270 = vmatprep.subr.bf16.mxu1 %v11680_v0  ;;  %v1300_v2 = vsel %vm170_vm2, %v1273_v33, 0.0 }
  0xfe   :  { %v1330_v62 = vrot.slane %v1329_v57, 2  ;;  %v1403_v63 = vadd.f32 %v1402_v36, %v1401_v54  ;;  %v1325_v3 = vrot.slane %v1324_v59, 1  ;;  %v1297_v5 = vadd.f32 %v1296_v60, %v1295_v44 }
  0xff   :  { %v1311_v6 = vsel %vm170_vm2, %v1275_v40, 0.0  ;;  %v1312_v7 = vsel %vm170_vm2, %v1277_v46, 0.0  ;;  %v1398_v9 = vadd.f32 %v1397_v49, %v1396_v58  ;;  %v1314_v14 = vsel %vm170_vm2, %v1279_v15, 0.0 }
 0x100   :  { %v1331_v4 = vadd.f32 %v1330_v62, %v1329_v57  ;;  %v1404_v10 = vrot.slane %v1403_v63, 2  ;;  %v1313_v11 = vadd.f32 %v1312_v7, %v1311_v6  ;;  %v1326_v13 = vadd.f32 %v1325_v3, %v1324_v59 }
 0x101   :  { %v1299_v8 = vadd.f32 %v1298_v61, %v1297_v5  ;;  %v1316_v17 = vsel %vm170_vm2, %v1281_v28, 0.0  ;;  %v1399_v1 = vrot.slane %v1398_v9, 1  ;;  %v1318_v23 = vsel %vm170_vm2, %v1283_v55, 0.0  ;;  %v12127_v55 = vld [vmem:[#allocation9 + $0x8] sm:$0xff] }
 0x102   :  { %v1332_v18 = vrot.slane %v1331_v4, 1  ;;  %v1405_v20 = vadd.f32 %v1404_v10, %v1403_v63  ;;  %v1315_v21 = vadd.f32 %v1314_v14, %v1313_v11  ;;  %v1334_v22 = vpack.c.bf16 %v1326_v13, %v1326_v13 }
 0x103   :  { %v1301_v25 = vadd.f32 %v1300_v2, %v1299_v8  ;;  %v1464_v26 = vrot.slane %v12080_v19, 6  ;;  %v1400_v30 = vadd.f32 %v1399_v1, %v1398_v9  ;;  %v1467_v34 = vrot.slane %v12086_v35, 6 }
 0x104   :  { %v1333_v29 = vadd.f32 %v1332_v18, %v1331_v4  ;;  %v1406_v32 = vrot.slane %v1405_v20, 1  ;;  %v1317_v12 = vadd.f32 %v1316_v17, %v1315_v21  ;;  %v1338_v31 = vunpack.c.l.b16 %v1334_v22 }
 0x105   :  { %v1465_v33 = vrot.slane %v1301_v25, 6  ;;  %v1540_v37 = vrot.slane %v1301_v25, 1  ;;  %v1408_v40 = vpack.c.bf16 %v1400_v30, %v1400_v30  ;;  %v9972_v52 = vcombine.high %v12116_v42, %v12118_v43 }
 0x106   :  { %v1335_v38 = vpack.c.bf16 %v1333_v29, %v1333_v29  ;;  %v1407_v39 = vadd.f32 %v1406_v32, %v1405_v20  ;;  %v1319_v41 = vadd.f32 %v1318_v23, %v1317_v12  ;;  %v9974_v63 = vcombine.high %v12127_v55, %v12129_v56  ;;  %v1622_v29 = vld [vmem:[#allocation9 + $0x40] sm:$0xff] }
 0x107   :  { %v1466_v45 = vsel %vm356_vm4, %v1464_v26, %v1465_v33  ;;  %v1544_v19 = vsel %vm198_vm3, %v1540_v37, 0.0  ;;  %v1412_v48 = vunpack.c.l.b16 %v1408_v40  ;;  %v1626_v12 = vld [vmem:[#allocation9 + $0x60] sm:$0xff]  ;;  %v1627_v33 = vld [vmem:[#allocation9 + $0x68] sm:$0xff] }
 0x108   :  { %v1339_v46 = vunpack.c.l.b16 %v1335_v38  ;;  %v1409_v47 = vpack.c.bf16 %v1407_v39, %v1407_v39  ;;  %v1468_v27 = vrot.slane %v1319_v41, 6  ;;  %v1472_v50 = vsel %vm198_vm3, %v1466_v45, 0.0 }
 0x109   :  { %v1541_v35 = vrot.slane %v1319_v41, 1  ;;  %v1545_v51 = vrot.slane %v1544_v19, 4  ;;  %v1473_v54 = vrot.slane %v1472_v50, 4  ;;  %v9971_v38 = vcombine.low %v12116_v42, %v12118_v43 }
 0x10a   :  { %v1340_v15 = vsel %vm225_vm5, %v1339_v46, %v1338_v31  ;;  %v1413_v28 = vunpack.c.l.b16 %v1409_v47  ;;  %v1469_v53 = vsel %vm356_vm4, %v1467_v34, %v1468_v27  ;;  %v1623_v31 = vld [vmem:[#allocation9 + $0x48] sm:$0xff]  ;;  %v9973_v39 = vcombine.low %v12127_v55, %v12129_v56  ;;  %v1630_v46 = vld [vmem:[#allocation9 + $0x80] sm:$0xff] }
 0x10b   :  { %v1341_v57 = vpack.c.b16 %v1340_v15, %v1340_v15  ;;  %v1479_v58 = vsel %vm198_vm3, %v1469_v53, 0.0  ;;  %v1546_v36 = vadd.f32 %v1545_v51, %v1544_v19  ;;  %v1551_v24 = vsel %vm198_vm3, %v1541_v35, 0.0  ;;  %v1634_v47 = vld [vmem:[#allocation9 + $0xa0] sm:$0xff]  ;;  %v1635_v27 = vld [vmem:[#allocation9 + $0xa8] sm:$0xff] }
 0x10c   :  { %v1414_v59 = vsel %vm225_vm5, %v1413_v28, %v1412_v48  ;;  %v1474_v44 = vadd.f32 %v1473_v54, %v1472_v50  ;;  %v1480_v60 = vrot.slane %v1479_v58, 4  ;;  %v1552_v61 = vrot.slane %v1551_v24, 4  ;;  %v1631_v48 = vld [vmem:[#allocation9 + $0x88] sm:$0xff]  ;;  %v1638_v51 = vld [vmem:[#allocation9 + $0xc0] sm:$0xff] }
 0x10d   :  { %11255 = vmatmul.mubr.msk.bf16.vlgmr.msra.gmra.mrb[24].mxu0 %vm160_vm1, %v1341_v57  ;;  %v1415_v62 = vpack.c.b16 %v1414_v59, %v1414_v59  ;;  %v1547_v49 = vrot.slane %v1546_v36, 2  ;;  %v9980_v45 = vcombine.high %v1622_v29, %v1626_v12  ;;  %v9982_v19 = vcombine.high %v1623_v31, %v1627_v33  ;;  %v1639_v15 = vld [vmem:[#allocation9 + $0xc8] sm:$0xff]  ;;  %v1646_v57 = vld [vmem:[#allocation9 + $0x100] sm:$0xff] }
 0x10e   :  { %11265 = vmatpush3.bf16.msra.mxu0 %v12018_v16  ;;  %11266 = vmatprep.mubr.msk.bf16.mxu0 %vm11681_vm0, %v11680_v0  ;;  %v1475_v2 = vrot.slane %v1474_v44, 2  ;;  %v1481_v3 = vadd.f32 %v1480_v60, %v1479_v58  ;;  %v1553_v5 = vadd.f32 %v1552_v61, %v1551_v24  ;;  %v9979_v50 = vcombine.low %v1622_v29, %v1626_v12  ;;  %v1643_v28 = vld [vmem:[#allocation9 + $0xe8] sm:$0xff]  ;;  %v1650_v58 = vld [vmem:[#allocation9 + $0x120] sm:$0xff] }
 0x10f   :  { %11261 = vmatmul.mubr.msk.bf16.vlgmr.msra.gmra.mrb[24].mxu1 %vm160_vm1, %v1415_v62  ;;  %v1548_v6 = vadd.f32 %v1547_v49, %v1546_v36  ;;  %7916 = vmatprep.subr.bf16.mxu0 %v9972_v52  ;;  %v9981_v35 = vcombine.low %v1623_v31, %v1627_v33  ;;  %v9988_v42 = vcombine.high %v1630_v46, %v1634_v47  ;;  %v1642_v52 = vld [vmem:[#allocation9 + $0xe0] sm:$0xff]  ;;  %v1647_v36 = vld [vmem:[#allocation9 + $0x108] sm:$0xff] }
 0x110   :  { %11271 = vmatpush3.bf16.msra.mxu1 %v12018_v16  ;;  %11272 = vmatprep.mubr.msk.bf16.mxu1 %vm11681_vm0, %v11680_v0  ;;  %v1476_v7 = vadd.f32 %v1475_v2, %v1474_v44  ;;  %v1482_v4 = vrot.slane %v1481_v3, 2  ;;  %v1554_v9 = vrot.slane %v1553_v5, 2  ;;  %v9990_v43 = vcombine.high %v1631_v48, %v1635_v27  ;;  %v1651_v24 = vld [vmem:[#allocation9 + $0x128] sm:$0xff]  ;;  %v1654_v62 = vld [vmem:[#allocation9 + $0x140] sm:$0xff] }
 0x111   :  { %v1549_v10 = vrot.slane %v1548_v6, 1  ;;  %8244 = vmatprep.subr.bf16.mxu1 %v9974_v63  ;;  %v9987_v53 = vcombine.low %v1630_v46, %v1634_v47  ;;  %v9989_v54 = vcombine.low %v1631_v48, %v1635_v27  ;;  %v9996_v55 = vcombine.high %v1638_v51, %v1642_v52  ;;  %v1658_v49 = vld [vmem:[#allocation9 + $0x160] sm:$0xff]  ;;  %v1655_v63 = vld [vmem:[#allocation9 + $0x148] sm:$0xff] }
 0x112   :  { %v1477_v11 = vrot.slane %v1476_v7, 1  ;;  %v1483_v13 = vadd.f32 %v1482_v4, %v1481_v3  ;;  %v1555_v8 = vadd.f32 %v1554_v9, %v1553_v5  ;;  %v9998_v56 = vcombine.high %v1639_v15, %v1643_v28  ;;  %v1659_v2 = vld [vmem:[#allocation9 + $0x168] sm:$0xff]  ;;  %v1662_v4 = vld [vmem:[#allocation9 + $0x180] sm:$0xff] }
 0x113   :  { %v1550_v14 = vadd.f32 %v1549_v10, %v1548_v6  ;;  %v9995_v59 = vcombine.low %v1638_v51, %v1642_v52  ;;  %v9997_v44 = vcombine.low %v1639_v15, %v1643_v28  ;;  %v10004_v60 = vcombine.high %v1646_v57, %v1650_v58  ;;  %v1666_v9 = vld [vmem:[#allocation9 + $0x1a0] sm:$0xff]  ;;  %v1663_v10 = vld [vmem:[#allocation9 + $0x188] sm:$0xff] }
 0x114   :  { %v1478_v17 = vadd.f32 %v1477_v11, %v1476_v7  ;;  %v1484_v18 = vrot.slane %v1483_v13, 1  ;;  %v1556_v1 = vrot.slane %v1555_v8, 1  ;;  %v10006_v61 = vcombine.high %v1647_v36, %v1651_v24  ;;  %v1667_v11 = vld [vmem:[#allocation9 + $0x1a8] sm:$0xff]  ;;  %v12152_v48 = vld [vmem:[#allocation9 + $0x400] sm:$0xff] }
 0x115   :  { %v1558_v20 = vpack.c.bf16 %v1550_v14, %v1550_v14  ;;  %v10003_v3 = vcombine.low %v1646_v57, %v1650_v58  ;;  %v10005_v5 = vcombine.low %v1647_v36, %v1651_v24  ;;  %v10012_v6 = vcombine.high %v1654_v62, %v1658_v49  ;;  %v1679_v29 = vld [vmem:[#allocation9 + $0x208] sm:$0xff]  ;;  %v12154_v27 = vld [vmem:[#allocation9 + $0x420] sm:$0xff] }
 0x116   :  { %v1485_v21 = vadd.f32 %v1484_v18, %v1483_v13  ;;  %v1486_v22 = vpack.c.bf16 %v1478_v17, %v1478_v17  ;;  %v1557_v25 = vadd.f32 %v1556_v1, %v1555_v8  ;;  %v10014_v7 = vcombine.high %v1655_v63, %v1659_v2  ;;  %v1670_v18 = vld [vmem:[#allocation9 + $0x1c0] sm:$0xff]  ;;  %v12160_v51 = vld [vmem:[#allocation9 + $0x428] sm:$0xff] }
 0x117   :  { %v1562_v0 = vunpack.c.l.b16 %v1558_v20  ;;  %v10011_v13 = vcombine.low %v1654_v62, %v1658_v49  ;;  %v10013_v8 = vcombine.low %v1655_v63, %v1659_v2  ;;  %v10020_v14 = vcombine.high %v1662_v4, %v1666_v9  ;;  %v1674_v1 = vld [vmem:[#allocation9 + $0x1e0] sm:$0xff]  ;;  %v1671_v20 = vld [vmem:[#allocation9 + $0x1c8] sm:$0xff] }
 0x118   :  { %v1487_v16 = vpack.c.bf16 %v1485_v21, %v1485_v21  ;;  %v1490_v23 = vunpack.c.l.b16 %v1486_v22  ;;  %v1559_v26 = vpack.c.bf16 %v1557_v25, %v1557_v25  ;;  %v10022_v17 = vcombine.high %v1663_v10, %v1667_v11  ;;  %v1675_v21 = vld [vmem:[#allocation9 + $0x1e8] sm:$0xff] }
 0x119   :  { %v10019_v22 = vcombine.low %v1662_v4, %v1666_v9  ;;  %v10021_v25 = vcombine.low %v1663_v10, %v1667_v11  ;;  %v10029_v12 = vcombine.low %v1671_v20, %v1675_v21  ;;  %v1703_v57 = vld [vmem:[#allocation9 + $0x2c8] sm:$0xff] }
 0x11a   :  { %v1491_v30 = vunpack.c.l.b16 %v1487_v16  ;;  %v1563_v32 = vunpack.c.l.b16 %v1559_v26  ;;  %v10028_v16 = vcombine.high %v1670_v18, %v1674_v1  ;;  %v1678_v26 = vld [vmem:[#allocation9 + $0x200] sm:$0xff]  ;;  %v1707_v58 = vld [vmem:[#allocation9 + $0x2e8] sm:$0xff] }
 0x11b   :  { %v1711_v62 = vld [vmem:[#allocation9 + $0x308] sm:$0xff]  ;;  %v10061_v2 = vcombine.low %v1703_v57, %v1707_v58 }
 0x11c   :  { %v1492_v34 = vsel %vm225_vm5, %v1491_v30, %v1490_v23  ;;  %v1564_v37 = vsel %vm225_vm5, %v1563_v32, %v1562_v0  ;;  %v10030_v23 = vcombine.high %v1671_v20, %v1675_v21  ;;  %v1682_v0 = vld [vmem:[#allocation9 + $0x220] sm:$0xff]  ;;  %v1683_v30 = vld [vmem:[#allocation9 + $0x228] sm:$0xff]  ;;  %v10027_v32 = vcombine.low %v1670_v18, %v1674_v1 }
 0x11d   :  { %v1493_v40 = vpack.c.b16 %v1492_v34, %v1492_v34  ;;  %v1565_v41 = vpack.c.b16 %v1564_v37, %v1564_v37  ;;  %v10036_v31 = vcombine.high %v1678_v26, %v1682_v0  ;;  %v10038_v33 = vcombine.high %v1679_v29, %v1683_v30  ;;  %v1686_v34 = vld [vmem:[#allocation9 + $0x240] sm:$0xff]  ;;  %v1715_v49 = vld [vmem:[#allocation9 + $0x328] sm:$0xff] }
 0x11e   :  { %v1690_v37 = vld [vmem:[#allocation9 + $0x260] sm:$0xff]  ;;  %v1719_v4 = vld [vmem:[#allocation9 + $0x348] sm:$0xff]  ;;  %v10069_v11 = vcombine.low %v1711_v62, %v1715_v49 }
 0x11f   :  { %11267 = vmatmul.mubr.msk.bf16.vlgmr.msra.gmra.mrb[28].mxu0 %vm160_vm1, %v1493_v40  ;;  %11273 = vmatmul.mubr.msk.bf16.vlgmr.msra.gmra.mrb[28].mxu1 %vm160_vm1, %v1565_v41  ;;  %v10035_v40 = vcombine.low %v1678_v26, %v1682_v0  ;;  %v10037_v41 = vcombine.low %v1679_v29, %v1683_v30  ;;  %v10044_v46 = vcombine.high %v1686_v34, %v1690_v37  ;;  %v1723_v9 = vld [vmem:[#allocation9 + $0x368] sm:$0xff] }
 0x120   :  { %7917 = vmatpush1.bf16.msra.mxu0 %v9971_v38  ;;  %8245 = vmatpush1.bf16.msra.mxu1 %v9973_v39  ;;  %v1687_v38 = vld [vmem:[#allocation9 + $0x248] sm:$0xff]  ;;  %v10043_v15 = vcombine.low %v1686_v34, %v1690_v37  ;;  %v10077_v21 = vcombine.low %v1719_v4, %v1723_v9  ;;  %v10100_v34 = vcombine.high %v12152_v48, %v12154_v27 }
 0x121   :  { %7918 = vmatprep.subr.bf16.mxu0 %v9980_v45  ;;  %8246 = vmatprep.subr.bf16.mxu1 %v9982_v19  ;;  %v1691_v39 = vld [vmem:[#allocation9 + $0x268] sm:$0xff]  ;;  %v1694_v45 = vld [vmem:[#allocation9 + $0x280] sm:$0xff] }
 0x122   :  { %v1698_v19 = vld [vmem:[#allocation9 + $0x2a0] sm:$0xff]  ;;  %v10046_v47 = vcombine.high %v1687_v38, %v1691_v39  ;;  %v10045_v28 = vcombine.low %v1687_v38, %v1691_v39  ;;  %v1727_v18 = vld [vmem:[#allocation9 + $0x388] sm:$0xff]  ;;  %v12168_v38 = vld [vmem:[#allocation8] ss:$0 sm:$0xff] }
 0x123   :  { %v10051_v36 = vcombine.low %v1694_v45, %v1698_v19  ;;  %v1731_v1 = vld [vmem:[#allocation9 + $0x3a8] sm:$0xff] }
 0x124   :  { %7919 = vmatpush1.bf16.msra.mxu0 %v9979_v50  ;;  %8247 = vmatpush1.bf16.msra.mxu1 %v9981_v35  ;;  %v12156_v50 = vld [vmem:[#allocation9 + $0x408] sm:$0xff]  ;;  %v10085_v30 = vcombine.low %v1727_v18, %v1731_v1 }
 0x125   :  { %7920 = vmatprep.subr.bf16.mxu0 %v9988_v42  ;;  %8248 = vmatprep.subr.bf16.mxu1 %v9990_v43  ;;  %v1695_v35 = vld [vmem:[#allocation9 + $0x288] sm:$0xff]  ;;  %v10099_v43 = vcombine.low %v12152_v48, %v12154_v27  ;;  %v10101_v52 = vcombine.low %v12156_v50, %v12160_v51  ;;  %v10102_v37 = vcombine.high %v12156_v50, %v12160_v51  ;;  %v1770_v27 = vld [vmem:[#allocation9 + $0x4e0] sm:$0xff] }
 0x126   :  { %v1699_v42 = vld [vmem:[#allocation9 + $0x2a8] sm:$0xff] }
 0x127   :  { %v10053_v24 = vcombine.low %v1695_v35, %v1699_v42  ;;  %v1735_v26 = vld [vmem:[#allocation9 + $0x3c8] sm:$0xff] }
 0x128   :  { %7921 = vmatpush1.bf16.msra.mxu0 %v9987_v53  ;;  %8249 = vmatpush1.bf16.msra.mxu1 %v9989_v54  ;;  %v10052_v53 = vcombine.high %v1694_v45, %v1698_v19  ;;  %v10054_v54 = vcombine.high %v1695_v35, %v1699_v42  ;;  %v1739_v0 = vld [vmem:[#allocation9 + $0x3e8] sm:$0xff] }
 0x129   :  { %7922 = vmatprep.subr.bf16.mxu0 %v9996_v55  ;;  %8250 = vmatprep.subr.bf16.mxu1 %v9998_v56  ;;  %v1702_v55 = vld [vmem:[#allocation9 + $0x2c0] sm:$0xff]  ;;  %v1767_v50 = vld [vmem:[#allocation9 + $0x4c8] sm:$0xff] }
 0x12a   :  { %v1706_v56 = vld [vmem:[#allocation9 + $0x2e0] sm:$0xff] }
 0x12b   :  { %v10059_v63 = vcombine.low %v1702_v55, %v1706_v56 }
 0x12c   :  { %7923 = vmatpush1.bf16.msra.mxu0 %v9995_v59  ;;  %8251 = vmatpush1.bf16.msra.mxu1 %v9997_v44  ;;  %v10060_v59 = vcombine.high %v1702_v55, %v1706_v56  ;;  %v10062_v44 = vcombine.high %v1703_v57, %v1707_v58 }
 0x12d   :  { %7924 = vmatprep.subr.bf16.mxu0 %v10004_v60  ;;  %8252 = vmatprep.subr.bf16.mxu1 %v10006_v61  ;;  %v1710_v60 = vld [vmem:[#allocation9 + $0x300] sm:$0xff] }
 0x12e   :  { %v1714_v61 = vld [vmem:[#allocation9 + $0x320] sm:$0xff] }
 0x12f   :  { %v10067_v10 = vcombine.low %v1710_v60, %v1714_v61 }
 0x130   :  { %7925 = vmatpush1.bf16.msra.mxu0 %v10003_v3  ;;  %8253 = vmatpush1.bf16.msra.mxu1 %v10005_v5  ;;  %v10068_v3 = vcombine.high %v1710_v60, %v1714_v61  ;;  %v10070_v5 = vcombine.high %v1711_v62, %v1715_v49 }
 0x131   :  { %7926 = vmatprep.subr.bf16.mxu0 %v10012_v6  ;;  %8254 = vmatprep.subr.bf16.mxu1 %v10014_v7  ;;  %v1718_v6 = vld [vmem:[#allocation9 + $0x340] sm:$0xff] }
 0x132   :  { %v1722_v7 = vld [vmem:[#allocation9 + $0x360] sm:$0xff] }
 0x133   :  { %v10075_v20 = vcombine.low %v1718_v6, %v1722_v7 }
 0x134   :  { %7927 = vmatpush1.bf16.msra.mxu0 %v10011_v13  ;;  %8255 = vmatpush1.bf16.msra.mxu1 %v10013_v8  ;;  %v10076_v13 = vcombine.high %v1718_v6, %v1722_v7  ;;  %v10078_v8 = vcombine.high %v1719_v4, %v1723_v9 }
 0x135   :  { %7928 = vmatprep.subr.bf16.mxu0 %v10020_v14  ;;  %8256 = vmatprep.subr.bf16.mxu1 %v10022_v17  ;;  %v1726_v14 = vld [vmem:[#allocation9 + $0x380] sm:$0xff] }
 0x136   :  { %v1730_v17 = vld [vmem:[#allocation9 + $0x3a0] sm:$0xff] }
 0x137   :  { %v10083_v29 = vcombine.low %v1726_v14, %v1730_v17 }
 0x138   :  { %7929 = vmatpush1.bf16.msra.mxu0 %v10019_v22  ;;  %8257 = vmatpush1.bf16.msra.mxu1 %v10021_v25  ;;  %v10084_v22 = vcombine.high %v1726_v14, %v1730_v17  ;;  %v10086_v25 = vcombine.high %v1727_v18, %v1731_v1 }
 0x139   :  { %7930 = vmatprep.subr.bf16.mxu0 %v10028_v16  ;;  %8258 = vmatprep.subr.bf16.mxu1 %v10030_v23  ;;  %v1734_v16 = vld [vmem:[#allocation9 + $0x3c0] sm:$0xff] }
 0x13a   :  { %v1738_v23 = vld [vmem:[#allocation9 + $0x3e0] sm:$0xff] }
 0x13c   :  { %7931 = vmatpush1.bf16.msra.mxu0 %v10027_v32  ;;  %8259 = vmatpush1.bf16.msra.mxu1 %v10029_v12  ;;  %v10092_v32 = vcombine.high %v1734_v16, %v1738_v23  ;;  %v10094_v12 = vcombine.high %v1735_v26, %v1739_v0 }
 0x13d   :  { %7932 = vmatprep.subr.bf16.mxu0 %v10036_v31  ;;  %8260 = vmatprep.subr.bf16.mxu1 %v10038_v33  ;;  %v10091_v31 = vcombine.low %v1734_v16, %v1738_v23  ;;  %v10093_v33 = vcombine.low %v1735_v26, %v1739_v0 }
 0x140   :  { %7933 = vmatpush1.bf16.msra.mxu0 %v10035_v40  ;;  %8261 = vmatpush1.bf16.msra.mxu1 %v10037_v41 }
 0x141   :  { %7934 = vmatprep.subr.bf16.mxu0 %v10044_v46  ;;  %8262 = vmatprep.subr.bf16.mxu1 %v10046_v47 }
 0x144   :  { %7935 = vmatpush1.bf16.msra.mxu0 %v10043_v15  ;;  %8263 = vmatpush1.bf16.msra.mxu1 %v10045_v28 }
 0x145   :  { %7936 = vmatprep.subr.bf16.mxu0 %v10052_v53  ;;  %8264 = vmatprep.subr.bf16.mxu1 %v10054_v54 }
 0x148   :  { %7937 = vmatpush1.bf16.msra.mxu0 %v10051_v36  ;;  %8265 = vmatpush1.bf16.msra.mxu1 %v10053_v24 }
 0x149   :  { %7938 = vmatprep.subr.bf16.mxu0 %v10060_v59  ;;  %8266 = vmatprep.subr.bf16.mxu1 %v10062_v44 }
 0x14c   :  { %7939 = vmatpush1.bf16.msra.mxu0 %v10059_v63  ;;  %8267 = vmatpush1.bf16.msra.mxu1 %v10061_v2 }
 0x14d   :  { %7940 = vmatprep.subr.bf16.mxu0 %v10068_v3  ;;  %8268 = vmatprep.subr.bf16.mxu1 %v10070_v5 }
 0x150   :  { %7941 = vmatpush1.bf16.msra.mxu0 %v10067_v10  ;;  %8269 = vmatpush1.bf16.msra.mxu1 %v10069_v11 }
 0x151   :  { %7942 = vmatprep.subr.bf16.mxu0 %v10076_v13  ;;  %8270 = vmatprep.subr.bf16.mxu1 %v10078_v8 }
 0x154   :  { %7943 = vmatpush1.bf16.msra.mxu0 %v10075_v20  ;;  %8271 = vmatpush1.bf16.msra.mxu1 %v10077_v21 }
 0x155   :  { %7944 = vmatprep.subr.bf16.mxu0 %v10084_v22  ;;  %8272 = vmatprep.subr.bf16.mxu1 %v10086_v25 }
 0x158   :  { %7945 = vmatpush1.bf16.msra.mxu0 %v10083_v29  ;;  %8273 = vmatpush1.bf16.msra.mxu1 %v10085_v30 }
 0x159   :  { %7946 = vmatprep.subr.bf16.mxu0 %v10092_v32  ;;  %8274 = vmatprep.subr.bf16.mxu1 %v10094_v12 }
 0x15c   :  { %7947 = vmatpush1.bf16.msra.mxu0 %v10091_v31  ;;  %8275 = vmatpush1.bf16.msra.mxu1 %v10093_v33  ;;  %v2640_v33 = vlaneseq }
 0x15d   :  { %7957 = vmatprep.subr.bf16.mxu0 %v10100_v34  ;;  %8285 = vmatprep.subr.bf16.mxu1 %v10102_v37  ;;  %v11682_v34 = vmov 1966171168  }
 0x15e   :  { %v2684_v37 = vunpack.c.l.s4 %v11682_v34 }
 0x175   :  { %v271_v39 = vpop.f32.mrb[0].mxu0 }
 0x176   :  { %v272_v40 = vadd.f32 %v12168_v38, %v271_v39  ;;  %v11184_v41 = vpop.f32.mrb[1].mxu0 }
 0x177   :  { %v274_v45 = vpop.f32.mrb[2].mxu0  ;;  %v345_v19 = vpop.f32.mrb[0].mxu1  ;;  %v12178_v41 = vshrl.u32 %v2640_v33, 7 }
 0x178   :  { %v277_v46 = vmax.f32 %v272_v40, 0.0  ;;  %v346_v47 = vadd.f32 %v12168_v38, %v345_v19  ;;  %v11185_v35 = vpop.f32.mrb[3].mxu0  ;;  %v11190_v42 = vpop.f32.mrb[1].mxu1  ;;  %v2685_v45 = vunpack.c.0.s8 %v2684_v37 }
 0x179   :  { %v348_v15 = vpop.f32.mrb[2].mxu1  ;;  %v1750_v42 = vld [vmem:[#allocation9 + $0x440] sm:$0xff] }
 0x17a   :  { %v278_v28 = vpack.c.bf16 %v277_v46, %v277_v46  ;;  %v351_v53 = vmax.f32 %v346_v47, 0.0  ;;  %v11191_v54 = vpop.f32.mrb[3].mxu1  ;;  %v12181_v19 = vsub.s32 %v2685_v45, %v12178_v41  ;;  %v1754_v15 = vld [vmem:[#allocation9 + $0x460] sm:$0xff] }
 0x17b   :  { %v1794_v45 = vld [vmem:[#allocation9 + $0x5a0] sm:$0xff] }
 0x17c   :  { %279 = vst [vmem:[#allocation2] sm:$0x1] %v278_v28  ;;  %v352_v55 = vpack.c.bf16 %v351_v53, %v351_v53  ;;  %v1751_v28 = vld [vmem:[#allocation9 + $0x448] sm:$0xff] }
 0x17d   :  { %v1755_v53 = vld [vmem:[#allocation9 + $0x468] sm:$0xff] }
 0x17e   :  { %353 = vst [vmem:[#allocation2 + $0x1] sm:$0x1] %v352_v55 }
 0x183   :  { %v496_v56 = vpop.f32.mrb[4].mxu1 }
 0x184   :  { %v424_v57 = vpop.f32.mrb[4].mxu0  ;;  %v497_v58 = vadd.f32 %v12168_v38, %v496_v56  ;;  %v11202_v36 = vpop.f32.mrb[5].mxu1  ;;  %v10108_v56 = vcombine.high %v1750_v42, %v1754_v15 }
 0x185   :  { %v425_v24 = vadd.f32 %v12168_v38, %v424_v57  ;;  %v11196_v59 = vpop.f32.mrb[5].mxu0  ;;  %v499_v44 = vpop.f32.mrb[6].mxu1  ;;  %v1758_v57 = vld [vmem:[#allocation9 + $0x480] sm:$0xff] }
 0x186   :  { %v427_v60 = vpop.f32.mrb[6].mxu0  ;;  %v502_v61 = vmax.f32 %v497_v58, 0.0  ;;  %v11203_v62 = vpop.f32.mrb[7].mxu1  ;;  %v1762_v59 = vld [vmem:[#allocation9 + $0x4a0] sm:$0xff]  ;;  %v1759_v44 = vld [vmem:[#allocation9 + $0x488] sm:$0xff] }
 0x187   :  { %v430_v49 = vmax.f32 %v425_v24, 0.0  ;;  %v11197_v63 = vpop.f32.mrb[7].mxu0  ;;  %v10110_v24 = vcombine.high %v1751_v28, %v1755_v53  ;;  %v1763_v60 = vld [vmem:[#allocation9 + $0x4a8] sm:$0xff] }
 0x188   :  { %v503_v2 = vpack.c.bf16 %v502_v61, %v502_v61 }
 0x189   :  { %v431_v3 = vpack.c.bf16 %v430_v49, %v430_v49 }
 0x18a   :  { %504 = vst [vmem:[#allocation2 + $0x3] sm:$0x1] %v503_v2  ;;  %v10107_v2 = vcombine.low %v1750_v42, %v1754_v15 }
 0x18b   :  { %432 = vst [vmem:[#allocation2 + $0x2] sm:$0x1] %v431_v3  ;;  %v10109_v3 = vcombine.low %v1751_v28, %v1755_v53 }
 0x198   :  { %v641_v5 = vpop.f32.mrb[8].mxu0 }
 0x199   :  { %v642_v6 = vadd.f32 %v12168_v38, %v641_v5  ;;  %v11208_v7 = vpop.f32.mrb[9].mxu0 }
 0x19a   :  { %v644_v4 = vpop.f32.mrb[10].mxu0  ;;  %v715_v9 = vpop.f32.mrb[8].mxu1 }
 0x19b   :  { %v647_v10 = vmax.f32 %v642_v6, 0.0  ;;  %v716_v11 = vadd.f32 %v12168_v38, %v715_v9  ;;  %v11209_v13 = vpop.f32.mrb[11].mxu0  ;;  %v11214_v8 = vpop.f32.mrb[9].mxu1  ;;  %v10116_v9 = vcombine.high %v1758_v57, %v1762_v59 }
 0x19c   :  { %v718_v14 = vpop.f32.mrb[10].mxu1  ;;  %v10115_v8 = vcombine.low %v1758_v57, %v1762_v59 }
 0x19d   :  { %v648_v17 = vpack.c.bf16 %v647_v10, %v647_v10  ;;  %v721_v18 = vmax.f32 %v716_v11, 0.0  ;;  %v11215_v1 = vpop.f32.mrb[11].mxu1  ;;  %v10118_v10 = vcombine.high %v1759_v44, %v1763_v60  ;;  %v1766_v11 = vld [vmem:[#allocation9 + $0x4c0] sm:$0xff]  ;;  %v10117_v14 = vcombine.low %v1759_v44, %v1763_v60 }
 0x19f   :  { %649 = vst [vmem:[#allocation2 + $0x4] sm:$0x1] %v648_v17  ;;  %v722_v20 = vpack.c.bf16 %v721_v18, %v721_v18  ;;  %v10124_v18 = vcombine.high %v1766_v11, %v1770_v27 }
 0x1a1   :  { %723 = vst [vmem:[#allocation2 + $0x5] sm:$0x1] %v722_v20  ;;  %v1774_v20 = vld [vmem:[#allocation9 + $0x500] sm:$0xff] }
 0x1a8   :  { %v865_v22 = vpop.f32.mrb[12].mxu1 }
 0x1a9   :  { %v793_v21 = vpop.f32.mrb[12].mxu0  ;;  %v866_v23 = vadd.f32 %v12168_v38, %v865_v22  ;;  %v11226_v26 = vpop.f32.mrb[13].mxu1  ;;  %v1775_v22 = vld [vmem:[#allocation9 + $0x508] sm:$0xff] }
 0x1aa   :  { %v794_v25 = vadd.f32 %v12168_v38, %v793_v21  ;;  %v11220_v16 = vpop.f32.mrb[13].mxu0  ;;  %v868_v29 = vpop.f32.mrb[14].mxu1  ;;  %v1778_v21 = vld [vmem:[#allocation9 + $0x520] sm:$0xff] }
 0x1ab   :  { %v796_v0 = vpop.f32.mrb[14].mxu0  ;;  %v871_v32 = vmax.f32 %v866_v23, 0.0  ;;  %v11227_v31 = vpop.f32.mrb[15].mxu1  ;;  %v10123_v16 = vcombine.low %v1766_v11, %v1770_v27  ;;  %v10132_v26 = vcombine.high %v1774_v20, %v1778_v21  ;;  %v1782_v29 = vld [vmem:[#allocation9 + $0x540] sm:$0xff] }
 0x1ac   :  { %v799_v30 = vmax.f32 %v794_v25, 0.0  ;;  %v11221_v12 = vpop.f32.mrb[15].mxu0  ;;  %v1779_v25 = vld [vmem:[#allocation9 + $0x528] sm:$0xff]  ;;  %v10131_v31 = vcombine.low %v1774_v20, %v1778_v21  ;;  %v1806_v27 = vld [vmem:[#allocation9 + $0x600] sm:$0xff] }
 0x1ad   :  { %v872_v40 = vpack.c.bf16 %v871_v32, %v871_v32  ;;  %v10134_v0 = vcombine.high %v1775_v22, %v1779_v25  ;;  %v1783_v32 = vld [vmem:[#allocation9 + $0x548] sm:$0xff]  ;;  %v10133_v33 = vcombine.low %v1775_v22, %v1779_v25 }
 0x1ae   :  { %v800_v39 = vpack.c.bf16 %v799_v30, %v799_v30  ;;  %v1786_v30 = vld [vmem:[#allocation9 + $0x560] sm:$0xff]  ;;  %v1787_v12 = vld [vmem:[#allocation9 + $0x568] sm:$0xff] }
 0x1af   :  { %873 = vst [vmem:[#allocation2 + $0x7] sm:$0x1] %v872_v40  ;;  %v10140_v34 = vcombine.high %v1782_v29, %v1786_v30  ;;  %v10142_v37 = vcombine.high %v1783_v32, %v1787_v12  ;;  %v1819_v20 = vld [vmem:[#allocation9 + $0x668] sm:$0xff] }
 0x1b0   :  { %801 = vst [vmem:[#allocation2 + $0x6] sm:$0x1] %v800_v39  ;;  %v1790_v39 = vld [vmem:[#allocation9 + $0x580] sm:$0xff] }
 0x1b7   :  { %v12183_v46 = vld [vmem:[#allocation2] sm:$0xff] }
 0x1b8   :  { %v2689_v47 = vrot.slane %v12183_v46, %v12181_v19 }
 0x1ba   :  { %v2697_v35 = vcombine.high %v2689_v47, %v2689_v47  ;;  %v12191_v55 = vrot.slane %v2689_v47, %v12181_v19  ;;  %v1791_v47 = vld [vmem:[#allocation9 + $0x588] sm:$0xff] }
 0x1bc   :  { %v12188_v54 = vrot.slane %v2697_v35, %v12181_v19  ;;  %v1795_v35 = vld [vmem:[#allocation9 + $0x5a8] sm:$0xff] }
 0x1bd   :  { %v1010_v58 = vpop.f32.mrb[16].mxu0 }
 0x1be   :  { %7948 = vmatprep.mubr.bf16.mxu0 %v12188_v54  ;;  %8276 = vmatprep.mubr.bf16.mxu1 %v12188_v54  ;;  %v12197_v36 = vcombine.high %v12188_v54, %v12188_v54  ;;  %v1011_v61 = vadd.f32 %v12168_v38, %v1010_v58  ;;  %v11232_v62 = vpop.f32.mrb[17].mxu0  ;;  %v10139_v58 = vcombine.low %v1782_v29, %v1786_v30  ;;  %v1827_v29 = vld [vmem:[#allocation9 + $0x6a8] sm:$0xff] }
 0x1bf   :  { %7949 = vmatmul.mubr.bf16.vlgmr.msra.gmra.mrb[32].mxu0 %v12191_v55  ;;  %8277 = vmatmul.mubr.bf16.vlgmr.msra.gmra.mrb[32].mxu1 %v12191_v55  ;;  %v1084_v49 = vpop.f32.mrb[16].mxu1  ;;  %v1013_v63 = vpop.f32.mrb[18].mxu0  ;;  %v10150_v62 = vcombine.high %v1791_v47, %v1795_v35 }
 0x1c0   :  { %7958 = vmatpush1.bf16.msra.mxu0 %v10099_v43  ;;  %8286 = vmatpush1.bf16.msra.mxu1 %v10101_v52  ;;  %v1016_v5 = vmax.f32 %v1011_v61, 0.0  ;;  %v1085_v6 = vadd.f32 %v12168_v38, %v1084_v49  ;;  %v11238_v7 = vpop.f32.mrb[17].mxu1  ;;  %v11233_v4 = vpop.f32.mrb[19].mxu0  ;;  %v1771_v43 = vld [vmem:[#allocation9 + $0x4e8] sm:$0xff]  ;;  %v10148_v61 = vcombine.high %v1790_v39, %v1794_v45  ;;  %v1798_v49 = vld [vmem:[#allocation9 + $0x5c0] sm:$0xff] }
 0x1c1   :  { %7989 = vmatprep.mubr.bf16.mxu0 %v12197_v36  ;;  %8317 = vmatprep.mubr.bf16.mxu1 %v12197_v36  ;;  %v1087_v48 = vpop.f32.mrb[18].mxu1  ;;  %v10126_v1 = vcombine.high %v1767_v50, %v1771_v43  ;;  %v10125_v23 = vcombine.low %v1767_v50, %v1771_v43  ;;  %v1810_v50 = vld [vmem:[#allocation9 + $0x620] sm:$0xff]  ;;  %v1807_v43 = vld [vmem:[#allocation9 + $0x608] sm:$0xff] }
 0x1c2   :  { %7959 = vmatprep.subr.bf16.mxu0 %v10108_v56  ;;  %8287 = vmatprep.subr.bf16.mxu1 %v10110_v24  ;;  %v1017_v51 = vpack.c.bf16 %v1016_v5, %v1016_v5  ;;  %v1090_v52 = vmax.f32 %v1085_v6, 0.0  ;;  %v11239_v13 = vpop.f32.mrb[19].mxu1  ;;  %v10141_v24 = vcombine.low %v1783_v32, %v1787_v12  ;;  %v1799_v5 = vld [vmem:[#allocation9 + $0x5c8] sm:$0xff]  ;;  %v10163_v21 = vcombine.low %v1806_v27, %v1810_v50 }
 0x1c3   :  { %v1803_v6 = vld [vmem:[#allocation9 + $0x5e8] sm:$0xff] }
 0x1c4   :  { %7960 = vmatpush1.bf16.msra.mxu0 %v10107_v2  ;;  %8288 = vmatpush1.bf16.msra.mxu1 %v10109_v3  ;;  %1018 = vst [vmem:[#allocation2 + $0x8] sm:$0x1] %v1017_v51  ;;  %v1091_v17 = vpack.c.bf16 %v1090_v52, %v1090_v52  ;;  %v1802_v3 = vld [vmem:[#allocation9 + $0x5e0] sm:$0xff]  ;;  %v10158_v48 = vcombine.high %v1799_v5, %v1803_v6  ;;  %v1811_v51 = vld [vmem:[#allocation9 + $0x628] sm:$0xff] }
 0x1c5   :  { %7961 = vmatprep.subr.bf16.mxu0 %v10116_v9  ;;  %8289 = vmatprep.subr.bf16.mxu1 %v10118_v10  ;;  %v10147_v9 = vcombine.low %v1790_v39, %v1794_v45  ;;  %v10149_v10 = vcombine.low %v1791_v47, %v1795_v35  ;;  %v10156_v11 = vcombine.high %v1798_v49, %v1802_v3  ;;  %v1831_v45 = vld [vmem:[#allocation9 + $0x6c8] sm:$0xff] }
 0x1c6   :  { %1092 = vst [vmem:[#allocation2 + $0x9] sm:$0x1] %v1091_v17  ;;  %v10155_v52 = vcombine.low %v1798_v49, %v1802_v3  ;;  %v10157_v13 = vcombine.low %v1799_v5, %v1803_v6  ;;  %v1814_v17 = vld [vmem:[#allocation9 + $0x640] sm:$0xff]  ;;  %v10165_v22 = vcombine.low %v1807_v43, %v1811_v51  ;;  %v1835_v47 = vld [vmem:[#allocation9 + $0x6e8] sm:$0xff] }
 0x1c7   :  { %v1843_v3 = vld [vmem:[#allocation9 + $0x728] sm:$0xff] }
 0x1c8   :  { %7962 = vmatpush1.bf16.msra.mxu0 %v10115_v8  ;;  %8290 = vmatpush1.bf16.msra.mxu1 %v10117_v14  ;;  %v10164_v8 = vcombine.high %v1806_v27, %v1810_v50  ;;  %v10166_v14 = vcombine.high %v1807_v43, %v1811_v51  ;;  %v1851_v27 = vld [vmem:[#allocation9 + $0x768] sm:$0xff] }
 0x1c9   :  { %7963 = vmatprep.subr.bf16.mxu0 %v10124_v18  ;;  %8291 = vmatprep.subr.bf16.mxu1 %v10126_v1  ;;  %v1818_v18 = vld [vmem:[#allocation9 + $0x660] sm:$0xff]  ;;  %v1815_v1 = vld [vmem:[#allocation9 + $0x648] sm:$0xff] }
 0x1ca   :  { %v10172_v25 = vcombine.high %v1814_v17, %v1818_v18  ;;  %v10171_v30 = vcombine.low %v1814_v17, %v1818_v18  ;;  %v10173_v32 = vcombine.low %v1815_v1, %v1819_v20  ;;  %v1859_v17 = vld [vmem:[#allocation9 + $0x7a8] sm:$0xff] }
 0x1cc   :  { %7964 = vmatpush1.bf16.msra.mxu0 %v10123_v16  ;;  %8292 = vmatpush1.bf16.msra.mxu1 %v10125_v23  ;;  %v10174_v16 = vcombine.high %v1815_v1, %v1819_v20  ;;  %v1822_v23 = vld [vmem:[#allocation9 + $0x680] sm:$0xff] }
 0x1cd   :  { %7965 = vmatprep.subr.bf16.mxu0 %v10132_v26  ;;  %8293 = vmatprep.subr.bf16.mxu1 %v10134_v0  ;;  %v1162_v40 = vpop.f32.mrb[20].mxu0  ;;  %v1234_v15 = vpop.f32.mrb[20].mxu1  ;;  %v1826_v26 = vld [vmem:[#allocation9 + $0x6a0] sm:$0xff]  ;;  %v1823_v0 = vld [vmem:[#allocation9 + $0x688] sm:$0xff] }
 0x1ce   :  { %v1163_v42 = vadd.f32 %v12168_v38, %v1162_v40  ;;  %v11244_v28 = vpop.f32.mrb[21].mxu0  ;;  %v1235_v53 = vadd.f32 %v12168_v38, %v1234_v15  ;;  %v11250_v56 = vpop.f32.mrb[21].mxu1  ;;  %v1834_v40 = vld [vmem:[#allocation9 + $0x6e0] sm:$0xff] }
 0x1cf   :  { %v1165_v57 = vpop.f32.mrb[22].mxu0  ;;  %v1237_v44 = vpop.f32.mrb[22].mxu1 }
 0x1d0   :  { %7966 = vmatpush1.bf16.msra.mxu0 %v10131_v31  ;;  %8294 = vmatpush1.bf16.msra.mxu1 %v10133_v33  ;;  %v1168_v59 = vmax.f32 %v1163_v42, 0.0  ;;  %v11245_v60 = vpop.f32.mrb[23].mxu0  ;;  %v1240_v63 = vmax.f32 %v1235_v53, 0.0  ;;  %v11251_v2 = vpop.f32.mrb[23].mxu1  ;;  %v10180_v31 = vcombine.high %v1822_v23, %v1826_v26  ;;  %v10182_v33 = vcombine.high %v1823_v0, %v1827_v29 }
 0x1d1   :  { %7967 = vmatprep.subr.bf16.mxu0 %v10140_v34  ;;  %8295 = vmatprep.subr.bf16.mxu1 %v10142_v37  ;;  %v1830_v34 = vld [vmem:[#allocation9 + $0x6c0] sm:$0xff]  ;;  %v10179_v57 = vcombine.low %v1822_v23, %v1826_v26  ;;  %v10190_v44 = vcombine.high %v1831_v45, %v1835_v47  ;;  %v1839_v2 = vld [vmem:[#allocation9 + $0x708] sm:$0xff]  ;;  %v2682_v26 = vcombine.high %v12183_v46, %v12183_v46 }
 0x1d2   :  { %v1169_v7 = vpack.c.bf16 %v1168_v59, %v1168_v59  ;;  %v1241_v4 = vpack.c.bf16 %v1240_v63, %v1240_v63  ;;  %v10188_v59 = vcombine.high %v1830_v34, %v1834_v40  ;;  %v1838_v60 = vld [vmem:[#allocation9 + $0x700] sm:$0xff]  ;;  %v10187_v6 = vcombine.low %v1830_v34, %v1834_v40  ;;  %v1867_v23 = vld [vmem:[#allocation9 + $0x7e8] sm:$0xff] }
 0x1d3   :  { %v1842_v63 = vld [vmem:[#allocation9 + $0x720] sm:$0xff]  ;;  %v10197_v43 = vcombine.low %v1839_v2, %v1843_v3 }
 0x1d4   :  { %7968 = vmatpush1.bf16.msra.mxu0 %v10139_v58  ;;  %8296 = vmatpush1.bf16.msra.mxu1 %v10141_v24  ;;  %1170 = vst [vmem:[#allocation2 + $0xa] sm:$0x1] %v1169_v7  ;;  %1242 = vst [vmem:[#allocation2 + $0xb] sm:$0x1] %v1241_v4  ;;  %v10181_v58 = vcombine.low %v1823_v0, %v1827_v29  ;;  %v10189_v7 = vcombine.low %v1831_v45, %v1835_v47  ;;  %v1870_v47 = vld [vmem:[#allocation9 + $0x800] sm:$0xff] }
 0x1d5   :  { %7969 = vmatprep.subr.bf16.mxu0 %v10148_v61  ;;  %8297 = vmatprep.subr.bf16.mxu1 %v10150_v62  ;;  %v10196_v4 = vcombine.high %v1838_v60, %v1842_v63  ;;  %v10195_v50 = vcombine.low %v1838_v60, %v1842_v63  ;;  %v1879_v63 = vld [vmem:[#allocation9 + $0x848] sm:$0xff] }
 0x1d8   :  { %7970 = vmatpush1.bf16.msra.mxu0 %v10147_v9  ;;  %8298 = vmatpush1.bf16.msra.mxu1 %v10149_v10  ;;  %v10198_v9 = vcombine.high %v1839_v2, %v1843_v3  ;;  %v1846_v10 = vld [vmem:[#allocation9 + $0x740] sm:$0xff]  ;;  %v1883_v2 = vld [vmem:[#allocation9 + $0x868] sm:$0xff] }
 0x1d9   :  { %7971 = vmatprep.subr.bf16.mxu0 %v10156_v11  ;;  %8299 = vmatprep.subr.bf16.mxu1 %v10158_v48  ;;  %v1850_v11 = vld [vmem:[#allocation9 + $0x760] sm:$0xff]  ;;  %v1847_v48 = vld [vmem:[#allocation9 + $0x748] sm:$0xff] }
 0x1da   :  { %v10204_v51 = vcombine.high %v1846_v10, %v1850_v11  ;;  %v10203_v18 = vcombine.low %v1846_v10, %v1850_v11  ;;  %v10205_v1 = vcombine.low %v1847_v48, %v1851_v27  ;;  %v1886_v10 = vld [vmem:[#allocation9 + $0x880] sm:$0xff] }
 0x1db   :  { %v1890_v11 = vld [vmem:[#allocation9 + $0x8a0] sm:$0xff] }
 0x1dc   :  { %7972 = vmatpush1.bf16.msra.mxu0 %v10155_v52  ;;  %8300 = vmatpush1.bf16.msra.mxu1 %v10157_v13  ;;  %v10206_v52 = vcombine.high %v1847_v48, %v1851_v27  ;;  %v1854_v13 = vld [vmem:[#allocation9 + $0x780] sm:$0xff]  ;;  %v1887_v48 = vld [vmem:[#allocation9 + $0x888] sm:$0xff] }
 0x1dd   :  { %7973 = vmatprep.subr.bf16.mxu0 %v10164_v8  ;;  %8301 = vmatprep.subr.bf16.mxu1 %v10166_v14  ;;  %v1858_v8 = vld [vmem:[#allocation9 + $0x7a0] sm:$0xff]  ;;  %v1855_v14 = vld [vmem:[#allocation9 + $0x788] sm:$0xff] }
 0x1de   :  { %v10212_v20 = vcombine.high %v1854_v13, %v1858_v8  ;;  %v10213_v34 = vcombine.low %v1855_v14, %v1859_v17  ;;  %v1891_v27 = vld [vmem:[#allocation9 + $0x8a8] sm:$0xff] }
 0x1e0   :  { %7974 = vmatpush1.bf16.msra.mxu0 %v10163_v21  ;;  %8302 = vmatpush1.bf16.msra.mxu1 %v10165_v22  ;;  %v1379_v12 = vpop.f32.mrb[24].mxu0  ;;  %v10214_v21 = vcombine.high %v1855_v14, %v1859_v17  ;;  %v1862_v22 = vld [vmem:[#allocation9 + $0x7c0] sm:$0xff]  ;;  %v1895_v14 = vld [vmem:[#allocation9 + $0x8c8] sm:$0xff] }
 0x1e1   :  { %7975 = vmatprep.subr.bf16.mxu0 %v10172_v25  ;;  %8303 = vmatprep.subr.bf16.mxu1 %v10174_v16  ;;  %v1380_v37 = vadd.f32 %v12168_v38, %v1379_v12  ;;  %v11256_v39 = vpop.f32.mrb[25].mxu0  ;;  %v1866_v25 = vld [vmem:[#allocation9 + $0x7e0] sm:$0xff]  ;;  %v1863_v16 = vld [vmem:[#allocation9 + $0x7c8] sm:$0xff] }
 0x1e2   :  { %v1453_v35 = vpop.f32.mrb[24].mxu1  ;;  %v1382_v42 = vpop.f32.mrb[26].mxu0  ;;  %v10220_v40 = vcombine.high %v1862_v22, %v1866_v25  ;;  %v10222_v45 = vcombine.high %v1863_v16, %v1867_v23  ;;  %v1899_v17 = vld [vmem:[#allocation9 + $0x8e8] sm:$0xff] }
 0x1e3   :  { %v1385_v15 = vmax.f32 %v1380_v37, 0.0  ;;  %v1454_v28 = vadd.f32 %v12168_v38, %v1453_v35  ;;  %v11262_v53 = vpop.f32.mrb[25].mxu1  ;;  %v11257_v56 = vpop.f32.mrb[27].mxu0 }
 0x1e4   :  { %7976 = vmatpush1.bf16.msra.mxu0 %v10171_v30  ;;  %8304 = vmatpush1.bf16.msra.mxu1 %v10173_v32  ;;  %v1456_v24 = vpop.f32.mrb[26].mxu1  ;;  %v1871_v53 = vld [vmem:[#allocation9 + $0x808] sm:$0xff]  ;;  %v12220_v56 = vrot.slane %v2682_v26, %v12181_v19 }
 0x1e5   :  { %7977 = vmatprep.subr.bf16.mxu0 %v10180_v31  ;;  %8305 = vmatprep.subr.bf16.mxu1 %v10182_v33  ;;  %v1386_v61 = vpack.c.bf16 %v1385_v15, %v1385_v15  ;;  %v1459_v62 = vmax.f32 %v1454_v28, 0.0  ;;  %v11263_v49 = vpop.f32.mrb[27].mxu1  ;;  %v10211_v33 = vcombine.low %v1854_v13, %v1858_v8  ;;  %v1874_v28 = vld [vmem:[#allocation9 + $0x820] sm:$0xff]  ;;  %v10219_v24 = vcombine.low %v1862_v22, %v1866_v25 }
 0x1e6   :  { %v1882_v49 = vld [vmem:[#allocation9 + $0x860] sm:$0xff]  ;;  %v10227_v3 = vcombine.low %v1870_v47, %v1874_v28 }
 0x1e7   :  { %1387 = vst [vmem:[#allocation2 + $0xc] sm:$0x1] %v1386_v61  ;;  %v1460_v5 = vpack.c.bf16 %v1459_v62, %v1459_v62  ;;  %v2698_v61 = vcombine.high %v12220_v56, %v12220_v56  ;;  %v1878_v62 = vld [vmem:[#allocation9 + $0x840] sm:$0xff] }
 0x1e8   :  { %7978 = vmatpush1.bf16.msra.mxu0 %v10179_v57  ;;  %8306 = vmatpush1.bf16.msra.mxu1 %v10181_v58  ;;  %v1894_v13 = vld [vmem:[#allocation9 + $0x8c0] sm:$0xff] }
 0x1e9   :  { %7979 = vmatprep.subr.bf16.mxu0 %v10188_v59  ;;  %8307 = vmatprep.subr.bf16.mxu1 %v10190_v44  ;;  %1461 = vst [vmem:[#allocation2 + $0xd] sm:$0x1] %v1460_v5  ;;  %v10221_v59 = vcombine.low %v1863_v16, %v1867_v23  ;;  %v10228_v44 = vcombine.high %v1870_v47, %v1874_v28  ;;  %v1898_v8 = vld [vmem:[#allocation9 + $0x8e0] sm:$0xff]  ;;  %v1903_v16 = vld [vmem:[#allocation9 + $0x908] sm:$0xff] }
 0x1ea   :  { %v12226_v5 = vcombine.high %v12191_v55, %v12191_v55  ;;  %v1902_v22 = vld [vmem:[#allocation9 + $0x900] sm:$0xff]  ;;  %v1907_v23 = vld [vmem:[#allocation9 + $0x928] sm:$0xff]  ;;  %v10251_v26 = vcombine.low %v1894_v13, %v1898_v8 }
 0x1eb   :  { %v1906_v25 = vld [vmem:[#allocation9 + $0x920] sm:$0xff] }
 0x1ec   :  { %7980 = vmatpush1.bf16.msra.mxu0 %v10187_v6  ;;  %8308 = vmatpush1.bf16.msra.mxu1 %v10189_v7  ;;  %v12229_v7 = vrot.slane %v2698_v61, %v12181_v19  ;;  %v1922_v47 = vld [vmem:[#allocation9 + $0x9a0] sm:$0xff] }
 0x1ed   :  { %7981 = vmatprep.subr.bf16.mxu0 %v10196_v4  ;;  %8309 = vmatprep.subr.bf16.mxu1 %v10198_v9  ;;  %v10236_v4 = vcombine.high %v1878_v62, %v1882_v49  ;;  %v10238_v9 = vcombine.high %v1879_v63, %v1883_v2 }
 0x1f0   :  { %7982 = vmatpush1.bf16.msra.mxu0 %v10195_v50  ;;  %8310 = vmatpush1.bf16.msra.mxu1 %v10197_v43  ;;  %v10235_v50 = vcombine.low %v1878_v62, %v1882_v49  ;;  %v10237_v43 = vcombine.low %v1879_v63, %v1883_v2  ;;  %v1934_v62 = vld [vmem:[#allocation9 + $0xa00] sm:$0xff]  ;;  %v1935_v63 = vld [vmem:[#allocation9 + $0xa08] sm:$0xff] }
 0x1f1   :  { %7983 = vmatprep.subr.bf16.mxu0 %v10204_v51  ;;  %8311 = vmatprep.subr.bf16.mxu1 %v10206_v52  ;;  %v10244_v51 = vcombine.high %v1886_v10, %v1890_v11  ;;  %v10246_v52 = vcombine.high %v1887_v48, %v1891_v27  ;;  %v1938_v49 = vld [vmem:[#allocation9 + $0xa20] sm:$0xff]  ;;  %v1939_v2 = vld [vmem:[#allocation9 + $0xa28] sm:$0xff] }
 0x1f2   :  { %v1531_v0 = vpop.f32.mrb[28].mxu0  ;;  %v1603_v29 = vpop.f32.mrb[28].mxu1 }
 0x1f3   :  { %v1532_v30 = vadd.f32 %v12168_v38, %v1531_v0  ;;  %v1604_v32 = vadd.f32 %v12168_v38, %v1603_v29  ;;  %v11268_v12 = vpop.f32.mrb[29].mxu0  ;;  %v11274_v31 = vpop.f32.mrb[29].mxu1  ;;  %v1875_v38 = vld [vmem:[#allocation9 + $0x828] sm:$0xff]  ;;  %v10253_v0 = vcombine.low %v1895_v14, %v1899_v17  ;;  %v10260_v29 = vcombine.high %v1902_v22, %v1906_v25 }
 0x1f4   :  { %7984 = vmatpush1.bf16.msra.mxu0 %v10203_v18  ;;  %8312 = vmatpush1.bf16.msra.mxu1 %v10205_v1  ;;  %v1534_v37 = vpop.f32.mrb[30].mxu0  ;;  %v1606_v39 = vpop.f32.mrb[30].mxu1  ;;  %v10230_v60 = vcombine.high %v1871_v53, %v1875_v38  ;;  %v10229_v6 = vcombine.low %v1871_v53, %v1875_v38  ;;  %v10243_v18 = vcombine.low %v1886_v10, %v1890_v11  ;;  %v1914_v12 = vld [vmem:[#allocation9 + $0x960] sm:$0xff]  ;;  %v1911_v31 = vld [vmem:[#allocation9 + $0x948] sm:$0xff] }
 0x1f5   :  { %7985 = vmatprep.subr.bf16.mxu0 %v10212_v20  ;;  %8313 = vmatprep.subr.bf16.mxu1 %v10214_v21  ;;  %v1537_v46 = vmax.f32 %v1532_v30, 0.0  ;;  %v1609_v35 = vmax.f32 %v1604_v32, 0.0  ;;  %v11269_v42 = vpop.f32.mrb[31].mxu0  ;;  %v11275_v15 = vpop.f32.mrb[31].mxu1  ;;  %v10245_v1 = vcombine.low %v1887_v48, %v1891_v27  ;;  %v10252_v20 = vcombine.high %v1894_v13, %v1898_v8  ;;  %v1910_v32 = vld [vmem:[#allocation9 + $0x940] sm:$0xff]  ;;  %v1943_v48 = vld [vmem:[#allocation9 + $0xa48] sm:$0xff] }
 0x1f6   :  { %v10254_v21 = vcombine.high %v1895_v14, %v1899_v17  ;;  %v10262_v30 = vcombine.high %v1903_v16, %v1907_v23  ;;  %v10261_v37 = vcombine.low %v1903_v16, %v1907_v23  ;;  %v10268_v39 = vcombine.high %v1910_v32, %v1914_v12  ;;  %v1926_v38 = vld [vmem:[#allocation9 + $0x9c0] sm:$0xff]  ;;  %v1947_v27 = vld [vmem:[#allocation9 + $0xa68] sm:$0xff] }
 0x1f7   :  { %v1538_v57 = vpack.c.bf16 %v1537_v46, %v1537_v46  ;;  %v1610_v58 = vpack.c.bf16 %v1609_v35, %v1609_v35  ;;  %v1919_v46 = vld [vmem:[#allocation9 + $0x988] sm:$0xff]  ;;  %v10267_v42 = vcombine.low %v1910_v32, %v1914_v12  ;;  %v1942_v10 = vld [vmem:[#allocation9 + $0xa40] sm:$0xff] }
 0x1f8   :  { %7986 = vmatpush1.bf16.msra.mxu0 %v10211_v33  ;;  %8314 = vmatpush1.bf16.msra.mxu1 %v10213_v34  ;;  %v1915_v33 = vld [vmem:[#allocation9 + $0x968] sm:$0xff]  ;;  %v10259_v34 = vcombine.low %v1902_v22, %v1906_v25  ;;  %v1946_v11 = vld [vmem:[#allocation9 + $0xa60] sm:$0xff] }
 0x1f9   :  { %7987 = vmatprep.subr.bf16.mxu0 %v10220_v40  ;;  %8315 = vmatprep.subr.bf16.mxu1 %v10222_v45  ;;  %1539 = vst [vmem:[#allocation2 + $0xe] sm:$0x1] %v1538_v57  ;;  %1611 = vst [vmem:[#allocation2 + $0xf] sm:$0x1] %v1610_v58  ;;  %v10270_v40 = vcombine.high %v1911_v31, %v1915_v33  ;;  %v1918_v45 = vld [vmem:[#allocation9 + $0x980] sm:$0xff]  ;;  %v1923_v35 = vld [vmem:[#allocation9 + $0x9a8] sm:$0xff]  ;;  %v10269_v15 = vcombine.low %v1911_v31, %v1915_v33 }
 0x1fa   :  { %v10276_v28 = vcombine.high %v1918_v45, %v1922_v47  ;;  %v10278_v53 = vcombine.high %v1919_v46, %v1923_v35  ;;  %v1930_v57 = vld [vmem:[#allocation9 + $0x9e0] sm:$0xff]  ;;  %v1927_v58 = vld [vmem:[#allocation9 + $0x9c8] sm:$0xff] }
 0x1fb   :  { %v1950_v13 = vld [vmem:[#allocation9 + $0xa80] sm:$0xff]  ;;  %v1951_v14 = vld [vmem:[#allocation9 + $0xa88] sm:$0xff] }
 0x1fc   :  { %7988 = vmatpush1.bf16.msra.mxu0 %v10219_v24  ;;  %8316 = vmatpush1.bf16.msra.mxu1 %v10221_v59  ;;  %v1931_v24 = vld [vmem:[#allocation9 + $0x9e8] sm:$0xff]  ;;  %v10275_v59 = vcombine.low %v1918_v45, %v1922_v47  ;;  %v1954_v8 = vld [vmem:[#allocation9 + $0xaa0] sm:$0xff] }
 0x1fd   :  { %7998 = vmatprep.subr.bf16.mxu0 %v10228_v44  ;;  %8326 = vmatprep.subr.bf16.mxu1 %v10230_v60  ;;  %v10277_v44 = vcombine.low %v1919_v46, %v1923_v35  ;;  %v10284_v60 = vcombine.high %v1926_v38, %v1930_v57  ;;  %v10286_v61 = vcombine.high %v1927_v58, %v1931_v24  ;;  %v1955_v17 = vld [vmem:[#allocation9 + $0xaa8] sm:$0xff]  ;;  %v1958_v22 = vld [vmem:[#allocation9 + $0xac0] sm:$0xff] }
 0x1fe   :  { %v1962_v25 = vld [vmem:[#allocation9 + $0xae0] sm:$0xff]  ;;  %v1959_v16 = vld [vmem:[#allocation9 + $0xac8] sm:$0xff] }
 0x1ff   :  { %7990 = vmatmul.mubr.bf16.vlgmr.msra.gmra.mrb[32].mxu0 %v12226_v5  ;;  %8318 = vmatmul.mubr.bf16.vlgmr.msra.gmra.mrb[32].mxu1 %v12226_v5  ;;  %v1963_v23 = vld [vmem:[#allocation9 + $0xae8] sm:$0xff]  ;;  %v1966_v32 = vld [vmem:[#allocation9 + $0xb00] sm:$0xff] }
 0x200   :  { %7999 = vmatpush1.bf16.msra.mxu0 %v10227_v3  ;;  %8030 = vmatprep.mubr.bf16.mxu0 %v12229_v7  ;;  %v10283_v3 = vcombine.low %v1926_v38, %v1930_v57  ;;  %v1970_v12 = vld [vmem:[#allocation9 + $0xb20] sm:$0xff]  ;;  %v1967_v31 = vld [vmem:[#allocation9 + $0xb08] sm:$0xff] }
 0x201   :  { %8327 = vmatpush1.bf16.msra.mxu1 %v10229_v6  ;;  %8358 = vmatprep.mubr.bf16.mxu1 %v12229_v7  ;;  %v10285_v6 = vcombine.low %v1927_v58, %v1931_v24  ;;  %v1971_v33 = vld [vmem:[#allocation9 + $0xb28] sm:$0xff]  ;;  %v1974_v45 = vld [vmem:[#allocation9 + $0xb40] sm:$0xff] }
 0x202   :  { %8000 = vmatprep.subr.bf16.mxu0 %v10236_v4  ;;  %8328 = vmatprep.subr.bf16.mxu1 %v10238_v9  ;;  %v10292_v4 = vcombine.high %v1934_v62, %v1938_v49  ;;  %v10294_v9 = vcombine.high %v1935_v63, %v1939_v2  ;;  %v1978_v47 = vld [vmem:[#allocation9 + $0xb60] sm:$0xff]  ;;  %v1975_v46 = vld [vmem:[#allocation9 + $0xb48] sm:$0xff] }
 0x203   :  { %v1979_v35 = vld [vmem:[#allocation9 + $0xb68] sm:$0xff]  ;;  %v1982_v38 = vld [vmem:[#allocation9 + $0xb80] sm:$0xff] }
 0x204   :  { %8001 = vmatpush1.bf16.msra.mxu0 %v10235_v50  ;;  %v10291_v50 = vcombine.low %v1934_v62, %v1938_v49  ;;  %v1986_v57 = vld [vmem:[#allocation9 + $0xba0] sm:$0xff]  ;;  %v1983_v58 = vld [vmem:[#allocation9 + $0xb88] sm:$0xff] }
 0x205   :  { %8329 = vmatpush1.bf16.msra.mxu1 %v10237_v43  ;;  %8002 = vmatprep.subr.bf16.mxu0 %v10244_v51  ;;  %v10293_v43 = vcombine.low %v1935_v63, %v1939_v2  ;;  %v10300_v51 = vcombine.high %v1942_v10, %v1946_v11  ;;  %v1987_v24 = vld [vmem:[#allocation9 + $0xba8] sm:$0xff]  ;;  %v1990_v62 = vld [vmem:[#allocation9 + $0xbc0] sm:$0xff] }
 0x206   :  { %8330 = vmatprep.subr.bf16.mxu1 %v10246_v52  ;;  %v10302_v52 = vcombine.high %v1943_v48, %v1947_v27  ;;  %v1994_v49 = vld [vmem:[#allocation9 + $0xbe0] sm:$0xff]  ;;  %v1991_v63 = vld [vmem:[#allocation9 + $0xbc8] sm:$0xff] }
 0x207   :  { %v1995_v2 = vld [vmem:[#allocation9 + $0xbe8] sm:$0xff] }
 0x208   :  { %8003 = vmatpush1.bf16.msra.mxu0 %v10243_v18  ;;  %v10299_v18 = vcombine.low %v1942_v10, %v1946_v11  ;;  %v1998_v10 = vld [vmem:[#allocation9 + $0xc00] sm:$0xff] }
 0x209   :  { %8331 = vmatpush1.bf16.msra.mxu1 %v10245_v1  ;;  %8004 = vmatprep.subr.bf16.mxu0 %v10252_v20  ;;  %v10301_v1 = vcombine.low %v1943_v48, %v1947_v27  ;;  %v10308_v20 = vcombine.high %v1950_v13, %v1954_v8  ;;  %v2002_v11 = vld [vmem:[#allocation9 + $0xc20] sm:$0xff]  ;;  %v1999_v48 = vld [vmem:[#allocation9 + $0xc08] sm:$0xff] }
 0x20a   :  { %8332 = vmatprep.subr.bf16.mxu1 %v10254_v21  ;;  %v10310_v21 = vcombine.high %v1951_v14, %v1955_v17  ;;  %v2003_v27 = vld [vmem:[#allocation9 + $0xc28] sm:$0xff] }
 0x20c   :  { %8005 = vmatpush1.bf16.msra.mxu0 %v10251_v26  ;;  %v10307_v26 = vcombine.low %v1950_v13, %v1954_v8  ;;  %v2006_v13 = vld [vmem:[#allocation9 + $0xc40] sm:$0xff] }
 0x20d   :  { %8333 = vmatpush1.bf16.msra.mxu1 %v10253_v0  ;;  %8006 = vmatprep.subr.bf16.mxu0 %v10260_v29  ;;  %v10309_v0 = vcombine.low %v1951_v14, %v1955_v17  ;;  %v10316_v29 = vcombine.high %v1958_v22, %v1962_v25  ;;  %v2010_v8 = vld [vmem:[#allocation9 + $0xc60] sm:$0xff]  ;;  %v10355_v14 = vcombine.low %v1998_v10, %v2002_v11  ;;  %v2007_v17 = vld [vmem:[#allocation9 + $0xc48] sm:$0xff] }
 0x20e   :  { %8334 = vmatprep.subr.bf16.mxu1 %v10262_v30  ;;  %v10318_v30 = vcombine.high %v1959_v16, %v1963_v23 }
 0x210   :  { %8007 = vmatpush1.bf16.msra.mxu0 %v10259_v34  ;;  %v10315_v34 = vcombine.low %v1958_v22, %v1962_v25  ;;  %v2014_v22 = vld [vmem:[#allocation9 + $0xc80] sm:$0xff] }
 0x211   :  { %8335 = vmatpush1.bf16.msra.mxu1 %v10261_v37  ;;  %8008 = vmatprep.subr.bf16.mxu0 %v10268_v39  ;;  %v10317_v37 = vcombine.low %v1959_v16, %v1963_v23  ;;  %v10324_v39 = vcombine.high %v1966_v32, %v1970_v12  ;;  %v2018_v25 = vld [vmem:[#allocation9 + $0xca0] sm:$0xff]  ;;  %v12242_v16 = vcombine.high %v12229_v7, %v12229_v7 }
 0x212   :  { %8336 = vmatprep.subr.bf16.mxu1 %v10270_v40  ;;  %v10326_v40 = vcombine.high %v1967_v31, %v1971_v33 }
 0x214   :  { %8009 = vmatpush1.bf16.msra.mxu0 %v10267_v42  ;;  %v10323_v42 = vcombine.low %v1966_v32, %v1970_v12  ;;  %v2022_v12 = vld [vmem:[#allocation9 + $0xcc0] sm:$0xff] }
 0x215   :  { %8337 = vmatpush1.bf16.msra.mxu1 %v10269_v15  ;;  %8010 = vmatprep.subr.bf16.mxu0 %v10276_v28  ;;  %v10325_v15 = vcombine.low %v1967_v31, %v1971_v33  ;;  %v10332_v28 = vcombine.high %v1974_v45, %v1978_v47  ;;  %v2026_v31 = vld [vmem:[#allocation9 + $0xce0] sm:$0xff]  ;;  %v2023_v33 = vld [vmem:[#allocation9 + $0xcc8] sm:$0xff] }
 0x216   :  { %8338 = vmatprep.subr.bf16.mxu1 %v10278_v53  ;;  %v10334_v53 = vcombine.high %v1975_v46, %v1979_v35 }
 0x218   :  { %8011 = vmatpush1.bf16.msra.mxu0 %v10275_v59  ;;  %v10331_v59 = vcombine.low %v1974_v45, %v1978_v47  ;;  %v2030_v47 = vld [vmem:[#allocation9 + $0xd00] sm:$0xff] }
 0x219   :  { %8339 = vmatpush1.bf16.msra.mxu1 %v10277_v44  ;;  %8012 = vmatprep.subr.bf16.mxu0 %v10284_v60  ;;  %v10333_v44 = vcombine.low %v1975_v46, %v1979_v35  ;;  %v10340_v60 = vcombine.high %v1982_v38, %v1986_v57  ;;  %v2034_v46 = vld [vmem:[#allocation9 + $0xd20] sm:$0xff]  ;;  %v2031_v35 = vld [vmem:[#allocation9 + $0xd08] sm:$0xff] }
 0x21a   :  { %8340 = vmatprep.subr.bf16.mxu1 %v10286_v61  ;;  %v10342_v61 = vcombine.high %v1983_v58, %v1987_v24 }
 0x21c   :  { %8013 = vmatpush1.bf16.msra.mxu0 %v10283_v3  ;;  %v10339_v3 = vcombine.low %v1982_v38, %v1986_v57  ;;  %v2038_v57 = vld [vmem:[#allocation9 + $0xd40] sm:$0xff] }
 0x21d   :  { %8341 = vmatpush1.bf16.msra.mxu1 %v10285_v6  ;;  %8014 = vmatprep.subr.bf16.mxu0 %v10292_v4  ;;  %v10341_v6 = vcombine.low %v1983_v58, %v1987_v24  ;;  %v10348_v4 = vcombine.high %v1990_v62, %v1994_v49  ;;  %v2042_v58 = vld [vmem:[#allocation9 + $0xd60] sm:$0xff]  ;;  %v2039_v24 = vld [vmem:[#allocation9 + $0xd48] sm:$0xff] }
 0x21e   :  { %8342 = vmatprep.subr.bf16.mxu1 %v10294_v9  ;;  %v10350_v9 = vcombine.high %v1991_v63, %v1995_v2 }
 0x220   :  { %8015 = vmatpush1.bf16.msra.mxu0 %v10291_v50  ;;  %v10347_v50 = vcombine.low %v1990_v62, %v1994_v49  ;;  %v2046_v49 = vld [vmem:[#allocation9 + $0xd80] sm:$0xff] }
 0x221   :  { %8343 = vmatpush1.bf16.msra.mxu1 %v10293_v43  ;;  %8016 = vmatprep.subr.bf16.mxu0 %v10300_v51  ;;  %v10349_v43 = vcombine.low %v1991_v63, %v1995_v2  ;;  %v10356_v51 = vcombine.high %v1998_v10, %v2002_v11  ;;  %v2050_v63 = vld [vmem:[#allocation9 + $0xda0] sm:$0xff]  ;;  %v2047_v2 = vld [vmem:[#allocation9 + $0xd88] sm:$0xff] }
 0x222   :  { %8344 = vmatprep.subr.bf16.mxu1 %v10302_v52  ;;  %v10358_v52 = vcombine.high %v1999_v48, %v2003_v27  ;;  %v2054_v11 = vld [vmem:[#allocation9 + $0xdc0] sm:$0xff] }
 0x224   :  { %8017 = vmatpush1.bf16.msra.mxu0 %v10299_v18  ;;  %v2011_v18 = vld [vmem:[#allocation9 + $0xc68] sm:$0xff] }
 0x225   :  { %8345 = vmatpush1.bf16.msra.mxu1 %v10301_v1  ;;  %8018 = vmatprep.subr.bf16.mxu0 %v10308_v20  ;;  %v12237_v1 = vrot.slane %v12220_v56, %v12181_v19  ;;  %v10357_v20 = vcombine.low %v1999_v48, %v2003_v27  ;;  %v10366_v23 = vcombine.high %v2007_v17, %v2011_v18  ;;  %v2058_v48 = vld [vmem:[#allocation9 + $0xde0] sm:$0xff]  ;;  %v2055_v27 = vld [vmem:[#allocation9 + $0xdc8] sm:$0xff] }
 0x226   :  { %8346 = vmatprep.subr.bf16.mxu1 %v10310_v21  ;;  %v10364_v21 = vcombine.high %v2006_v13, %v2010_v8  ;;  %v10363_v56 = vcombine.low %v2006_v13, %v2010_v8  ;;  %v2062_v8 = vld [vmem:[#allocation9 + $0xe00] sm:$0xff] }
 0x228   :  { %8019 = vmatpush1.bf16.msra.mxu0 %v10307_v26  ;;  %v2015_v26 = vld [vmem:[#allocation9 + $0xc88] sm:$0xff] }
 0x229   :  { %8347 = vmatpush1.bf16.msra.mxu1 %v10309_v0  ;;  %8020 = vmatprep.subr.bf16.mxu0 %v10316_v29  ;;  %v2019_v0 = vld [vmem:[#allocation9 + $0xca8] sm:$0xff]  ;;  %v10365_v29 = vcombine.low %v2007_v17, %v2011_v18 }
 0x22a   :  { %8348 = vmatprep.subr.bf16.mxu1 %v10318_v30  ;;  %v10372_v30 = vcombine.high %v2014_v22, %v2018_v25  ;;  %v10374_v32 = vcombine.high %v2015_v26, %v2019_v0  ;;  %v2063_v17 = vld [vmem:[#allocation9 + $0xe08] sm:$0xff] }
 0x22b   :  { %v2067_v18 = vld [vmem:[#allocation9 + $0xe28] sm:$0xff] }
 0x22c   :  { %8021 = vmatpush1.bf16.msra.mxu0 %v10315_v34  ;;  %v2027_v34 = vld [vmem:[#allocation9 + $0xce8] sm:$0xff] }
 0x22d   :  { %8349 = vmatpush1.bf16.msra.mxu1 %v10317_v37  ;;  %8022 = vmatprep.subr.bf16.mxu0 %v10324_v39  ;;  %v10371_v37 = vcombine.low %v2014_v22, %v2018_v25  ;;  %v10373_v39 = vcombine.low %v2015_v26, %v2019_v0  ;;  %v10382_v45 = vcombine.high %v2023_v33, %v2027_v34  ;;  %v2074_v26 = vld [vmem:[#allocation9 + $0xe60] sm:$0xff]  ;;  %v2071_v0 = vld [vmem:[#allocation9 + $0xe48] sm:$0xff] }
 0x22e   :  { %8350 = vmatprep.subr.bf16.mxu1 %v10326_v40  ;;  %v10380_v40 = vcombine.high %v2022_v12, %v2026_v31  ;;  %v10422_v25 = vcombine.high %v2063_v17, %v2067_v18 }
 0x230   :  { %8023 = vmatpush1.bf16.msra.mxu0 %v10323_v42  ;;  %v2035_v42 = vld [vmem:[#allocation9 + $0xd28] sm:$0xff] }
 0x231   :  { %8351 = vmatpush1.bf16.msra.mxu1 %v10325_v15  ;;  %8024 = vmatprep.subr.bf16.mxu0 %v10332_v28  ;;  %v10379_v15 = vcombine.low %v2022_v12, %v2026_v31  ;;  %v10381_v28 = vcombine.low %v2023_v33, %v2027_v34  ;;  %v10390_v38 = vcombine.high %v2031_v35, %v2035_v42  ;;  %v2078_v31 = vld [vmem:[#allocation9 + $0xe80] sm:$0xff]  ;;  %v2079_v34 = vld [vmem:[#allocation9 + $0xe88] sm:$0xff] }
 0x232   :  { %8352 = vmatprep.subr.bf16.mxu1 %v10334_v53  ;;  %v10388_v53 = vcombine.high %v2030_v47, %v2034_v46  ;;  %v2082_v33 = vld [vmem:[#allocation9 + $0xea0] sm:$0xff] }
 0x234   :  { %8025 = vmatpush1.bf16.msra.mxu0 %v10331_v59  ;;  %v2043_v59 = vld [vmem:[#allocation9 + $0xd68] sm:$0xff] }
 0x235   :  { %8353 = vmatpush1.bf16.msra.mxu1 %v10333_v44  ;;  %8026 = vmatprep.subr.bf16.mxu0 %v10340_v60  ;;  %v10387_v44 = vcombine.low %v2030_v47, %v2034_v46  ;;  %v10389_v60 = vcombine.low %v2031_v35, %v2035_v42  ;;  %v10398_v62 = vcombine.high %v2039_v24, %v2043_v59  ;;  %v2086_v46 = vld [vmem:[#allocation9 + $0xec0] sm:$0xff]  ;;  %v2087_v42 = vld [vmem:[#allocation9 + $0xec8] sm:$0xff] }
 0x236   :  { %8354 = vmatprep.subr.bf16.mxu1 %v10342_v61  ;;  %v10396_v61 = vcombine.high %v2038_v57, %v2042_v58  ;;  %v2090_v35 = vld [vmem:[#allocation9 + $0xee0] sm:$0xff] }
 0x238   :  { %8027 = vmatpush1.bf16.msra.mxu0 %v10339_v3  ;;  %v2051_v3 = vld [vmem:[#allocation9 + $0xda8] sm:$0xff] }
 0x239   :  { %8355 = vmatpush1.bf16.msra.mxu1 %v10341_v6  ;;  %8028 = vmatprep.subr.bf16.mxu0 %v10348_v4  ;;  %v10395_v6 = vcombine.low %v2038_v57, %v2042_v58  ;;  %v10397_v4 = vcombine.low %v2039_v24, %v2043_v59  ;;  %v10406_v10 = vcombine.high %v2047_v2, %v2051_v3  ;;  %v2094_v58 = vld [vmem:[#allocation9 + $0xf00] sm:$0xff]  ;;  %v2095_v59 = vld [vmem:[#allocation9 + $0xf08] sm:$0xff] }
 0x23a   :  { %8356 = vmatprep.subr.bf16.mxu1 %v10350_v9  ;;  %v10404_v9 = vcombine.high %v2046_v49, %v2050_v63  ;;  %v2098_v24 = vld [vmem:[#allocation9 + $0xf20] sm:$0xff] }
 0x23c   :  { %8029 = vmatpush1.bf16.msra.mxu0 %v10347_v50  ;;  %v2059_v50 = vld [vmem:[#allocation9 + $0xde8] sm:$0xff] }
 0x23d   :  { %8357 = vmatpush1.bf16.msra.mxu1 %v10349_v43  ;;  %8039 = vmatprep.subr.bf16.mxu0 %v10356_v51  ;;  %v10403_v43 = vcombine.low %v2046_v49, %v2050_v63  ;;  %v10405_v51 = vcombine.low %v2047_v2, %v2051_v3  ;;  %v10414_v13 = vcombine.high %v2055_v27, %v2059_v50  ;;  %v2102_v63 = vld [vmem:[#allocation9 + $0xf40] sm:$0xff]  ;;  %v2103_v3 = vld [vmem:[#allocation9 + $0xf48] sm:$0xff] }
 0x23e   :  { %8367 = vmatprep.subr.bf16.mxu1 %v10358_v52  ;;  %v10412_v52 = vcombine.high %v2054_v11, %v2058_v48  ;;  %v2106_v2 = vld [vmem:[#allocation9 + $0xf60] sm:$0xff] }
 0x23f   :  { %8031 = vmatmul.mubr.bf16.vlgmr.msra.gmra.mrb[32].mxu0 %v12237_v1 }
 0x240   :  { %8359 = vmatmul.mubr.bf16.vlgmr.msra.gmra.mrb[32].mxu1 %v12237_v1  ;;  %8040 = vmatpush1.bf16.msra.mxu0 %v10355_v14  ;;  %v2066_v14 = vld [vmem:[#allocation9 + $0xe20] sm:$0xff] }
 0x241   :  { %8071 = vmatprep.mubr.bf16.mxu0 %v12242_v16  ;;  %8368 = vmatpush1.bf16.msra.mxu1 %v10357_v20  ;;  %v10411_v20 = vcombine.low %v2054_v11, %v2058_v48  ;;  %v10420_v22 = vcombine.high %v2062_v8, %v2066_v14  ;;  %v2110_v48 = vld [vmem:[#allocation9 + $0xf80] sm:$0xff] }
 0x242   :  { %8399 = vmatprep.mubr.bf16.mxu1 %v12242_v16  ;;  %8041 = vmatprep.subr.bf16.mxu0 %v10364_v21  ;;  %v10413_v21 = vcombine.low %v2055_v27, %v2059_v50  ;;  %v2114_v27 = vld [vmem:[#allocation9 + $0xfa0] sm:$0xff]  ;;  %v2111_v50 = vld [vmem:[#allocation9 + $0xf88] sm:$0xff] }
 0x243   :  { %8369 = vmatprep.subr.bf16.mxu1 %v10366_v23  ;;  %v2070_v23 = vld [vmem:[#allocation9 + $0xe40] sm:$0xff] }
 0x244   :  { %8042 = vmatpush1.bf16.msra.mxu0 %v10363_v56  ;;  %v2075_v56 = vld [vmem:[#allocation9 + $0xe68] sm:$0xff] }
 0x245   :  { %8370 = vmatpush1.bf16.msra.mxu1 %v10365_v29  ;;  %8043 = vmatprep.subr.bf16.mxu0 %v10372_v30  ;;  %v10419_v29 = vcombine.low %v2062_v8, %v2066_v14  ;;  %v10421_v30 = vcombine.low %v2063_v17, %v2067_v18  ;;  %v10430_v12 = vcombine.high %v2071_v0, %v2075_v56  ;;  %v2118_v14 = vld [vmem:[#allocation9 + $0xfc0] sm:$0xff]  ;;  %v2119_v18 = vld [vmem:[#allocation9 + $0xfc8] sm:$0xff] }
 0x246   :  { %8371 = vmatprep.subr.bf16.mxu1 %v10374_v32  ;;  %v10428_v32 = vcombine.high %v2070_v23, %v2074_v26  ;;  %v2122_v17 = vld [vmem:[#allocation9 + $0xfe0] sm:$0xff] }
 0x248   :  { %8044 = vmatpush1.bf16.msra.mxu0 %v10371_v37  ;;  %v2083_v37 = vld [vmem:[#allocation9 + $0xea8] sm:$0xff] }
 0x249   :  { %8372 = vmatpush1.bf16.msra.mxu1 %v10373_v39  ;;  %8045 = vmatprep.subr.bf16.mxu0 %v10380_v40  ;;  %v10427_v39 = vcombine.low %v2070_v23, %v2074_v26  ;;  %v10429_v40 = vcombine.low %v2071_v0, %v2075_v56  ;;  %v10438_v47 = vcombine.high %v2079_v34, %v2083_v37  ;;  %v2126_v0 = vld [vmem:[#allocation9 + $0x1000] sm:$0xff] }
 0x24a   :  { %8373 = vmatprep.subr.bf16.mxu1 %v10382_v45  ;;  %v10436_v45 = vcombine.high %v2078_v31, %v2082_v33  ;;  %v10476_v23 = vcombine.high %v2118_v14, %v2122_v17  ;;  %v2130_v56 = vld [vmem:[#allocation9 + $0x1020] sm:$0xff] }
 0x24c   :  { %8046 = vmatpush1.bf16.msra.mxu0 %v10379_v15  ;;  %v2091_v15 = vld [vmem:[#allocation9 + $0xee8] sm:$0xff] }
 0x24d   :  { %8374 = vmatpush1.bf16.msra.mxu1 %v10381_v28  ;;  %8047 = vmatprep.subr.bf16.mxu0 %v10388_v53  ;;  %v10435_v28 = vcombine.low %v2078_v31, %v2082_v33  ;;  %v10437_v53 = vcombine.low %v2079_v34, %v2083_v37  ;;  %v10446_v57 = vcombine.high %v2087_v42, %v2091_v15 }
 0x24e   :  { %8375 = vmatprep.subr.bf16.mxu1 %v10390_v38  ;;  %v10444_v38 = vcombine.high %v2086_v46, %v2090_v35  ;;  %v10484_v33 = vcombine.high %v2126_v0, %v2130_v56 }
 0x250   :  { %8048 = vmatpush1.bf16.msra.mxu0 %v10387_v44  ;;  %v2099_v44 = vld [vmem:[#allocation9 + $0xf28] sm:$0xff] }
 0x251   :  { %8376 = vmatpush1.bf16.msra.mxu1 %v10389_v60  ;;  %8049 = vmatprep.subr.bf16.mxu0 %v10396_v61  ;;  %v10443_v60 = vcombine.low %v2086_v46, %v2090_v35  ;;  %v10445_v61 = vcombine.low %v2087_v42, %v2091_v15  ;;  %v10454_v49 = vcombine.high %v2095_v59, %v2099_v44  ;;  %v2139_v46 = vld [vmem:[#allocation9 + $0x1068] sm:$0xff] }
 0x252   :  { %8377 = vmatprep.subr.bf16.mxu1 %v10398_v62  ;;  %v10452_v62 = vcombine.high %v2094_v58, %v2098_v24  ;;  %v12257_v35 = vcombine.high %v12237_v1, %v12237_v1 }
 0x254   :  { %8050 = vmatpush1.bf16.msra.mxu0 %v10395_v6  ;;  %v2107_v6 = vld [vmem:[#allocation9 + $0xf68] sm:$0xff] }
 0x255   :  { %8378 = vmatpush1.bf16.msra.mxu1 %v10397_v4  ;;  %8051 = vmatprep.subr.bf16.mxu0 %v10404_v9  ;;  %v10451_v4 = vcombine.low %v2094_v58, %v2098_v24  ;;  %v10453_v9 = vcombine.low %v2095_v59, %v2099_v44  ;;  %v10462_v11 = vcombine.high %v2103_v3, %v2107_v6  ;;  %v2143_v58 = vld [vmem:[#allocation9 + $0x1088] sm:$0xff] }
 0x256   :  { %8379 = vmatprep.subr.bf16.mxu1 %v10406_v10  ;;  %v10460_v10 = vcombine.high %v2102_v63, %v2106_v2  ;;  %v2147_v24 = vld [vmem:[#allocation9 + $0x10a8] sm:$0xff] }
 0x258   :  { %8052 = vmatpush1.bf16.msra.mxu0 %v10403_v43  ;;  %v2115_v43 = vld [vmem:[#allocation9 + $0xfa8] sm:$0xff] }
 0x259   :  { %8380 = vmatpush1.bf16.msra.mxu1 %v10405_v51  ;;  %8053 = vmatprep.subr.bf16.mxu0 %v10412_v52  ;;  %v10459_v51 = vcombine.low %v2102_v63, %v2106_v2  ;;  %v10461_v52 = vcombine.low %v2103_v3, %v2107_v6  ;;  %v10470_v8 = vcombine.high %v2111_v50, %v2115_v43  ;;  %v2151_v63 = vld [vmem:[#allocation9 + $0x10c8] sm:$0xff] }
 0x25a   :  { %8381 = vmatprep.subr.bf16.mxu1 %v10414_v13  ;;  %v10468_v13 = vcombine.high %v2110_v48, %v2114_v27  ;;  %v2155_v2 = vld [vmem:[#allocation9 + $0x10e8] sm:$0xff]  ;;  %v10501_v6 = vcombine.low %v2143_v58, %v2147_v24 }
 0x25c   :  { %8054 = vmatpush1.bf16.msra.mxu0 %v10411_v20  ;;  %v2123_v20 = vld [vmem:[#allocation9 + $0xfe8] sm:$0xff] }
 0x25d   :  { %8382 = vmatpush1.bf16.msra.mxu1 %v10413_v21  ;;  %8055 = vmatprep.subr.bf16.mxu0 %v10420_v22  ;;  %v10467_v21 = vcombine.low %v2110_v48, %v2114_v27  ;;  %v12247_v22 = vld [vmem:[#allocation2 + $0x8] sm:$0xff]  ;;  %v10478_v26 = vcombine.high %v2119_v18, %v2123_v20  ;;  %v10477_v31 = vcombine.low %v2119_v18, %v2123_v20 }
 0x25e   :  { %8383 = vmatprep.subr.bf16.mxu1 %v10422_v25  ;;  %v10469_v25 = vcombine.low %v2111_v50, %v2115_v43  ;;  %v2159_v48 = vld [vmem:[#allocation9 + $0x1108] sm:$0xff]  ;;  %v10509_v43 = vcombine.low %v2151_v63, %v2155_v2 }
 0x25f   :  { %v2163_v27 = vld [vmem:[#allocation9 + $0x1128] sm:$0xff] }
 0x260   :  { %8056 = vmatpush1.bf16.msra.mxu0 %v10419_v29  ;;  %v2127_v29 = vld [vmem:[#allocation9 + $0x1008] sm:$0xff]  ;;  %v10517_v20 = vcombine.low %v2159_v48, %v2163_v27 }
 0x261   :  { %8384 = vmatpush1.bf16.msra.mxu1 %v10421_v30  ;;  %8057 = vmatprep.subr.bf16.mxu0 %v10428_v32  ;;  %v2131_v30 = vld [vmem:[#allocation9 + $0x1028] sm:$0xff]  ;;  %v12251_v32 = vrot.slane %v12247_v22, %v12181_v19 }
 0x262   :  { %8385 = vmatprep.subr.bf16.mxu1 %v10430_v12  ;;  %v10475_v12 = vcombine.low %v2118_v14, %v2122_v17  ;;  %v10486_v34 = vcombine.high %v2127_v29, %v2131_v30  ;;  %v10485_v42 = vcombine.low %v2127_v29, %v2131_v30  ;;  %v2167_v14 = vld [vmem:[#allocation9 + $0x1148] sm:$0xff] }
 0x263   :  { %v2746_v37 = vcombine.high %v12251_v32, %v12251_v32  ;;  %v2171_v17 = vld [vmem:[#allocation9 + $0x1168] sm:$0xff] }
 0x264   :  { %8058 = vmatpush1.bf16.msra.mxu0 %v10427_v39  ;;  %v2134_v39 = vld [vmem:[#allocation9 + $0x1040] sm:$0xff]  ;;  %v10525_v30 = vcombine.low %v2167_v14, %v2171_v17 }
 0x265   :  { %8386 = vmatpush1.bf16.msra.mxu1 %v10429_v40  ;;  %8059 = vmatprep.subr.bf16.mxu0 %v10436_v45  ;;  %v2138_v40 = vld [vmem:[#allocation9 + $0x1060] sm:$0xff]  ;;  %v10483_v45 = vcombine.low %v2126_v0, %v2130_v56  ;;  %v2175_v0 = vld [vmem:[#allocation9 + $0x1188] sm:$0xff] }
 0x266   :  { %8387 = vmatprep.subr.bf16.mxu1 %v10438_v47  ;;  %v2135_v47 = vld [vmem:[#allocation9 + $0x1048] sm:$0xff]  ;;  %v10492_v15 = vcombine.high %v2134_v39, %v2138_v40  ;;  %v10491_v59 = vcombine.low %v2134_v39, %v2138_v40 }
 0x267   :  { %v10493_v44 = vcombine.low %v2135_v47, %v2139_v46  ;;  %v2179_v56 = vld [vmem:[#allocation9 + $0x11a8] sm:$0xff] }
 0x268   :  { %8060 = vmatpush1.bf16.msra.mxu0 %v10435_v28  ;;  %v2142_v28 = vld [vmem:[#allocation9 + $0x1080] sm:$0xff]  ;;  %v2187_v39 = vld [vmem:[#allocation9 + $0x11e8] sm:$0xff] }
 0x269   :  { %8388 = vmatpush1.bf16.msra.mxu1 %v10437_v53  ;;  %8061 = vmatprep.subr.bf16.mxu0 %v10444_v38  ;;  %v2146_v53 = vld [vmem:[#allocation9 + $0x10a0] sm:$0xff]  ;;  %v12261_v38 = vrot.slane %v2746_v37, %v12181_v19  ;;  %v2183_v37 = vld [vmem:[#allocation9 + $0x11c8] sm:$0xff] }
 0x26a   :  { %8389 = vmatprep.subr.bf16.mxu1 %v10446_v57  ;;  %v10494_v57 = vcombine.high %v2135_v47, %v2139_v46  ;;  %v10499_v3 = vcombine.low %v2142_v28, %v2146_v53  ;;  %v10542_v46 = vcombine.high %v2183_v37, %v2187_v39 }
 0x26c   :  { %8062 = vmatpush1.bf16.msra.mxu0 %v10443_v60  ;;  %v10500_v60 = vcombine.high %v2142_v28, %v2146_v53  ;;  %v2191_v28 = vld [vmem:[#allocation9 + $0x1208] sm:$0xff] }
 0x26d   :  { %8390 = vmatpush1.bf16.msra.mxu1 %v10445_v61  ;;  %8063 = vmatprep.subr.bf16.mxu0 %v10452_v62  ;;  %v10502_v61 = vcombine.high %v2143_v58, %v2147_v24  ;;  %v2150_v62 = vld [vmem:[#allocation9 + $0x10c0] sm:$0xff]  ;;  %v2195_v53 = vld [vmem:[#allocation9 + $0x1228] sm:$0xff]  ;;  %v10541_v58 = vcombine.low %v2183_v37, %v2187_v39 }
 0x26e   :  { %8391 = vmatprep.subr.bf16.mxu1 %v10454_v49  ;;  %v2154_v49 = vld [vmem:[#allocation9 + $0x10e0] sm:$0xff] }
 0x26f   :  { %v10507_v50 = vcombine.low %v2150_v62, %v2154_v49 }
 0x270   :  { %8064 = vmatpush1.bf16.msra.mxu0 %v10451_v4  ;;  %v10508_v4 = vcombine.high %v2150_v62, %v2154_v49  ;;  %v2203_v62 = vld [vmem:[#allocation9 + $0x1268] sm:$0xff] }
 0x271   :  { %8392 = vmatpush1.bf16.msra.mxu1 %v10453_v9  ;;  %8065 = vmatprep.subr.bf16.mxu0 %v10460_v10  ;;  %v10510_v9 = vcombine.high %v2151_v63, %v2155_v2  ;;  %v2158_v10 = vld [vmem:[#allocation9 + $0x1100] sm:$0xff]  ;;  %v10549_v63 = vcombine.low %v2191_v28, %v2195_v53 }
 0x272   :  { %8393 = vmatprep.subr.bf16.mxu1 %v10462_v11  ;;  %v2162_v11 = vld [vmem:[#allocation9 + $0x1120] sm:$0xff] }
 0x273   :  { %v10515_v18 = vcombine.low %v2158_v10, %v2162_v11 }
 0x274   :  { %8066 = vmatpush1.bf16.msra.mxu0 %v10459_v51  ;;  %v10516_v51 = vcombine.high %v2158_v10, %v2162_v11  ;;  %v2211_v10 = vld [vmem:[#allocation9 + $0x12a8] sm:$0xff] }
 0x275   :  { %8394 = vmatpush1.bf16.msra.mxu1 %v10461_v52  ;;  %8067 = vmatprep.subr.bf16.mxu0 %v10468_v13  ;;  %v10518_v52 = vcombine.high %v2159_v48, %v2163_v27  ;;  %v2166_v13 = vld [vmem:[#allocation9 + $0x1140] sm:$0xff] }
 0x276   :  { %8395 = vmatprep.subr.bf16.mxu1 %v10470_v8  ;;  %v2170_v8 = vld [vmem:[#allocation9 + $0x1160] sm:$0xff] }
 0x277   :  { %v10523_v29 = vcombine.low %v2166_v13, %v2170_v8 }
 0x278   :  { %8068 = vmatpush1.bf16.msra.mxu0 %v10467_v21  ;;  %v10524_v21 = vcombine.high %v2166_v13, %v2170_v8  ;;  %v2219_v13 = vld [vmem:[#allocation9 + $0x12e8] sm:$0xff] }
 0x279   :  { %8396 = vmatpush1.bf16.msra.mxu1 %v10469_v25  ;;  %8069 = vmatprep.subr.bf16.mxu0 %v10476_v23  ;;  %v10526_v25 = vcombine.high %v2167_v14, %v2171_v17  ;;  %v2174_v23 = vld [vmem:[#allocation9 + $0x1180] sm:$0xff] }
 0x27a   :  { %8397 = vmatprep.subr.bf16.mxu1 %v10478_v26  ;;  %v2178_v26 = vld [vmem:[#allocation9 + $0x11a0] sm:$0xff] }
 0x27b   :  { %v10531_v40 = vcombine.low %v2174_v23, %v2178_v26 }
 0x27c   :  { %8070 = vmatpush1.bf16.msra.mxu0 %v10475_v12  ;;  %v10532_v12 = vcombine.high %v2174_v23, %v2178_v26  ;;  %v2227_v23 = vld [vmem:[#allocation9 + $0x1328] sm:$0xff] }
 0x27d   :  { %8398 = vmatpush1.bf16.msra.mxu1 %v10477_v31  ;;  %8080 = vmatprep.subr.bf16.mxu0 %v10484_v33  ;;  %v10534_v31 = vcombine.high %v2175_v0, %v2179_v56  ;;  %v2182_v33 = vld [vmem:[#allocation9 + $0x11c0] sm:$0xff] }
 0x27e   :  { %8408 = vmatprep.subr.bf16.mxu1 %v10486_v34  ;;  %v2186_v34 = vld [vmem:[#allocation9 + $0x11e0] sm:$0xff] }
 0x27f   :  { %8072 = vmatmul.mubr.bf16.vlgmr.msra.gmra.mrb[32].mxu0 %v12257_v35  ;;  %v10540_v47 = vcombine.high %v2182_v33, %v2186_v34 }
 0x280   :  { %8400 = vmatmul.mubr.bf16.vlgmr.msra.gmra.mrb[32].mxu1 %v12257_v35  ;;  %8081 = vmatpush1.bf16.msra.mxu0 %v10483_v45  ;;  %v10533_v45 = vcombine.low %v2175_v0, %v2179_v56 }
 0x281   :  { %8112 = vmatprep.mubr.bf16.mxu0 %v12261_v38  ;;  %8409 = vmatpush1.bf16.msra.mxu1 %v10485_v42  ;;  %v2190_v42 = vld [vmem:[#allocation9 + $0x1200] sm:$0xff] }
 0x282   :  { %8440 = vmatprep.mubr.bf16.mxu1 %v12261_v38  ;;  %8082 = vmatprep.subr.bf16.mxu0 %v10492_v15  ;;  %v2194_v15 = vld [vmem:[#allocation9 + $0x1220] sm:$0xff] }
 0x283   :  { %8410 = vmatprep.subr.bf16.mxu1 %v10494_v57  ;;  %v10539_v57 = vcombine.low %v2182_v33, %v2186_v34  ;;  %v10548_v24 = vcombine.high %v2190_v42, %v2194_v15  ;;  %v10547_v49 = vcombine.low %v2190_v42, %v2194_v15  ;;  %v2235_v33 = vld [vmem:[#allocation9 + $0x1368] sm:$0xff] }
 0x284   :  { %8083 = vmatpush1.bf16.msra.mxu0 %v10491_v59  ;;  %v10550_v59 = vcombine.high %v2191_v28, %v2195_v53  ;;  %v2243_v42 = vld [vmem:[#allocation9 + $0x13a8] sm:$0xff] }
 0x285   :  { %8411 = vmatpush1.bf16.msra.mxu1 %v10493_v44  ;;  %8084 = vmatprep.subr.bf16.mxu0 %v10500_v60  ;;  %v2198_v44 = vld [vmem:[#allocation9 + $0x1240] sm:$0xff] }
 0x286   :  { %8412 = vmatprep.subr.bf16.mxu1 %v10502_v61  ;;  %v2202_v60 = vld [vmem:[#allocation9 + $0x1260] sm:$0xff]  ;;  %v2199_v61 = vld [vmem:[#allocation9 + $0x1248] sm:$0xff] }
 0x287   :  { %v10556_v2 = vcombine.high %v2198_v44, %v2202_v60  ;;  %v10555_v11 = vcombine.low %v2198_v44, %v2202_v60  ;;  %v10557_v48 = vcombine.low %v2199_v61, %v2203_v62  ;;  %v2251_v44 = vld [vmem:[#allocation9 + $0x13e8] sm:$0xff] }
 0x288   :  { %8085 = vmatpush1.bf16.msra.mxu0 %v10499_v3  ;;  %v10558_v3 = vcombine.high %v2199_v61, %v2203_v62 }
 0x289   :  { %8413 = vmatpush1.bf16.msra.mxu1 %v10501_v6  ;;  %8086 = vmatprep.subr.bf16.mxu0 %v10508_v4  ;;  %v2206_v6 = vld [vmem:[#allocation9 + $0x1280] sm:$0xff] }
 0x28a   :  { %8414 = vmatprep.subr.bf16.mxu1 %v10510_v9  ;;  %v2210_v4 = vld [vmem:[#allocation9 + $0x12a0] sm:$0xff]  ;;  %v2207_v9 = vld [vmem:[#allocation9 + $0x1288] sm:$0xff] }
 0x28b   :  { %v10564_v27 = vcombine.high %v2206_v6, %v2210_v4  ;;  %v10563_v8 = vcombine.low %v2206_v6, %v2210_v4  ;;  %v10565_v14 = vcombine.low %v2207_v9, %v2211_v10  ;;  %v2259_v6 = vld [vmem:[#allocation9 + $0x1428] sm:$0xff] }
 0x28c   :  { %8087 = vmatpush1.bf16.msra.mxu0 %v10507_v50  ;;  %v10566_v50 = vcombine.high %v2207_v9, %v2211_v10 }
 0x28d   :  { %8415 = vmatpush1.bf16.msra.mxu1 %v10509_v43  ;;  %8088 = vmatprep.subr.bf16.mxu0 %v10516_v51  ;;  %v2214_v43 = vld [vmem:[#allocation9 + $0x12c0] sm:$0xff] }
 0x28e   :  { %8416 = vmatprep.subr.bf16.mxu1 %v10518_v52  ;;  %v2218_v51 = vld [vmem:[#allocation9 + $0x12e0] sm:$0xff]  ;;  %v2215_v52 = vld [vmem:[#allocation9 + $0x12c8] sm:$0xff] }
 0x28f   :  { %v10572_v17 = vcombine.high %v2214_v43, %v2218_v51  ;;  %v10571_v26 = vcombine.low %v2214_v43, %v2218_v51  ;;  %v10573_v0 = vcombine.low %v2215_v52, %v2219_v13  ;;  %v2263_v43 = vld [vmem:[#allocation9 + $0x1448] sm:$0xff] }
 0x290   :  { %8089 = vmatpush1.bf16.msra.mxu0 %v10515_v18  ;;  %v10574_v18 = vcombine.high %v2215_v52, %v2219_v13  ;;  %v2267_v51 = vld [vmem:[#allocation9 + $0x1468] sm:$0xff]  ;;  %v12268_v52 = vrot.slane %v12251_v32, %v12181_v19 }
 0x291   :  { %8417 = vmatpush1.bf16.msra.mxu1 %v10517_v20  ;;  %8090 = vmatprep.subr.bf16.mxu0 %v10524_v21  ;;  %v2222_v20 = vld [vmem:[#allocation9 + $0x1300] sm:$0xff] }
 0x292   :  { %8418 = vmatprep.subr.bf16.mxu1 %v10526_v25  ;;  %v2226_v21 = vld [vmem:[#allocation9 + $0x1320] sm:$0xff]  ;;  %v2223_v25 = vld [vmem:[#allocation9 + $0x1308] sm:$0xff] }
 0x293   :  { %v10580_v56 = vcombine.high %v2222_v20, %v2226_v21  ;;  %v10579_v34 = vcombine.low %v2222_v20, %v2226_v21  ;;  %v10581_v37 = vcombine.low %v2223_v25, %v2227_v23  ;;  %v10622_v20 = vcombine.high %v2263_v43, %v2267_v51  ;;  %v2271_v21 = vld [vmem:[#allocation9 + $0x1488] sm:$0xff] }
 0x294   :  { %8091 = vmatpush1.bf16.msra.mxu0 %v10523_v29  ;;  %v10582_v29 = vcombine.high %v2223_v25, %v2227_v23  ;;  %v2275_v25 = vld [vmem:[#allocation9 + $0x14a8] sm:$0xff]  ;;  %v10621_v23 = vcombine.low %v2263_v43, %v2267_v51 }
 0x295   :  { %8419 = vmatpush1.bf16.msra.mxu1 %v10525_v30  ;;  %8092 = vmatprep.subr.bf16.mxu0 %v10532_v12  ;;  %v2230_v30 = vld [vmem:[#allocation9 + $0x1340] sm:$0xff] }
 0x296   :  { %8420 = vmatprep.subr.bf16.mxu1 %v10534_v31  ;;  %v2234_v12 = vld [vmem:[#allocation9 + $0x1360] sm:$0xff]  ;;  %v2231_v31 = vld [vmem:[#allocation9 + $0x1348] sm:$0xff] }
 0x297   :  { %v10588_v39 = vcombine.high %v2230_v30, %v2234_v12  ;;  %v10587_v15 = vcombine.low %v2230_v30, %v2234_v12  ;;  %v10589_v28 = vcombine.low %v2231_v31, %v2235_v33  ;;  %v2279_v30 = vld [vmem:[#allocation9 + $0x14c8] sm:$0xff] }
 0x298   :  { %8093 = vmatpush1.bf16.msra.mxu0 %v10531_v40  ;;  %v10590_v40 = vcombine.high %v2231_v31, %v2235_v33  ;;  %v2283_v12 = vld [vmem:[#allocation9 + $0x14e8] sm:$0xff]  ;;  %v10629_v33 = vcombine.low %v2271_v21, %v2275_v25 }
 0x299   :  { %8421 = vmatpush1.bf16.msra.mxu1 %v10533_v45  ;;  %8094 = vmatprep.subr.bf16.mxu0 %v10540_v47  ;;  %v2238_v45 = vld [vmem:[#allocation9 + $0x1380] sm:$0xff] }
 0x29a   :  { %8422 = vmatprep.subr.bf16.mxu1 %v10542_v46  ;;  %v2242_v47 = vld [vmem:[#allocation9 + $0x13a0] sm:$0xff]  ;;  %v2239_v46 = vld [vmem:[#allocation9 + $0x1388] sm:$0xff] }
 0x29b   :  { %v10596_v53 = vcombine.high %v2238_v45, %v2242_v47  ;;  %v10595_v60 = vcombine.low %v2238_v45, %v2242_v47  ;;  %v10597_v61 = vcombine.low %v2239_v46, %v2243_v42  ;;  %v2287_v45 = vld [vmem:[#allocation9 + $0x1508] sm:$0xff] }
 0x29c   :  { %8095 = vmatpush1.bf16.msra.mxu0 %v10539_v57  ;;  %v10598_v57 = vcombine.high %v2239_v46, %v2243_v42  ;;  %v2291_v47 = vld [vmem:[#allocation9 + $0x1528] sm:$0xff]  ;;  %v10637_v42 = vcombine.low %v2279_v30, %v2283_v12 }
 0x29d   :  { %8423 = vmatpush1.bf16.msra.mxu1 %v10541_v58  ;;  %8096 = vmatprep.subr.bf16.mxu0 %v10548_v24  ;;  %v2246_v58 = vld [vmem:[#allocation9 + $0x13c0] sm:$0xff] }
 0x29e   :  { %8424 = vmatprep.subr.bf16.mxu1 %v10550_v59  ;;  %v2250_v24 = vld [vmem:[#allocation9 + $0x13e0] sm:$0xff]  ;;  %v2247_v59 = vld [vmem:[#allocation9 + $0x13c8] sm:$0xff] }
 0x29f   :  { %v10604_v62 = vcombine.high %v2246_v58, %v2250_v24  ;;  %v10603_v4 = vcombine.low %v2246_v58, %v2250_v24  ;;  %v10605_v9 = vcombine.low %v2247_v59, %v2251_v44  ;;  %v2295_v58 = vld [vmem:[#allocation9 + $0x1548] sm:$0xff] }
 0x2a0   :  { %8097 = vmatpush1.bf16.msra.mxu0 %v10547_v49  ;;  %v10606_v49 = vcombine.high %v2247_v59, %v2251_v44  ;;  %v2299_v24 = vld [vmem:[#allocation9 + $0x1568] sm:$0xff]  ;;  %v10645_v44 = vcombine.low %v2287_v45, %v2291_v47 }
 0x2a1   :  { %8425 = vmatpush1.bf16.msra.mxu1 %v10549_v63  ;;  %8098 = vmatprep.subr.bf16.mxu0 %v10556_v2  ;;  %v2254_v63 = vld [vmem:[#allocation9 + $0x1400] sm:$0xff] }
 0x2a2   :  { %8426 = vmatprep.subr.bf16.mxu1 %v10558_v3  ;;  %v2258_v2 = vld [vmem:[#allocation9 + $0x1420] sm:$0xff]  ;;  %v2255_v3 = vld [vmem:[#allocation9 + $0x1408] sm:$0xff] }
 0x2a3   :  { %v10612_v10 = vcombine.high %v2254_v63, %v2258_v2  ;;  %v10613_v13 = vcombine.low %v2255_v3, %v2259_v6 }
 0x2a4   :  { %8099 = vmatpush1.bf16.msra.mxu0 %v10555_v11  ;;  %v10614_v11 = vcombine.high %v2255_v3, %v2259_v6  ;;  %v10653_v6 = vcombine.low %v2295_v58, %v2299_v24 }
 0x2a5   :  { %8427 = vmatpush1.bf16.msra.mxu1 %v10557_v48  ;;  %8100 = vmatprep.subr.bf16.mxu0 %v10564_v27  ;;  %v2262_v48 = vld [vmem:[#allocation9 + $0x1440] sm:$0xff] }
 0x2a6   :  { %8428 = vmatprep.subr.bf16.mxu1 %v10566_v50  ;;  %v2266_v27 = vld [vmem:[#allocation9 + $0x1460] sm:$0xff]  ;;  %v10611_v50 = vcombine.low %v2254_v63, %v2258_v2  ;;  %v2303_v63 = vld [vmem:[#allocation9 + $0x1588] sm:$0xff] }
 0x2a7   :  { %v10619_v32 = vcombine.low %v2262_v48, %v2266_v27  ;;  %v2307_v2 = vld [vmem:[#allocation9 + $0x15a8] sm:$0xff] }
 0x2a8   :  { %8101 = vmatpush1.bf16.msra.mxu0 %v10563_v8  ;;  %v10620_v8 = vcombine.high %v2262_v48, %v2266_v27  ;;  %v2311_v48 = vld [vmem:[#allocation9 + $0x15c8] sm:$0xff]  ;;  %v10661_v43 = vcombine.low %v2303_v63, %v2307_v2 }
 0x2a9   :  { %8429 = vmatpush1.bf16.msra.mxu1 %v10565_v14  ;;  %8102 = vmatprep.subr.bf16.mxu0 %v10572_v17  ;;  %v2270_v14 = vld [vmem:[#allocation9 + $0x1480] sm:$0xff]  ;;  %v2315_v27 = vld [vmem:[#allocation9 + $0x15e8] sm:$0xff] }
 0x2aa   :  { %8430 = vmatprep.subr.bf16.mxu1 %v10574_v18  ;;  %v2274_v17 = vld [vmem:[#allocation9 + $0x14a0] sm:$0xff]  ;;  %v12273_v18 = vcombine.high %v12261_v38, %v12261_v38 }
 0x2ab   :  { %v10627_v31 = vcombine.low %v2270_v14, %v2274_v17 }
 0x2ac   :  { %8103 = vmatpush1.bf16.msra.mxu0 %v10571_v26  ;;  %v10628_v26 = vcombine.high %v2270_v14, %v2274_v17  ;;  %v2322_v14 = vld [vmem:[#allocation9 + $0x1620] sm:$0xff]  ;;  %v2319_v17 = vld [vmem:[#allocation9 + $0x1608] sm:$0xff] }
 0x2ad   :  { %8431 = vmatpush1.bf16.msra.mxu1 %v10573_v0  ;;  %8104 = vmatprep.subr.bf16.mxu0 %v10580_v56  ;;  %v10630_v0 = vcombine.high %v2271_v21, %v2275_v25  ;;  %v2278_v56 = vld [vmem:[#allocation9 + $0x14c0] sm:$0xff]  ;;  %v10669_v25 = vcombine.low %v2311_v48, %v2315_v27 }
 0x2ae   :  { %8432 = vmatprep.subr.bf16.mxu1 %v10582_v29  ;;  %v2282_v29 = vld [vmem:[#allocation9 + $0x14e0] sm:$0xff] }
 0x2af   :  { %v10635_v46 = vcombine.low %v2278_v56, %v2282_v29 }
 0x2b0   :  { %8105 = vmatpush1.bf16.msra.mxu0 %v10579_v34  ;;  %v10636_v34 = vcombine.high %v2278_v56, %v2282_v29  ;;  %v2327_v56 = vld [vmem:[#allocation9 + $0x1648] sm:$0xff] }
 0x2b1   :  { %8433 = vmatpush1.bf16.msra.mxu1 %v10581_v37  ;;  %8106 = vmatprep.subr.bf16.mxu0 %v10588_v39  ;;  %v10638_v37 = vcombine.high %v2279_v30, %v2283_v12  ;;  %v2286_v39 = vld [vmem:[#allocation9 + $0x1500] sm:$0xff]  ;;  %v2331_v29 = vld [vmem:[#allocation9 + $0x1668] sm:$0xff] }
 0x2b2   :  { %8434 = vmatprep.subr.bf16.mxu1 %v10590_v40  ;;  %v2290_v40 = vld [vmem:[#allocation9 + $0x1520] sm:$0xff] }
 0x2b3   :  { %v10643_v59 = vcombine.low %v2286_v39, %v2290_v40 }
 0x2b4   :  { %8107 = vmatpush1.bf16.msra.mxu0 %v10587_v15  ;;  %v10644_v15 = vcombine.high %v2286_v39, %v2290_v40  ;;  %v2335_v39 = vld [vmem:[#allocation9 + $0x1688] sm:$0xff] }
 0x2b5   :  { %8435 = vmatpush1.bf16.msra.mxu1 %v10589_v28  ;;  %8108 = vmatprep.subr.bf16.mxu0 %v10596_v53  ;;  %v10646_v28 = vcombine.high %v2287_v45, %v2291_v47  ;;  %v2294_v53 = vld [vmem:[#allocation9 + $0x1540] sm:$0xff]  ;;  %v2339_v40 = vld [vmem:[#allocation9 + $0x16a8] sm:$0xff]  ;;  %v10685_v47 = vcombine.low %v2327_v56, %v2331_v29 }
 0x2b6   :  { %8436 = vmatprep.subr.bf16.mxu1 %v10598_v57  ;;  %v2298_v57 = vld [vmem:[#allocation9 + $0x1560] sm:$0xff] }
 0x2b7   :  { %v10651_v3 = vcombine.low %v2294_v53, %v2298_v57 }
 0x2b8   :  { %8109 = vmatpush1.bf16.msra.mxu0 %v10595_v60  ;;  %v10652_v60 = vcombine.high %v2294_v53, %v2298_v57  ;;  %v2343_v53 = vld [vmem:[#allocation9 + $0x16c8] sm:$0xff] }
 0x2b9   :  { %8437 = vmatpush1.bf16.msra.mxu1 %v10597_v61  ;;  %8110 = vmatprep.subr.bf16.mxu0 %v10604_v62  ;;  %v10654_v61 = vcombine.high %v2295_v58, %v2299_v24  ;;  %v2302_v62 = vld [vmem:[#allocation9 + $0x1580] sm:$0xff]  ;;  %v2347_v57 = vld [vmem:[#allocation9 + $0x16e8] sm:$0xff]  ;;  %v10693_v24 = vcombine.low %v2335_v39, %v2339_v40 }
 0x2ba   :  { %8438 = vmatprep.subr.bf16.mxu1 %v10606_v49  ;;  %v2306_v49 = vld [vmem:[#allocation9 + $0x15a0] sm:$0xff] }
 0x2bc   :  { %8111 = vmatpush1.bf16.msra.mxu0 %v10603_v4  ;;  %v10660_v4 = vcombine.high %v2302_v62, %v2306_v49 }
 0x2bd   :  { %8439 = vmatpush1.bf16.msra.mxu1 %v10605_v9  ;;  %8121 = vmatprep.subr.bf16.mxu0 %v10612_v10  ;;  %v10662_v9 = vcombine.high %v2303_v63, %v2307_v2  ;;  %v2310_v10 = vld [vmem:[#allocation9 + $0x15c0] sm:$0xff]  ;;  %v10701_v2 = vcombine.low %v2343_v53, %v2347_v57 }
 0x2be   :  { %8449 = vmatprep.subr.bf16.mxu1 %v10614_v11  ;;  %v2314_v11 = vld [vmem:[#allocation9 + $0x15e0] sm:$0xff] }
 0x2bf   :  { %8113 = vmatmul.mubr.bf16.vlgmr.msra.gmra.mrb[32].mxu0 %v12268_v52  ;;  %v10668_v51 = vcombine.high %v2310_v10, %v2314_v11  ;;  %v10667_v21 = vcombine.low %v2310_v10, %v2314_v11  ;;  %v2359_v10 = vld [vmem:[#allocation9 + $0x1748] sm:$0xff] }
 0x2c0   :  { %8441 = vmatmul.mubr.bf16.vlgmr.msra.gmra.mrb[32].mxu1 %v12268_v52  ;;  %8122 = vmatpush1.bf16.msra.mxu0 %v10611_v50  ;;  %v10659_v50 = vcombine.low %v2302_v62, %v2306_v49  ;;  %v2351_v62 = vld [vmem:[#allocation9 + $0x1708] sm:$0xff] }
 0x2c1   :  { %8153 = vmatprep.mubr.bf16.mxu0 %v12273_v18  ;;  %8450 = vmatpush1.bf16.msra.mxu1 %v10613_v13  ;;  %v10670_v13 = vcombine.high %v2311_v48, %v2315_v27  ;;  %v2355_v49 = vld [vmem:[#allocation9 + $0x1728] sm:$0xff] }
 0x2c2   :  { %8481 = vmatprep.mubr.bf16.mxu1 %v12273_v18  ;;  %8123 = vmatprep.subr.bf16.mxu0 %v10620_v8  ;;  %v2318_v8 = vld [vmem:[#allocation9 + $0x1600] sm:$0xff]  ;;  %v2363_v11 = vld [vmem:[#allocation9 + $0x1768] sm:$0xff]  ;;  %v10709_v27 = vcombine.low %v2351_v62, %v2355_v49 }
 0x2c3   :  { %8451 = vmatprep.subr.bf16.mxu1 %v10622_v20  ;;  %v2323_v20 = vld [vmem:[#allocation9 + $0x1628] sm:$0xff]  ;;  %v10675_v30 = vcombine.low %v2318_v8, %v2322_v14 }
 0x2c4   :  { %8124 = vmatpush1.bf16.msra.mxu0 %v10619_v32  ;;  %v10676_v32 = vcombine.high %v2318_v8, %v2322_v14  ;;  %v10677_v12 = vcombine.low %v2319_v17, %v2323_v20  ;;  %v2367_v8 = vld [vmem:[#allocation9 + $0x1788] sm:$0xff] }
 0x2c5   :  { %8452 = vmatpush1.bf16.msra.mxu1 %v10621_v23  ;;  %8125 = vmatprep.subr.bf16.mxu0 %v10628_v26  ;;  %v10678_v23 = vcombine.high %v2319_v17, %v2323_v20  ;;  %v2326_v26 = vld [vmem:[#allocation9 + $0x1640] sm:$0xff]  ;;  %v2371_v14 = vld [vmem:[#allocation9 + $0x17a8] sm:$0xff]  ;;  %v10717_v20 = vcombine.low %v2359_v10, %v2363_v11 }
 0x2c6   :  { %8453 = vmatprep.subr.bf16.mxu1 %v10630_v0  ;;  %v2330_v0 = vld [vmem:[#allocation9 + $0x1660] sm:$0xff] }
 0x2c7   :  { %v10683_v45 = vcombine.low %v2326_v26, %v2330_v0 }
 0x2c8   :  { %8126 = vmatpush1.bf16.msra.mxu0 %v10627_v31  ;;  %v10684_v31 = vcombine.high %v2326_v26, %v2330_v0  ;;  %v2375_v26 = vld [vmem:[#allocation9 + $0x17c8] sm:$0xff] }
 0x2c9   :  { %8454 = vmatpush1.bf16.msra.mxu1 %v10629_v33  ;;  %8127 = vmatprep.subr.bf16.mxu0 %v10636_v34  ;;  %v10686_v33 = vcombine.high %v2327_v56, %v2331_v29  ;;  %v2334_v34 = vld [vmem:[#allocation9 + $0x1680] sm:$0xff]  ;;  %v2379_v0 = vld [vmem:[#allocation9 + $0x17e8] sm:$0xff]  ;;  %v2731_v56 = vcombine.high %v12247_v22, %v12247_v22 }
 0x2ca   :  { %8455 = vmatprep.subr.bf16.mxu1 %v10638_v37  ;;  %v2338_v37 = vld [vmem:[#allocation9 + $0x16a0] sm:$0xff]  ;;  %v10733_v22 = vcombine.low %v2375_v26, %v2379_v0 }
 0x2cb   :  { %v10691_v58 = vcombine.low %v2334_v34, %v2338_v37 }
 0x2cc   :  { %8128 = vmatpush1.bf16.msra.mxu0 %v10635_v46  ;;  %v10692_v46 = vcombine.high %v2334_v34, %v2338_v37  ;;  %v2386_v34 = vld [vmem:[#allocation9 + $0x1820] sm:$0xff]  ;;  %v2383_v37 = vld [vmem:[#allocation9 + $0x1808] sm:$0xff] }
 0x2cd   :  { %8456 = vmatpush1.bf16.msra.mxu1 %v10637_v42  ;;  %8129 = vmatprep.subr.bf16.mxu0 %v10644_v15  ;;  %v10694_v42 = vcombine.high %v2335_v39, %v2339_v40  ;;  %v2342_v15 = vld [vmem:[#allocation9 + $0x16c0] sm:$0xff]  ;;  %v2387_v39 = vld [vmem:[#allocation9 + $0x1828] sm:$0xff]  ;;  %v12281_v40 = vrot.slane %v2731_v56, %v12181_v19 }
 0x2ce   :  { %8457 = vmatprep.subr.bf16.mxu1 %v10646_v28  ;;  %v2346_v28 = vld [vmem:[#allocation9 + $0x16e0] sm:$0xff]  ;;  %v2423_v56 = vld [vmem:[#allocation9 + $0x1948] sm:$0xff] }
 0x2cf   :  { %v10699_v63 = vcombine.low %v2342_v15, %v2346_v28 }
 0x2d0   :  { %8130 = vmatpush1.bf16.msra.mxu0 %v10643_v59  ;;  %v10700_v59 = vcombine.high %v2342_v15, %v2346_v28  ;;  %v2390_v15 = vld [vmem:[#allocation9 + $0x1840] sm:$0xff] }
 0x2d1   :  { %8458 = vmatpush1.bf16.msra.mxu1 %v10645_v44  ;;  %8131 = vmatprep.subr.bf16.mxu0 %v10652_v60  ;;  %v10702_v44 = vcombine.high %v2343_v53, %v2347_v57  ;;  %v2350_v60 = vld [vmem:[#allocation9 + $0x1700] sm:$0xff]  ;;  %v2391_v57 = vld [vmem:[#allocation9 + $0x1848] sm:$0xff] }
 0x2d2   :  { %8459 = vmatprep.subr.bf16.mxu1 %v10654_v61  ;;  %v2354_v61 = vld [vmem:[#allocation9 + $0x1720] sm:$0xff] }
 0x2d3   :  { %v10707_v48 = vcombine.low %v2350_v60, %v2354_v61  ;;  %v2394_v28 = vld [vmem:[#allocation9 + $0x1860] sm:$0xff] }
 0x2d4   :  { %8132 = vmatpush1.bf16.msra.mxu0 %v10651_v3  ;;  %v10708_v3 = vcombine.high %v2350_v60, %v2354_v61  ;;  %v2398_v60 = vld [vmem:[#allocation9 + $0x1880] sm:$0xff] }
 0x2d5   :  { %8460 = vmatpush1.bf16.msra.mxu1 %v10653_v6  ;;  %8133 = vmatprep.subr.bf16.mxu0 %v10660_v4  ;;  %v10710_v6 = vcombine.high %v2351_v62, %v2355_v49  ;;  %v2358_v4 = vld [vmem:[#allocation9 + $0x1740] sm:$0xff] }
 0x2d6   :  { %8461 = vmatprep.subr.bf16.mxu1 %v10662_v9  ;;  %v2362_v9 = vld [vmem:[#allocation9 + $0x1760] sm:$0xff] }
 0x2d7   :  { %v10715_v17 = vcombine.low %v2358_v4, %v2362_v9  ;;  %v2402_v61 = vld [vmem:[#allocation9 + $0x18a0] sm:$0xff] }
 0x2d8   :  { %8134 = vmatpush1.bf16.msra.mxu0 %v10659_v50  ;;  %v10716_v50 = vcombine.high %v2358_v4, %v2362_v9  ;;  %v10756_v4 = vcombine.high %v2398_v60, %v2402_v61 }
 0x2d9   :  { %8462 = vmatpush1.bf16.msra.mxu1 %v10661_v43  ;;  %8135 = vmatprep.subr.bf16.mxu0 %v10668_v51  ;;  %v10718_v43 = vcombine.high %v2359_v10, %v2363_v11  ;;  %v2366_v51 = vld [vmem:[#allocation9 + $0x1780] sm:$0xff] }
 0x2da   :  { %8463 = vmatprep.subr.bf16.mxu1 %v10670_v13  ;;  %v2370_v13 = vld [vmem:[#allocation9 + $0x17a0] sm:$0xff] }
 0x2db   :  { %v10723_v29 = vcombine.low %v2366_v51, %v2370_v13  ;;  %v2406_v10 = vld [vmem:[#allocation9 + $0x18c0] sm:$0xff] }
 0x2dc   :  { %8136 = vmatpush1.bf16.msra.mxu0 %v10667_v21  ;;  %v10724_v21 = vcombine.high %v2366_v51, %v2370_v13  ;;  %v2410_v11 = vld [vmem:[#allocation9 + $0x18e0] sm:$0xff] }
 0x2dd   :  { %8464 = vmatpush1.bf16.msra.mxu1 %v10669_v25  ;;  %8137 = vmatprep.subr.bf16.mxu0 %v10676_v32  ;;  %v10726_v25 = vcombine.high %v2367_v8, %v2371_v14  ;;  %v2374_v32 = vld [vmem:[#allocation9 + $0x17c0] sm:$0xff]  ;;  %v10764_v51 = vcombine.high %v2406_v10, %v2410_v11 }
 0x2de   :  { %8465 = vmatprep.subr.bf16.mxu1 %v10678_v23  ;;  %v2378_v23 = vld [vmem:[#allocation9 + $0x17e0] sm:$0xff] }
 0x2e0   :  { %8138 = vmatpush1.bf16.msra.mxu0 %v10675_v30  ;;  %v10725_v30 = vcombine.low %v2367_v8, %v2371_v14  ;;  %v2414_v8 = vld [vmem:[#allocation9 + $0x1900] sm:$0xff] }
 0x2e1   :  { %8466 = vmatpush1.bf16.msra.mxu1 %v10677_v12  ;;  %8139 = vmatprep.subr.bf16.mxu0 %v10684_v31  ;;  %v10732_v12 = vcombine.high %v2374_v32, %v2378_v23  ;;  %v10734_v31 = vcombine.high %v2375_v26, %v2379_v0  ;;  %v2418_v14 = vld [vmem:[#allocation9 + $0x1920] sm:$0xff] }
 0x2e2   :  { %8467 = vmatprep.subr.bf16.mxu1 %v10686_v33  ;;  %v2382_v33 = vld [vmem:[#allocation9 + $0x1800] sm:$0xff] }
 0x2e3   :  { %v10739_v53 = vcombine.low %v2382_v33, %v2386_v34  ;;  %v2422_v26 = vld [vmem:[#allocation9 + $0x1940] sm:$0xff] }
 0x2e4   :  { %8140 = vmatpush1.bf16.msra.mxu0 %v10683_v45  ;;  %v10731_v45 = vcombine.low %v2374_v32, %v2378_v23  ;;  %v10772_v32 = vcombine.high %v2414_v8, %v2418_v14  ;;  %v2426_v0 = vld [vmem:[#allocation9 + $0x1960] sm:$0xff] }
 0x2e5   :  { %8468 = vmatpush1.bf16.msra.mxu1 %v10685_v47  ;;  %8141 = vmatprep.subr.bf16.mxu0 %v10692_v46  ;;  %v10740_v47 = vcombine.high %v2382_v33, %v2386_v34  ;;  %v10742_v46 = vcombine.high %v2383_v37, %v2387_v39  ;;  %v2430_v34 = vld [vmem:[#allocation9 + $0x1980] sm:$0xff] }
 0x2e6   :  { %8469 = vmatprep.subr.bf16.mxu1 %v10694_v42  ;;  %v2747_v42 = vcombine.high %v12281_v40, %v12281_v40 }
 0x2e8   :  { %8142 = vmatpush1.bf16.msra.mxu0 %v10691_v58  ;;  %v2395_v58 = vld [vmem:[#allocation9 + $0x1868] sm:$0xff]  ;;  %v12291_v62 = vrot.slane %v2747_v42, %v12181_v19 }
 0x2e9   :  { %8470 = vmatpush1.bf16.msra.mxu1 %v10693_v24  ;;  %8143 = vmatprep.subr.bf16.mxu0 %v10700_v59  ;;  %v12287_v24 = vcombine.high %v12268_v52, %v12268_v52  ;;  %v10741_v59 = vcombine.low %v2383_v37, %v2387_v39  ;;  %v10750_v49 = vcombine.high %v2391_v57, %v2395_v58  ;;  %v2434_v37 = vld [vmem:[#allocation9 + $0x19a0] sm:$0xff]  ;;  %v2431_v39 = vld [vmem:[#allocation9 + $0x1988] sm:$0xff] }
 0x2ea   :  { %8471 = vmatprep.subr.bf16.mxu1 %v10702_v44  ;;  %v10748_v44 = vcombine.high %v2390_v15, %v2394_v28 }
 0x2ec   :  { %8144 = vmatpush1.bf16.msra.mxu0 %v10699_v63  ;;  %v2399_v63 = vld [vmem:[#allocation9 + $0x1888] sm:$0xff] }
 0x2ed   :  { %8472 = vmatpush1.bf16.msra.mxu1 %v10701_v2  ;;  %8145 = vmatprep.subr.bf16.mxu0 %v10708_v3  ;;  %v2403_v2 = vld [vmem:[#allocation9 + $0x18a8] sm:$0xff]  ;;  %v10747_v3 = vcombine.low %v2390_v15, %v2394_v28  ;;  %v2438_v15 = vld [vmem:[#allocation9 + $0x19c0] sm:$0xff] }
 0x2ee   :  { %8473 = vmatprep.subr.bf16.mxu1 %v10710_v6  ;;  %v10749_v6 = vcombine.low %v2391_v57, %v2395_v58  ;;  %v10758_v9 = vcombine.high %v2399_v63, %v2403_v2  ;;  %v2442_v28 = vld [vmem:[#allocation9 + $0x19e0] sm:$0xff]  ;;  %v2443_v57 = vld [vmem:[#allocation9 + $0x19e8] sm:$0xff]  ;;  %v10787_v58 = vcombine.low %v2430_v34, %v2434_v37 }
 0x2f0   :  { %8146 = vmatpush1.bf16.msra.mxu0 %v10707_v48  ;;  %v2407_v48 = vld [vmem:[#allocation9 + $0x18c8] sm:$0xff] }
 0x2f1   :  { %8474 = vmatpush1.bf16.msra.mxu1 %v10709_v27  ;;  %8147 = vmatprep.subr.bf16.mxu0 %v10716_v50  ;;  %v2411_v27 = vld [vmem:[#allocation9 + $0x18e8] sm:$0xff]  ;;  %v10755_v50 = vcombine.low %v2398_v60, %v2402_v61  ;;  %v2446_v61 = vld [vmem:[#allocation9 + $0x1a00] sm:$0xff] }
 0x2f2   :  { %8475 = vmatprep.subr.bf16.mxu1 %v10718_v43  ;;  %v10757_v43 = vcombine.low %v2399_v63, %v2403_v2  ;;  %v10766_v13 = vcombine.high %v2407_v48, %v2411_v27  ;;  %v2447_v63 = vld [vmem:[#allocation9 + $0x1a08] sm:$0xff] }
 0x2f3   :  { %v2451_v2 = vld [vmem:[#allocation9 + $0x1a28] sm:$0xff] }
 0x2f4   :  { %8148 = vmatpush1.bf16.msra.mxu0 %v10715_v17  ;;  %v2415_v17 = vld [vmem:[#allocation9 + $0x1908] sm:$0xff] }
 0x2f5   :  { %8476 = vmatpush1.bf16.msra.mxu1 %v10717_v20  ;;  %8149 = vmatprep.subr.bf16.mxu0 %v10724_v21  ;;  %v2419_v20 = vld [vmem:[#allocation9 + $0x1928] sm:$0xff]  ;;  %v10763_v21 = vcombine.low %v2406_v10, %v2410_v11  ;;  %v2454_v10 = vld [vmem:[#allocation9 + $0x1a40] sm:$0xff] }
 0x2f6   :  { %8477 = vmatprep.subr.bf16.mxu1 %v10726_v25  ;;  %v10765_v25 = vcombine.low %v2407_v48, %v2411_v27  ;;  %v10774_v23 = vcombine.high %v2415_v17, %v2419_v20  ;;  %v2458_v11 = vld [vmem:[#allocation9 + $0x1a60] sm:$0xff]  ;;  %v2455_v48 = vld [vmem:[#allocation9 + $0x1a48] sm:$0xff] }
 0x2f7   :  { %v2459_v27 = vld [vmem:[#allocation9 + $0x1a68] sm:$0xff] }
 0x2f8   :  { %8150 = vmatpush1.bf16.msra.mxu0 %v10723_v29  ;;  %v2427_v29 = vld [vmem:[#allocation9 + $0x1968] sm:$0xff] }
 0x2f9   :  { %8478 = vmatpush1.bf16.msra.mxu1 %v10725_v30  ;;  %8151 = vmatprep.subr.bf16.mxu0 %v10732_v12  ;;  %v10771_v30 = vcombine.low %v2414_v8, %v2418_v14  ;;  %v10773_v12 = vcombine.low %v2415_v17, %v2419_v20  ;;  %v10782_v33 = vcombine.high %v2423_v56, %v2427_v29  ;;  %v2462_v8 = vld [vmem:[#allocation9 + $0x1a80] sm:$0xff]  ;;  %v2463_v17 = vld [vmem:[#allocation9 + $0x1a88] sm:$0xff] }
 0x2fa   :  { %8479 = vmatprep.subr.bf16.mxu1 %v10734_v31  ;;  %v10780_v31 = vcombine.high %v2422_v26, %v2426_v0  ;;  %v2466_v14 = vld [vmem:[#allocation9 + $0x1aa0] sm:$0xff]  ;;  %v2467_v20 = vld [vmem:[#allocation9 + $0x1aa8] sm:$0xff] }
 0x2fc   :  { %8152 = vmatpush1.bf16.msra.mxu0 %v10731_v45  ;;  %v2435_v45 = vld [vmem:[#allocation9 + $0x19a8] sm:$0xff] }
 0x2fd   :  { %8480 = vmatpush1.bf16.msra.mxu1 %v10733_v22  ;;  %8162 = vmatprep.subr.bf16.mxu0 %v10740_v47  ;;  %v10779_v22 = vcombine.low %v2422_v26, %v2426_v0  ;;  %v10781_v47 = vcombine.low %v2423_v56, %v2427_v29  ;;  %v10790_v42 = vcombine.high %v2431_v39, %v2435_v45  ;;  %v2470_v26 = vld [vmem:[#allocation9 + $0x1ac0] sm:$0xff]  ;;  %v2471_v56 = vld [vmem:[#allocation9 + $0x1ac8] sm:$0xff] }
 0x2fe   :  { %8490 = vmatprep.subr.bf16.mxu1 %v10742_v46  ;;  %v10788_v46 = vcombine.high %v2430_v34, %v2434_v37  ;;  %v2474_v0 = vld [vmem:[#allocation9 + $0x1ae0] sm:$0xff]  ;;  %v2475_v29 = vld [vmem:[#allocation9 + $0x1ae8] sm:$0xff] }
 0x2ff   :  { %8154 = vmatmul.mubr.bf16.vlgmr.msra.gmra.mrb[32].mxu0 %v12287_v24  ;;  %v2478_v34 = vld [vmem:[#allocation9 + $0x1b00] sm:$0xff] }
 0x300   :  { %8482 = vmatmul.mubr.bf16.vlgmr.msra.gmra.mrb[32].mxu1 %v12287_v24  ;;  %8163 = vmatpush1.bf16.msra.mxu0 %v10739_v53  ;;  %v2439_v53 = vld [vmem:[#allocation9 + $0x19c8] sm:$0xff]  ;;  %v2482_v37 = vld [vmem:[#allocation9 + $0x1b20] sm:$0xff] }
 0x301   :  { %8194 = vmatprep.mubr.bf16.mxu0 %v12291_v62  ;;  %8491 = vmatpush1.bf16.msra.mxu1 %v10741_v59  ;;  %v10789_v59 = vcombine.low %v2431_v39, %v2435_v45  ;;  %v10798_v60 = vcombine.high %v2439_v53, %v2443_v57  ;;  %v2479_v39 = vld [vmem:[#allocation9 + $0x1b08] sm:$0xff] }
 0x302   :  { %8522 = vmatprep.mubr.bf16.mxu1 %v12291_v62  ;;  %8164 = vmatprep.subr.bf16.mxu0 %v10748_v44  ;;  %v10796_v44 = vcombine.high %v2438_v15, %v2442_v28  ;;  %v2483_v45 = vld [vmem:[#allocation9 + $0x1b28] sm:$0xff] }
 0x303   :  { %8492 = vmatprep.subr.bf16.mxu1 %v10750_v49  ;;  %v2450_v49 = vld [vmem:[#allocation9 + $0x1a20] sm:$0xff] }
 0x304   :  { %8165 = vmatpush1.bf16.msra.mxu0 %v10747_v3  ;;  %v10795_v3 = vcombine.low %v2438_v15, %v2442_v28  ;;  %v2486_v15 = vld [vmem:[#allocation9 + $0x1b40] sm:$0xff] }
 0x305   :  { %8493 = vmatpush1.bf16.msra.mxu1 %v10749_v6  ;;  %8166 = vmatprep.subr.bf16.mxu0 %v10756_v4  ;;  %v10797_v6 = vcombine.low %v2439_v53, %v2443_v57  ;;  %v10804_v4 = vcombine.high %v2446_v61, %v2450_v49  ;;  %v2490_v28 = vld [vmem:[#allocation9 + $0x1b60] sm:$0xff]  ;;  %v2487_v53 = vld [vmem:[#allocation9 + $0x1b48] sm:$0xff] }
 0x306   :  { %8494 = vmatprep.subr.bf16.mxu1 %v10758_v9  ;;  %v10806_v9 = vcombine.high %v2447_v63, %v2451_v2  ;;  %v2491_v57 = vld [vmem:[#allocation9 + $0x1b68] sm:$0xff] }
 0x308   :  { %8167 = vmatpush1.bf16.msra.mxu0 %v10755_v50  ;;  %v10803_v50 = vcombine.low %v2446_v61, %v2450_v49  ;;  %v2494_v61 = vld [vmem:[#allocation9 + $0x1b80] sm:$0xff] }
 0x309   :  { %8495 = vmatpush1.bf16.msra.mxu1 %v10757_v43  ;;  %8168 = vmatprep.subr.bf16.mxu0 %v10764_v51  ;;  %v10805_v43 = vcombine.low %v2447_v63, %v2451_v2  ;;  %v10812_v51 = vcombine.high %v2454_v10, %v2458_v11  ;;  %v2498_v49 = vld [vmem:[#allocation9 + $0x1ba0] sm:$0xff]  ;;  %v2495_v63 = vld [vmem:[#allocation9 + $0x1b88] sm:$0xff] }
 0x30a   :  { %8496 = vmatprep.subr.bf16.mxu1 %v10766_v13  ;;  %v10814_v13 = vcombine.high %v2455_v48, %v2459_v27  ;;  %v2499_v2 = vld [vmem:[#allocation9 + $0x1ba8] sm:$0xff] }
 0x30c   :  { %8169 = vmatpush1.bf16.msra.mxu0 %v10763_v21  ;;  %v10811_v21 = vcombine.low %v2454_v10, %v2458_v11  ;;  %v2502_v10 = vld [vmem:[#allocation9 + $0x1bc0] sm:$0xff] }
 0x30d   :  { %8497 = vmatpush1.bf16.msra.mxu1 %v10765_v25  ;;  %8170 = vmatprep.subr.bf16.mxu0 %v10772_v32  ;;  %v10813_v25 = vcombine.low %v2455_v48, %v2459_v27  ;;  %v10820_v32 = vcombine.high %v2462_v8, %v2466_v14  ;;  %v2506_v11 = vld [vmem:[#allocation9 + $0x1be0] sm:$0xff]  ;;  %v2503_v48 = vld [vmem:[#allocation9 + $0x1bc8] sm:$0xff] }
 0x30e   :  { %8498 = vmatprep.subr.bf16.mxu1 %v10774_v23  ;;  %v10822_v23 = vcombine.high %v2463_v17, %v2467_v20  ;;  %v2507_v27 = vld [vmem:[#allocation9 + $0x1be8] sm:$0xff] }
 0x310   :  { %8171 = vmatpush1.bf16.msra.mxu0 %v10771_v30  ;;  %v10819_v30 = vcombine.low %v2462_v8, %v2466_v14  ;;  %v2510_v8 = vld [vmem:[#allocation9 + $0x1c00] sm:$0xff] }
 0x311   :  { %8499 = vmatpush1.bf16.msra.mxu1 %v10773_v12  ;;  %8172 = vmatprep.subr.bf16.mxu0 %v10780_v31  ;;  %v10821_v12 = vcombine.low %v2463_v17, %v2467_v20  ;;  %v10828_v31 = vcombine.high %v2470_v26, %v2474_v0  ;;  %v2514_v14 = vld [vmem:[#allocation9 + $0x1c20] sm:$0xff]  ;;  %v2511_v17 = vld [vmem:[#allocation9 + $0x1c08] sm:$0xff] }
 0x312   :  { %8500 = vmatprep.subr.bf16.mxu1 %v10782_v33  ;;  %v10830_v33 = vcombine.high %v2471_v56, %v2475_v29  ;;  %v2515_v20 = vld [vmem:[#allocation9 + $0x1c28] sm:$0xff] }
 0x314   :  { %8173 = vmatpush1.bf16.msra.mxu0 %v10779_v22  ;;  %v10827_v22 = vcombine.low %v2470_v26, %v2474_v0  ;;  %v2518_v26 = vld [vmem:[#allocation9 + $0x1c40] sm:$0xff] }
 0x315   :  { %8501 = vmatpush1.bf16.msra.mxu1 %v10781_v47  ;;  %8174 = vmatprep.subr.bf16.mxu0 %v10788_v46  ;;  %v10829_v47 = vcombine.low %v2471_v56, %v2475_v29  ;;  %v10836_v46 = vcombine.high %v2478_v34, %v2482_v37  ;;  %v2522_v0 = vld [vmem:[#allocation9 + $0x1c60] sm:$0xff]  ;;  %v10867_v56 = vcombine.low %v2510_v8, %v2514_v14  ;;  %v2519_v29 = vld [vmem:[#allocation9 + $0x1c48] sm:$0xff] }
 0x316   :  { %8502 = vmatprep.subr.bf16.mxu1 %v10790_v42  ;;  %v10838_v42 = vcombine.high %v2479_v39, %v2483_v45 }
 0x318   :  { %8175 = vmatpush1.bf16.msra.mxu0 %v10787_v58  ;;  %v10835_v58 = vcombine.low %v2478_v34, %v2482_v37  ;;  %v2526_v34 = vld [vmem:[#allocation9 + $0x1c80] sm:$0xff] }
 0x319   :  { %8503 = vmatpush1.bf16.msra.mxu1 %v10789_v59  ;;  %8176 = vmatprep.subr.bf16.mxu0 %v10796_v44  ;;  %v10837_v59 = vcombine.low %v2479_v39, %v2483_v45  ;;  %v10844_v44 = vcombine.high %v2486_v15, %v2490_v28  ;;  %v2530_v37 = vld [vmem:[#allocation9 + $0x1ca0] sm:$0xff]  ;;  %v12303_v39 = vcombine.high %v12291_v62, %v12291_v62 }
 0x31a   :  { %8504 = vmatprep.subr.bf16.mxu1 %v10798_v60  ;;  %v10846_v60 = vcombine.high %v2487_v53, %v2491_v57 }
 0x31c   :  { %8177 = vmatpush1.bf16.msra.mxu0 %v10795_v3  ;;  %v10843_v3 = vcombine.low %v2486_v15, %v2490_v28  ;;  %v2534_v15 = vld [vmem:[#allocation9 + $0x1cc0] sm:$0xff] }
 0x31d   :  { %8505 = vmatpush1.bf16.msra.mxu1 %v10797_v6  ;;  %8178 = vmatprep.subr.bf16.mxu0 %v10804_v4  ;;  %v10845_v6 = vcombine.low %v2487_v53, %v2491_v57  ;;  %v10852_v4 = vcombine.high %v2494_v61, %v2498_v49  ;;  %v2538_v28 = vld [vmem:[#allocation9 + $0x1ce0] sm:$0xff]  ;;  %v2535_v53 = vld [vmem:[#allocation9 + $0x1cc8] sm:$0xff] }
 0x31e   :  { %8506 = vmatprep.subr.bf16.mxu1 %v10806_v9  ;;  %v10854_v9 = vcombine.high %v2495_v63, %v2499_v2  ;;  %v2539_v57 = vld [vmem:[#allocation9 + $0x1ce8] sm:$0xff] }
 0x320   :  { %8179 = vmatpush1.bf16.msra.mxu0 %v10803_v50  ;;  %v10851_v50 = vcombine.low %v2494_v61, %v2498_v49  ;;  %v2542_v61 = vld [vmem:[#allocation9 + $0x1d00] sm:$0xff] }
 0x321   :  { %8507 = vmatpush1.bf16.msra.mxu1 %v10805_v43  ;;  %8180 = vmatprep.subr.bf16.mxu0 %v10812_v51  ;;  %v10853_v43 = vcombine.low %v2495_v63, %v2499_v2  ;;  %v10860_v51 = vcombine.high %v2502_v10, %v2506_v11  ;;  %v2546_v49 = vld [vmem:[#allocation9 + $0x1d20] sm:$0xff]  ;;  %v2543_v63 = vld [vmem:[#allocation9 + $0x1d08] sm:$0xff] }
 0x322   :  { %8508 = vmatprep.subr.bf16.mxu1 %v10814_v13  ;;  %v10862_v13 = vcombine.high %v2503_v48, %v2507_v27  ;;  %v2547_v2 = vld [vmem:[#allocation9 + $0x1d28] sm:$0xff] }
 0x324   :  { %8181 = vmatpush1.bf16.msra.mxu0 %v10811_v21  ;;  %v10859_v21 = vcombine.low %v2502_v10, %v2506_v11  ;;  %v2550_v10 = vld [vmem:[#allocation9 + $0x1d40] sm:$0xff] }
 0x325   :  { %8509 = vmatpush1.bf16.msra.mxu1 %v10813_v25  ;;  %8182 = vmatprep.subr.bf16.mxu0 %v10820_v32  ;;  %v10861_v25 = vcombine.low %v2503_v48, %v2507_v27  ;;  %v10868_v32 = vcombine.high %v2510_v8, %v2514_v14  ;;  %v2554_v11 = vld [vmem:[#allocation9 + $0x1d60] sm:$0xff]  ;;  %v2551_v48 = vld [vmem:[#allocation9 + $0x1d48] sm:$0xff] }
 0x326   :  { %8510 = vmatprep.subr.bf16.mxu1 %v10822_v23  ;;  %v10870_v23 = vcombine.high %v2511_v17, %v2515_v20  ;;  %v2555_v27 = vld [vmem:[#allocation9 + $0x1d68] sm:$0xff]  ;;  %v2558_v8 = vld [vmem:[#allocation9 + $0x1d80] sm:$0xff] }
 0x327   :  { %v2562_v14 = vld [vmem:[#allocation9 + $0x1da0] sm:$0xff] }
 0x328   :  { %8183 = vmatpush1.bf16.msra.mxu0 %v10819_v30  ;;  %v2523_v30 = vld [vmem:[#allocation9 + $0x1c68] sm:$0xff] }
 0x329   :  { %8511 = vmatpush1.bf16.msra.mxu1 %v10821_v12  ;;  %8184 = vmatprep.subr.bf16.mxu0 %v10828_v31  ;;  %v12298_v12 = vrot.slane %v12281_v40, %v12181_v19  ;;  %v10869_v31 = vcombine.low %v2511_v17, %v2515_v20  ;;  %v10878_v45 = vcombine.high %v2519_v29, %v2523_v30  ;;  %v2559_v17 = vld [vmem:[#allocation9 + $0x1d88] sm:$0xff] }
 0x32a   :  { %8512 = vmatprep.subr.bf16.mxu1 %v10830_v33  ;;  %v10876_v33 = vcombine.high %v2518_v26, %v2522_v0  ;;  %v10875_v19 = vcombine.low %v2518_v26, %v2522_v0  ;;  %v10877_v40 = vcombine.low %v2519_v29, %v2523_v30  ;;  %v2563_v20 = vld [vmem:[#allocation9 + $0x1da8] sm:$0xff]  ;;  %v2566_v26 = vld [vmem:[#allocation9 + $0x1dc0] sm:$0xff]  ;;  %v10915_v30 = vcombine.low %v2558_v8, %v2562_v14 }
 0x32b   :  { %v2570_v0 = vld [vmem:[#allocation9 + $0x1de0] sm:$0xff]  ;;  %v2571_v29 = vld [vmem:[#allocation9 + $0x1de8] sm:$0xff] }
 0x32c   :  { %8185 = vmatpush1.bf16.msra.mxu0 %v10827_v22  ;;  %v2527_v22 = vld [vmem:[#allocation9 + $0x1c88] sm:$0xff] }
 0x32d   :  { %8513 = vmatpush1.bf16.msra.mxu1 %v10829_v47  ;;  %8186 = vmatprep.subr.bf16.mxu0 %v10836_v46  ;;  %v2531_v47 = vld [vmem:[#allocation9 + $0x1ca8] sm:$0xff]  ;;  %v10884_v46 = vcombine.high %v2526_v34, %v2530_v37 }
 0x32e   :  { %8514 = vmatprep.subr.bf16.mxu1 %v10838_v42  ;;  %v10886_v42 = vcombine.high %v2527_v22, %v2531_v47 }
 0x330   :  { %8187 = vmatpush1.bf16.msra.mxu0 %v10835_v58  ;;  %v10883_v58 = vcombine.low %v2526_v34, %v2530_v37  ;;  %v2574_v37 = vld [vmem:[#allocation9 + $0x1e00] sm:$0xff] }
 0x331   :  { %8515 = vmatpush1.bf16.msra.mxu1 %v10837_v59  ;;  %8188 = vmatprep.subr.bf16.mxu0 %v10844_v44  ;;  %v10885_v59 = vcombine.low %v2527_v22, %v2531_v47  ;;  %v10892_v44 = vcombine.high %v2534_v15, %v2538_v28  ;;  %v2575_v22 = vld [vmem:[#allocation9 + $0x1e08] sm:$0xff] }
 0x332   :  { %8516 = vmatprep.subr.bf16.mxu1 %v10846_v60  ;;  %v10894_v60 = vcombine.high %v2535_v53, %v2539_v57  ;;  %v2579_v47 = vld [vmem:[#allocation9 + $0x1e28] sm:$0xff] }
 0x334   :  { %8189 = vmatpush1.bf16.msra.mxu0 %v10843_v3  ;;  %v10891_v3 = vcombine.low %v2534_v15, %v2538_v28  ;;  %v2582_v15 = vld [vmem:[#allocation9 + $0x1e40] sm:$0xff] }
 0x335   :  { %8517 = vmatpush1.bf16.msra.mxu1 %v10845_v6  ;;  %8190 = vmatprep.subr.bf16.mxu0 %v10852_v4  ;;  %v10893_v6 = vcombine.low %v2535_v53, %v2539_v57  ;;  %v10900_v4 = vcombine.high %v2542_v61, %v2546_v49  ;;  %v2586_v28 = vld [vmem:[#allocation9 + $0x1e60] sm:$0xff]  ;;  %v2583_v53 = vld [vmem:[#allocation9 + $0x1e48] sm:$0xff] }
 0x336   :  { %8518 = vmatprep.subr.bf16.mxu1 %v10854_v9  ;;  %v10902_v9 = vcombine.high %v2543_v63, %v2547_v2  ;;  %v2587_v57 = vld [vmem:[#allocation9 + $0x1e68] sm:$0xff] }
 0x338   :  { %8191 = vmatpush1.bf16.msra.mxu0 %v10851_v50  ;;  %v10899_v50 = vcombine.low %v2542_v61, %v2546_v49  ;;  %v2590_v61 = vld [vmem:[#allocation9 + $0x1e80] sm:$0xff] }
 0x339   :  { %8519 = vmatpush1.bf16.msra.mxu1 %v10853_v43  ;;  %8192 = vmatprep.subr.bf16.mxu0 %v10860_v51  ;;  %v10901_v43 = vcombine.low %v2543_v63, %v2547_v2  ;;  %v10908_v51 = vcombine.high %v2550_v10, %v2554_v11  ;;  %v2594_v49 = vld [vmem:[#allocation9 + $0x1ea0] sm:$0xff]  ;;  %v2591_v63 = vld [vmem:[#allocation9 + $0x1e88] sm:$0xff] }
 0x33a   :  { %8520 = vmatprep.subr.bf16.mxu1 %v10862_v13  ;;  %v10910_v13 = vcombine.high %v2551_v48, %v2555_v27  ;;  %v2595_v2 = vld [vmem:[#allocation9 + $0x1ea8] sm:$0xff] }
 0x33c   :  { %8193 = vmatpush1.bf16.msra.mxu0 %v10859_v21  ;;  %v10907_v21 = vcombine.low %v2550_v10, %v2554_v11  ;;  %v2598_v10 = vld [vmem:[#allocation9 + $0x1ec0] sm:$0xff] }
 0x33d   :  { %8521 = vmatpush1.bf16.msra.mxu1 %v10861_v25  ;;  %8203 = vmatprep.subr.bf16.mxu0 %v10868_v32  ;;  %v10909_v25 = vcombine.low %v2551_v48, %v2555_v27  ;;  %v10916_v32 = vcombine.high %v2558_v8, %v2562_v14  ;;  %v2602_v11 = vld [vmem:[#allocation9 + $0x1ee0] sm:$0xff]  ;;  %v2599_v48 = vld [vmem:[#allocation9 + $0x1ec8] sm:$0xff] }
 0x33e   :  { %8531 = vmatprep.subr.bf16.mxu1 %v10870_v23  ;;  %v10918_v23 = vcombine.high %v2559_v17, %v2563_v20  ;;  %v2603_v27 = vld [vmem:[#allocation9 + $0x1ee8] sm:$0xff]  ;;  %v2606_v8 = vld [vmem:[#allocation9 + $0x1f00] sm:$0xff] }
 0x33f   :  { %8195 = vmatmul.mubr.bf16.vlgmr.msra.gmra.mrb[32].mxu0 %v12298_v12  ;;  %v2610_v14 = vld [vmem:[#allocation9 + $0x1f20] sm:$0xff] }
 0x340   :  { %8523 = vmatmul.mubr.bf16.vlgmr.msra.gmra.mrb[32].mxu1 %v12298_v12  ;;  %8204 = vmatpush1.bf16.msra.mxu0 %v10867_v56  ;;  %v2567_v56 = vld [vmem:[#allocation9 + $0x1dc8] sm:$0xff] }
 0x341   :  { %8235 = vmatprep.mubr.bf16.mxu0 %v12303_v39  ;;  %8532 = vmatpush1.bf16.msra.mxu1 %v10869_v31  ;;  %v10917_v31 = vcombine.low %v2559_v17, %v2563_v20  ;;  %v10926_v34 = vcombine.high %v2567_v56, %v2571_v29  ;;  %v2607_v17 = vld [vmem:[#allocation9 + $0x1f08] sm:$0xff] }
 0x342   :  { %8563 = vmatprep.mubr.bf16.mxu1 %v12303_v39  ;;  %8205 = vmatprep.subr.bf16.mxu0 %v10876_v33  ;;  %v10924_v33 = vcombine.high %v2566_v26, %v2570_v0  ;;  %v2611_v20 = vld [vmem:[#allocation9 + $0x1f28] sm:$0xff] }
 0x343   :  { %8533 = vmatprep.subr.bf16.mxu1 %v10878_v45  ;;  %v2578_v45 = vld [vmem:[#allocation9 + $0x1e20] sm:$0xff] }
 0x344   :  { %8206 = vmatpush1.bf16.msra.mxu0 %v10875_v19  ;;  %v10923_v19 = vcombine.low %v2566_v26, %v2570_v0  ;;  %v2614_v26 = vld [vmem:[#allocation9 + $0x1f40] sm:$0xff] }
 0x345   :  { %8534 = vmatpush1.bf16.msra.mxu1 %v10877_v40  ;;  %8207 = vmatprep.subr.bf16.mxu0 %v10884_v46  ;;  %v10925_v40 = vcombine.low %v2567_v56, %v2571_v29  ;;  %v10932_v46 = vcombine.high %v2574_v37, %v2578_v45  ;;  %v2618_v0 = vld [vmem:[#allocation9 + $0x1f60] sm:$0xff]  ;;  %v2615_v56 = vld [vmem:[#allocation9 + $0x1f48] sm:$0xff] }
 0x346   :  { %8535 = vmatprep.subr.bf16.mxu1 %v10886_v42  ;;  %v10934_v42 = vcombine.high %v2575_v22, %v2579_v47  ;;  %v2619_v29 = vld [vmem:[#allocation9 + $0x1f68] sm:$0xff] }
 0x348   :  { %8208 = vmatpush1.bf16.msra.mxu0 %v10883_v58  ;;  %v10931_v58 = vcombine.low %v2574_v37, %v2578_v45  ;;  %v2622_v37 = vld [vmem:[#allocation9 + $0x1f80] sm:$0xff] }
 0x349   :  { %8536 = vmatpush1.bf16.msra.mxu1 %v10885_v59  ;;  %8209 = vmatprep.subr.bf16.mxu0 %v10892_v44  ;;  %v10933_v59 = vcombine.low %v2575_v22, %v2579_v47  ;;  %v10940_v44 = vcombine.high %v2582_v15, %v2586_v28  ;;  %v2626_v45 = vld [vmem:[#allocation9 + $0x1fa0] sm:$0xff]  ;;  %v2623_v22 = vld [vmem:[#allocation9 + $0x1f88] sm:$0xff] }
 0x34a   :  { %8537 = vmatprep.subr.bf16.mxu1 %v10894_v60  ;;  %v10942_v60 = vcombine.high %v2583_v53, %v2587_v57  ;;  %v2627_v47 = vld [vmem:[#allocation9 + $0x1fa8] sm:$0xff] }
 0x34c   :  { %8210 = vmatpush1.bf16.msra.mxu0 %v10891_v3  ;;  %v10939_v3 = vcombine.low %v2582_v15, %v2586_v28  ;;  %v2630_v15 = vld [vmem:[#allocation9 + $0x1fc0] sm:$0xff] }
 0x34d   :  { %8538 = vmatpush1.bf16.msra.mxu1 %v10893_v6  ;;  %8211 = vmatprep.subr.bf16.mxu0 %v10900_v4  ;;  %v10941_v6 = vcombine.low %v2583_v53, %v2587_v57  ;;  %v10948_v4 = vcombine.high %v2590_v61, %v2594_v49  ;;  %v2634_v28 = vld [vmem:[#allocation9 + $0x1fe0] sm:$0xff]  ;;  %v2631_v53 = vld [vmem:[#allocation9 + $0x1fc8] sm:$0xff] }
 0x34e   :  { %8539 = vmatprep.subr.bf16.mxu1 %v10902_v9  ;;  %v10950_v9 = vcombine.high %v2591_v63, %v2595_v2  ;;  %v2635_v57 = vld [vmem:[#allocation9 + $0x1fe8] sm:$0xff] }
 0x350   :  { %8212 = vmatpush1.bf16.msra.mxu0 %v10899_v50  ;;  %v10947_v50 = vcombine.low %v2590_v61, %v2594_v49  ;;  %v1616_v61 = vld [vmem:[#allocation9 + $0x10] sm:$0xff] }
 0x351   :  { %8540 = vmatpush1.bf16.msra.mxu1 %v10901_v43  ;;  %8213 = vmatprep.subr.bf16.mxu0 %v10908_v51  ;;  %v10949_v43 = vcombine.low %v2591_v63, %v2595_v2  ;;  %v10956_v51 = vcombine.high %v2598_v10, %v2602_v11  ;;  %v1620_v49 = vld [vmem:[#allocation9 + $0x30] sm:$0xff]  ;;  %v1617_v63 = vld [vmem:[#allocation9 + $0x18] sm:$0xff] }
 0x352   :  { %8541 = vmatprep.subr.bf16.mxu1 %v10910_v13  ;;  %v10958_v13 = vcombine.high %v2599_v48, %v2603_v27  ;;  %v1621_v2 = vld [vmem:[#allocation9 + $0x38] sm:$0xff] }
 0x354   :  { %8214 = vmatpush1.bf16.msra.mxu0 %v10907_v21  ;;  %v10955_v21 = vcombine.low %v2598_v10, %v2602_v11  ;;  %v1624_v10 = vld [vmem:[#allocation9 + $0x50] sm:$0xff] }
 0x355   :  { %8542 = vmatpush1.bf16.msra.mxu1 %v10909_v25  ;;  %8215 = vmatprep.subr.bf16.mxu0 %v10916_v32  ;;  %v10957_v25 = vcombine.low %v2599_v48, %v2603_v27  ;;  %v10964_v32 = vcombine.high %v2606_v8, %v2610_v14  ;;  %v1628_v11 = vld [vmem:[#allocation9 + $0x70] sm:$0xff]  ;;  %v9975_v48 = vcombine.low %v1616_v61, %v1620_v49  ;;  %v1625_v27 = vld [vmem:[#allocation9 + $0x58] sm:$0xff] }
 0x356   :  { %8543 = vmatprep.subr.bf16.mxu1 %v10918_v23  ;;  %v10966_v23 = vcombine.high %v2607_v17, %v2611_v20 }
 0x358   :  { %8216 = vmatpush1.bf16.msra.mxu0 %v10915_v30  ;;  %v10963_v30 = vcombine.low %v2606_v8, %v2610_v14  ;;  %v1632_v8 = vld [vmem:[#allocation9 + $0x90] sm:$0xff] }
 0x359   :  { %8544 = vmatpush1.bf16.msra.mxu1 %v10917_v31  ;;  %8217 = vmatprep.subr.bf16.mxu0 %v10924_v33  ;;  %v10965_v31 = vcombine.low %v2607_v17, %v2611_v20  ;;  %v10972_v33 = vcombine.high %v2614_v26, %v2618_v0  ;;  %v1636_v14 = vld [vmem:[#allocation9 + $0xb0] sm:$0xff]  ;;  %v1633_v20 = vld [vmem:[#allocation9 + $0x98] sm:$0xff] }
 0x35a   :  { %8545 = vmatprep.subr.bf16.mxu1 %v10926_v34  ;;  %v10974_v34 = vcombine.high %v2615_v56, %v2619_v29 }
 0x35c   :  { %8218 = vmatpush1.bf16.msra.mxu0 %v10923_v19  ;;  %v10971_v19 = vcombine.low %v2614_v26, %v2618_v0  ;;  %v1640_v0 = vld [vmem:[#allocation9 + $0xd0] sm:$0xff] }
 0x35d   :  { %8546 = vmatpush1.bf16.msra.mxu1 %v10925_v40  ;;  %8219 = vmatprep.subr.bf16.mxu0 %v10932_v46  ;;  %v10973_v40 = vcombine.low %v2615_v56, %v2619_v29  ;;  %v10980_v46 = vcombine.high %v2622_v37, %v2626_v45  ;;  %v1644_v56 = vld [vmem:[#allocation9 + $0xf0] sm:$0xff]  ;;  %v1641_v29 = vld [vmem:[#allocation9 + $0xd8] sm:$0xff] }
 0x35e   :  { %8547 = vmatprep.subr.bf16.mxu1 %v10934_v42  ;;  %v10982_v42 = vcombine.high %v2623_v22, %v2627_v47 }
 0x360   :  { %8220 = vmatpush1.bf16.msra.mxu0 %v10931_v58  ;;  %v10979_v58 = vcombine.low %v2622_v37, %v2626_v45  ;;  %v1648_v45 = vld [vmem:[#allocation9 + $0x110] sm:$0xff] }
 0x361   :  { %8548 = vmatpush1.bf16.msra.mxu1 %v10933_v59  ;;  %8221 = vmatprep.subr.bf16.mxu0 %v10940_v44  ;;  %v10981_v59 = vcombine.low %v2623_v22, %v2627_v47  ;;  %v10988_v44 = vcombine.high %v2630_v15, %v2634_v28  ;;  %v1652_v22 = vld [vmem:[#allocation9 + $0x130] sm:$0xff]  ;;  %v1649_v47 = vld [vmem:[#allocation9 + $0x118] sm:$0xff] }
 0x362   :  { %8549 = vmatprep.subr.bf16.mxu1 %v10942_v60  ;;  %v10990_v60 = vcombine.high %v2631_v53, %v2635_v57 }
 0x364   :  { %8222 = vmatpush1.bf16.msra.mxu0 %v10939_v3  ;;  %v10987_v3 = vcombine.low %v2630_v15, %v2634_v28  ;;  %v1656_v15 = vld [vmem:[#allocation9 + $0x150] sm:$0xff] }
 0x365   :  { %8550 = vmatpush1.bf16.msra.mxu1 %v10941_v6  ;;  %8223 = vmatprep.subr.bf16.mxu0 %v10948_v4  ;;  %v10989_v6 = vcombine.low %v2631_v53, %v2635_v57  ;;  %v9976_v4 = vcombine.high %v1616_v61, %v1620_v49  ;;  %v1660_v28 = vld [vmem:[#allocation9 + $0x170] sm:$0xff]  ;;  %v1657_v53 = vld [vmem:[#allocation9 + $0x158] sm:$0xff] }
 0x366   :  { %8551 = vmatprep.subr.bf16.mxu1 %v10950_v9  ;;  %v9978_v9 = vcombine.high %v1617_v63, %v1621_v2  ;;  %v1661_v57 = vld [vmem:[#allocation9 + $0x178] sm:$0xff]  ;;  %v1664_v61 = vld [vmem:[#allocation9 + $0x190] sm:$0xff] }
 0x367   :  { %v1668_v49 = vld [vmem:[#allocation9 + $0x1b0] sm:$0xff] }
 0x368   :  { %8224 = vmatpush1.bf16.msra.mxu0 %v10947_v50  ;;  %v1629_v50 = vld [vmem:[#allocation9 + $0x78] sm:$0xff] }
 0x369   :  { %8552 = vmatpush1.bf16.msra.mxu1 %v10949_v43  ;;  %8225 = vmatprep.subr.bf16.mxu0 %v10956_v51  ;;  %v12310_v43 = vcombine.high %v12298_v12, %v12298_v12  ;;  %v9977_v51 = vcombine.low %v1617_v63, %v1621_v2  ;;  %v9986_v17 = vcombine.high %v1625_v27, %v1629_v50  ;;  %v1665_v63 = vld [vmem:[#allocation9 + $0x198] sm:$0xff] }
 0x36a   :  { %8553 = vmatprep.subr.bf16.mxu1 %v10958_v13  ;;  %v9984_v13 = vcombine.high %v1624_v10, %v1628_v11  ;;  %v1669_v2 = vld [vmem:[#allocation9 + $0x1b8] sm:$0xff] }
 0x36c   :  { %8226 = vmatpush1.bf16.msra.mxu0 %v10955_v21  ;;  %v1637_v21 = vld [vmem:[#allocation9 + $0xb8] sm:$0xff] }
 0x36d   :  { %8554 = vmatpush1.bf16.msra.mxu1 %v10957_v25  ;;  %8227 = vmatprep.subr.bf16.mxu0 %v10964_v32  ;;  %v9983_v25 = vcombine.low %v1624_v10, %v1628_v11  ;;  %v9985_v32 = vcombine.low %v1625_v27, %v1629_v50  ;;  %v9994_v26 = vcombine.high %v1633_v20, %v1637_v21  ;;  %v1672_v10 = vld [vmem:[#allocation9 + $0x1d0] sm:$0xff]  ;;  %v1677_v27 = vld [vmem:[#allocation9 + $0x1f8] sm:$0xff] }
 0x36e   :  { %8555 = vmatprep.subr.bf16.mxu1 %v10966_v23  ;;  %v9992_v23 = vcombine.high %v1632_v8, %v1636_v14  ;;  %v1676_v11 = vld [vmem:[#allocation9 + $0x1f0] sm:$0xff]  ;;  %v10023_v50 = vcombine.low %v1664_v61, %v1668_v49 }
 0x370   :  { %8228 = vmatpush1.bf16.msra.mxu0 %v10963_v30  ;;  %v1645_v30 = vld [vmem:[#allocation9 + $0xf8] sm:$0xff] }
 0x371   :  { %8556 = vmatpush1.bf16.msra.mxu1 %v10965_v31  ;;  %8229 = vmatprep.subr.bf16.mxu0 %v10972_v33  ;;  %v9991_v31 = vcombine.low %v1632_v8, %v1636_v14  ;;  %v9993_v33 = vcombine.low %v1633_v20, %v1637_v21  ;;  %v10002_v37 = vcombine.high %v1641_v29, %v1645_v30  ;;  %v1680_v14 = vld [vmem:[#allocation9 + $0x210] sm:$0xff]  ;;  %v1681_v20 = vld [vmem:[#allocation9 + $0x218] sm:$0xff] }
 0x372   :  { %8557 = vmatprep.subr.bf16.mxu1 %v10974_v34  ;;  %v10000_v34 = vcombine.high %v1640_v0, %v1644_v56  ;;  %v1685_v21 = vld [vmem:[#allocation9 + $0x238] sm:$0xff] }
 0x374   :  { %8230 = vmatpush1.bf16.msra.mxu0 %v10971_v19  ;;  %v1653_v19 = vld [vmem:[#allocation9 + $0x138] sm:$0xff] }
 0x375   :  { %8558 = vmatpush1.bf16.msra.mxu1 %v10973_v40  ;;  %8231 = vmatprep.subr.bf16.mxu0 %v10980_v46  ;;  %v10001_v40 = vcombine.low %v1641_v29, %v1645_v30  ;;  %v10008_v46 = vcombine.high %v1648_v45, %v1652_v22  ;;  %v1689_v29 = vld [vmem:[#allocation9 + $0x258] sm:$0xff] }
 0x376   :  { %8559 = vmatprep.subr.bf16.mxu1 %v10982_v42  ;;  %v10010_v42 = vcombine.high %v1649_v47, %v1653_v19  ;;  %v1693_v30 = vld [vmem:[#allocation9 + $0x278] sm:$0xff] }
 0x378   :  { %8232 = vmatpush1.bf16.msra.mxu0 %v10979_v58  ;;  %v10007_v58 = vcombine.low %v1648_v45, %v1652_v22  ;;  %v1696_v45 = vld [vmem:[#allocation9 + $0x290] sm:$0xff] }
 0x379   :  { %8560 = vmatpush1.bf16.msra.mxu1 %v10981_v59  ;;  %8233 = vmatprep.subr.bf16.mxu0 %v10988_v44  ;;  %v10009_v59 = vcombine.low %v1649_v47, %v1653_v19  ;;  %v10016_v44 = vcombine.high %v1656_v15, %v1660_v28  ;;  %v1700_v22 = vld [vmem:[#allocation9 + $0x2b0] sm:$0xff]  ;;  %v1697_v47 = vld [vmem:[#allocation9 + $0x298] sm:$0xff] }
 0x37a   :  { %8561 = vmatprep.subr.bf16.mxu1 %v10990_v60  ;;  %v10018_v60 = vcombine.high %v1657_v53, %v1661_v57  ;;  %v1701_v19 = vld [vmem:[#allocation9 + $0x2b8] sm:$0xff] }
 0x37c   :  { %8234 = vmatpush1.bf16.msra.mxu0 %v10987_v3  ;;  %v10015_v3 = vcombine.low %v1656_v15, %v1660_v28  ;;  %v1704_v15 = vld [vmem:[#allocation9 + $0x2d0] sm:$0xff] }
 0x37d   :  { %8562 = vmatpush1.bf16.msra.mxu1 %v10989_v6  ;;  %8572 = vmatprep.subr.bf16.mxu0 %v9976_v4  ;;  %v10017_v6 = vcombine.low %v1657_v53, %v1661_v57  ;;  %v10024_v4 = vcombine.high %v1664_v61, %v1668_v49  ;;  %v1708_v28 = vld [vmem:[#allocation9 + $0x2f0] sm:$0xff]  ;;  %v1705_v53 = vld [vmem:[#allocation9 + $0x2d8] sm:$0xff] }
 0x37e   :  { %8900 = vmatprep.subr.bf16.mxu1 %v9978_v9  ;;  %v10026_v9 = vcombine.high %v1665_v63, %v1669_v2  ;;  %v1709_v57 = vld [vmem:[#allocation9 + $0x2f8] sm:$0xff]  ;;  %v1712_v61 = vld [vmem:[#allocation9 + $0x310] sm:$0xff] }
 0x37f   :  { %8236 = vmatmul.mubr.bf16.vlgmr.msra.gmra.mrb[32].mxu0 %v12310_v43  ;;  %v1716_v49 = vld [vmem:[#allocation9 + $0x330] sm:$0xff] }
 0x380   :  { %8564 = vmatmul.mubr.bf16.vlgmr.msra.gmra.mrb[32].mxu1 %v12310_v43  ;;  %8573 = vmatpush1.bf16.msra.mxu0 %v9975_v48  ;;  %v1673_v48 = vld [vmem:[#allocation9 + $0x1d8] sm:$0xff] }
 0x381   :  { %8604 = vmatprep.mubr.bf16.mxu0 %v12188_v54  ;;  %8901 = vmatpush1.bf16.msra.mxu1 %v9977_v51  ;;  %v10025_v51 = vcombine.low %v1665_v63, %v1669_v2  ;;  %v10034_v8 = vcombine.high %v1673_v48, %v1677_v27  ;;  %v1713_v63 = vld [vmem:[#allocation9 + $0x318] sm:$0xff] }
 0x382   :  { %8932 = vmatprep.mubr.bf16.mxu1 %v12188_v54  ;;  %8574 = vmatprep.subr.bf16.mxu0 %v9984_v13  ;;  %v9999_v54 = vcombine.low %v1640_v0, %v1644_v56  ;;  %v10032_v13 = vcombine.high %v1672_v10, %v1676_v11  ;;  %v1688_v0 = vld [vmem:[#allocation9 + $0x250] sm:$0xff]  ;;  %v1717_v2 = vld [vmem:[#allocation9 + $0x338] sm:$0xff] }
 0x383   :  { %8902 = vmatprep.subr.bf16.mxu1 %v9986_v17  ;;  %v1684_v17 = vld [vmem:[#allocation9 + $0x230] sm:$0xff] }
 0x384   :  { %8575 = vmatpush1.bf16.msra.mxu0 %v9983_v25  ;;  %v10031_v25 = vcombine.low %v1672_v10, %v1676_v11  ;;  %v1692_v56 = vld [vmem:[#allocation9 + $0x270] sm:$0xff] }
 0x385   :  { %8903 = vmatpush1.bf16.msra.mxu1 %v9985_v32  ;;  %8576 = vmatprep.subr.bf16.mxu0 %v9992_v23  ;;  %v10033_v32 = vcombine.low %v1673_v48, %v1677_v27  ;;  %v10040_v23 = vcombine.high %v1680_v14, %v1684_v17  ;;  %v1720_v10 = vld [vmem:[#allocation9 + $0x350] sm:$0xff]  ;;  %v1721_v48 = vld [vmem:[#allocation9 + $0x358] sm:$0xff] }
 0x386   :  { %8904 = vmatprep.subr.bf16.mxu1 %v9994_v26  ;;  %v10042_v26 = vcombine.high %v1681_v20, %v1685_v21  ;;  %v1724_v11 = vld [vmem:[#allocation9 + $0x370] sm:$0xff]  ;;  %v1725_v27 = vld [vmem:[#allocation9 + $0x378] sm:$0xff] }
 0x388   :  { %8577 = vmatpush1.bf16.msra.mxu0 %v9991_v31  ;;  %v10039_v31 = vcombine.low %v1680_v14, %v1684_v17  ;;  %v1728_v14 = vld [vmem:[#allocation9 + $0x390] sm:$0xff] }
 0x389   :  { %8905 = vmatpush1.bf16.msra.mxu1 %v9993_v33  ;;  %8578 = vmatprep.subr.bf16.mxu0 %v10000_v34  ;;  %v10041_v33 = vcombine.low %v1681_v20, %v1685_v21  ;;  %v10048_v34 = vcombine.high %v1688_v0, %v1692_v56  ;;  %v1732_v17 = vld [vmem:[#allocation9 + $0x3b0] sm:$0xff]  ;;  %v1729_v20 = vld [vmem:[#allocation9 + $0x398] sm:$0xff] }
 0x38a   :  { %8906 = vmatprep.subr.bf16.mxu1 %v10002_v37  ;;  %v10050_v37 = vcombine.high %v1689_v29, %v1693_v30  ;;  %v1733_v21 = vld [vmem:[#allocation9 + $0x3b8] sm:$0xff] }
 0x38c   :  { %8579 = vmatpush1.bf16.msra.mxu0 %v9999_v54  ;;  %v10047_v54 = vcombine.low %v1688_v0, %v1692_v56  ;;  %v1736_v0 = vld [vmem:[#allocation9 + $0x3d0] sm:$0xff] }
 0x38d   :  { %8907 = vmatpush1.bf16.msra.mxu1 %v10001_v40  ;;  %8580 = vmatprep.subr.bf16.mxu0 %v10008_v46  ;;  %v10049_v40 = vcombine.low %v1689_v29, %v1693_v30  ;;  %v10056_v46 = vcombine.high %v1696_v45, %v1700_v22  ;;  %v1740_v56 = vld [vmem:[#allocation9 + $0x3f0] sm:$0xff]  ;;  %v1737_v29 = vld [vmem:[#allocation9 + $0x3d8] sm:$0xff] }
 0x38e   :  { %8908 = vmatprep.subr.bf16.mxu1 %v10010_v42  ;;  %v10058_v42 = vcombine.high %v1697_v47, %v1701_v19  ;;  %v1741_v30 = vld [vmem:[#allocation9 + $0x3f8] sm:$0xff] }
 0x390   :  { %8581 = vmatpush1.bf16.msra.mxu0 %v10007_v58  ;;  %v10055_v58 = vcombine.low %v1696_v45, %v1700_v22  ;;  %v1744_v45 = vld [vmem:[#allocation9 + $0x410] sm:$0xff] }
 0x391   :  { %8909 = vmatpush1.bf16.msra.mxu1 %v10009_v59  ;;  %8582 = vmatprep.subr.bf16.mxu0 %v10016_v44  ;;  %v10057_v59 = vcombine.low %v1697_v47, %v1701_v19  ;;  %v10064_v44 = vcombine.high %v1704_v15, %v1708_v28  ;;  %v1748_v22 = vld [vmem:[#allocation9 + $0x430] sm:$0xff]  ;;  %v1745_v47 = vld [vmem:[#allocation9 + $0x418] sm:$0xff] }
 0x392   :  { %8910 = vmatprep.subr.bf16.mxu1 %v10018_v60  ;;  %v10066_v60 = vcombine.high %v1705_v53, %v1709_v57  ;;  %v1749_v19 = vld [vmem:[#allocation9 + $0x438] sm:$0xff] }
 0x394   :  { %8583 = vmatpush1.bf16.msra.mxu0 %v10015_v3  ;;  %v10063_v3 = vcombine.low %v1704_v15, %v1708_v28  ;;  %v1752_v15 = vld [vmem:[#allocation9 + $0x450] sm:$0xff] }
 0x395   :  { %8911 = vmatpush1.bf16.msra.mxu1 %v10017_v6  ;;  %8584 = vmatprep.subr.bf16.mxu0 %v10024_v4  ;;  %v10065_v6 = vcombine.low %v1705_v53, %v1709_v57  ;;  %v10072_v4 = vcombine.high %v1712_v61, %v1716_v49  ;;  %v1756_v28 = vld [vmem:[#allocation9 + $0x470] sm:$0xff]  ;;  %v10103_v53 = vcombine.low %v1744_v45, %v1748_v22  ;;  %v1753_v57 = vld [vmem:[#allocation9 + $0x458] sm:$0xff] }
 0x396   :  { %8912 = vmatprep.subr.bf16.mxu1 %v10026_v9  ;;  %v10074_v9 = vcombine.high %v1713_v63, %v1717_v2 }
 0x398   :  { %8585 = vmatpush1.bf16.msra.mxu0 %v10023_v50  ;;  %v10071_v50 = vcombine.low %v1712_v61, %v1716_v49  ;;  %v1764_v61 = vld [vmem:[#allocation9 + $0x4b0] sm:$0xff] }
 0x399   :  { %8913 = vmatpush1.bf16.msra.mxu1 %v10025_v51  ;;  %8586 = vmatprep.subr.bf16.mxu0 %v10032_v13  ;;  %v10073_v51 = vcombine.low %v1713_v63, %v1717_v2  ;;  %v10080_v13 = vcombine.high %v1720_v10, %v1724_v11  ;;  %v1761_v63 = vld [vmem:[#allocation9 + $0x498] sm:$0xff] }
 0x39a   :  { %8914 = vmatprep.subr.bf16.mxu1 %v10034_v8  ;;  %v10082_v8 = vcombine.high %v1721_v48, %v1725_v27  ;;  %v1765_v2 = vld [vmem:[#allocation9 + $0x4b8] sm:$0xff] }
 0x39c   :  { %8587 = vmatpush1.bf16.msra.mxu0 %v10031_v25  ;;  %v10079_v25 = vcombine.low %v1720_v10, %v1724_v11  ;;  %v1768_v10 = vld [vmem:[#allocation9 + $0x4d0] sm:$0xff] }
 0x39d   :  { %8915 = vmatpush1.bf16.msra.mxu1 %v10033_v32  ;;  %8588 = vmatprep.subr.bf16.mxu0 %v10040_v23  ;;  %v10081_v32 = vcombine.low %v1721_v48, %v1725_v27  ;;  %v10088_v23 = vcombine.high %v1728_v14, %v1732_v17  ;;  %v1772_v11 = vld [vmem:[#allocation9 + $0x4f0] sm:$0xff]  ;;  %v1769_v48 = vld [vmem:[#allocation9 + $0x4d8] sm:$0xff] }
 0x39e   :  { %8916 = vmatprep.subr.bf16.mxu1 %v10042_v26  ;;  %v10090_v26 = vcombine.high %v1729_v20, %v1733_v21  ;;  %v1773_v27 = vld [vmem:[#allocation9 + $0x4f8] sm:$0xff] }
 0x3a0   :  { %8589 = vmatpush1.bf16.msra.mxu0 %v10039_v31  ;;  %v10087_v31 = vcombine.low %v1728_v14, %v1732_v17  ;;  %v1780_v14 = vld [vmem:[#allocation9 + $0x530] sm:$0xff]  ;;  %v1777_v17 = vld [vmem:[#allocation9 + $0x518] sm:$0xff] }
 0x3a1   :  { %8917 = vmatpush1.bf16.msra.mxu1 %v10041_v33  ;;  %8590 = vmatprep.subr.bf16.mxu0 %v10048_v34  ;;  %v10089_v33 = vcombine.low %v1729_v20, %v1733_v21  ;;  %v10096_v34 = vcombine.high %v1736_v0, %v1740_v56  ;;  %v1781_v20 = vld [vmem:[#allocation9 + $0x538] sm:$0xff]  ;;  %v10129_v21 = vcombine.low %v1769_v48, %v1773_v27 }
 0x3a2   :  { %8918 = vmatprep.subr.bf16.mxu1 %v10050_v37  ;;  %v10098_v37 = vcombine.high %v1737_v29, %v1741_v30 }
 0x3a4   :  { %8591 = vmatpush1.bf16.msra.mxu0 %v10047_v54  ;;  %v10095_v54 = vcombine.low %v1736_v0, %v1740_v56  ;;  %v1785_v0 = vld [vmem:[#allocation9 + $0x558] sm:$0xff] }
 0x3a5   :  { %8919 = vmatpush1.bf16.msra.mxu1 %v10049_v40  ;;  %8592 = vmatprep.subr.bf16.mxu0 %v10056_v46  ;;  %v10097_v40 = vcombine.low %v1737_v29, %v1741_v30  ;;  %v10104_v46 = vcombine.high %v1744_v45, %v1748_v22  ;;  %v1789_v56 = vld [vmem:[#allocation9 + $0x578] sm:$0xff]  ;;  %v10137_v30 = vcombine.low %v1777_v17, %v1781_v20 }
 0x3a6   :  { %8920 = vmatprep.subr.bf16.mxu1 %v10058_v42  ;;  %v10106_v42 = vcombine.high %v1745_v47, %v1749_v19  ;;  %v1793_v45 = vld [vmem:[#allocation9 + $0x598] sm:$0xff] }
 0x3a7   :  { %v1797_v22 = vld [vmem:[#allocation9 + $0x5b8] sm:$0xff] }
 0x3a8   :  { %8593 = vmatpush1.bf16.msra.mxu0 %v10055_v58  ;;  %v1757_v58 = vld [vmem:[#allocation9 + $0x478] sm:$0xff] }
 0x3a9   :  { %8921 = vmatpush1.bf16.msra.mxu1 %v10057_v59  ;;  %8594 = vmatprep.subr.bf16.mxu0 %v10064_v44  ;;  %v10105_v59 = vcombine.low %v1745_v47, %v1749_v19  ;;  %v10112_v44 = vcombine.high %v1752_v15, %v1756_v28  ;;  %v10114_v49 = vcombine.high %v1753_v57, %v1757_v58 }
 0x3aa   :  { %8922 = vmatprep.subr.bf16.mxu1 %v10066_v60  ;;  %v1760_v60 = vld [vmem:[#allocation9 + $0x490] sm:$0xff]  ;;  %v10145_v19 = vcombine.low %v1785_v0, %v1789_v56 }
 0x3ac   :  { %8595 = vmatpush1.bf16.msra.mxu0 %v10063_v3  ;;  %v10111_v3 = vcombine.low %v1752_v15, %v1756_v28  ;;  %v1801_v15 = vld [vmem:[#allocation9 + $0x5d8] sm:$0xff] }
 0x3ad   :  { %8923 = vmatpush1.bf16.msra.mxu1 %v10065_v6  ;;  %8596 = vmatprep.subr.bf16.mxu0 %v10072_v4  ;;  %v10113_v6 = vcombine.low %v1753_v57, %v1757_v58  ;;  %v10120_v4 = vcombine.high %v1760_v60, %v1764_v61  ;;  %v1805_v28 = vld [vmem:[#allocation9 + $0x5f8] sm:$0xff]  ;;  %v10153_v57 = vcombine.low %v1793_v45, %v1797_v22 }
 0x3ae   :  { %8924 = vmatprep.subr.bf16.mxu1 %v10074_v9  ;;  %v10122_v9 = vcombine.high %v1761_v63, %v1765_v2 }
 0x3b0   :  { %8597 = vmatpush1.bf16.msra.mxu0 %v10071_v50  ;;  %v10119_v50 = vcombine.low %v1760_v60, %v1764_v61  ;;  %v1812_v60 = vld [vmem:[#allocation9 + $0x630] sm:$0xff]  ;;  %v1809_v61 = vld [vmem:[#allocation9 + $0x618] sm:$0xff] }
 0x3b1   :  { %8925 = vmatpush1.bf16.msra.mxu1 %v10073_v51  ;;  %8598 = vmatprep.subr.bf16.mxu0 %v10080_v13  ;;  %v10128_v51 = vcombine.high %v1768_v10, %v1772_v11  ;;  %v10130_v13 = vcombine.high %v1769_v48, %v1773_v27 }
 0x3b2   :  { %8926 = vmatprep.subr.bf16.mxu1 %v10082_v8  ;;  %v1776_v8 = vld [vmem:[#allocation9 + $0x510] sm:$0xff] }
 0x3b3   :  { %v10135_v29 = vcombine.low %v1776_v8, %v1780_v14 }
 0x3b4   :  { %8599 = vmatpush1.bf16.msra.mxu0 %v10079_v25  ;;  %v10136_v25 = vcombine.high %v1776_v8, %v1780_v14  ;;  %v1825_v8 = vld [vmem:[#allocation9 + $0x698] sm:$0xff] }
 0x3b5   :  { %8927 = vmatpush1.bf16.msra.mxu1 %v10081_v32  ;;  %8600 = vmatprep.subr.bf16.mxu0 %v10088_v23  ;;  %v10138_v32 = vcombine.high %v1777_v17, %v1781_v20  ;;  %v1784_v23 = vld [vmem:[#allocation9 + $0x550] sm:$0xff]  ;;  %v1829_v14 = vld [vmem:[#allocation9 + $0x6b8] sm:$0xff] }
 0x3b6   :  { %8928 = vmatprep.subr.bf16.mxu1 %v10090_v26  ;;  %v1788_v26 = vld [vmem:[#allocation9 + $0x570] sm:$0xff] }
 0x3b7   :  { %v10143_v47 = vcombine.low %v1784_v23, %v1788_v26 }
 0x3b8   :  { %8601 = vmatpush1.bf16.msra.mxu0 %v10087_v31  ;;  %v10144_v31 = vcombine.high %v1784_v23, %v1788_v26  ;;  %v1833_v23 = vld [vmem:[#allocation9 + $0x6d8] sm:$0xff] }
 0x3b9   :  { %8929 = vmatpush1.bf16.msra.mxu1 %v10089_v33  ;;  %8602 = vmatprep.subr.bf16.mxu0 %v10096_v34  ;;  %v10146_v33 = vcombine.high %v1785_v0, %v1789_v56  ;;  %v1792_v34 = vld [vmem:[#allocation9 + $0x590] sm:$0xff]  ;;  %v1837_v26 = vld [vmem:[#allocation9 + $0x6f8] sm:$0xff]  ;;  %v10185_v56 = vcombine.low %v1825_v8, %v1829_v14 }
 0x3ba   :  { %8930 = vmatprep.subr.bf16.mxu1 %v10098_v37  ;;  %v1796_v37 = vld [vmem:[#allocation9 + $0x5b0] sm:$0xff] }
 0x3bc   :  { %8603 = vmatpush1.bf16.msra.mxu0 %v10095_v54  ;;  %v10152_v54 = vcombine.high %v1792_v34, %v1796_v37 }
 0x3bd   :  { %8931 = vmatpush1.bf16.msra.mxu1 %v10097_v40  ;;  %8613 = vmatprep.subr.bf16.mxu0 %v10104_v46  ;;  %v10154_v40 = vcombine.high %v1793_v45, %v1797_v22  ;;  %v1800_v46 = vld [vmem:[#allocation9 + $0x5d0] sm:$0xff]  ;;  %v10193_v22 = vcombine.low %v1833_v23, %v1837_v26 }
 0x3be   :  { %8941 = vmatprep.subr.bf16.mxu1 %v10106_v42  ;;  %v1804_v42 = vld [vmem:[#allocation9 + $0x5f0] sm:$0xff] }
 0x3bf   :  { %8605 = vmatmul.mubr.bf16.vlgmr.msra.gmra.mrb[36].mxu0 %v12191_v55  ;;  %v10160_v58 = vcombine.high %v1800_v46, %v1804_v42 }
 0x3c0   :  { %8933 = vmatmul.mubr.bf16.vlgmr.msra.gmra.mrb[36].mxu1 %v12191_v55  ;;  %8614 = vmatpush1.bf16.msra.mxu0 %v10103_v53  ;;  %v10121_v55 = vcombine.low %v1761_v63, %v1765_v2  ;;  %v10151_v53 = vcombine.low %v1792_v34, %v1796_v37  ;;  %v10159_v63 = vcombine.low %v1800_v46, %v1804_v42  ;;  %v1841_v34 = vld [vmem:[#allocation9 + $0x718] sm:$0xff] }
 0x3c1   :  { %8645 = vmatprep.mubr.bf16.mxu0 %v12197_v36  ;;  %8942 = vmatpush1.bf16.msra.mxu1 %v10105_v59  ;;  %v10162_v59 = vcombine.high %v1801_v15, %v1805_v28  ;;  %v10161_v2 = vcombine.low %v1801_v15, %v1805_v28  ;;  %v1845_v37 = vld [vmem:[#allocation9 + $0x738] sm:$0xff] }
 0x3c2   :  { %8973 = vmatprep.mubr.bf16.mxu1 %v12197_v36  ;;  %8615 = vmatprep.subr.bf16.mxu0 %v10112_v44  ;;  %v10127_v36 = vcombine.low %v1768_v10, %v1772_v11  ;;  %v1808_v44 = vld [vmem:[#allocation9 + $0x610] sm:$0xff]  ;;  %v1817_v10 = vld [vmem:[#allocation9 + $0x658] sm:$0xff]  ;;  %v10201_v28 = vcombine.low %v1841_v34, %v1845_v37 }
 0x3c3   :  { %8943 = vmatprep.subr.bf16.mxu1 %v10114_v49  ;;  %v1813_v49 = vld [vmem:[#allocation9 + $0x638] sm:$0xff]  ;;  %v10167_v48 = vcombine.low %v1808_v44, %v1812_v60 }
 0x3c4   :  { %8616 = vmatpush1.bf16.msra.mxu0 %v10111_v3  ;;  %v10168_v3 = vcombine.high %v1808_v44, %v1812_v60  ;;  %v1821_v11 = vld [vmem:[#allocation9 + $0x678] sm:$0xff]  ;;  %v10169_v27 = vcombine.low %v1809_v61, %v1813_v49 }
 0x3c5   :  { %8944 = vmatpush1.bf16.msra.mxu1 %v10113_v6  ;;  %8617 = vmatprep.subr.bf16.mxu0 %v10120_v4  ;;  %v10170_v6 = vcombine.high %v1809_v61, %v1813_v49  ;;  %v1816_v4 = vld [vmem:[#allocation9 + $0x650] sm:$0xff]  ;;  %v10177_v20 = vcombine.low %v1817_v10, %v1821_v11  ;;  %v1849_v46 = vld [vmem:[#allocation9 + $0x758] sm:$0xff] }
 0x3c6   :  { %8945 = vmatprep.subr.bf16.mxu1 %v10122_v9  ;;  %v1820_v9 = vld [vmem:[#allocation9 + $0x670] sm:$0xff]  ;;  %v1853_v42 = vld [vmem:[#allocation9 + $0x778] sm:$0xff] }
 0x3c7   :  { %v10175_v17 = vcombine.low %v1816_v4, %v1820_v9  ;;  %v1857_v44 = vld [vmem:[#allocation9 + $0x798] sm:$0xff]  ;;  %v10209_v49 = vcombine.low %v1849_v46, %v1853_v42 }
 0x3c8   :  { %8618 = vmatpush1.bf16.msra.mxu0 %v10119_v50  ;;  %v10176_v50 = vcombine.high %v1816_v4, %v1820_v9  ;;  %v1861_v60 = vld [vmem:[#allocation9 + $0x7b8] sm:$0xff] }
 0x3c9   :  { %8946 = vmatpush1.bf16.msra.mxu1 %v10121_v55  ;;  %8619 = vmatprep.subr.bf16.mxu0 %v10128_v51  ;;  %v10178_v55 = vcombine.high %v1817_v10, %v1821_v11  ;;  %v1824_v51 = vld [vmem:[#allocation9 + $0x690] sm:$0xff]  ;;  %v1865_v4 = vld [vmem:[#allocation9 + $0x7d8] sm:$0xff]  ;;  %v10217_v11 = vcombine.low %v1857_v44, %v1861_v60 }
 0x3ca   :  { %8947 = vmatprep.subr.bf16.mxu1 %v10130_v13  ;;  %v1828_v13 = vld [vmem:[#allocation9 + $0x6b0] sm:$0xff]  ;;  %v1869_v9 = vld [vmem:[#allocation9 + $0x7f8] sm:$0xff] }
 0x3cb   :  { %v10183_v0 = vcombine.low %v1824_v51, %v1828_v13 }
 0x3cc   :  { %8620 = vmatpush1.bf16.msra.mxu0 %v10127_v36  ;;  %v10184_v36 = vcombine.high %v1824_v51, %v1828_v13  ;;  %v1873_v51 = vld [vmem:[#allocation9 + $0x818] sm:$0xff] }
 0x3cd   :  { %8948 = vmatpush1.bf16.msra.mxu1 %v10129_v21  ;;  %8621 = vmatprep.subr.bf16.mxu0 %v10136_v25  ;;  %v10186_v21 = vcombine.high %v1825_v8, %v1829_v14  ;;  %v1832_v25 = vld [vmem:[#allocation9 + $0x6d0] sm:$0xff]  ;;  %v1877_v13 = vld [vmem:[#allocation9 + $0x838] sm:$0xff]  ;;  %v10225_v14 = vcombine.low %v1865_v4, %v1869_v9 }
 0x3ce   :  { %8949 = vmatprep.subr.bf16.mxu1 %v10138_v32  ;;  %v1836_v32 = vld [vmem:[#allocation9 + $0x6f0] sm:$0xff] }
 0x3cf   :  { %v10191_v45 = vcombine.low %v1832_v25, %v1836_v32 }
 0x3d0   :  { %8622 = vmatpush1.bf16.msra.mxu0 %v10135_v29  ;;  %v10192_v29 = vcombine.high %v1832_v25, %v1836_v32  ;;  %v1881_v32 = vld [vmem:[#allocation9 + $0x858] sm:$0xff] }
 0x3d1   :  { %8950 = vmatpush1.bf16.msra.mxu1 %v10137_v30  ;;  %8623 = vmatprep.subr.bf16.mxu0 %v10144_v31  ;;  %v10194_v30 = vcombine.high %v1833_v23, %v1837_v26  ;;  %v1840_v31 = vld [vmem:[#allocation9 + $0x710] sm:$0xff]  ;;  %v1885_v23 = vld [vmem:[#allocation9 + $0x878] sm:$0xff]  ;;  %v10233_v26 = vcombine.low %v1873_v51, %v1877_v13 }
 0x3d2   :  { %8951 = vmatprep.subr.bf16.mxu1 %v10146_v33  ;;  %v1844_v33 = vld [vmem:[#allocation9 + $0x730] sm:$0xff] }
 0x3d3   :  { %v10199_v15 = vcombine.low %v1840_v31, %v1844_v33 }
 0x3d4   :  { %8624 = vmatpush1.bf16.msra.mxu0 %v10143_v47  ;;  %v10200_v47 = vcombine.high %v1840_v31, %v1844_v33  ;;  %v1889_v31 = vld [vmem:[#allocation9 + $0x898] sm:$0xff] }
 0x3d5   :  { %8952 = vmatpush1.bf16.msra.mxu1 %v10145_v19  ;;  %8625 = vmatprep.subr.bf16.mxu0 %v10152_v54  ;;  %v10202_v19 = vcombine.high %v1841_v34, %v1845_v37  ;;  %v1848_v54 = vld [vmem:[#allocation9 + $0x750] sm:$0xff]  ;;  %v1893_v33 = vld [vmem:[#allocation9 + $0x8b8] sm:$0xff]  ;;  %v10241_v37 = vcombine.low %v1881_v32, %v1885_v23 }
 0x3d6   :  { %8953 = vmatprep.subr.bf16.mxu1 %v10154_v40  ;;  %v1852_v40 = vld [vmem:[#allocation9 + $0x770] sm:$0xff] }
 0x3d7   :  { %v10207_v61 = vcombine.low %v1848_v54, %v1852_v40 }
 0x3d8   :  { %8626 = vmatpush1.bf16.msra.mxu0 %v10151_v53  ;;  %v10208_v53 = vcombine.high %v1848_v54, %v1852_v40  ;;  %v1897_v54 = vld [vmem:[#allocation9 + $0x8d8] sm:$0xff] }
 0x3d9   :  { %8954 = vmatpush1.bf16.msra.mxu1 %v10153_v57  ;;  %8627 = vmatprep.subr.bf16.mxu0 %v10160_v58  ;;  %v10210_v57 = vcombine.high %v1849_v46, %v1853_v42  ;;  %v1856_v58 = vld [vmem:[#allocation9 + $0x790] sm:$0xff]  ;;  %v1901_v40 = vld [vmem:[#allocation9 + $0x8f8] sm:$0xff] }
 0x3da   :  { %8955 = vmatprep.subr.bf16.mxu1 %v10162_v59  ;;  %v1860_v59 = vld [vmem:[#allocation9 + $0x7b0] sm:$0xff] }
 0x3db   :  { %v10215_v10 = vcombine.low %v1856_v58, %v1860_v59 }
 0x3dc   :  { %8628 = vmatpush1.bf16.msra.mxu0 %v10159_v63  ;;  %v10216_v63 = vcombine.high %v1856_v58, %v1860_v59  ;;  %v1909_v58 = vld [vmem:[#allocation9 + $0x938] sm:$0xff]  ;;  %v10257_v59 = vcombine.low %v1897_v54, %v1901_v40 }
 0x3dd   :  { %8956 = vmatpush1.bf16.msra.mxu1 %v10161_v2  ;;  %8629 = vmatprep.subr.bf16.mxu0 %v10168_v3  ;;  %v10218_v2 = vcombine.high %v1857_v44, %v1861_v60  ;;  %v1864_v3 = vld [vmem:[#allocation9 + $0x7d0] sm:$0xff] }
 0x3de   :  { %8957 = vmatprep.subr.bf16.mxu1 %v10170_v6  ;;  %v1868_v6 = vld [vmem:[#allocation9 + $0x7f0] sm:$0xff] }
 0x3df   :  { %v10223_v8 = vcombine.low %v1864_v3, %v1868_v6 }
 0x3e0   :  { %8630 = vmatpush1.bf16.msra.mxu0 %v10167_v48  ;;  %v10224_v48 = vcombine.high %v1864_v3, %v1868_v6 }
 0x3e1   :  { %8958 = vmatpush1.bf16.msra.mxu1 %v10169_v27  ;;  %8631 = vmatprep.subr.bf16.mxu0 %v10176_v50  ;;  %v10226_v27 = vcombine.high %v1865_v4, %v1869_v9  ;;  %v1872_v50 = vld [vmem:[#allocation9 + $0x810] sm:$0xff] }
 0x3e2   :  { %8959 = vmatprep.subr.bf16.mxu1 %v10178_v55  ;;  %v1876_v55 = vld [vmem:[#allocation9 + $0x830] sm:$0xff] }
 0x3e3   :  { %v10231_v25 = vcombine.low %v1872_v50, %v1876_v55 }
 0x3e4   :  { %8632 = vmatpush1.bf16.msra.mxu0 %v10175_v17  ;;  %v10232_v17 = vcombine.high %v1872_v50, %v1876_v55 }
 0x3e5   :  { %8960 = vmatpush1.bf16.msra.mxu1 %v10177_v20  ;;  %8633 = vmatprep.subr.bf16.mxu0 %v10184_v36  ;;  %v10234_v20 = vcombine.high %v1873_v51, %v1877_v13  ;;  %v1880_v36 = vld [vmem:[#allocation9 + $0x850] sm:$0xff] }
 0x3e6   :  { %8961 = vmatprep.subr.bf16.mxu1 %v10186_v21  ;;  %v1884_v21 = vld [vmem:[#allocation9 + $0x870] sm:$0xff] }
 0x3e7   :  { %v10239_v34 = vcombine.low %v1880_v36, %v1884_v21 }
 0x3e8   :  { %8634 = vmatpush1.bf16.msra.mxu0 %v10183_v0  ;;  %v10240_v0 = vcombine.high %v1880_v36, %v1884_v21 }
 0x3e9   :  { %8962 = vmatpush1.bf16.msra.mxu1 %v10185_v56  ;;  %8635 = vmatprep.subr.bf16.mxu0 %v10192_v29  ;;  %v1888_v56 = vld [vmem:[#allocation9 + $0x890] sm:$0xff] }
 0x3ea   :  { %8963 = vmatprep.subr.bf16.mxu1 %v10194_v30  ;;  %v1892_v29 = vld [vmem:[#allocation9 + $0x8b0] sm:$0xff]  ;;  %v10242_v30 = vcombine.high %v1881_v32, %v1885_v23 }
 0x3eb   :  { %v10247_v46 = vcombine.low %v1888_v56, %v1892_v29  ;;  %v1936_v23 = vld [vmem:[#allocation9 + $0xa10] sm:$0xff] }
 0x3ec   :  { %8636 = vmatpush1.bf16.msra.mxu0 %v10191_v45  ;;  %v10248_v45 = vcombine.high %v1888_v56, %v1892_v29  ;;  %v1941_v56 = vld [vmem:[#allocation9 + $0xa38] sm:$0xff] }
 0x3ed   :  { %8964 = vmatpush1.bf16.msra.mxu1 %v10193_v22  ;;  %8637 = vmatprep.subr.bf16.mxu0 %v10200_v47  ;;  %v10250_v22 = vcombine.high %v1889_v31, %v1893_v33  ;;  %v1896_v47 = vld [vmem:[#allocation9 + $0x8d0] sm:$0xff] }
 0x3ee   :  { %8965 = vmatprep.subr.bf16.mxu1 %v10202_v19  ;;  %v1900_v19 = vld [vmem:[#allocation9 + $0x8f0] sm:$0xff] }
 0x3ef   :  { %v10256_v42 = vcombine.high %v1896_v47, %v1900_v19 }
 0x3f0   :  { %8638 = vmatpush1.bf16.msra.mxu0 %v10199_v15  ;;  %v10258_v15 = vcombine.high %v1897_v54, %v1901_v40 }
 0x3f1   :  { %8966 = vmatpush1.bf16.msra.mxu1 %v10201_v28  ;;  %8639 = vmatprep.subr.bf16.mxu0 %v10208_v53  ;;  %v1904_v28 = vld [vmem:[#allocation9 + $0x910] sm:$0xff] }
 0x3f2   :  { %8967 = vmatprep.subr.bf16.mxu1 %v10210_v57  ;;  %v1908_v53 = vld [vmem:[#allocation9 + $0x930] sm:$0xff]  ;;  %v1905_v57 = vld [vmem:[#allocation9 + $0x918] sm:$0xff] }
 0x3f3   :  { %v10264_v44 = vcombine.high %v1904_v28, %v1908_v53  ;;  %v10266_v60 = vcombine.high %v1905_v57, %v1909_v58  ;;  %v10263_v3 = vcombine.low %v1904_v28, %v1908_v53  ;;  %v10265_v6 = vcombine.low %v1905_v57, %v1909_v58 }
 0x3f4   :  { %8640 = vmatpush1.bf16.msra.mxu0 %v10207_v61  ;;  %v1912_v61 = vld [vmem:[#allocation9 + $0x950] sm:$0xff] }
 0x3f5   :  { %8968 = vmatpush1.bf16.msra.mxu1 %v10209_v49  ;;  %8641 = vmatprep.subr.bf16.mxu0 %v10216_v63  ;;  %v1916_v49 = vld [vmem:[#allocation9 + $0x970] sm:$0xff]  ;;  %v1913_v63 = vld [vmem:[#allocation9 + $0x958] sm:$0xff] }
 0x3f6   :  { %8969 = vmatprep.subr.bf16.mxu1 %v10218_v2  ;;  %v1917_v2 = vld [vmem:[#allocation9 + $0x978] sm:$0xff]  ;;  %v10272_v4 = vcombine.high %v1912_v61, %v1916_v49  ;;  %v10271_v50 = vcombine.low %v1912_v61, %v1916_v49 }
 0x3f7   :  { %v10274_v9 = vcombine.high %v1913_v63, %v1917_v2  ;;  %v10273_v55 = vcombine.low %v1913_v63, %v1917_v2 }
 0x3f8   :  { %8642 = vmatpush1.bf16.msra.mxu0 %v10215_v10  ;;  %v1920_v10 = vld [vmem:[#allocation9 + $0x990] sm:$0xff] }
 0x3f9   :  { %8970 = vmatpush1.bf16.msra.mxu1 %v10217_v11  ;;  %8643 = vmatprep.subr.bf16.mxu0 %v10224_v48  ;;  %v1924_v11 = vld [vmem:[#allocation9 + $0x9b0] sm:$0xff]  ;;  %v1921_v48 = vld [vmem:[#allocation9 + $0x998] sm:$0xff] }
 0x3fa   :  { %8971 = vmatprep.subr.bf16.mxu1 %v10226_v27  ;;  %v1925_v27 = vld [vmem:[#allocation9 + $0x9b8] sm:$0xff]  ;;  %v10280_v51 = vcombine.high %v1920_v10, %v1924_v11  ;;  %v10279_v36 = vcombine.low %v1920_v10, %v1924_v11 }
 0x3fb   :  { %v10282_v13 = vcombine.high %v1921_v48, %v1925_v27  ;;  %v10281_v21 = vcombine.low %v1921_v48, %v1925_v27 }
 0x3fc   :  { %8644 = vmatpush1.bf16.msra.mxu0 %v10223_v8  ;;  %v1928_v8 = vld [vmem:[#allocation9 + $0x9d0] sm:$0xff] }
 0x3fd   :  { %8972 = vmatpush1.bf16.msra.mxu1 %v10225_v14  ;;  %8654 = vmatprep.subr.bf16.mxu0 %v10232_v17  ;;  %v1932_v14 = vld [vmem:[#allocation9 + $0x9f0] sm:$0xff]  ;;  %v1929_v17 = vld [vmem:[#allocation9 + $0x9d8] sm:$0xff] }
 0x3fe   :  { %8982 = vmatprep.subr.bf16.mxu1 %v10234_v20  ;;  %v1933_v20 = vld [vmem:[#allocation9 + $0x9f8] sm:$0xff]  ;;  %v10287_v29 = vcombine.low %v1928_v8, %v1932_v14 }
 0x3ff   :  { %8646 = vmatmul.mubr.bf16.vlgmr.msra.gmra.mrb[36].mxu0 %v12226_v5  ;;  %v10290_v32 = vcombine.high %v1929_v17, %v1933_v20 }
 0x400   :  { %8974 = vmatmul.mubr.bf16.vlgmr.msra.gmra.mrb[36].mxu1 %v12226_v5  ;;  %8655 = vmatpush1.bf16.msra.mxu0 %v10231_v25  ;;  %v10249_v5 = vcombine.low %v1889_v31, %v1893_v33  ;;  %v10288_v25 = vcombine.high %v1928_v8, %v1932_v14 }
 0x401   :  { %8686 = vmatprep.mubr.bf16.mxu0 %v12229_v7  ;;  %8983 = vmatpush1.bf16.msra.mxu1 %v10233_v26  ;;  %v1940_v26 = vld [vmem:[#allocation9 + $0xa30] sm:$0xff] }
 0x402   :  { %9014 = vmatprep.mubr.bf16.mxu1 %v12229_v7  ;;  %8656 = vmatprep.subr.bf16.mxu0 %v10240_v0  ;;  %v10255_v7 = vcombine.low %v1896_v47, %v1900_v19  ;;  %v1937_v0 = vld [vmem:[#allocation9 + $0xa18] sm:$0xff]  ;;  %v10296_v31 = vcombine.high %v1936_v23, %v1940_v26  ;;  %v10295_v47 = vcombine.low %v1936_v23, %v1940_v26 }
 0x403   :  { %8984 = vmatprep.subr.bf16.mxu1 %v10242_v30  ;;  %v10289_v30 = vcombine.low %v1929_v17, %v1933_v20  ;;  %v10298_v33 = vcombine.high %v1937_v0, %v1941_v56  ;;  %v10297_v19 = vcombine.low %v1937_v0, %v1941_v56 }
 0x404   :  { %8657 = vmatpush1.bf16.msra.mxu0 %v10239_v34  ;;  %v1944_v34 = vld [vmem:[#allocation9 + $0xa50] sm:$0xff] }
 0x405   :  { %8985 = vmatpush1.bf16.msra.mxu1 %v10241_v37  ;;  %8658 = vmatprep.subr.bf16.mxu0 %v10248_v45  ;;  %v1948_v37 = vld [vmem:[#allocation9 + $0xa70] sm:$0xff]  ;;  %v1945_v45 = vld [vmem:[#allocation9 + $0xa58] sm:$0xff] }
 0x406   :  { %8986 = vmatprep.subr.bf16.mxu1 %v10250_v22  ;;  %v1949_v22 = vld [vmem:[#allocation9 + $0xa78] sm:$0xff]  ;;  %v10304_v54 = vcombine.high %v1944_v34, %v1948_v37  ;;  %v10303_v28 = vcombine.low %v1944_v34, %v1948_v37 }
 0x407   :  { %v10306_v40 = vcombine.high %v1945_v45, %v1949_v22  ;;  %v10305_v53 = vcombine.low %v1945_v45, %v1949_v22 }
 0x408   :  { %8659 = vmatpush1.bf16.msra.mxu0 %v10247_v46  ;;  %v1952_v46 = vld [vmem:[#allocation9 + $0xa90] sm:$0xff] }
 0x409   :  { %8987 = vmatpush1.bf16.msra.mxu1 %v10249_v5  ;;  %8660 = vmatprep.subr.bf16.mxu0 %v10256_v42  ;;  %v1956_v5 = vld [vmem:[#allocation9 + $0xab0] sm:$0xff]  ;;  %v1953_v42 = vld [vmem:[#allocation9 + $0xa98] sm:$0xff] }
 0x40a   :  { %8988 = vmatprep.subr.bf16.mxu1 %v10258_v15  ;;  %v1957_v15 = vld [vmem:[#allocation9 + $0xab8] sm:$0xff]  ;;  %v10312_v57 = vcombine.high %v1952_v46, %v1956_v5  ;;  %v10311_v61 = vcombine.low %v1952_v46, %v1956_v5 }
 0x40b   :  { %v10314_v58 = vcombine.high %v1953_v42, %v1957_v15  ;;  %v10313_v49 = vcombine.low %v1953_v42, %v1957_v15 }
 0x40c   :  { %8661 = vmatpush1.bf16.msra.mxu0 %v10255_v7  ;;  %v1960_v7 = vld [vmem:[#allocation9 + $0xad0] sm:$0xff] }
 0x40d   :  { %8989 = vmatpush1.bf16.msra.mxu1 %v10257_v59  ;;  %8662 = vmatprep.subr.bf16.mxu0 %v10264_v44  ;;  %v1964_v59 = vld [vmem:[#allocation9 + $0xaf0] sm:$0xff]  ;;  %v1961_v44 = vld [vmem:[#allocation9 + $0xad8] sm:$0xff] }
 0x40e   :  { %8990 = vmatprep.subr.bf16.mxu1 %v10266_v60  ;;  %v1965_v60 = vld [vmem:[#allocation9 + $0xaf8] sm:$0xff]  ;;  %v10320_v63 = vcombine.high %v1960_v7, %v1964_v59  ;;  %v10319_v10 = vcombine.low %v1960_v7, %v1964_v59 }
 0x40f   :  { %v10322_v2 = vcombine.high %v1961_v44, %v1965_v60  ;;  %v10321_v11 = vcombine.low %v1961_v44, %v1965_v60  ;;  %v2013_v7 = vld [vmem:[#allocation9 + $0xc78] sm:$0xff]  ;;  %v2016_v60 = vld [vmem:[#allocation9 + $0xc90] sm:$0xff] }
 0x410   :  { %8663 = vmatpush1.bf16.msra.mxu0 %v10263_v3  ;;  %v1968_v3 = vld [vmem:[#allocation9 + $0xb10] sm:$0xff] }
 0x411   :  { %8991 = vmatpush1.bf16.msra.mxu1 %v10265_v6  ;;  %8664 = vmatprep.subr.bf16.mxu0 %v10272_v4  ;;  %v1972_v6 = vld [vmem:[#allocation9 + $0xb30] sm:$0xff]  ;;  %v1969_v4 = vld [vmem:[#allocation9 + $0xb18] sm:$0xff] }
 0x412   :  { %8992 = vmatprep.subr.bf16.mxu1 %v10274_v9  ;;  %v1973_v9 = vld [vmem:[#allocation9 + $0xb38] sm:$0xff]  ;;  %v10328_v48 = vcombine.high %v1968_v3, %v1972_v6  ;;  %v10327_v8 = vcombine.low %v1968_v3, %v1972_v6 }
 0x413   :  { %v10330_v27 = vcombine.high %v1969_v4, %v1973_v9  ;;  %v10329_v14 = vcombine.low %v1969_v4, %v1973_v9 }
 0x414   :  { %8665 = vmatpush1.bf16.msra.mxu0 %v10271_v50  ;;  %v1976_v50 = vld [vmem:[#allocation9 + $0xb50] sm:$0xff] }
 0x415   :  { %8993 = vmatpush1.bf16.msra.mxu1 %v10273_v55  ;;  %8666 = vmatprep.subr.bf16.mxu0 %v10280_v51  ;;  %v1980_v55 = vld [vmem:[#allocation9 + $0xb70] sm:$0xff]  ;;  %v1977_v51 = vld [vmem:[#allocation9 + $0xb58] sm:$0xff] }
 0x416   :  { %8994 = vmatprep.subr.bf16.mxu1 %v10282_v13  ;;  %v1981_v13 = vld [vmem:[#allocation9 + $0xb78] sm:$0xff]  ;;  %v10336_v17 = vcombine.high %v1976_v50, %v1980_v55  ;;  %v10335_v23 = vcombine.low %v1976_v50, %v1980_v55 }
 0x417   :  { %v10338_v20 = vcombine.high %v1977_v51, %v1981_v13  ;;  %v10337_v26 = vcombine.low %v1977_v51, %v1981_v13  ;;  %v2032_v13 = vld [vmem:[#allocation9 + $0xd10] sm:$0xff] }
 0x418   :  { %8667 = vmatpush1.bf16.msra.mxu0 %v10279_v36  ;;  %v1984_v36 = vld [vmem:[#allocation9 + $0xb90] sm:$0xff] }
 0x419   :  { %8995 = vmatpush1.bf16.msra.mxu1 %v10281_v21  ;;  %8668 = vmatprep.subr.bf16.mxu0 %v10288_v25  ;;  %v1988_v21 = vld [vmem:[#allocation9 + $0xbb0] sm:$0xff]  ;;  %v1985_v25 = vld [vmem:[#allocation9 + $0xb98] sm:$0xff] }
 0x41a   :  { %8996 = vmatprep.subr.bf16.mxu1 %v10290_v32  ;;  %v1989_v32 = vld [vmem:[#allocation9 + $0xbb8] sm:$0xff]  ;;  %v10344_v0 = vcombine.high %v1984_v36, %v1988_v21  ;;  %v10343_v34 = vcombine.low %v1984_v36, %v1988_v21 }
 0x41b   :  { %v10346_v56 = vcombine.high %v1985_v25, %v1989_v32  ;;  %v10345_v37 = vcombine.low %v1985_v25, %v1989_v32  ;;  %v2040_v25 = vld [vmem:[#allocation9 + $0xd50] sm:$0xff] }
 0x41c   :  { %8669 = vmatpush1.bf16.msra.mxu0 %v10287_v29  ;;  %v1992_v29 = vld [vmem:[#allocation9 + $0xbd0] sm:$0xff] }
 0x41d   :  { %8997 = vmatpush1.bf16.msra.mxu1 %v10289_v30  ;;  %8670 = vmatprep.subr.bf16.mxu0 %v10296_v31  ;;  %v1996_v30 = vld [vmem:[#allocation9 + $0xbf0] sm:$0xff]  ;;  %v1993_v31 = vld [vmem:[#allocation9 + $0xbd8] sm:$0xff] }
 0x41e   :  { %8998 = vmatprep.subr.bf16.mxu1 %v10298_v33  ;;  %v1997_v33 = vld [vmem:[#allocation9 + $0xbf8] sm:$0xff]  ;;  %v10352_v45 = vcombine.high %v1992_v29, %v1996_v30  ;;  %v10351_v46 = vcombine.low %v1992_v29, %v1996_v30  ;;  %v2044_v32 = vld [vmem:[#allocation9 + $0xd70] sm:$0xff] }
 0x41f   :  { %v10354_v22 = vcombine.high %v1993_v31, %v1997_v33  ;;  %v10353_v5 = vcombine.low %v1993_v31, %v1997_v33  ;;  %v10400_v29 = vcombine.high %v2040_v25, %v2044_v32  ;;  %v2048_v31 = vld [vmem:[#allocation9 + $0xd90] sm:$0xff] }
 0x420   :  { %8671 = vmatpush1.bf16.msra.mxu0 %v10295_v47  ;;  %v2000_v47 = vld [vmem:[#allocation9 + $0xc10] sm:$0xff] }
 0x421   :  { %8999 = vmatpush1.bf16.msra.mxu1 %v10297_v19  ;;  %8672 = vmatprep.subr.bf16.mxu0 %v10304_v54  ;;  %v2004_v19 = vld [vmem:[#allocation9 + $0xc30] sm:$0xff]  ;;  %v2001_v54 = vld [vmem:[#allocation9 + $0xc18] sm:$0xff] }
 0x422   :  { %9000 = vmatprep.subr.bf16.mxu1 %v10306_v40  ;;  %v2005_v40 = vld [vmem:[#allocation9 + $0xc38] sm:$0xff]  ;;  %v10360_v42 = vcombine.high %v2000_v47, %v2004_v19  ;;  %v2052_v33 = vld [vmem:[#allocation9 + $0xdb0] sm:$0xff] }
 0x423   :  { %v10362_v15 = vcombine.high %v2001_v54, %v2005_v40  ;;  %v10361_v59 = vcombine.low %v2001_v54, %v2005_v40  ;;  %v2056_v40 = vld [vmem:[#allocation9 + $0xdd0] sm:$0xff] }
 0x424   :  { %8673 = vmatpush1.bf16.msra.mxu0 %v10303_v28  ;;  %v2008_v28 = vld [vmem:[#allocation9 + $0xc50] sm:$0xff] }
 0x425   :  { %9001 = vmatpush1.bf16.msra.mxu1 %v10305_v53  ;;  %8674 = vmatprep.subr.bf16.mxu0 %v10312_v57  ;;  %v2012_v53 = vld [vmem:[#allocation9 + $0xc70] sm:$0xff]  ;;  %v10359_v57 = vcombine.low %v2000_v47, %v2004_v19  ;;  %v10408_v47 = vcombine.high %v2048_v31, %v2052_v33 }
 0x426   :  { %9002 = vmatprep.subr.bf16.mxu1 %v10314_v58  ;;  %v2009_v58 = vld [vmem:[#allocation9 + $0xc58] sm:$0xff]  ;;  %v10368_v44 = vcombine.high %v2008_v28, %v2012_v53  ;;  %v10367_v3 = vcombine.low %v2008_v28, %v2012_v53 }
 0x427   :  { %v10369_v6 = vcombine.low %v2009_v58, %v2013_v7  ;;  %v2061_v28 = vld [vmem:[#allocation9 + $0xdf8] sm:$0xff] }
 0x428   :  { %8675 = vmatpush1.bf16.msra.mxu0 %v10311_v61  ;;  %v2020_v61 = vld [vmem:[#allocation9 + $0xcb0] sm:$0xff] }
 0x429   :  { %9003 = vmatpush1.bf16.msra.mxu1 %v10313_v49  ;;  %8676 = vmatprep.subr.bf16.mxu0 %v10320_v63  ;;  %v10370_v49 = vcombine.high %v2009_v58, %v2013_v7  ;;  %v2017_v63 = vld [vmem:[#allocation9 + $0xc98] sm:$0xff]  ;;  %v10376_v4 = vcombine.high %v2016_v60, %v2020_v61  ;;  %v10375_v50 = vcombine.low %v2016_v60, %v2020_v61 }
 0x42a   :  { %9004 = vmatprep.subr.bf16.mxu1 %v10322_v2  ;;  %v2021_v2 = vld [vmem:[#allocation9 + $0xcb8] sm:$0xff]  ;;  %v10407_v58 = vcombine.low %v2048_v31, %v2052_v33 }
 0x42b   :  { %v10378_v9 = vcombine.high %v2017_v63, %v2021_v2 }
 0x42c   :  { %8677 = vmatpush1.bf16.msra.mxu0 %v10319_v10  ;;  %v2024_v10 = vld [vmem:[#allocation9 + $0xcd0] sm:$0xff] }
 0x42d   :  { %9005 = vmatpush1.bf16.msra.mxu1 %v10321_v11  ;;  %8678 = vmatprep.subr.bf16.mxu0 %v10328_v48  ;;  %v2028_v11 = vld [vmem:[#allocation9 + $0xcf0] sm:$0xff]  ;;  %v2025_v48 = vld [vmem:[#allocation9 + $0xcd8] sm:$0xff] }
 0x42e   :  { %9006 = vmatprep.subr.bf16.mxu1 %v10330_v27  ;;  %v2029_v27 = vld [vmem:[#allocation9 + $0xcf8] sm:$0xff]  ;;  %v10384_v55 = vcombine.high %v2024_v10, %v2028_v11 }
 0x42f   :  { %v10386_v51 = vcombine.high %v2025_v48, %v2029_v27 }
 0x430   :  { %8679 = vmatpush1.bf16.msra.mxu0 %v10327_v8  ;;  %v2036_v8 = vld [vmem:[#allocation9 + $0xd30] sm:$0xff] }
 0x431   :  { %9007 = vmatpush1.bf16.msra.mxu1 %v10329_v14  ;;  %8680 = vmatprep.subr.bf16.mxu0 %v10336_v17  ;;  %v2033_v14 = vld [vmem:[#allocation9 + $0xd18] sm:$0xff]  ;;  %v10392_v36 = vcombine.high %v2032_v13, %v2036_v8 }
 0x432   :  { %9008 = vmatprep.subr.bf16.mxu1 %v10338_v20  ;;  %v2037_v17 = vld [vmem:[#allocation9 + $0xd38] sm:$0xff]  ;;  %v10385_v20 = vcombine.low %v2025_v48, %v2029_v27  ;;  %v2072_v48 = vld [vmem:[#allocation9 + $0xe50] sm:$0xff] }
 0x433   :  { %v10394_v21 = vcombine.high %v2033_v14, %v2037_v17  ;;  %v2076_v27 = vld [vmem:[#allocation9 + $0xe70] sm:$0xff] }
 0x434   :  { %8681 = vmatpush1.bf16.msra.mxu0 %v10335_v23  ;;  %v2041_v23 = vld [vmem:[#allocation9 + $0xd58] sm:$0xff] }
 0x435   :  { %9009 = vmatpush1.bf16.msra.mxu1 %v10337_v26  ;;  %8682 = vmatprep.subr.bf16.mxu0 %v10344_v0  ;;  %v2045_v26 = vld [vmem:[#allocation9 + $0xd78] sm:$0xff]  ;;  %v10391_v0 = vcombine.low %v2032_v13, %v2036_v8  ;;  %v10432_v13 = vcombine.high %v2072_v48, %v2076_v27 }
 0x436   :  { %9010 = vmatprep.subr.bf16.mxu1 %v10346_v56  ;;  %v10393_v56 = vcombine.low %v2033_v14, %v2037_v17  ;;  %v10402_v30 = vcombine.high %v2041_v23, %v2045_v26  ;;  %v2080_v14 = vld [vmem:[#allocation9 + $0xe90] sm:$0xff] }
 0x437   :  { %v2084_v17 = vld [vmem:[#allocation9 + $0xeb0] sm:$0xff] }
 0x438   :  { %8683 = vmatpush1.bf16.msra.mxu0 %v10343_v34  ;;  %v2049_v34 = vld [vmem:[#allocation9 + $0xd98] sm:$0xff] }
 0x439   :  { %9011 = vmatpush1.bf16.msra.mxu1 %v10345_v37  ;;  %8684 = vmatprep.subr.bf16.mxu0 %v10352_v45  ;;  %v2053_v37 = vld [vmem:[#allocation9 + $0xdb8] sm:$0xff]  ;;  %v10399_v45 = vcombine.low %v2040_v25, %v2044_v32  ;;  %v10440_v25 = vcombine.high %v2080_v14, %v2084_v17 }
 0x43a   :  { %9012 = vmatprep.subr.bf16.mxu1 %v10354_v22  ;;  %v10401_v22 = vcombine.low %v2041_v23, %v2045_v26  ;;  %v10410_v54 = vcombine.high %v2049_v34, %v2053_v37  ;;  %v2088_v23 = vld [vmem:[#allocation9 + $0xed0] sm:$0xff] }
 0x43b   :  { %v2092_v26 = vld [vmem:[#allocation9 + $0xef0] sm:$0xff] }
 0x43c   :  { %8685 = vmatpush1.bf16.msra.mxu0 %v10351_v46  ;;  %v2060_v46 = vld [vmem:[#allocation9 + $0xdf0] sm:$0xff]  ;;  %v10448_v31 = vcombine.high %v2088_v23, %v2092_v26 }
 0x43d   :  { %9013 = vmatpush1.bf16.msra.mxu1 %v10353_v5  ;;  %8695 = vmatprep.subr.bf16.mxu0 %v10360_v42  ;;  %v10416_v60 = vcombine.high %v2056_v40, %v2060_v46 }
 0x43e   :  { %9023 = vmatprep.subr.bf16.mxu1 %v10362_v15  ;;  %v2057_v15 = vld [vmem:[#allocation9 + $0xdd8] sm:$0xff] }
 0x43f   :  { %8687 = vmatmul.mubr.bf16.vlgmr.msra.gmra.mrb[36].mxu0 %v12237_v1 }
 0x440   :  { %9015 = vmatmul.mubr.bf16.vlgmr.msra.gmra.mrb[36].mxu1 %v12237_v1  ;;  %8696 = vmatpush1.bf16.msra.mxu0 %v10359_v57  ;;  %v10377_v1 = vcombine.low %v2017_v63, %v2021_v2  ;;  %v2064_v63 = vld [vmem:[#allocation9 + $0xe10] sm:$0xff] }
 0x441   :  { %8727 = vmatprep.mubr.bf16.mxu0 %v12242_v16  ;;  %9024 = vmatpush1.bf16.msra.mxu1 %v10361_v59  ;;  %v2068_v2 = vld [vmem:[#allocation9 + $0xe30] sm:$0xff] }
 0x442   :  { %9055 = vmatprep.mubr.bf16.mxu1 %v12242_v16  ;;  %8697 = vmatprep.subr.bf16.mxu0 %v10368_v44  ;;  %v10383_v16 = vcombine.low %v2024_v10, %v2028_v11  ;;  %v10409_v44 = vcombine.low %v2049_v34, %v2053_v37  ;;  %v10424_v10 = vcombine.high %v2064_v63, %v2068_v2  ;;  %v2096_v34 = vld [vmem:[#allocation9 + $0xf10] sm:$0xff] }
 0x443   :  { %9025 = vmatprep.subr.bf16.mxu1 %v10370_v49  ;;  %v10418_v49 = vcombine.high %v2057_v15, %v2061_v28  ;;  %v2100_v37 = vld [vmem:[#allocation9 + $0xf30] sm:$0xff] }
 0x444   :  { %8698 = vmatpush1.bf16.msra.mxu0 %v10367_v3  ;;  %v2065_v3 = vld [vmem:[#allocation9 + $0xe18] sm:$0xff] }
 0x445   :  { %9026 = vmatpush1.bf16.msra.mxu1 %v10369_v6  ;;  %8699 = vmatprep.subr.bf16.mxu0 %v10376_v4  ;;  %v2069_v6 = vld [vmem:[#allocation9 + $0xe38] sm:$0xff]  ;;  %v10415_v4 = vcombine.low %v2056_v40, %v2060_v46  ;;  %v10456_v40 = vcombine.high %v2096_v34, %v2100_v37 }
 0x446   :  { %9027 = vmatprep.subr.bf16.mxu1 %v10378_v9  ;;  %v10417_v9 = vcombine.low %v2057_v15, %v2061_v28  ;;  %v10426_v11 = vcombine.high %v2065_v3, %v2069_v6  ;;  %v2104_v15 = vld [vmem:[#allocation9 + $0xf50] sm:$0xff] }
 0x447   :  { %v2108_v28 = vld [vmem:[#allocation9 + $0xf70] sm:$0xff] }
 0x448   :  { %8700 = vmatpush1.bf16.msra.mxu0 %v10375_v50  ;;  %v2073_v50 = vld [vmem:[#allocation9 + $0xe58] sm:$0xff] }
 0x449   :  { %9028 = vmatpush1.bf16.msra.mxu1 %v10377_v1  ;;  %8701 = vmatprep.subr.bf16.mxu0 %v10384_v55  ;;  %v2077_v1 = vld [vmem:[#allocation9 + $0xe78] sm:$0xff]  ;;  %v10423_v55 = vcombine.low %v2064_v63, %v2068_v2 }
 0x44a   :  { %9029 = vmatprep.subr.bf16.mxu1 %v10386_v51  ;;  %v10425_v51 = vcombine.low %v2065_v3, %v2069_v6  ;;  %v10434_v8 = vcombine.high %v2073_v50, %v2077_v1  ;;  %v2113_v63 = vld [vmem:[#allocation9 + $0xf98] sm:$0xff]  ;;  %v10463_v3 = vcombine.low %v2104_v15, %v2108_v28 }
 0x44b   :  { %v2117_v2 = vld [vmem:[#allocation9 + $0xfb8] sm:$0xff] }
 0x44c   :  { %8702 = vmatpush1.bf16.msra.mxu0 %v10383_v16  ;;  %v2081_v16 = vld [vmem:[#allocation9 + $0xe98] sm:$0xff] }
 0x44d   :  { %9030 = vmatpush1.bf16.msra.mxu1 %v10385_v20  ;;  %8703 = vmatprep.subr.bf16.mxu0 %v10392_v36  ;;  %v2085_v20 = vld [vmem:[#allocation9 + $0xeb8] sm:$0xff]  ;;  %v10431_v36 = vcombine.low %v2072_v48, %v2076_v27 }
 0x44e   :  { %9031 = vmatprep.subr.bf16.mxu1 %v10394_v21  ;;  %v10433_v21 = vcombine.low %v2073_v50, %v2077_v1  ;;  %v10442_v32 = vcombine.high %v2081_v16, %v2085_v20  ;;  %v2121_v48 = vld [vmem:[#allocation9 + $0xfd8] sm:$0xff]  ;;  %v10473_v1 = vcombine.low %v2113_v63, %v2117_v2 }
 0x44f   :  { %v2125_v27 = vld [vmem:[#allocation9 + $0xff8] sm:$0xff] }
 0x450   :  { %8704 = vmatpush1.bf16.msra.mxu0 %v10391_v0  ;;  %v2089_v0 = vld [vmem:[#allocation9 + $0xed8] sm:$0xff] }
 0x451   :  { %9032 = vmatpush1.bf16.msra.mxu1 %v10393_v56  ;;  %8705 = vmatprep.subr.bf16.mxu0 %v10400_v29  ;;  %v2093_v56 = vld [vmem:[#allocation9 + $0xef8] sm:$0xff]  ;;  %v10439_v29 = vcombine.low %v2080_v14, %v2084_v17 }
 0x452   :  { %v12328_v19 = vpop.f32.mrb[32].mxu0  ;;  %9033 = vmatprep.subr.bf16.mxu1 %v10402_v30  ;;  %v10441_v30 = vcombine.low %v2081_v16, %v2085_v20  ;;  %v10450_v33 = vcombine.high %v2089_v0, %v2093_v56  ;;  %v2129_v14 = vld [vmem:[#allocation9 + $0x1018] sm:$0xff]  ;;  %v10481_v20 = vcombine.low %v2121_v48, %v2125_v27 }
 0x453   :  { %v12330_v5 = vpop.f32.mrb[32].mxu1  ;;  %v12332_v42 = vpop.f32.mrb[33].mxu0  ;;  %v2133_v17 = vld [vmem:[#allocation9 + $0x1038] sm:$0xff] }
 0x454   :  { %v12334_v53 = vpop.f32.mrb[33].mxu1  ;;  %v8241_v57 = vpop.f32.mrb[34].mxu0  ;;  %8706 = vmatpush1.bf16.msra.mxu0 %v10399_v45  ;;  %v2097_v45 = vld [vmem:[#allocation9 + $0xf18] sm:$0xff] }
 0x455   :  { %v8569_v7 = vpop.f32.mrb[34].mxu1  ;;  %9034 = vmatpush1.bf16.msra.mxu1 %v10401_v22  ;;  %v8242_v59 = vpop.f32.mrb[35].mxu0  ;;  %8707 = vmatprep.subr.bf16.mxu0 %v10408_v47  ;;  %v2101_v22 = vld [vmem:[#allocation9 + $0xf38] sm:$0xff]  ;;  %v10447_v47 = vcombine.low %v2088_v23, %v2092_v26 }
 0x456   :  { %v8570_v61 = vpop.f32.mrb[35].mxu1  ;;  %9035 = vmatprep.subr.bf16.mxu1 %v10410_v54  ;;  %v10449_v54 = vcombine.low %v2089_v0, %v2093_v56  ;;  %v10458_v46 = vcombine.high %v2097_v45, %v2101_v22  ;;  %v2105_v57 = vld [vmem:[#allocation9 + $0xf58] sm:$0xff]  ;;  %v10455_v7 = vcombine.low %v2096_v34, %v2100_v37  ;;  %v10457_v59 = vcombine.low %v2097_v45, %v2101_v22 }
 0x457   :  { %v2112_v61 = vld [vmem:[#allocation9 + $0xf90] sm:$0xff]  ;;  %v2137_v26 = vld [vmem:[#allocation9 + $0x1058] sm:$0xff]  ;;  %v10489_v56 = vcombine.low %v2129_v14, %v2133_v17 }
 0x458   :  { %8708 = vmatpush1.bf16.msra.mxu0 %v10407_v58  ;;  %v2109_v58 = vld [vmem:[#allocation9 + $0xf78] sm:$0xff] }
 0x459   :  { %9036 = vmatpush1.bf16.msra.mxu1 %v10409_v44  ;;  %8709 = vmatprep.subr.bf16.mxu0 %v10416_v60  ;;  %v10464_v44 = vcombine.high %v2104_v15, %v2108_v28  ;;  %v10466_v60 = vcombine.high %v2105_v57, %v2109_v58  ;;  %v10465_v6 = vcombine.low %v2105_v57, %v2109_v58  ;;  %v2141_v0 = vld [vmem:[#allocation9 + $0x1078] sm:$0xff] }
 0x45a   :  { %9037 = vmatprep.subr.bf16.mxu1 %v10418_v49  ;;  %v2116_v49 = vld [vmem:[#allocation9 + $0xfb0] sm:$0xff]  ;;  %v2145_v34 = vld [vmem:[#allocation9 + $0x1098] sm:$0xff]  ;;  %v10497_v22 = vcombine.low %v2137_v26, %v2141_v0 }
 0x45b   :  { %v10471_v50 = vcombine.low %v2112_v61, %v2116_v49  ;;  %v2149_v37 = vld [vmem:[#allocation9 + $0x10b8] sm:$0xff] }
 0x45c   :  { %8710 = vmatpush1.bf16.msra.mxu0 %v10415_v4  ;;  %v10472_v4 = vcombine.high %v2112_v61, %v2116_v49  ;;  %v2153_v15 = vld [vmem:[#allocation9 + $0x10d8] sm:$0xff] }
 0x45d   :  { %9038 = vmatpush1.bf16.msra.mxu1 %v10417_v9  ;;  %8711 = vmatprep.subr.bf16.mxu0 %v10424_v10  ;;  %v10474_v9 = vcombine.high %v2113_v63, %v2117_v2  ;;  %v2120_v10 = vld [vmem:[#allocation9 + $0xfd0] sm:$0xff]  ;;  %v2157_v28 = vld [vmem:[#allocation9 + $0x10f8] sm:$0xff] }
 0x45e   :  { %9039 = vmatprep.subr.bf16.mxu1 %v10426_v11  ;;  %v2124_v11 = vld [vmem:[#allocation9 + $0xff0] sm:$0xff]  ;;  %v2165_v61 = vld [vmem:[#allocation9 + $0x1138] sm:$0xff]  ;;  %v10513_v49 = vcombine.low %v2153_v15, %v2157_v28 }
 0x45f   :  { %v10479_v16 = vcombine.low %v2120_v10, %v2124_v11 }
 0x460   :  { %8712 = vmatpush1.bf16.msra.mxu0 %v10423_v55  ;;  %v10480_v55 = vcombine.high %v2120_v10, %v2124_v11 }
 0x461   :  { %9040 = vmatpush1.bf16.msra.mxu1 %v10425_v51  ;;  %8713 = vmatprep.subr.bf16.mxu0 %v10432_v13  ;;  %v10482_v51 = vcombine.high %v2121_v48, %v2125_v27  ;;  %v2128_v13 = vld [vmem:[#allocation9 + $0x1010] sm:$0xff] }
 0x462   :  { %9041 = vmatprep.subr.bf16.mxu1 %v10434_v8  ;;  %v2132_v8 = vld [vmem:[#allocation9 + $0x1030] sm:$0xff] }
 0x463   :  { %v10487_v23 = vcombine.low %v2128_v13, %v2132_v8 }
 0x464   :  { %8714 = vmatpush1.bf16.msra.mxu0 %v10431_v36  ;;  %v10488_v36 = vcombine.high %v2128_v13, %v2132_v8 }
 0x465   :  { %9042 = vmatpush1.bf16.msra.mxu1 %v10433_v21  ;;  %8715 = vmatprep.subr.bf16.mxu0 %v10440_v25  ;;  %v10490_v21 = vcombine.high %v2129_v14, %v2133_v17  ;;  %v2136_v25 = vld [vmem:[#allocation9 + $0x1050] sm:$0xff] }
 0x466   :  { %9043 = vmatprep.subr.bf16.mxu1 %v10442_v32  ;;  %v2140_v32 = vld [vmem:[#allocation9 + $0x1070] sm:$0xff] }
 0x467   :  { %v10495_v45 = vcombine.low %v2136_v25, %v2140_v32 }
 0x468   :  { %8716 = vmatpush1.bf16.msra.mxu0 %v10439_v29  ;;  %v10496_v29 = vcombine.high %v2136_v25, %v2140_v32 }
 0x469   :  { %9044 = vmatpush1.bf16.msra.mxu1 %v10441_v30  ;;  %8717 = vmatprep.subr.bf16.mxu0 %v10448_v31  ;;  %v2144_v30 = vld [vmem:[#allocation9 + $0x1090] sm:$0xff] }
 0x46a   :  { %9045 = vmatprep.subr.bf16.mxu1 %v10450_v33  ;;  %v2148_v31 = vld [vmem:[#allocation9 + $0x10b0] sm:$0xff]  ;;  %v10498_v33 = vcombine.high %v2137_v26, %v2141_v0 }
 0x46b   :  { %v10503_v57 = vcombine.low %v2144_v30, %v2148_v31  ;;  %v2192_v0 = vld [vmem:[#allocation9 + $0x1210] sm:$0xff] }
 0x46c   :  { %8718 = vmatpush1.bf16.msra.mxu0 %v10447_v47  ;;  %v10504_v47 = vcombine.high %v2144_v30, %v2148_v31  ;;  %v2197_v30 = vld [vmem:[#allocation9 + $0x1238] sm:$0xff] }
 0x46d   :  { %9046 = vmatpush1.bf16.msra.mxu1 %v10449_v54  ;;  %8719 = vmatprep.subr.bf16.mxu0 %v10456_v40  ;;  %v10506_v54 = vcombine.high %v2145_v34, %v2149_v37  ;;  %v2152_v40 = vld [vmem:[#allocation9 + $0x10d0] sm:$0xff] }
 0x46e   :  { %9047 = vmatprep.subr.bf16.mxu1 %v10458_v46  ;;  %v2156_v46 = vld [vmem:[#allocation9 + $0x10f0] sm:$0xff] }
 0x46f   :  { %v10512_v58 = vcombine.high %v2152_v40, %v2156_v46 }
 0x470   :  { %8720 = vmatpush1.bf16.msra.mxu0 %v10455_v7  ;;  %v10514_v7 = vcombine.high %v2153_v15, %v2157_v28 }
 0x471   :  { %9048 = vmatpush1.bf16.msra.mxu1 %v10457_v59  ;;  %8721 = vmatprep.subr.bf16.mxu0 %v10464_v44  ;;  %v2160_v59 = vld [vmem:[#allocation9 + $0x1110] sm:$0xff] }
 0x472   :  { %9049 = vmatprep.subr.bf16.mxu1 %v10466_v60  ;;  %v2164_v44 = vld [vmem:[#allocation9 + $0x1130] sm:$0xff]  ;;  %v2161_v60 = vld [vmem:[#allocation9 + $0x1118] sm:$0xff] }
 0x473   :  { %v10520_v63 = vcombine.high %v2160_v59, %v2164_v44  ;;  %v10522_v2 = vcombine.high %v2161_v60, %v2165_v61  ;;  %v10519_v10 = vcombine.low %v2160_v59, %v2164_v44  ;;  %v10521_v11 = vcombine.low %v2161_v60, %v2165_v61 }
 0x474   :  { %8722 = vmatpush1.bf16.msra.mxu0 %v10463_v3  ;;  %v2168_v3 = vld [vmem:[#allocation9 + $0x1150] sm:$0xff] }
 0x475   :  { %9050 = vmatpush1.bf16.msra.mxu1 %v10465_v6  ;;  %8723 = vmatprep.subr.bf16.mxu0 %v10472_v4  ;;  %v2172_v6 = vld [vmem:[#allocation9 + $0x1170] sm:$0xff]  ;;  %v2169_v4 = vld [vmem:[#allocation9 + $0x1158] sm:$0xff] }
 0x476   :  { %9051 = vmatprep.subr.bf16.mxu1 %v10474_v9  ;;  %v2173_v9 = vld [vmem:[#allocation9 + $0x1178] sm:$0xff]  ;;  %v10528_v48 = vcombine.high %v2168_v3, %v2172_v6  ;;  %v10527_v13 = vcombine.low %v2168_v3, %v2172_v6 }
 0x477   :  { %v10530_v27 = vcombine.high %v2169_v4, %v2173_v9  ;;  %v10529_v8 = vcombine.low %v2169_v4, %v2173_v9 }
 0x478   :  { %8724 = vmatpush1.bf16.msra.mxu0 %v10471_v50  ;;  %v2176_v50 = vld [vmem:[#allocation9 + $0x1190] sm:$0xff] }
 0x479   :  { %9052 = vmatpush1.bf16.msra.mxu1 %v10473_v1  ;;  %8725 = vmatprep.subr.bf16.mxu0 %v10480_v55  ;;  %v2180_v1 = vld [vmem:[#allocation9 + $0x11b0] sm:$0xff]  ;;  %v2177_v55 = vld [vmem:[#allocation9 + $0x1198] sm:$0xff] }
 0x47a   :  { %9053 = vmatprep.subr.bf16.mxu1 %v10482_v51  ;;  %v2181_v51 = vld [vmem:[#allocation9 + $0x11b8] sm:$0xff]  ;;  %v10536_v14 = vcombine.high %v2176_v50, %v2180_v1  ;;  %v10535_v25 = vcombine.low %v2176_v50, %v2180_v1 }
 0x47b   :  { %v10538_v17 = vcombine.high %v2177_v55, %v2181_v51  ;;  %v10537_v32 = vcombine.low %v2177_v55, %v2181_v51 }
 0x47c   :  { %8726 = vmatpush1.bf16.msra.mxu0 %v10479_v16  ;;  %v2184_v16 = vld [vmem:[#allocation9 + $0x11d0] sm:$0xff] }
 0x47d   :  { %9054 = vmatpush1.bf16.msra.mxu1 %v10481_v20  ;;  %8736 = vmatprep.subr.bf16.mxu0 %v10488_v36  ;;  %v2188_v20 = vld [vmem:[#allocation9 + $0x11f0] sm:$0xff]  ;;  %v2185_v36 = vld [vmem:[#allocation9 + $0x11d8] sm:$0xff] }
 0x47e   :  { %9064 = vmatprep.subr.bf16.mxu1 %v10490_v21  ;;  %v2189_v21 = vld [vmem:[#allocation9 + $0x11f8] sm:$0xff]  ;;  %v10543_v31 = vcombine.low %v2184_v16, %v2188_v20 }
 0x47f   :  { %8728 = vmatmul.mubr.bf16.vlgmr.msra.gmra.mrb[36].mxu0 %v12257_v35  ;;  %v10546_v26 = vcombine.high %v2185_v36, %v2189_v21 }
 0x480   :  { %9056 = vmatmul.mubr.bf16.vlgmr.msra.gmra.mrb[36].mxu1 %v12257_v35  ;;  %8737 = vmatpush1.bf16.msra.mxu0 %v10487_v23  ;;  %v10505_v35 = vcombine.low %v2145_v34, %v2149_v37  ;;  %v10544_v23 = vcombine.high %v2184_v16, %v2188_v20 }
 0x481   :  { %8768 = vmatprep.mubr.bf16.mxu0 %v12261_v38  ;;  %9065 = vmatpush1.bf16.msra.mxu1 %v10489_v56  ;;  %v2196_v56 = vld [vmem:[#allocation9 + $0x1230] sm:$0xff] }
 0x482   :  { %9096 = vmatprep.mubr.bf16.mxu1 %v12261_v38  ;;  %8738 = vmatprep.subr.bf16.mxu0 %v10496_v29  ;;  %v10511_v38 = vcombine.low %v2152_v40, %v2156_v46  ;;  %v2193_v29 = vld [vmem:[#allocation9 + $0x1218] sm:$0xff]  ;;  %v10552_v34 = vcombine.high %v2192_v0, %v2196_v56  ;;  %v10551_v40 = vcombine.low %v2192_v0, %v2196_v56 }
 0x483   :  { %9066 = vmatprep.subr.bf16.mxu1 %v10498_v33  ;;  %v10545_v33 = vcombine.low %v2185_v36, %v2189_v21  ;;  %v10554_v37 = vcombine.high %v2193_v29, %v2197_v30  ;;  %v10553_v46 = vcombine.low %v2193_v29, %v2197_v30 }
 0x484   :  { %8739 = vmatpush1.bf16.msra.mxu0 %v10495_v45  ;;  %v2200_v45 = vld [vmem:[#allocation9 + $0x1250] sm:$0xff] }
 0x485   :  { %9067 = vmatpush1.bf16.msra.mxu1 %v10497_v22  ;;  %8740 = vmatprep.subr.bf16.mxu0 %v10504_v47  ;;  %v2204_v22 = vld [vmem:[#allocation9 + $0x1270] sm:$0xff]  ;;  %v2201_v47 = vld [vmem:[#allocation9 + $0x1258] sm:$0xff] }
 0x486   :  { %9068 = vmatprep.subr.bf16.mxu1 %v10506_v54  ;;  %v2205_v54 = vld [vmem:[#allocation9 + $0x1278] sm:$0xff]  ;;  %v10560_v15 = vcombine.high %v2200_v45, %v2204_v22  ;;  %v10559_v59 = vcombine.low %v2200_v45, %v2204_v22 }
 0x487   :  { %v10562_v28 = vcombine.high %v2201_v47, %v2205_v54  ;;  %v10561_v44 = vcombine.low %v2201_v47, %v2205_v54 }
 0x488   :  { %8741 = vmatpush1.bf16.msra.mxu0 %v10503_v57  ;;  %v2208_v57 = vld [vmem:[#allocation9 + $0x1290] sm:$0xff] }
 0x489   :  { %9069 = vmatpush1.bf16.msra.mxu1 %v10505_v35  ;;  %8742 = vmatprep.subr.bf16.mxu0 %v10512_v58  ;;  %v2212_v35 = vld [vmem:[#allocation9 + $0x12b0] sm:$0xff]  ;;  %v2209_v58 = vld [vmem:[#allocation9 + $0x1298] sm:$0xff] }
 0x48a   :  { %9070 = vmatprep.subr.bf16.mxu1 %v10514_v7  ;;  %v2213_v7 = vld [vmem:[#allocation9 + $0x12b8] sm:$0xff]  ;;  %v10568_v60 = vcombine.high %v2208_v57, %v2212_v35  ;;  %v10567_v3 = vcombine.low %v2208_v57, %v2212_v35 }
 0x48b   :  { %v10570_v61 = vcombine.high %v2209_v58, %v2213_v7  ;;  %v10569_v6 = vcombine.low %v2209_v58, %v2213_v7 }
 0x48c   :  { %8743 = vmatpush1.bf16.msra.mxu0 %v10511_v38  ;;  %v2216_v38 = vld [vmem:[#allocation9 + $0x12d0] sm:$0xff] }
 0x48d   :  { %9071 = vmatpush1.bf16.msra.mxu1 %v10513_v49  ;;  %8744 = vmatprep.subr.bf16.mxu0 %v10520_v63  ;;  %v2220_v49 = vld [vmem:[#allocation9 + $0x12f0] sm:$0xff]  ;;  %v2217_v63 = vld [vmem:[#allocation9 + $0x12d8] sm:$0xff] }
 0x48e   :  { %9072 = vmatprep.subr.bf16.mxu1 %v10522_v2  ;;  %v2221_v2 = vld [vmem:[#allocation9 + $0x12f8] sm:$0xff]  ;;  %v10576_v4 = vcombine.high %v2216_v38, %v2220_v49  ;;  %v10575_v50 = vcombine.low %v2216_v38, %v2220_v49 }
 0x48f   :  { %v10578_v9 = vcombine.high %v2217_v63, %v2221_v2  ;;  %v10577_v1 = vcombine.low %v2217_v63, %v2221_v2  ;;  %v2269_v38 = vld [vmem:[#allocation9 + $0x1478] sm:$0xff]  ;;  %v2272_v2 = vld [vmem:[#allocation9 + $0x1490] sm:$0xff] }
 0x490   :  { %8745 = vmatpush1.bf16.msra.mxu0 %v10519_v10  ;;  %v2224_v10 = vld [vmem:[#allocation9 + $0x1310] sm:$0xff] }
 0x491   :  { %9073 = vmatpush1.bf16.msra.mxu1 %v10521_v11  ;;  %8746 = vmatprep.subr.bf16.mxu0 %v10528_v48  ;;  %v2228_v11 = vld [vmem:[#allocation9 + $0x1330] sm:$0xff]  ;;  %v2225_v48 = vld [vmem:[#allocation9 + $0x1318] sm:$0xff] }
 0x492   :  { %9074 = vmatprep.subr.bf16.mxu1 %v10530_v27  ;;  %v2229_v27 = vld [vmem:[#allocation9 + $0x1338] sm:$0xff]  ;;  %v10584_v55 = vcombine.high %v2224_v10, %v2228_v11  ;;  %v10583_v16 = vcombine.low %v2224_v10, %v2228_v11 }
 0x493   :  { %v10586_v51 = vcombine.high %v2225_v48, %v2229_v27  ;;  %v10585_v20 = vcombine.low %v2225_v48, %v2229_v27 }
 0x494   :  { %8747 = vmatpush1.bf16.msra.mxu0 %v10527_v13  ;;  %v2232_v13 = vld [vmem:[#allocation9 + $0x1350] sm:$0xff] }
 0x495   :  { %9075 = vmatpush1.bf16.msra.mxu1 %v10529_v8  ;;  %8748 = vmatprep.subr.bf16.mxu0 %v10536_v14  ;;  %v2236_v8 = vld [vmem:[#allocation9 + $0x1370] sm:$0xff]  ;;  %v2233_v14 = vld [vmem:[#allocation9 + $0x1358] sm:$0xff] }
 0x496   :  { %9076 = vmatprep.subr.bf16.mxu1 %v10538_v17  ;;  %v2237_v17 = vld [vmem:[#allocation9 + $0x1378] sm:$0xff]  ;;  %v10592_v36 = vcombine.high %v2232_v13, %v2236_v8  ;;  %v10591_v0 = vcombine.low %v2232_v13, %v2236_v8 }
 0x497   :  { %v10594_v21 = vcombine.high %v2233_v14, %v2237_v17  ;;  %v10593_v56 = vcombine.low %v2233_v14, %v2237_v17  ;;  %v2288_v17 = vld [vmem:[#allocation9 + $0x1510] sm:$0xff] }
 0x498   :  { %8749 = vmatpush1.bf16.msra.mxu0 %v10535_v25  ;;  %v2240_v25 = vld [vmem:[#allocation9 + $0x1390] sm:$0xff] }
 0x499   :  { %9077 = vmatpush1.bf16.msra.mxu1 %v10537_v32  ;;  %8750 = vmatprep.subr.bf16.mxu0 %v10544_v23  ;;  %v2244_v32 = vld [vmem:[#allocation9 + $0x13b0] sm:$0xff]  ;;  %v2241_v23 = vld [vmem:[#allocation9 + $0x1398] sm:$0xff] }
 0x49a   :  { %9078 = vmatprep.subr.bf16.mxu1 %v10546_v26  ;;  %v2245_v26 = vld [vmem:[#allocation9 + $0x13b8] sm:$0xff]  ;;  %v10600_v29 = vcombine.high %v2240_v25, %v2244_v32  ;;  %v10599_v45 = vcombine.low %v2240_v25, %v2244_v32 }
 0x49b   :  { %v10602_v30 = vcombine.high %v2241_v23, %v2245_v26  ;;  %v10601_v22 = vcombine.low %v2241_v23, %v2245_v26  ;;  %v2296_v23 = vld [vmem:[#allocation9 + $0x1550] sm:$0xff] }
 0x49c   :  { %8751 = vmatpush1.bf16.msra.mxu0 %v10543_v31  ;;  %v2248_v31 = vld [vmem:[#allocation9 + $0x13d0] sm:$0xff] }
 0x49d   :  { %9079 = vmatpush1.bf16.msra.mxu1 %v10545_v33  ;;  %8752 = vmatprep.subr.bf16.mxu0 %v10552_v34  ;;  %v2252_v33 = vld [vmem:[#allocation9 + $0x13f0] sm:$0xff]  ;;  %v2249_v34 = vld [vmem:[#allocation9 + $0x13d8] sm:$0xff] }
 0x49e   :  { %9080 = vmatprep.subr.bf16.mxu1 %v10554_v37  ;;  %v2253_v37 = vld [vmem:[#allocation9 + $0x13f8] sm:$0xff]  ;;  %v10608_v47 = vcombine.high %v2248_v31, %v2252_v33  ;;  %v10607_v57 = vcombine.low %v2248_v31, %v2252_v33  ;;  %v2300_v26 = vld [vmem:[#allocation9 + $0x1570] sm:$0xff] }
 0x49f   :  { %v10610_v54 = vcombine.high %v2249_v34, %v2253_v37  ;;  %v10609_v35 = vcombine.low %v2249_v34, %v2253_v37  ;;  %v10656_v31 = vcombine.high %v2296_v23, %v2300_v26  ;;  %v2304_v34 = vld [vmem:[#allocation9 + $0x1590] sm:$0xff] }
 0x4a0   :  { %8753 = vmatpush1.bf16.msra.mxu0 %v10551_v40  ;;  %v2256_v40 = vld [vmem:[#allocation9 + $0x1410] sm:$0xff] }
 0x4a1   :  { %9081 = vmatpush1.bf16.msra.mxu1 %v10553_v46  ;;  %8754 = vmatprep.subr.bf16.mxu0 %v10560_v15  ;;  %v2260_v46 = vld [vmem:[#allocation9 + $0x1430] sm:$0xff]  ;;  %v2257_v15 = vld [vmem:[#allocation9 + $0x1418] sm:$0xff] }
 0x4a2   :  { %9082 = vmatprep.subr.bf16.mxu1 %v10562_v28  ;;  %v2261_v28 = vld [vmem:[#allocation9 + $0x1438] sm:$0xff]  ;;  %v10616_v58 = vcombine.high %v2256_v40, %v2260_v46  ;;  %v2308_v37 = vld [vmem:[#allocation9 + $0x15b0] sm:$0xff] }
 0x4a3   :  { %v10618_v7 = vcombine.high %v2257_v15, %v2261_v28  ;;  %v10617_v49 = vcombine.low %v2257_v15, %v2261_v28  ;;  %v2312_v15 = vld [vmem:[#allocation9 + $0x15d0] sm:$0xff] }
 0x4a4   :  { %8755 = vmatpush1.bf16.msra.mxu0 %v10559_v59  ;;  %v2264_v59 = vld [vmem:[#allocation9 + $0x1450] sm:$0xff] }
 0x4a5   :  { %9083 = vmatpush1.bf16.msra.mxu1 %v10561_v44  ;;  %8756 = vmatprep.subr.bf16.mxu0 %v10568_v60  ;;  %v2268_v44 = vld [vmem:[#allocation9 + $0x1470] sm:$0xff]  ;;  %v10615_v60 = vcombine.low %v2256_v40, %v2260_v46  ;;  %v10664_v40 = vcombine.high %v2304_v34, %v2308_v37 }
 0x4a6   :  { %9084 = vmatprep.subr.bf16.mxu1 %v10570_v61  ;;  %v2265_v61 = vld [vmem:[#allocation9 + $0x1458] sm:$0xff]  ;;  %v10624_v63 = vcombine.high %v2264_v59, %v2268_v44  ;;  %v10623_v10 = vcombine.low %v2264_v59, %v2268_v44  ;;  %v2316_v28 = vld [vmem:[#allocation9 + $0x15f0] sm:$0xff] }
 0x4a7   :  { %v10625_v11 = vcombine.low %v2265_v61, %v2269_v38  ;;  %v10672_v59 = vcombine.high %v2312_v15, %v2316_v28 }
 0x4a8   :  { %8757 = vmatpush1.bf16.msra.mxu0 %v10567_v3  ;;  %v2276_v3 = vld [vmem:[#allocation9 + $0x14b0] sm:$0xff] }
 0x4a9   :  { %9085 = vmatpush1.bf16.msra.mxu1 %v10569_v6  ;;  %8758 = vmatprep.subr.bf16.mxu0 %v10576_v4  ;;  %v10626_v6 = vcombine.high %v2265_v61, %v2269_v38  ;;  %v2273_v4 = vld [vmem:[#allocation9 + $0x1498] sm:$0xff]  ;;  %v10632_v48 = vcombine.high %v2272_v2, %v2276_v3  ;;  %v10631_v13 = vcombine.low %v2272_v2, %v2276_v3  ;;  %v2324_v61 = vld [vmem:[#allocation9 + $0x1630] sm:$0xff] }
 0x4aa   :  { %9086 = vmatprep.subr.bf16.mxu1 %v10578_v9  ;;  %v2277_v9 = vld [vmem:[#allocation9 + $0x14b8] sm:$0xff] }
 0x4ab   :  { %v10634_v27 = vcombine.high %v2273_v4, %v2277_v9  ;;  %v2321_v38 = vld [vmem:[#allocation9 + $0x1618] sm:$0xff] }
 0x4ac   :  { %8759 = vmatpush1.bf16.msra.mxu0 %v10575_v50  ;;  %v2280_v50 = vld [vmem:[#allocation9 + $0x14d0] sm:$0xff] }
 0x4ad   :  { %9087 = vmatpush1.bf16.msra.mxu1 %v10577_v1  ;;  %8760 = vmatprep.subr.bf16.mxu0 %v10584_v55  ;;  %v2284_v1 = vld [vmem:[#allocation9 + $0x14f0] sm:$0xff]  ;;  %v2281_v55 = vld [vmem:[#allocation9 + $0x14d8] sm:$0xff] }
 0x4ae   :  { %9088 = vmatprep.subr.bf16.mxu1 %v10586_v51  ;;  %v2285_v51 = vld [vmem:[#allocation9 + $0x14f8] sm:$0xff]  ;;  %v10640_v8 = vcombine.high %v2280_v50, %v2284_v1 }
 0x4af   :  { %v10642_v14 = vcombine.high %v2281_v55, %v2285_v51 }
 0x4b0   :  { %8761 = vmatpush1.bf16.msra.mxu0 %v10583_v16  ;;  %v2292_v16 = vld [vmem:[#allocation9 + $0x1530] sm:$0xff] }
 0x4b1   :  { %9089 = vmatpush1.bf16.msra.mxu1 %v10585_v20  ;;  %8762 = vmatprep.subr.bf16.mxu0 %v10592_v36  ;;  %v2289_v20 = vld [vmem:[#allocation9 + $0x1518] sm:$0xff]  ;;  %v10648_v25 = vcombine.high %v2288_v17, %v2292_v16 }
 0x4b2   :  { %9090 = vmatprep.subr.bf16.mxu1 %v10594_v21  ;;  %v2293_v36 = vld [vmem:[#allocation9 + $0x1538] sm:$0xff]  ;;  %v10641_v21 = vcombine.low %v2281_v55, %v2285_v51  ;;  %v2336_v55 = vld [vmem:[#allocation9 + $0x1690] sm:$0xff] }
 0x4b3   :  { %v10650_v32 = vcombine.high %v2289_v20, %v2293_v36  ;;  %v2340_v51 = vld [vmem:[#allocation9 + $0x16b0] sm:$0xff] }
 0x4b4   :  { %8763 = vmatpush1.bf16.msra.mxu0 %v10591_v0  ;;  %v2297_v0 = vld [vmem:[#allocation9 + $0x1558] sm:$0xff] }
 0x4b5   :  { %9091 = vmatpush1.bf16.msra.mxu1 %v10593_v56  ;;  %8764 = vmatprep.subr.bf16.mxu0 %v10600_v29  ;;  %v2301_v56 = vld [vmem:[#allocation9 + $0x1578] sm:$0xff]  ;;  %v10647_v29 = vcombine.low %v2288_v17, %v2292_v16  ;;  %v10696_v17 = vcombine.high %v2336_v55, %v2340_v51 }
 0x4b6   :  { %9092 = vmatprep.subr.bf16.mxu1 %v10602_v30  ;;  %v10649_v30 = vcombine.low %v2289_v20, %v2293_v36  ;;  %v10658_v33 = vcombine.high %v2297_v0, %v2301_v56  ;;  %v2344_v20 = vld [vmem:[#allocation9 + $0x16d0] sm:$0xff] }
 0x4b7   :  { %v2348_v36 = vld [vmem:[#allocation9 + $0x16f0] sm:$0xff] }
 0x4b8   :  { %8765 = vmatpush1.bf16.msra.mxu0 %v10599_v45  ;;  %v2305_v45 = vld [vmem:[#allocation9 + $0x1598] sm:$0xff] }
 0x4b9   :  { %9093 = vmatpush1.bf16.msra.mxu1 %v10601_v22  ;;  %8766 = vmatprep.subr.bf16.mxu0 %v10608_v47  ;;  %v2309_v22 = vld [vmem:[#allocation9 + $0x15b8] sm:$0xff]  ;;  %v10655_v47 = vcombine.low %v2296_v23, %v2300_v26  ;;  %v10704_v23 = vcombine.high %v2344_v20, %v2348_v36 }
 0x4ba   :  { %9094 = vmatprep.subr.bf16.mxu1 %v10610_v54  ;;  %v10657_v54 = vcombine.low %v2297_v0, %v2301_v56  ;;  %v10666_v46 = vcombine.high %v2305_v45, %v2309_v22  ;;  %v2352_v0 = vld [vmem:[#allocation9 + $0x1710] sm:$0xff] }
 0x4bb   :  { %v2356_v56 = vld [vmem:[#allocation9 + $0x1730] sm:$0xff] }
 0x4bc   :  { %8767 = vmatpush1.bf16.msra.mxu0 %v10607_v57  ;;  %v2313_v57 = vld [vmem:[#allocation9 + $0x15d8] sm:$0xff] }
 0x4bd   :  { %9095 = vmatpush1.bf16.msra.mxu1 %v10609_v35  ;;  %8777 = vmatprep.subr.bf16.mxu0 %v10616_v58  ;;  %v2317_v35 = vld [vmem:[#allocation9 + $0x15f8] sm:$0xff]  ;;  %v10663_v58 = vcombine.low %v2304_v34, %v2308_v37  ;;  %v10712_v34 = vcombine.high %v2352_v0, %v2356_v56 }
 0x4be   :  { %9105 = vmatprep.subr.bf16.mxu1 %v10618_v7  ;;  %v10665_v7 = vcombine.low %v2305_v45, %v2309_v22  ;;  %v10674_v44 = vcombine.high %v2313_v57, %v2317_v35  ;;  %v10673_v2 = vcombine.low %v2313_v57, %v2317_v35  ;;  %v2360_v45 = vld [vmem:[#allocation9 + $0x1750] sm:$0xff] }
 0x4bf   :  { %8769 = vmatmul.mubr.bf16.vlgmr.msra.gmra.mrb[36].mxu0 %v12268_v52  ;;  %v2364_v22 = vld [vmem:[#allocation9 + $0x1770] sm:$0xff] }
 0x4c0   :  { %9097 = vmatmul.mubr.bf16.vlgmr.msra.gmra.mrb[36].mxu1 %v12268_v52  ;;  %8778 = vmatpush1.bf16.msra.mxu0 %v10615_v60  ;;  %v10633_v52 = vcombine.low %v2273_v4, %v2277_v9  ;;  %v2320_v60 = vld [vmem:[#allocation9 + $0x1610] sm:$0xff] }
 0x4c1   :  { %8809 = vmatprep.mubr.bf16.mxu0 %v12273_v18  ;;  %9106 = vmatpush1.bf16.msra.mxu1 %v10617_v49  ;;  %v2325_v49 = vld [vmem:[#allocation9 + $0x1638] sm:$0xff]  ;;  %v10680_v3 = vcombine.high %v2320_v60, %v2324_v61  ;;  %v2328_v4 = vld [vmem:[#allocation9 + $0x1650] sm:$0xff] }
 0x4c2   :  { %9137 = vmatprep.mubr.bf16.mxu1 %v12273_v18  ;;  %8779 = vmatprep.subr.bf16.mxu0 %v10624_v63  ;;  %v10639_v18 = vcombine.low %v2280_v50, %v2284_v1  ;;  %v10671_v63 = vcombine.low %v2312_v15, %v2316_v28  ;;  %v2332_v9 = vld [vmem:[#allocation9 + $0x1670] sm:$0xff]  ;;  %v10720_v15 = vcombine.high %v2360_v45, %v2364_v22 }
 0x4c3   :  { %9107 = vmatprep.subr.bf16.mxu1 %v10626_v6  ;;  %v10682_v6 = vcombine.high %v2321_v38, %v2325_v49  ;;  %v10688_v50 = vcombine.high %v2328_v4, %v2332_v9  ;;  %v2368_v57 = vld [vmem:[#allocation9 + $0x1790] sm:$0xff] }
 0x4c4   :  { %8780 = vmatpush1.bf16.msra.mxu0 %v10623_v10  ;;  %v2329_v10 = vld [vmem:[#allocation9 + $0x1658] sm:$0xff]  ;;  %v2372_v35 = vld [vmem:[#allocation9 + $0x17b0] sm:$0xff] }
 0x4c5   :  { %9108 = vmatpush1.bf16.msra.mxu1 %v10625_v11  ;;  %8781 = vmatprep.subr.bf16.mxu0 %v10632_v48  ;;  %v2333_v11 = vld [vmem:[#allocation9 + $0x1678] sm:$0xff]  ;;  %v10679_v48 = vcombine.low %v2320_v60, %v2324_v61  ;;  %v10728_v60 = vcombine.high %v2368_v57, %v2372_v35 }
 0x4c6   :  { %9109 = vmatprep.subr.bf16.mxu1 %v10634_v27  ;;  %v10681_v27 = vcombine.low %v2321_v38, %v2325_v49  ;;  %v10690_v1 = vcombine.high %v2329_v10, %v2333_v11  ;;  %v2376_v38 = vld [vmem:[#allocation9 + $0x17d0] sm:$0xff] }
 0x4c7   :  { %v2380_v49 = vld [vmem:[#allocation9 + $0x17f0] sm:$0xff] }
 0x4c8   :  { %8782 = vmatpush1.bf16.msra.mxu0 %v10631_v13  ;;  %v2337_v13 = vld [vmem:[#allocation9 + $0x1698] sm:$0xff] }
 0x4c9   :  { %9110 = vmatpush1.bf16.msra.mxu1 %v10633_v52  ;;  %8783 = vmatprep.subr.bf16.mxu0 %v10640_v8  ;;  %v2341_v52 = vld [vmem:[#allocation9 + $0x16b8] sm:$0xff]  ;;  %v10687_v8 = vcombine.low %v2328_v4, %v2332_v9  ;;  %v10736_v4 = vcombine.high %v2376_v38, %v2380_v49 }
 0x4ca   :  { %9111 = vmatprep.subr.bf16.mxu1 %v10642_v14  ;;  %v10689_v14 = vcombine.low %v2329_v10, %v2333_v11  ;;  %v10698_v16 = vcombine.high %v2337_v13, %v2341_v52  ;;  %v2384_v10 = vld [vmem:[#allocation9 + $0x1810] sm:$0xff] }
 0x4cb   :  { %v2388_v11 = vld [vmem:[#allocation9 + $0x1830] sm:$0xff] }
 0x4cc   :  { %8784 = vmatpush1.bf16.msra.mxu0 %v10639_v18  ;;  %v2345_v18 = vld [vmem:[#allocation9 + $0x16d8] sm:$0xff] }
 0x4cd   :  { %9112 = vmatpush1.bf16.msra.mxu1 %v10641_v21  ;;  %8785 = vmatprep.subr.bf16.mxu0 %v10648_v25  ;;  %v2349_v21 = vld [vmem:[#allocation9 + $0x16f8] sm:$0xff]  ;;  %v10695_v25 = vcombine.low %v2336_v55, %v2340_v51  ;;  %v10744_v55 = vcombine.high %v2384_v10, %v2388_v11 }
 0x4ce   :  { %9113 = vmatprep.subr.bf16.mxu1 %v10650_v32  ;;  %v10697_v32 = vcombine.low %v2337_v13, %v2341_v52  ;;  %v10706_v26 = vcombine.high %v2345_v18, %v2349_v21  ;;  %v2392_v13 = vld [vmem:[#allocation9 + $0x1850] sm:$0xff] }
 0x4cf   :  { %v2396_v52 = vld [vmem:[#allocation9 + $0x1870] sm:$0xff] }
 0x4d0   :  { %8786 = vmatpush1.bf16.msra.mxu0 %v10647_v29  ;;  %v2353_v29 = vld [vmem:[#allocation9 + $0x1718] sm:$0xff] }
 0x4d1   :  { %9114 = vmatpush1.bf16.msra.mxu1 %v10649_v30  ;;  %8787 = vmatprep.subr.bf16.mxu0 %v10656_v31  ;;  %v2357_v30 = vld [vmem:[#allocation9 + $0x1738] sm:$0xff]  ;;  %v10703_v31 = vcombine.low %v2344_v20, %v2348_v36  ;;  %v10752_v20 = vcombine.high %v2392_v13, %v2396_v52  ;;  %v2400_v36 = vld [vmem:[#allocation9 + $0x1890] sm:$0xff] }
 0x4d2   :  { %9115 = vmatprep.subr.bf16.mxu1 %v10658_v33  ;;  %v10705_v33 = vcombine.low %v2345_v18, %v2349_v21  ;;  %v10714_v37 = vcombine.high %v2353_v29, %v2357_v30  ;;  %v2404_v18 = vld [vmem:[#allocation9 + $0x18b0] sm:$0xff] }
 0x4d4   :  { %8788 = vmatpush1.bf16.msra.mxu0 %v10655_v47  ;;  %v2361_v47 = vld [vmem:[#allocation9 + $0x1758] sm:$0xff] }
 0x4d5   :  { %9116 = vmatpush1.bf16.msra.mxu1 %v10657_v54  ;;  %8789 = vmatprep.subr.bf16.mxu0 %v10664_v40  ;;  %v2365_v54 = vld [vmem:[#allocation9 + $0x1778] sm:$0xff]  ;;  %v10711_v40 = vcombine.low %v2352_v0, %v2356_v56  ;;  %v10760_v0 = vcombine.high %v2400_v36, %v2404_v18 }
 0x4d6   :  { %9117 = vmatprep.subr.bf16.mxu1 %v10666_v46  ;;  %v10713_v46 = vcombine.low %v2353_v29, %v2357_v30  ;;  %v10722_v28 = vcombine.high %v2361_v47, %v2365_v54  ;;  %v2408_v29 = vld [vmem:[#allocation9 + $0x18d0] sm:$0xff] }
 0x4d7   :  { %v2412_v30 = vld [vmem:[#allocation9 + $0x18f0] sm:$0xff] }
 0x4d8   :  { %8790 = vmatpush1.bf16.msra.mxu0 %v10663_v58  ;;  %v2369_v58 = vld [vmem:[#allocation9 + $0x1798] sm:$0xff] }
 0x4d9   :  { %9118 = vmatpush1.bf16.msra.mxu1 %v10665_v7  ;;  %8791 = vmatprep.subr.bf16.mxu0 %v10672_v59  ;;  %v2373_v7 = vld [vmem:[#allocation9 + $0x17b8] sm:$0xff]  ;;  %v10719_v59 = vcombine.low %v2360_v45, %v2364_v22  ;;  %v2416_v22 = vld [vmem:[#allocation9 + $0x1910] sm:$0xff] }
 0x4da   :  { %9119 = vmatprep.subr.bf16.mxu1 %v10674_v44  ;;  %v10721_v44 = vcombine.low %v2361_v47, %v2365_v54  ;;  %v10730_v61 = vcombine.high %v2369_v58, %v2373_v7  ;;  %v2420_v47 = vld [vmem:[#allocation9 + $0x1930] sm:$0xff]  ;;  %v2417_v54 = vld [vmem:[#allocation9 + $0x1918] sm:$0xff] }
 0x4dc   :  { %8792 = vmatpush1.bf16.msra.mxu0 %v10671_v63  ;;  %v2377_v63 = vld [vmem:[#allocation9 + $0x17d8] sm:$0xff] }
 0x4dd   :  { %9120 = vmatpush1.bf16.msra.mxu1 %v10673_v2  ;;  %8793 = vmatprep.subr.bf16.mxu0 %v10680_v3  ;;  %v2381_v2 = vld [vmem:[#allocation9 + $0x17f8] sm:$0xff]  ;;  %v10727_v3 = vcombine.low %v2368_v57, %v2372_v35  ;;  %v2424_v57 = vld [vmem:[#allocation9 + $0x1950] sm:$0xff] }
 0x4de   :  { %9121 = vmatprep.subr.bf16.mxu1 %v10682_v6  ;;  %v10729_v6 = vcombine.low %v2369_v58, %v2373_v7  ;;  %v10738_v9 = vcombine.high %v2377_v63, %v2381_v2  ;;  %v2428_v35 = vld [vmem:[#allocation9 + $0x1970] sm:$0xff]  ;;  %v2425_v58 = vld [vmem:[#allocation9 + $0x1958] sm:$0xff] }
 0x4df   :  { %v2429_v7 = vld [vmem:[#allocation9 + $0x1978] sm:$0xff] }
 0x4e0   :  { %8794 = vmatpush1.bf16.msra.mxu0 %v10679_v48  ;;  %v2385_v48 = vld [vmem:[#allocation9 + $0x1818] sm:$0xff] }
 0x4e1   :  { %9122 = vmatpush1.bf16.msra.mxu1 %v10681_v27  ;;  %8795 = vmatprep.subr.bf16.mxu0 %v10688_v50  ;;  %v2389_v27 = vld [vmem:[#allocation9 + $0x1838] sm:$0xff]  ;;  %v10735_v50 = vcombine.low %v2376_v38, %v2380_v49  ;;  %v2432_v38 = vld [vmem:[#allocation9 + $0x1990] sm:$0xff] }
 0x4e2   :  { %9123 = vmatprep.subr.bf16.mxu1 %v10690_v1  ;;  %v10737_v1 = vcombine.low %v2377_v63, %v2381_v2  ;;  %v10746_v51 = vcombine.high %v2385_v48, %v2389_v27  ;;  %v2436_v49 = vld [vmem:[#allocation9 + $0x19b0] sm:$0xff]  ;;  %v2433_v63 = vld [vmem:[#allocation9 + $0x1998] sm:$0xff] }
 0x4e3   :  { %v2437_v2 = vld [vmem:[#allocation9 + $0x19b8] sm:$0xff] }
 0x4e4   :  { %8796 = vmatpush1.bf16.msra.mxu0 %v10687_v8  ;;  %v10743_v8 = vcombine.low %v2384_v10, %v2388_v11  ;;  %v2440_v10 = vld [vmem:[#allocation9 + $0x19d0] sm:$0xff] }
 0x4e5   :  { %9124 = vmatpush1.bf16.msra.mxu1 %v10689_v14  ;;  %8797 = vmatprep.subr.bf16.mxu0 %v10696_v17  ;;  %v2393_v14 = vld [vmem:[#allocation9 + $0x1858] sm:$0xff]  ;;  %v2444_v11 = vld [vmem:[#allocation9 + $0x19f0] sm:$0xff] }
 0x4e6   :  { %9125 = vmatprep.subr.bf16.mxu1 %v10698_v16  ;;  %v2397_v17 = vld [vmem:[#allocation9 + $0x1878] sm:$0xff]  ;;  %v10745_v16 = vcombine.low %v2385_v48, %v2389_v27 }
 0x4e7   :  { %v10754_v21 = vcombine.high %v2393_v14, %v2397_v17  ;;  %v2441_v48 = vld [vmem:[#allocation9 + $0x19d8] sm:$0xff] }
 0x4e8   :  { %8798 = vmatpush1.bf16.msra.mxu0 %v10695_v25  ;;  %v2401_v25 = vld [vmem:[#allocation9 + $0x1898] sm:$0xff] }
 0x4e9   :  { %9126 = vmatpush1.bf16.msra.mxu1 %v10697_v32  ;;  %8799 = vmatprep.subr.bf16.mxu0 %v10704_v23  ;;  %v2405_v32 = vld [vmem:[#allocation9 + $0x18b8] sm:$0xff]  ;;  %v10751_v23 = vcombine.low %v2392_v13, %v2396_v52  ;;  %v2448_v13 = vld [vmem:[#allocation9 + $0x1a10] sm:$0xff] }
 0x4ea   :  { %9127 = vmatprep.subr.bf16.mxu1 %v10706_v26  ;;  %v10753_v26 = vcombine.low %v2393_v14, %v2397_v17  ;;  %v10762_v56 = vcombine.high %v2401_v25, %v2405_v32  ;;  %v2445_v27 = vld [vmem:[#allocation9 + $0x19f8] sm:$0xff]  ;;  %v2452_v52 = vld [vmem:[#allocation9 + $0x1a30] sm:$0xff]  ;;  %v10799_v17 = vcombine.low %v2440_v10, %v2444_v11 }
 0x4eb   :  { %v2453_v14 = vld [vmem:[#allocation9 + $0x1a38] sm:$0xff] }
 0x4ec   :  { %8800 = vmatpush1.bf16.msra.mxu0 %v10703_v31  ;;  %v2409_v31 = vld [vmem:[#allocation9 + $0x18d8] sm:$0xff] }
 0x4ed   :  { %9128 = vmatpush1.bf16.msra.mxu1 %v10705_v33  ;;  %8801 = vmatprep.subr.bf16.mxu0 %v10712_v34  ;;  %v2413_v33 = vld [vmem:[#allocation9 + $0x18f8] sm:$0xff]  ;;  %v10759_v34 = vcombine.low %v2400_v36, %v2404_v18  ;;  %v2456_v18 = vld [vmem:[#allocation9 + $0x1a50] sm:$0xff] }
 0x4ee   :  { %9129 = vmatprep.subr.bf16.mxu1 %v10714_v37  ;;  %v10768_v37 = vcombine.high %v2408_v29, %v2412_v30  ;;  %v10770_v45 = vcombine.high %v2409_v31, %v2413_v33 }
 0x4f0   :  { %8802 = vmatpush1.bf16.msra.mxu0 %v10711_v40  ;;  %v2421_v40 = vld [vmem:[#allocation9 + $0x1938] sm:$0xff] }
 0x4f1   :  { %9130 = vmatpush1.bf16.msra.mxu1 %v10713_v46  ;;  %8803 = vmatprep.subr.bf16.mxu0 %v10720_v15  ;;  %v10769_v46 = vcombine.low %v2409_v31, %v2413_v33  ;;  %v10776_v15 = vcombine.high %v2416_v22, %v2420_v47  ;;  %v2465_v31 = vld [vmem:[#allocation9 + $0x1a98] sm:$0xff] }
 0x4f2   :  { %9131 = vmatprep.subr.bf16.mxu1 %v10722_v28  ;;  %v10778_v28 = vcombine.high %v2417_v54, %v2421_v40  ;;  %v2469_v33 = vld [vmem:[#allocation9 + $0x1ab8] sm:$0xff] }
 0x4f4   :  { %8804 = vmatpush1.bf16.msra.mxu0 %v10719_v59  ;;  %v10775_v59 = vcombine.low %v2416_v22, %v2420_v47  ;;  %v2472_v22 = vld [vmem:[#allocation9 + $0x1ad0] sm:$0xff] }
 0x4f5   :  { %9132 = vmatpush1.bf16.msra.mxu1 %v10721_v44  ;;  %8805 = vmatprep.subr.bf16.mxu0 %v10728_v60  ;;  %v10777_v44 = vcombine.low %v2417_v54, %v2421_v40  ;;  %v10784_v60 = vcombine.high %v2424_v57, %v2428_v35  ;;  %v2476_v47 = vld [vmem:[#allocation9 + $0x1af0] sm:$0xff]  ;;  %v2473_v54 = vld [vmem:[#allocation9 + $0x1ad8] sm:$0xff] }
 0x4f6   :  { %9133 = vmatprep.subr.bf16.mxu1 %v10730_v61  ;;  %v10786_v61 = vcombine.high %v2425_v58, %v2429_v7  ;;  %v2477_v40 = vld [vmem:[#allocation9 + $0x1af8] sm:$0xff] }
 0x4f8   :  { %8806 = vmatpush1.bf16.msra.mxu0 %v10727_v3  ;;  %v10783_v3 = vcombine.low %v2424_v57, %v2428_v35  ;;  %v2480_v57 = vld [vmem:[#allocation9 + $0x1b10] sm:$0xff] }
 0x4f9   :  { %9134 = vmatpush1.bf16.msra.mxu1 %v10729_v6  ;;  %8807 = vmatprep.subr.bf16.mxu0 %v10736_v4  ;;  %v10785_v6 = vcombine.low %v2425_v58, %v2429_v7  ;;  %v10792_v4 = vcombine.high %v2432_v38, %v2436_v49  ;;  %v2484_v35 = vld [vmem:[#allocation9 + $0x1b30] sm:$0xff]  ;;  %v2481_v58 = vld [vmem:[#allocation9 + $0x1b18] sm:$0xff] }
 0x4fa   :  { %9135 = vmatprep.subr.bf16.mxu1 %v10738_v9  ;;  %v10794_v9 = vcombine.high %v2433_v63, %v2437_v2  ;;  %v2485_v7 = vld [vmem:[#allocation9 + $0x1b38] sm:$0xff] }
 0x4fc   :  { %8808 = vmatpush1.bf16.msra.mxu0 %v10735_v50  ;;  %v10791_v50 = vcombine.low %v2432_v38, %v2436_v49  ;;  %v2488_v38 = vld [vmem:[#allocation9 + $0x1b50] sm:$0xff] }
 0x4fd   :  { %9136 = vmatpush1.bf16.msra.mxu1 %v10737_v1  ;;  %8818 = vmatprep.subr.bf16.mxu0 %v10744_v55  ;;  %v10793_v1 = vcombine.low %v2433_v63, %v2437_v2  ;;  %v10800_v55 = vcombine.high %v2440_v10, %v2444_v11  ;;  %v2492_v49 = vld [vmem:[#allocation9 + $0x1b70] sm:$0xff]  ;;  %v2489_v63 = vld [vmem:[#allocation9 + $0x1b58] sm:$0xff] }
 0x4fe   :  { %9146 = vmatprep.subr.bf16.mxu1 %v10746_v51  ;;  %v10802_v51 = vcombine.high %v2441_v48, %v2445_v27  ;;  %v2493_v2 = vld [vmem:[#allocation9 + $0x1b78] sm:$0xff]  ;;  %v2496_v10 = vld [vmem:[#allocation9 + $0x1b90] sm:$0xff] }
 0x4ff   :  { %8810 = vmatmul.mubr.bf16.vlgmr.msra.gmra.mrb[36].mxu0 %v12287_v24  ;;  %v2500_v11 = vld [vmem:[#allocation9 + $0x1bb0] sm:$0xff] }
 0x500   :  { %9138 = vmatmul.mubr.bf16.vlgmr.msra.gmra.mrb[36].mxu1 %v12287_v24  ;;  %8819 = vmatpush1.bf16.msra.mxu0 %v10743_v8  ;;  %v10761_v24 = vcombine.low %v2401_v25, %v2405_v32  ;;  %v2449_v8 = vld [vmem:[#allocation9 + $0x1a18] sm:$0xff] }
 0x501   :  { %8850 = vmatprep.mubr.bf16.mxu0 %v12291_v62  ;;  %9147 = vmatpush1.bf16.msra.mxu1 %v10745_v16  ;;  %v10801_v16 = vcombine.low %v2441_v48, %v2445_v27  ;;  %v10810_v36 = vcombine.high %v2449_v8, %v2453_v14  ;;  %v2457_v25 = vld [vmem:[#allocation9 + $0x1a58] sm:$0xff] }
 0x502   :  { %9178 = vmatprep.mubr.bf16.mxu1 %v12291_v62  ;;  %8820 = vmatprep.subr.bf16.mxu0 %v10752_v20  ;;  %v10767_v62 = vcombine.low %v2408_v29, %v2412_v30  ;;  %v10808_v20 = vcombine.high %v2448_v13, %v2452_v52  ;;  %v2461_v32 = vld [vmem:[#allocation9 + $0x1a78] sm:$0xff]  ;;  %v2464_v29 = vld [vmem:[#allocation9 + $0x1a90] sm:$0xff] }
 0x503   :  { %9148 = vmatprep.subr.bf16.mxu1 %v10754_v21  ;;  %v2460_v21 = vld [vmem:[#allocation9 + $0x1a70] sm:$0xff]  ;;  %v2497_v48 = vld [vmem:[#allocation9 + $0x1b98] sm:$0xff] }
 0x504   :  { %8821 = vmatpush1.bf16.msra.mxu0 %v10751_v23  ;;  %v10807_v23 = vcombine.low %v2448_v13, %v2452_v52  ;;  %v2468_v30 = vld [vmem:[#allocation9 + $0x1ab0] sm:$0xff]  ;;  %v2501_v27 = vld [vmem:[#allocation9 + $0x1bb8] sm:$0xff] }
 0x505   :  { %9149 = vmatpush1.bf16.msra.mxu1 %v10753_v26  ;;  %8822 = vmatprep.subr.bf16.mxu0 %v10760_v0  ;;  %v10809_v26 = vcombine.low %v2449_v8, %v2453_v14  ;;  %v10816_v0 = vcombine.high %v2456_v18, %v2460_v21  ;;  %v2504_v13 = vld [vmem:[#allocation9 + $0x1bd0] sm:$0xff]  ;;  %v2505_v8 = vld [vmem:[#allocation9 + $0x1bd8] sm:$0xff] }
 0x506   :  { %9150 = vmatprep.subr.bf16.mxu1 %v10762_v56  ;;  %v10818_v56 = vcombine.high %v2457_v25, %v2461_v32  ;;  %v2508_v52 = vld [vmem:[#allocation9 + $0x1bf0] sm:$0xff]  ;;  %v2509_v14 = vld [vmem:[#allocation9 + $0x1bf8] sm:$0xff] }
 0x508   :  { %8823 = vmatpush1.bf16.msra.mxu0 %v10759_v34  ;;  %v10815_v34 = vcombine.low %v2456_v18, %v2460_v21  ;;  %v2512_v18 = vld [vmem:[#allocation9 + $0x1c10] sm:$0xff] }
 0x509   :  { %9151 = vmatpush1.bf16.msra.mxu1 %v10761_v24  ;;  %8824 = vmatprep.subr.bf16.mxu0 %v10768_v37  ;;  %v10817_v24 = vcombine.low %v2457_v25, %v2461_v32  ;;  %v10824_v37 = vcombine.high %v2464_v29, %v2468_v30  ;;  %v2516_v21 = vld [vmem:[#allocation9 + $0x1c30] sm:$0xff]  ;;  %v2513_v25 = vld [vmem:[#allocation9 + $0x1c18] sm:$0xff] }
 0x50a   :  { %9152 = vmatprep.subr.bf16.mxu1 %v10770_v45  ;;  %v10826_v45 = vcombine.high %v2465_v31, %v2469_v33  ;;  %v2517_v32 = vld [vmem:[#allocation9 + $0x1c38] sm:$0xff] }
 0x50c   :  { %8825 = vmatpush1.bf16.msra.mxu0 %v10767_v62  ;;  %v10823_v62 = vcombine.low %v2464_v29, %v2468_v30  ;;  %v2520_v29 = vld [vmem:[#allocation9 + $0x1c50] sm:$0xff] }
 0x50d   :  { %9153 = vmatpush1.bf16.msra.mxu1 %v10769_v46  ;;  %8826 = vmatprep.subr.bf16.mxu0 %v10776_v15  ;;  %v10825_v46 = vcombine.low %v2465_v31, %v2469_v33  ;;  %v10832_v15 = vcombine.high %v2472_v22, %v2476_v47  ;;  %v2524_v30 = vld [vmem:[#allocation9 + $0x1c70] sm:$0xff]  ;;  %v10871_v31 = vcombine.low %v2512_v18, %v2516_v21  ;;  %v2521_v33 = vld [vmem:[#allocation9 + $0x1c58] sm:$0xff] }
 0x50e   :  { %9154 = vmatprep.subr.bf16.mxu1 %v10778_v28  ;;  %v10834_v28 = vcombine.high %v2473_v54, %v2477_v40 }
 0x510   :  { %8827 = vmatpush1.bf16.msra.mxu0 %v10775_v59  ;;  %v10831_v59 = vcombine.low %v2472_v22, %v2476_v47  ;;  %v2532_v22 = vld [vmem:[#allocation9 + $0x1cb0] sm:$0xff] }
 0x511   :  { %9155 = vmatpush1.bf16.msra.mxu1 %v10777_v44  ;;  %8828 = vmatprep.subr.bf16.mxu0 %v10784_v60  ;;  %v10833_v44 = vcombine.low %v2473_v54, %v2477_v40  ;;  %v10840_v60 = vcombine.high %v2480_v57, %v2484_v35  ;;  %v2529_v54 = vld [vmem:[#allocation9 + $0x1c98] sm:$0xff] }
 0x512   :  { %9156 = vmatprep.subr.bf16.mxu1 %v10786_v61  ;;  %v10842_v61 = vcombine.high %v2481_v58, %v2485_v7  ;;  %v2533_v40 = vld [vmem:[#allocation9 + $0x1cb8] sm:$0xff] }
 0x514   :  { %8829 = vmatpush1.bf16.msra.mxu0 %v10783_v3  ;;  %v10839_v3 = vcombine.low %v2480_v57, %v2484_v35  ;;  %v2536_v57 = vld [vmem:[#allocation9 + $0x1cd0] sm:$0xff] }
 0x515   :  { %9157 = vmatpush1.bf16.msra.mxu1 %v10785_v6  ;;  %8830 = vmatprep.subr.bf16.mxu0 %v10792_v4  ;;  %v10841_v6 = vcombine.low %v2481_v58, %v2485_v7  ;;  %v10848_v4 = vcombine.high %v2488_v38, %v2492_v49  ;;  %v2540_v35 = vld [vmem:[#allocation9 + $0x1cf0] sm:$0xff]  ;;  %v2537_v58 = vld [vmem:[#allocation9 + $0x1cd8] sm:$0xff] }
 0x516   :  { %9158 = vmatprep.subr.bf16.mxu1 %v10794_v9  ;;  %v10850_v9 = vcombine.high %v2489_v63, %v2493_v2  ;;  %v2541_v7 = vld [vmem:[#allocation9 + $0x1cf8] sm:$0xff] }
 0x518   :  { %8831 = vmatpush1.bf16.msra.mxu0 %v10791_v50  ;;  %v10847_v50 = vcombine.low %v2488_v38, %v2492_v49  ;;  %v2548_v38 = vld [vmem:[#allocation9 + $0x1d30] sm:$0xff]  ;;  %v2545_v49 = vld [vmem:[#allocation9 + $0x1d18] sm:$0xff] }
 0x519   :  { %9159 = vmatpush1.bf16.msra.mxu1 %v10793_v1  ;;  %8832 = vmatprep.subr.bf16.mxu0 %v10800_v55  ;;  %v10849_v1 = vcombine.low %v2489_v63, %v2493_v2  ;;  %v10856_v55 = vcombine.high %v2496_v10, %v2500_v11  ;;  %v2549_v63 = vld [vmem:[#allocation9 + $0x1d38] sm:$0xff]  ;;  %v10897_v2 = vcombine.low %v2537_v58, %v2541_v7 }
 0x51a   :  { %9160 = vmatprep.subr.bf16.mxu1 %v10802_v51  ;;  %v10858_v51 = vcombine.high %v2497_v48, %v2501_v27 }
 0x51c   :  { %8833 = vmatpush1.bf16.msra.mxu0 %v10799_v17  ;;  %v10855_v17 = vcombine.low %v2496_v10, %v2500_v11  ;;  %v2553_v10 = vld [vmem:[#allocation9 + $0x1d58] sm:$0xff] }
 0x51d   :  { %9161 = vmatpush1.bf16.msra.mxu1 %v10801_v16  ;;  %8834 = vmatprep.subr.bf16.mxu0 %v10808_v20  ;;  %v10857_v16 = vcombine.low %v2497_v48, %v2501_v27  ;;  %v10864_v20 = vcombine.high %v2504_v13, %v2508_v52  ;;  %v2557_v11 = vld [vmem:[#allocation9 + $0x1d78] sm:$0xff]  ;;  %v10905_v27 = vcombine.low %v2545_v49, %v2549_v63 }
 0x51e   :  { %9162 = vmatprep.subr.bf16.mxu1 %v10810_v36  ;;  %v10866_v36 = vcombine.high %v2505_v8, %v2509_v14 }
 0x520   :  { %8835 = vmatpush1.bf16.msra.mxu0 %v10807_v23  ;;  %v10863_v23 = vcombine.low %v2504_v13, %v2508_v52  ;;  %v2561_v13 = vld [vmem:[#allocation9 + $0x1d98] sm:$0xff] }
 0x521   :  { %9163 = vmatpush1.bf16.msra.mxu1 %v10809_v26  ;;  %8836 = vmatprep.subr.bf16.mxu0 %v10816_v0  ;;  %v10865_v26 = vcombine.low %v2505_v8, %v2509_v14  ;;  %v10872_v0 = vcombine.high %v2512_v18, %v2516_v21  ;;  %v2565_v52 = vld [vmem:[#allocation9 + $0x1db8] sm:$0xff]  ;;  %v10913_v14 = vcombine.low %v2553_v10, %v2557_v11 }
 0x522   :  { %9164 = vmatprep.subr.bf16.mxu1 %v10818_v56  ;;  %v10874_v56 = vcombine.high %v2513_v25, %v2517_v32  ;;  %v2569_v18 = vld [vmem:[#allocation9 + $0x1dd8] sm:$0xff] }
 0x523   :  { %v2573_v21 = vld [vmem:[#allocation9 + $0x1df8] sm:$0xff] }
 0x524   :  { %8837 = vmatpush1.bf16.msra.mxu0 %v10815_v34  ;;  %v2525_v34 = vld [vmem:[#allocation9 + $0x1c78] sm:$0xff] }
 0x525   :  { %9165 = vmatpush1.bf16.msra.mxu1 %v10817_v24  ;;  %8838 = vmatprep.subr.bf16.mxu0 %v10824_v37  ;;  %v10873_v24 = vcombine.low %v2513_v25, %v2517_v32  ;;  %v10880_v37 = vcombine.high %v2520_v29, %v2524_v30  ;;  %v10882_v47 = vcombine.high %v2521_v33, %v2525_v34 }
 0x526   :  { %9166 = vmatprep.subr.bf16.mxu1 %v10826_v45  ;;  %v2528_v45 = vld [vmem:[#allocation9 + $0x1c90] sm:$0xff]  ;;  %v10921_v32 = vcombine.low %v2561_v13, %v2565_v52 }
 0x528   :  { %8839 = vmatpush1.bf16.msra.mxu0 %v10823_v62  ;;  %v10879_v62 = vcombine.low %v2520_v29, %v2524_v30  ;;  %v2577_v29 = vld [vmem:[#allocation9 + $0x1e18] sm:$0xff] }
 0x529   :  { %9167 = vmatpush1.bf16.msra.mxu1 %v10825_v46  ;;  %8840 = vmatprep.subr.bf16.mxu0 %v10832_v15  ;;  %v10881_v46 = vcombine.low %v2521_v33, %v2525_v34  ;;  %v10888_v15 = vcombine.high %v2528_v45, %v2532_v22  ;;  %v2581_v30 = vld [vmem:[#allocation9 + $0x1e38] sm:$0xff]  ;;  %v10929_v33 = vcombine.low %v2569_v18, %v2573_v21 }
 0x52a   :  { %9168 = vmatprep.subr.bf16.mxu1 %v10834_v28  ;;  %v10890_v28 = vcombine.high %v2529_v54, %v2533_v40 }
 0x52c   :  { %8841 = vmatpush1.bf16.msra.mxu0 %v10831_v59  ;;  %v10887_v59 = vcombine.low %v2528_v45, %v2532_v22  ;;  %v2588_v45 = vld [vmem:[#allocation9 + $0x1e70] sm:$0xff]  ;;  %v2585_v22 = vld [vmem:[#allocation9 + $0x1e58] sm:$0xff] }
 0x52d   :  { %9169 = vmatpush1.bf16.msra.mxu1 %v10833_v44  ;;  %8842 = vmatprep.subr.bf16.mxu0 %v10840_v60  ;;  %v10896_v44 = vcombine.high %v2536_v57, %v2540_v35  ;;  %v10898_v60 = vcombine.high %v2537_v58, %v2541_v7 }
 0x52e   :  { %9170 = vmatprep.subr.bf16.mxu1 %v10842_v61  ;;  %v2544_v61 = vld [vmem:[#allocation9 + $0x1d10] sm:$0xff] }
 0x52f   :  { %v10903_v48 = vcombine.low %v2544_v61, %v2548_v38 }
 0x530   :  { %8843 = vmatpush1.bf16.msra.mxu0 %v10839_v3  ;;  %v10904_v3 = vcombine.high %v2544_v61, %v2548_v38  ;;  %v2601_v61 = vld [vmem:[#allocation9 + $0x1ed8] sm:$0xff] }
 0x531   :  { %9171 = vmatpush1.bf16.msra.mxu1 %v10841_v6  ;;  %8844 = vmatprep.subr.bf16.mxu0 %v10848_v4  ;;  %v10906_v6 = vcombine.high %v2545_v49, %v2549_v63  ;;  %v2552_v4 = vld [vmem:[#allocation9 + $0x1d50] sm:$0xff]  ;;  %v2605_v38 = vld [vmem:[#allocation9 + $0x1ef8] sm:$0xff] }
 0x532   :  { %9172 = vmatprep.subr.bf16.mxu1 %v10850_v9  ;;  %v2556_v9 = vld [vmem:[#allocation9 + $0x1d70] sm:$0xff] }
 0x533   :  { %v10911_v8 = vcombine.low %v2552_v4, %v2556_v9 }
 0x534   :  { %8845 = vmatpush1.bf16.msra.mxu0 %v10847_v50  ;;  %v10912_v50 = vcombine.high %v2552_v4, %v2556_v9  ;;  %v2609_v4 = vld [vmem:[#allocation9 + $0x1f18] sm:$0xff] }
 0x535   :  { %9173 = vmatpush1.bf16.msra.mxu1 %v10849_v1  ;;  %8846 = vmatprep.subr.bf16.mxu0 %v10856_v55  ;;  %v10914_v1 = vcombine.high %v2553_v10, %v2557_v11  ;;  %v2560_v55 = vld [vmem:[#allocation9 + $0x1d90] sm:$0xff]  ;;  %v2613_v9 = vld [vmem:[#allocation9 + $0x1f38] sm:$0xff]  ;;  %v10961_v11 = vcombine.low %v2601_v61, %v2605_v38 }
 0x536   :  { %9174 = vmatprep.subr.bf16.mxu1 %v10858_v51  ;;  %v2564_v51 = vld [vmem:[#allocation9 + $0x1db0] sm:$0xff] }
 0x537   :  { %v10919_v25 = vcombine.low %v2560_v55, %v2564_v51 }
 0x538   :  { %8847 = vmatpush1.bf16.msra.mxu0 %v10855_v17  ;;  %v10920_v17 = vcombine.high %v2560_v55, %v2564_v51  ;;  %v2617_v55 = vld [vmem:[#allocation9 + $0x1f58] sm:$0xff] }
 0x539   :  { %9175 = vmatpush1.bf16.msra.mxu1 %v10857_v16  ;;  %8848 = vmatprep.subr.bf16.mxu0 %v10864_v20  ;;  %v10922_v16 = vcombine.high %v2561_v13, %v2565_v52  ;;  %v2568_v20 = vld [vmem:[#allocation9 + $0x1dd0] sm:$0xff]  ;;  %v2621_v51 = vld [vmem:[#allocation9 + $0x1f78] sm:$0xff]  ;;  %v10969_v52 = vcombine.low %v2609_v4, %v2613_v9 }
 0x53a   :  { %9176 = vmatprep.subr.bf16.mxu1 %v10866_v36  ;;  %v2572_v36 = vld [vmem:[#allocation9 + $0x1df0] sm:$0xff] }
 0x53c   :  { %8849 = vmatpush1.bf16.msra.mxu0 %v10863_v23  ;;  %v10928_v23 = vcombine.high %v2568_v20, %v2572_v36 }
 0x53d   :  { %9177 = vmatpush1.bf16.msra.mxu1 %v10865_v26  ;;  %8859 = vmatprep.subr.bf16.mxu0 %v10872_v0  ;;  %v10930_v26 = vcombine.high %v2569_v18, %v2573_v21  ;;  %v2576_v0 = vld [vmem:[#allocation9 + $0x1e10] sm:$0xff]  ;;  %v2629_v18 = vld [vmem:[#allocation9 + $0x1fb8] sm:$0xff]  ;;  %v12353_v21 = vld [vmem:[#allocation11] sm:$0xff] }
 0x53e   :  { %9187 = vmatprep.subr.bf16.mxu1 %v10874_v56  ;;  %v2580_v56 = vld [vmem:[#allocation9 + $0x1e30] sm:$0xff] }
 0x53f   :  { %8851 = vmatmul.mubr.bf16.vlgmr.msra.gmra.mrb[36].mxu0 %v12298_v12  ;;  %v10936_v34 = vcombine.high %v2576_v0, %v2580_v56 }
 0x540   :  { %9179 = vmatmul.mubr.bf16.vlgmr.msra.gmra.mrb[36].mxu1 %v12298_v12  ;;  %8860 = vmatpush1.bf16.msra.mxu0 %v10871_v31  ;;  %v10889_v12 = vcombine.low %v2529_v54, %v2533_v40  ;;  %v10927_v31 = vcombine.low %v2568_v20, %v2572_v36  ;;  %v10935_v54 = vcombine.low %v2576_v0, %v2580_v56  ;;  %v2646_v20 = vsub.s32 1, %v12178_v41  ;;  %v2625_v36 = vld [vmem:[#allocation9 + $0x1f98] sm:$0xff]  ;;  %v2632_v56 = vld [vmem:[#allocation9 + $0x1fd0] sm:$0xff] }
 0x541   :  { %8891 = vmatprep.mubr.bf16.mxu0 %v12303_v39  ;;  %9188 = vmatpush1.bf16.msra.mxu1 %v10873_v24  ;;  %v10938_v24 = vcombine.high %v2577_v29, %v2581_v30  ;;  %v10937_v40 = vcombine.low %v2577_v29, %v2581_v30  ;;  %v10986_v0 = vcombine.high %v2625_v36, %v2629_v18  ;;  %v2636_v29 = vld [vmem:[#allocation9 + $0x1ff0] sm:$0xff] }
 0x542   :  { %9219 = vmatprep.mubr.bf16.mxu1 %v12303_v39  ;;  %8861 = vmatprep.subr.bf16.mxu0 %v10880_v37  ;;  %v10895_v39 = vcombine.low %v2536_v57, %v2540_v35  ;;  %v2584_v37 = vld [vmem:[#allocation9 + $0x1e50] sm:$0xff]  ;;  %v2593_v57 = vld [vmem:[#allocation9 + $0x1e98] sm:$0xff]  ;;  %v2647_v30 = vrot.slane %v12353_v21, %v2646_v20 }
 0x543   :  { %9189 = vmatprep.subr.bf16.mxu1 %v10882_v47  ;;  %v2589_v47 = vld [vmem:[#allocation9 + $0x1e78] sm:$0xff]  ;;  %v10943_v58 = vcombine.low %v2584_v37, %v2588_v45 }
 0x544   :  { %8862 = vmatpush1.bf16.msra.mxu0 %v10879_v62  ;;  %v10944_v62 = vcombine.high %v2584_v37, %v2588_v45  ;;  %v2597_v35 = vld [vmem:[#allocation9 + $0x1eb8] sm:$0xff]  ;;  %v10945_v7 = vcombine.low %v2585_v22, %v2589_v47  ;;  %v10985_v37 = vcombine.low %v2625_v36, %v2629_v18  ;;  %v10992_v45 = vcombine.high %v2632_v56, %v2636_v29  ;;  %v11443_v36 = vld [vmem:[#allocation12 + $0xf8] sm:$0xff]  }
 0x545   :  { %9190 = vmatpush1.bf16.msra.mxu1 %v10881_v46  ;;  %8863 = vmatprep.subr.bf16.mxu0 %v10888_v15  ;;  %v10946_v46 = vcombine.high %v2585_v22, %v2589_v47  ;;  %v2592_v15 = vld [vmem:[#allocation9 + $0x1e90] sm:$0xff]  ;;  %v10953_v63 = vcombine.low %v2593_v57, %v2597_v35  ;;  %v11277_v47 = vadd.f32 %v12332_v42, %v2647_v30  ;;  %v11444_v18 = vld [vmem:[#allocation12 + $0x38] sm:$0xff]  }
 0x546   :  { %9191 = vmatprep.subr.bf16.mxu1 %v10890_v28  ;;  %v2596_v28 = vld [vmem:[#allocation9 + $0x1eb0] sm:$0xff] }
 0x547   :  { %v10951_v49 = vcombine.low %v2592_v15, %v2596_v28  ;;  %v11450_v30 = vld [vmem:[#allocation12 + $0x148] sm:$0xff]  }
 0x548   :  { %8864 = vmatpush1.bf16.msra.mxu0 %v10887_v59  ;;  %v10952_v59 = vcombine.high %v2592_v15, %v2596_v28  ;;  %v11415_v15 = vld [vmem:[#allocation12 + $0xc0] sm:$0xff]   ;;  %v9229_v28 = vmax.f32 %v11277_v47, 0.0  ;;  %v11458_v47 = vld [vmem:[#allocation12 + $0x158] sm:$0xff]  }
 0x549   :  { %9192 = vmatpush1.bf16.msra.mxu1 %v10889_v12  ;;  %8865 = vmatprep.subr.bf16.mxu0 %v10896_v44  ;;  %v10954_v12 = vcombine.high %v2593_v57, %v2597_v35  ;;  %v2600_v44 = vld [vmem:[#allocation9 + $0x1ed0] sm:$0xff]  ;;  %v11416_v35 = vld [vmem:[#allocation12] sm:$0xff]  }
 0x54a   :  { %9193 = vmatprep.subr.bf16.mxu1 %v10898_v60  ;;  %v2604_v60 = vld [vmem:[#allocation9 + $0x1ef0] sm:$0xff]  ;;  %v9237_v42 = vpack.c.bf16 %v9229_v28, %v9229_v28  ;;  %v11464_v28 = vld [vmem:[#allocation12 + $0x120] sm:$0xff]  }
 0x54b   :  { %v10959_v10 = vcombine.low %v2600_v44, %v2604_v60 }
 0x54c   :  { %8866 = vmatpush1.bf16.msra.mxu0 %v10895_v39  ;;  %v10960_v39 = vcombine.high %v2600_v44, %v2604_v60  ;;  %v11421_v44 = vld [vmem:[#allocation12 + $0x88] sm:$0xff]   ;;  %v11422_v60 = vld [vmem:[#allocation12 + $0x50] sm:$0xff]  }
 0x54d   :  { %9194 = vmatpush1.bf16.msra.mxu1 %v10897_v2  ;;  %8867 = vmatprep.subr.bf16.mxu0 %v10904_v3  ;;  %v10962_v2 = vcombine.high %v2601_v61, %v2605_v38  ;;  %v2608_v3 = vld [vmem:[#allocation9 + $0x1f10] sm:$0xff]  ;;  %v11423_v61 = vld [vmem:[#allocation12 + $0xd0] sm:$0xff]  }
 0x54e   :  { %9195 = vmatprep.subr.bf16.mxu1 %v10906_v6  ;;  %v2612_v6 = vld [vmem:[#allocation9 + $0x1f30] sm:$0xff]  ;;  %v11424_v38 = vld [vmem:[#allocation12 + $0x10] sm:$0xff]  }
 0x54f   :  { %v10967_v13 = vcombine.low %v2608_v3, %v2612_v6 }
 0x550   :  { %8868 = vmatpush1.bf16.msra.mxu0 %v10903_v48  ;;  %v10968_v48 = vcombine.high %v2608_v3, %v2612_v6  ;;  %v11430_v3 = vld [vmem:[#allocation12 + $0x60] sm:$0xff]  }
 0x551   :  { %9196 = vmatpush1.bf16.msra.mxu1 %v10905_v27  ;;  %8869 = vmatprep.subr.bf16.mxu0 %v10912_v50  ;;  %v10970_v27 = vcombine.high %v2609_v4, %v2613_v9  ;;  %v2616_v50 = vld [vmem:[#allocation9 + $0x1f50] sm:$0xff]  ;;  %v11431_v6 = vld [vmem:[#allocation12 + $0xe0] sm:$0xff]   ;;  %v2642_v9 = vsub.s32 0, %v12178_v41 }
 0x552   :  { %9197 = vmatprep.subr.bf16.mxu1 %v10914_v1  ;;  %v2620_v1 = vld [vmem:[#allocation9 + $0x1f70] sm:$0xff]  ;;  %v11432_v4 = vld [vmem:[#allocation12 + $0x20] sm:$0xff]  }
 0x554   :  { %8870 = vmatpush1.bf16.msra.mxu0 %v10911_v8  ;;  %v10976_v8 = vcombine.high %v2616_v50, %v2620_v1 }
 0x555   :  { %9198 = vmatpush1.bf16.msra.mxu1 %v10913_v14  ;;  %8871 = vmatprep.subr.bf16.mxu0 %v10920_v17  ;;  %v10978_v14 = vcombine.high %v2617_v55, %v2621_v51  ;;  %v2624_v17 = vld [vmem:[#allocation9 + $0x1f90] sm:$0xff] }
 0x556   :  { %9199 = vmatprep.subr.bf16.mxu1 %v10922_v16  ;;  %v2628_v16 = vld [vmem:[#allocation9 + $0x1fb0] sm:$0xff] }
 0x558   :  { %8872 = vmatpush1.bf16.msra.mxu0 %v10919_v25  ;;  %v2654_v25 = vsub.s32 3, %v12178_v41 }
 0x559   :  { %9200 = vmatpush1.bf16.msra.mxu1 %v10921_v32  ;;  %8873 = vmatprep.subr.bf16.mxu0 %v10928_v23  ;;  %v10975_v32 = vcombine.low %v2616_v50, %v2620_v1  ;;  %v10977_v23 = vcombine.low %v2617_v55, %v2621_v51  ;;  %v11436_v50 = vld [vmem:[#allocation12 + $0x28] sm:$0xff]   ;;  %v2643_v1 = vrot.slane %v12353_v21, %v2642_v9  ;;  %v11438_v51 = vld [vmem:[#allocation12 + $0x70] sm:$0xff]  }
 0x55a   :  { %9201 = vmatprep.subr.bf16.mxu1 %v10930_v26  ;;  %v10984_v26 = vcombine.high %v2624_v17, %v2628_v16  ;;  %v11437_v55 = vld [vmem:[#allocation12 + $0xa8] sm:$0xff]  }
 0x55c   :  { %8874 = vmatpush1.bf16.msra.mxu0 %v10927_v31  ;;  %v2633_v31 = vld [vmem:[#allocation9 + $0x1fd8] sm:$0xff] }
 0x55d   :  { %9202 = vmatpush1.bf16.msra.mxu1 %v10929_v33  ;;  %8875 = vmatprep.subr.bf16.mxu0 %v10936_v34  ;;  %v2637_v33 = vld [vmem:[#allocation9 + $0x1ff8] sm:$0xff]  ;;  %v2655_v34 = vrot.slane %v12353_v21, %v2654_v25 }
 0x55e   :  { %9203 = vmatprep.subr.bf16.mxu1 %v10938_v24  ;;  %v10983_v24 = vcombine.low %v2624_v17, %v2628_v16  ;;  %v10994_v22 = vcombine.high %v2633_v31, %v2637_v33  ;;  %v11441_v17 = vld [vmem:[#allocation12 + $0xb0] sm:$0xff]   ;;  %v11442_v16 = vld [vmem:[#allocation12 + $0x78] sm:$0xff]  }
 0x560   :  { %8876 = vmatpush1.bf16.msra.mxu0 %v10935_v54  ;;  %v11279_v54 = vadd.f32 %v12334_v53, %v2655_v34  ;;  %v11419_v53 = vld [vmem:[#allocation12 + $0xc8] sm:$0xff]  }
 0x561   :  { %9204 = vmatpush1.bf16.msra.mxu1 %v10937_v40  ;;  %8877 = vmatprep.subr.bf16.mxu0 %v10944_v62  ;;  %v10991_v40 = vcombine.low %v2632_v56, %v2636_v29  ;;  %v10993_v62 = vcombine.low %v2633_v31, %v2637_v33  ;;  %v11449_v29 = vld [vmem:[#allocation12 + $0x180] sm:$0xff]   ;;  %v11451_v31 = vld [vmem:[#allocation12 + $0x1c8] sm:$0xff]  }
 0x562   :  { %9205 = vmatprep.subr.bf16.mxu1 %v10946_v46  ;;  %v11414_v46 = vld [vmem:[#allocation12 + $0x40] sm:$0xff]   ;;  %v9231_v57 = vmax.f32 %v11279_v54, 0.0  ;;  %v11452_v33 = vld [vmem:[#allocation12 + $0x108] sm:$0xff]   ;;  %v11459_v54 = vld [vmem:[#allocation12 + $0x1d8] sm:$0xff]  }
 0x563   :  { %v11453_v34 = vld [vmem:[#allocation12 + $0x188] sm:$0xff]  }
 0x564   :  { %8878 = vmatpush1.bf16.msra.mxu0 %v10943_v58  ;;  %v11417_v58 = vld [vmem:[#allocation12 + $0x80] sm:$0xff]  }
 0x565   :  { %9206 = vmatpush1.bf16.msra.mxu1 %v10945_v7  ;;  %8879 = vmatprep.subr.bf16.mxu0 %v10952_v59  ;;  %v11418_v7 = vld [vmem:[#allocation12 + $0x48] sm:$0xff]   ;;  %v9239_v59 = vpack.c.bf16 %v9231_v57, %v9231_v57  ;;  %v11465_v57 = vld [vmem:[#allocation12 + $0x1a0] sm:$0xff]  }
 0x566   :  { %9207 = vmatprep.subr.bf16.mxu1 %v10954_v12  ;;  %v11420_v12 = vld [vmem:[#allocation12 + $0x8] sm:$0xff]  }
 0x568   :  { %8880 = vmatpush1.bf16.msra.mxu0 %v10951_v49  ;;  %v11425_v49 = vld [vmem:[#allocation12 + $0x90] sm:$0xff]  }
 0x569   :  { %9208 = vmatpush1.bf16.msra.mxu1 %v10953_v63  ;;  %8881 = vmatprep.subr.bf16.mxu0 %v10960_v39  ;;  %v11426_v63 = vld [vmem:[#allocation12 + $0x58] sm:$0xff]  }
 0x56a   :  { %9209 = vmatprep.subr.bf16.mxu1 %v10962_v2  ;;  %v11427_v39 = vld [vmem:[#allocation12 + $0xd8] sm:$0xff]  }
 0x56b   :  { %v11429_v2 = vld [vmem:[#allocation12 + $0x98] sm:$0xff]  }
 0x56c   :  { %8882 = vmatpush1.bf16.msra.mxu0 %v10959_v10  ;;  %v11433_v10 = vld [vmem:[#allocation12 + $0xa0] sm:$0xff]  }
 0x56d   :  { %9210 = vmatpush1.bf16.msra.mxu1 %v10961_v11  ;;  %8883 = vmatprep.subr.bf16.mxu0 %v10968_v48  ;;  %v11434_v11 = vld [vmem:[#allocation12 + $0x68] sm:$0xff]   ;;  %v2650_v48 = vsub.s32 2, %v12178_v41 }
 0x56e   :  { %9211 = vmatprep.subr.bf16.mxu1 %v10970_v27  ;;  %v11435_v27 = vld [vmem:[#allocation12 + $0xe8] sm:$0xff]  }
 0x570   :  { %8884 = vmatpush1.bf16.msra.mxu0 %v10967_v13  ;;  %v2651_v13 = vrot.slane %v12353_v21, %v2650_v48 }
 0x571   :  { %9212 = vmatpush1.bf16.msra.mxu1 %v10969_v52  ;;  %8885 = vmatprep.subr.bf16.mxu0 %v10976_v8  ;;  %v11439_v52 = vld [vmem:[#allocation12 + $0xf0] sm:$0xff]  }
 0x572   :  { %9213 = vmatprep.subr.bf16.mxu1 %v10978_v14  ;;  %v11440_v8 = vld [vmem:[#allocation12 + $0x30] sm:$0xff]   ;;  %v11276_v14 = vadd.f32 %v12328_v19, %v2643_v1  ;;  %v11278_v20 = vadd.f32 %v12330_v5, %v2651_v13  ;;  %v11448_v19 = vld [vmem:[#allocation12 + $0x100] sm:$0xff]  }
 0x574   :  { %8886 = vmatpush1.bf16.msra.mxu0 %v10975_v32  ;;  %v9228_v25 = vmax.f32 %v11276_v14, 0.0  ;;  %v11445_v32 = vld [vmem:[#allocation12 + $0xb8] sm:$0xff]  }
 0x575   :  { %9214 = vmatpush1.bf16.msra.mxu1 %v10977_v23  ;;  %8887 = vmatprep.subr.bf16.mxu0 %v10984_v26  ;;  %v11446_v23 = vld [vmem:[#allocation12 + $0x140] sm:$0xff]   ;;  %v9230_v26 = vmax.f32 %v11278_v20, 0.0 }
 0x576   :  { %9215 = vmatprep.subr.bf16.mxu1 %v10986_v0  ;;  %v11447_v0 = vld [vmem:[#allocation12 + $0x1c0] sm:$0xff]   ;;  %v9236_v56 = vpack.c.bf16 %v9228_v25, %v9228_v25 }
 0x577   :  { %v9238_v5 = vpack.c.bf16 %v9230_v26, %v9230_v26  ;;  %v10995_v26 = vld [vmem:[#allocation14] ss:$0 sm:$0xff] }
 0x578   :  { %8888 = vmatpush1.bf16.msra.mxu0 %v10983_v24  ;;  %v11454_v24 = vld [vmem:[#allocation12 + $0x150] sm:$0xff]  }
 0x579   :  { %9216 = vmatpush1.bf16.msra.mxu1 %v10985_v37  ;;  %8889 = vmatprep.subr.bf16.mxu0 %v10992_v45  ;;  %v11455_v37 = vld [vmem:[#allocation12 + $0x1d0] sm:$0xff]  }
 0x57a   :  { %9217 = vmatprep.subr.bf16.mxu1 %v10994_v22  ;;  %v11456_v45 = vld [vmem:[#allocation12 + $0x110] sm:$0xff]  }
 0x57b   :  { %v11457_v22 = vld [vmem:[#allocation12 + $0x190] sm:$0xff]  }
 0x57c   :  { %8890 = vmatpush1.bf16.msra.mxu0 %v10991_v40  ;;  %v11460_v40 = vld [vmem:[#allocation12 + $0x118] sm:$0xff]  }
 0x57d   :  { %9218 = vmatpush1.bf16.msra.mxu1 %v10993_v62  ;;  %11092 = vmatprep.subr.bf16.mxu0 %v11414_v46  ;;  %v11461_v62 = vld [vmem:[#allocation12 + $0x198] sm:$0xff]   ;;  %v11462_v46 = vld [vmem:[#allocation12 + $0x160] sm:$0xff]  }
 0x57e   :  { %11114 = vmatprep.subr.bf16.mxu1 %v11415_v15  ;;  %v11463_v15 = vld [vmem:[#allocation12 + $0x1e0] sm:$0xff]  }
 0x57f   :  { %8892 = vmatmul.mubr.bf16.vlgmr.msra.gmra.mrb[36].mxu0 %v12310_v43 }
 0x580   :  { %9220 = vmatmul.mubr.bf16.vlgmr.msra.gmra.mrb[36].mxu1 %v12310_v43  ;;  %11093 = vmatpush3.bf16.msra.mxu0 %v11416_v35  ;;  %v11428_v43 = vld [vmem:[#allocation12 + $0x18] sm:$0xff]   ;;  %v11466_v35 = vld [vmem:[#allocation12 + $0x168] sm:$0xff]  }
 0x581   :  { %9795 = vmatprep.mubr.bf16.mxu0 %v9237_v42  ;;  %11115 = vmatpush3.bf16.msra.mxu1 %v11417_v58  ;;  %v11467_v58 = vld [vmem:[#allocation12 + $0x1e8] sm:$0xff]  }
 0x582   :  { %9835 = vmatprep.mubr.bf16.mxu1 %v9239_v59  ;;  %11094 = vmatprep.subr.bf16.mxu0 %v11418_v7  ;;  %v11468_v7 = vld [vmem:[#allocation12 + $0x128] sm:$0xff]   ;;  %v11471_v59 = vld [vmem:[#allocation12 + $0x1f0] sm:$0xff]  }
 0x583   :  { %11116 = vmatprep.subr.bf16.mxu1 %v11419_v53  ;;  %v11469_v42 = vld [vmem:[#allocation12 + $0x1a8] sm:$0xff]   ;;  %v11470_v53 = vld [vmem:[#allocation12 + $0x170] sm:$0xff]  }
 0x584   :  { %11095 = vmatpush3.bf16.msra.mxu0 %v11420_v12  ;;  %v11472_v12 = vld [vmem:[#allocation12 + $0x130] sm:$0xff]  }
 0x585   :  { %11117 = vmatpush3.bf16.msra.mxu1 %v11421_v44  ;;  %11096 = vmatprep.subr.bf16.mxu0 %v11422_v60  ;;  %v11473_v44 = vld [vmem:[#allocation12 + $0x1b0] sm:$0xff]   ;;  %v11474_v60 = vld [vmem:[#allocation12 + $0x178] sm:$0xff]  }
 0x586   :  { %11118 = vmatprep.subr.bf16.mxu1 %v11423_v61  ;;  %v11475_v61 = vld [vmem:[#allocation12 + $0x1f8] sm:$0xff]  }
 0x588   :  { %11097 = vmatpush3.bf16.msra.mxu0 %v11424_v38  ;;  %v11476_v38 = vld [vmem:[#allocation12 + $0x138] sm:$0xff]  }
 0x589   :  { %11119 = vmatpush3.bf16.msra.mxu1 %v11425_v49  ;;  %11098 = vmatprep.subr.bf16.mxu0 %v11426_v63  ;;  %v11477_v49 = vld [vmem:[#allocation12 + $0x1b8] sm:$0xff]   ;;  %v2658_v63 = vsub.s32 4, %v12178_v41 }
 0x58a   :  { %11120 = vmatprep.subr.bf16.mxu1 %v11427_v39  ;;  %v2666_v39 = vsub.s32 6, %v12178_v41 }
 0x58c   :  { %11099 = vmatpush3.bf16.msra.mxu0 %v11428_v43  ;;  %v2662_v43 = vsub.s32 5, %v12178_v41 }
 0x58d   :  { %11121 = vmatpush3.bf16.msra.mxu1 %v11429_v2  ;;  %11100 = vmatprep.subr.bf16.mxu0 %v11430_v3  ;;  %v2670_v2 = vsub.s32 7, %v12178_v41  ;;  %v2659_v3 = vrot.slane %v12353_v21, %v2658_v63 }
 0x58e   :  { %11122 = vmatprep.subr.bf16.mxu1 %v11431_v6  ;;  %v2667_v6 = vrot.slane %v12353_v21, %v2666_v39 }
 0x58f   :  { %v2671_v9 = vrot.slane %v12353_v21, %v2670_v2 }
 0x590   :  { %11101 = vmatpush3.bf16.msra.mxu0 %v11432_v4  ;;  %v2663_v4 = vrot.slane %v12353_v21, %v2662_v43 }
 0x591   :  { %11123 = vmatpush3.bf16.msra.mxu1 %v11433_v10  ;;  %11102 = vmatprep.subr.bf16.mxu0 %v11434_v11 }
 0x592   :  { %11124 = vmatprep.subr.bf16.mxu1 %v11435_v27 }
 0x594   :  { %11103 = vmatpush3.bf16.msra.mxu0 %v11436_v50 }
 0x595   :  { %11125 = vmatpush3.bf16.msra.mxu1 %v11437_v55  ;;  %11104 = vmatprep.subr.bf16.mxu0 %v11438_v51 }
 0x596   :  { %11126 = vmatprep.subr.bf16.mxu1 %v11439_v52 }
 0x598   :  { %11105 = vmatpush3.bf16.msra.mxu0 %v11440_v8 }
 0x599   :  { %11127 = vmatpush3.bf16.msra.mxu1 %v11441_v17  ;;  %11106 = vmatprep.subr.bf16.mxu0 %v11442_v16 }
 0x59a   :  { %11128 = vmatprep.subr.bf16.mxu1 %v11443_v36 }
 0x59c   :  { %11107 = vmatpush3.bf16.msra.mxu0 %v11444_v18 }
 0x59d   :  { %11129 = vmatpush3.bf16.msra.mxu1 %v11445_v32  ;;  %11136 = vmatprep.subr.bf16.mxu0 %v11446_v23 }
 0x59e   :  { %11158 = vmatprep.subr.bf16.mxu1 %v11447_v0 }
 0x59f   :  { %9796 = vmatmul.mubr.bf16.vlgmr.msra.gmra.mrb[40].mxu0 %v9236_v56 }
 0x5a0   :  { %9836 = vmatmul.mubr.bf16.vlgmr.msra.gmra.mrb[40].mxu1 %v9238_v5  ;;  %11137 = vmatpush3.bf16.msra.mxu0 %v11448_v19 }
 0x5a1   :  { %11159 = vmatpush3.bf16.msra.mxu1 %v11449_v29  ;;  %11138 = vmatprep.subr.bf16.mxu0 %v11450_v30 }
 0x5a2   :  { %11160 = vmatprep.subr.bf16.mxu1 %v11451_v31 }
 0x5a4   :  { %11139 = vmatpush3.bf16.msra.mxu0 %v11452_v33 }
 0x5a5   :  { %11161 = vmatpush3.bf16.msra.mxu1 %v11453_v34  ;;  %11140 = vmatprep.subr.bf16.mxu0 %v11454_v24 }
 0x5a6   :  { %11162 = vmatprep.subr.bf16.mxu1 %v11455_v37 }
 0x5a8   :  { %11141 = vmatpush3.bf16.msra.mxu0 %v11456_v45 }
 0x5a9   :  { %11163 = vmatpush3.bf16.msra.mxu1 %v11457_v22  ;;  %11142 = vmatprep.subr.bf16.mxu0 %v11458_v47 }
 0x5aa   :  { %11164 = vmatprep.subr.bf16.mxu1 %v11459_v54 }
 0x5ac   :  { %11143 = vmatpush3.bf16.msra.mxu0 %v11460_v40 }
 0x5ad   :  { %11165 = vmatpush3.bf16.msra.mxu1 %v11461_v62  ;;  %11144 = vmatprep.subr.bf16.mxu0 %v11462_v46 }
 0x5ae   :  { %11166 = vmatprep.subr.bf16.mxu1 %v11463_v15 }
 0x5b0   :  { %11145 = vmatpush3.bf16.msra.mxu0 %v11464_v28 }
 0x5b1   :  { %11167 = vmatpush3.bf16.msra.mxu1 %v11465_v57  ;;  %11146 = vmatprep.subr.bf16.mxu0 %v11466_v35 }
 0x5b2   :  { %11168 = vmatprep.subr.bf16.mxu1 %v11467_v58 }
 0x5b4   :  { %11147 = vmatpush3.bf16.msra.mxu0 %v11468_v7 }
 0x5b5   :  { %11169 = vmatpush3.bf16.msra.mxu1 %v11469_v42  ;;  %11148 = vmatprep.subr.bf16.mxu0 %v11470_v53 }
 0x5b6   :  { %11170 = vmatprep.subr.bf16.mxu1 %v11471_v59 }
 0x5b8   :  { %11149 = vmatpush3.bf16.msra.mxu0 %v11472_v12 }
 0x5b9   :  { %11171 = vmatpush3.bf16.msra.mxu1 %v11473_v44  ;;  %11150 = vmatprep.subr.bf16.mxu0 %v11474_v60 }
 0x5ba   :  { %11172 = vmatprep.subr.bf16.mxu1 %v11475_v61 }
 0x5bc   :  { %11151 = vmatpush3.bf16.msra.mxu0 %v11476_v38 }
 0x5bd   :  { %11173 = vmatpush3.bf16.msra.mxu1 %v11477_v49 }
 0x652   :  { %v8893_v10 = vpop.f32.mrb[36].mxu0 }
 0x653   :  { %v11280_v11 = vadd.f32 %v8893_v10, %v2659_v3  ;;  %v9221_v48 = vpop.f32.mrb[36].mxu1  ;;  %v8895_v27 = vpop.f32.mrb[37].mxu0 }
 0x654   :  { %v11282_v50 = vadd.f32 %v9221_v48, %v2667_v6  ;;  %v11281_v1 = vadd.f32 %v8895_v27, %v2663_v4  ;;  %v9223_v55 = vpop.f32.mrb[37].mxu1  ;;  %v8897_v51 = vpop.f32.mrb[38].mxu0 }
 0x655   :  { %v9232_v13 = vmax.f32 %v11280_v11, 0.0  ;;  %v11283_v52 = vadd.f32 %v9223_v55, %v2671_v9  ;;  %v9225_v8 = vpop.f32.mrb[38].mxu1  ;;  %v8898_v41 = vpop.f32.mrb[39].mxu0 }
 0x656   :  { %v9234_v14 = vmax.f32 %v11282_v50, 0.0  ;;  %v9233_v17 = vmax.f32 %v11281_v1, 0.0  ;;  %v9226_v16 = vpop.f32.mrb[39].mxu1 }
 0x657   :  { %v9235_v20 = vmax.f32 %v11283_v52, 0.0  ;;  %v9240_v18 = vpack.c.bf16 %v9232_v13, %v9232_v13 }
 0x658   :  { %v9241_v36 = vpack.c.bf16 %v9233_v17, %v9233_v17  ;;  %v9242_v21 = vpack.c.bf16 %v9234_v14, %v9234_v14 }
 0x659   :  { %v9243_v25 = vpack.c.bf16 %v9235_v20, %v9235_v20 }
 0x65a   :  { %9875 = vmatprep.mubr.bf16.mxu0 %v9241_v36 }
 0x65b   :  { %9915 = vmatprep.mubr.bf16.mxu1 %v9243_v25  ;;  %9876 = vmatmul.mubr.bf16.vlgmr.msra.gmra.mrb[44].mxu0 %v9240_v18 }
 0x65c   :  { %9916 = vmatmul.mubr.bf16.vlgmr.msra.gmra.mrb[44].mxu1 %v9242_v21 }
 0x672   :  { %v11108_v32 = vpop.f32.mrb[40].mxu0 }
 0x673   :  { %v11130_v23 = vpop.f32.mrb[40].mxu1  ;;  %v11109_v0 = vpop.f32.mrb[41].mxu0 }
 0x674   :  { %v11110_v19 = vadd.f32 %v11109_v0, %v11108_v32  ;;  %v11131_v56 = vpop.f32.mrb[41].mxu1  ;;  %v11111_v29 = vpop.f32.mrb[42].mxu0 }
 0x675   :  { %v11132_v30 = vadd.f32 %v11131_v56, %v11130_v23  ;;  %v11133_v5 = vpop.f32.mrb[42].mxu1  ;;  %v11112_v31 = vpop.f32.mrb[43].mxu0 }
 0x676   :  { %v9798_v33 = vadd.f32 %v11110_v19, %v10995_v26  ;;  %v11134_v34 = vpop.f32.mrb[43].mxu1 }
 0x678   :  { %v9838_v24 = vadd.f32 %v11132_v30, %v9798_v33 }
 0x72e   :  { %v11152_v37 = vpop.f32.mrb[44].mxu0 }
 0x72f   :  { %v11174_v45 = vpop.f32.mrb[44].mxu1  ;;  %v11153_v22 = vpop.f32.mrb[45].mxu0 }
 0x730   :  { %v11154_v47 = vadd.f32 %v11153_v22, %v11152_v37  ;;  %v11175_v54 = vpop.f32.mrb[45].mxu1  ;;  %v11155_v40 = vpop.f32.mrb[46].mxu0 }
 0x731   :  { %v11176_v62 = vadd.f32 %v11175_v54, %v11174_v45  ;;  %v11177_v46 = vpop.f32.mrb[46].mxu1  ;;  %v11156_v15 = vpop.f32.mrb[47].mxu0 }
 0x732   :  { %v9878_v28 = vadd.f32 %v11154_v47, %v9838_v24  ;;  %v11178_v57 = vpop.f32.mrb[47].mxu1 }
 0x734   :  { %v9918_v35 = vadd.f32 %v11176_v62, %v9878_v28 }
 0x736   :  { %v9923_v58 = vsel %vm356_vm4, %v9918_v35, -inf }
 0x737   :  { %9924 = vmax.xlane.f32.xlu0 %v9923_v58 }
 0x7c4   :  { %v9925_v7 = vpop.xlane.xlu0 %9924 }
 0x7c5   :  { %v9926_v42 = vsub.f32 %v9918_v35, %v9925_v7 }
 0x7c7   :  { %v9927_v53 = vmul.f32 1.442695, %v9926_v42 }
 0x7c9   :  { %11478 = vpow2.f32 %v9927_v53 }
 0x7d3   :  { %v11479_v59 = vpop.eup %11478 }
 0x7d4   :  { %v9929_v12 = vsel %vm356_vm4, %v11479_v59, 0.0 }
 0x7d5   :  { %9930 = vadd.xlane.f32.xlu0 %v9929_v12 }
 0x862   :  { %v9931_v44 = vpop.xlane.xlu0 %9930 }
 0x863   :  { %11480 = vrcp.f32 %v9931_v44 }
 0x86d   :  { %v11481_v60 = vpop.eup %11480 }
 0x86e   :  { %v9933_v61 = vmul.f32 %v11481_v60, %v11479_v59 }
 0x870   :  { %9934 = vst [vmem:[#allocation15] sm:$0x3] %v9933_v61 }
 0x871   :  { %11648 = shalt.err (!%p11645_p4)
}
 0x872   :  { %s11649_s14 = scalar_lea.hbm %s12397_s7, 32 }
 0x873   :  { %p11650_p5 = scmp.ne.s32.totalorder %s12397_s7, %s11649_s14  ;;  %p11653_p6 = scmp.lt.u32.totalorder %s11649_s14, %s12397_s7 }
 0x875   :  { %p11655_p7 = pnand %p11653_p6, %p11650_p5 }
 0x877   :  { %11658 = shalt.err (!%p11655_p7)
}
 0x878   :  { %9944 = dma.vmem_to_hbm [thread:$0]  %s9942_s18, 32, %s12397_s7, [#allocation5]  }
 0x879   :  { %11667 = dma.done.wait [#allocation5], 32  }
 0x87a   :  { %11668 = vsyncadd [#allocation5], 4294967264 }
 0x87b   :  { %9948 = vsyncpa [#allocation4], 1 }
 0x87c   :  { %9949 = vsyncpa [#allocation7], 1 }
 0x87d   :  { %9950 = vsyncpa [#allocation10], 1 }
 0x87e   :  { %9951 = vsyncpa [#allocation13], 1 }
 0x87f   :  { %9952 = vsyncpa [#allocation5], 1 }

</bundles_post_ra>
